<compile_context>
chip_gen: v7x
topology: tpu7x:2x2x1
jax: 0.10.0
libtpu: 0.0.40
codegen_flags: <defaults>
</compile_context>

<pallas_src>
import jax
import jax.numpy as jnp
from jax import lax
from jax.experimental import pallas as pl
from jax.experimental.pallas import tpu as pltpu


# -----------------------------------------------------------------------------
# Per-generation tuning (tk / hd_split / VMEM limit)
# -----------------------------------------------------------------------------
def _chip_config():
    kind = ""
    try:
        kind = jax.devices()[0].device_kind.lower()
    except Exception:
        pass
    if "v5 lite" in kind or "v5e" in kind or "v5litepod" in kind:
        # 128 MiB VMEM, ~820 GB/s HBM: big weight blocks, single TensorCore.
        return dict(name="v5e", hd_split=1, w1_buf_bytes=16 << 20, vmem_limit=96 << 20)
    if "v6" in kind or "trillium" in kind:
        return dict(name="v6e", hd_split=1, w1_buf_bytes=16 << 20, vmem_limit=64 << 20)
    if "v7" in kind:
        # 64 MiB VMEM but 2 TensorCores: split the fc1 weight stream across
        # cores (hd_split=2 'parallel') instead of using bigger tiles.
        return dict(name="v7x", hd_split=2, w1_buf_bytes=4 << 20, vmem_limit=48 << 20)
    # Unknown / older chips: conservative defaults.
    return dict(name="tpu", hd_split=1, w1_buf_bytes=8 << 20, vmem_limit=48 << 20)


def _pick_rows(H, W, max_rows):
    """Largest even row strip dividing H with strip_rows*W <= max_rows."""
    for rs in (32, 16, 8, 4, 2):
        if H % rs == 0 and rs * W <= max_rows:
            return rs
    return 2


# -----------------------------------------------------------------------------
# conv1: all 25 taps pre-folded into K (Cin == 1), gridded over (N, H/RS),
# bias + ReLU + fused 2x2 max pool.
# -----------------------------------------------------------------------------
def conv1_relu_pool(x_packed, w_packed, b, *, vmem_limit):
    """x_packed: (N, H, W, 25) bf16 ; w_packed: (25, 64) bf16 ; b: (1, 64) f32
       returns   (N, H//2, W//2, 64) bf16"""
    N, H, W, K = x_packed.shape
    Kw, Cout = w_packed.shape
    assert Kw == K and H % 2 == 0 and W % 2 == 0
    RS = _pick_rows(H, W, 2048)        # keeps the lane-padded block ~<=1 MiB
    W2 = W // 2

    def kernel(x_ref, w_ref, b_ref, o_ref, s_ref):
        lhs = x_ref[0].reshape(RS * W, K)                              # bf16
        acc = jnp.dot(lhs, w_ref[...], preferred_element_type=jnp.float32)
        s_ref[...] = jnp.maximum(acc + b_ref[...], 0.0)                # bias + ReLU (f32)
        # 2x2 max pool: W direction via even/odd stride-2 reads of the flat
        # strip, H direction via the two W-halves of each reshaped row.
        wmax = jnp.maximum(s_ref[pl.ds(0, RS * W2, 2), :],
                           s_ref[pl.ds(1, RS * W2, 2), :])             # (RS*W2, Cout)
        wm = wmax.reshape(RS // 2, W, Cout)
        o_ref[0] = jnp.maximum(wm[:, :W2, :], wm[:, W2:, :]).astype(o_ref.dtype)

    return pl.pallas_call(
        kernel,
        out_shape=jax.ShapeDtypeStruct((N, H // 2, W2, Cout), jnp.bfloat16),
        grid_spec=pltpu.PrefetchScalarGridSpec(
            num_scalar_prefetch=0,
            grid=(N, H // RS),
            in_specs=[
                pl.BlockSpec((1, RS, W, K), lambda n, h: (n, h, 0, 0)),
                pl.BlockSpec((K, Cout), lambda n, h: (0, 0)),
                pl.BlockSpec((1, Cout), lambda n, h: (0, 0)),
            ],
            out_specs=pl.BlockSpec((1, RS // 2, W2, Cout), lambda n, h: (n, h, 0, 0)),
            scratch_shapes=[pltpu.VMEM((RS * W, Cout), jnp.float32)],
        ),
        compiler_params=pltpu.CompilerParams(
            dimension_semantics=("parallel", "parallel"),
            vmem_limit_bytes=vmem_limit,
        ),
    )(x_packed, w_packed, b)


# -----------------------------------------------------------------------------
# conv2: 5x5 taps folded inside the kernel from the padded NHWC activation
# (no wrapper im2col), VMEM-scratch accumulation, bias + ReLU + fused 2x2 pool.
# -----------------------------------------------------------------------------
def conv2_relu_pool(x_padded, w, b, *, vmem_limit):
    """x_padded: (N, H2+4, W2+4, Cin) bf16 ; w: (25, Cin, Cout) bf16 ; b: (1, Cout) f32
       returns   (N, H2//2, W2//2, Cout) bf16"""
    N, Hp, Wp, Cin = x_padded.shape
    KK, Cin_w, Cout = w.shape
    assert KK == 25 and Cin_w == Cin
    H2, W2 = Hp - 4, Wp - 4
    assert H2 % 2 == 0 and W2 % 2 == 0
    W4 = W2 // 2
    RS = _pick_rows(H2, W2, 256)       # RS*W2 -> 256 rows fills the v6e/v7x MXU
    n_strips = H2 // RS

    def kernel(x_ref, w_ref, b_ref, o_ref, acc_ref):
        bias = b_ref[...]              # hoisted: loaded once, not per strip

        def strip_body(s):
            if isinstance(s, int):
                row0, out0 = s * RS, s * (RS // 2)
            else:
                row0 = pl.multiple_of(s * RS, RS)
                out0 = pl.multiple_of(s * (RS // 2), RS // 2)
            acc_ref[...] = jnp.zeros_like(acc_ref)
            for kh in range(5):                     # fully unrolled 5x5 tap loop
                for kw in range(5):
                    lhs = x_ref[0, pl.ds(row0 + kh, RS), pl.ds(kw, W2), :]
                    acc_ref[...] += jnp.dot(lhs.reshape(RS * W2, Cin),
                                            w_ref[kh * 5 + kw],
                                            preferred_element_type=jnp.float32)
            acc_ref[...] = jnp.maximum(acc_ref[...] + bias, 0.0)       # bias + ReLU
            # Fused 2x2 max pool (same stride-2 / W-half trick as conv1).
            wmax = jnp.maximum(acc_ref[pl.ds(0, RS * W4, 2), :],
                               acc_ref[pl.ds(1, RS * W4, 2), :])       # (RS*W4, Cout)
            wm = wmax.reshape(RS // 2, W2, Cout)
            pooled = jnp.maximum(wm[:, :W4, :], wm[:, W4:, :])
            o_ref[0, pl.ds(out0, RS // 2), :, :] = pooled.astype(o_ref.dtype)

        if n_strips == 1:
            strip_body(0)
        else:
            @pl.loop(0, n_strips)
            def _(s):
                strip_body(s)

    return pl.pallas_call(
        kernel,
        out_shape=jax.ShapeDtypeStruct((N, H2 // 2, W4, Cout), jnp.bfloat16),
        grid_spec=pltpu.PrefetchScalarGridSpec(
            num_scalar_prefetch=0,
            grid=(N,),
            in_specs=[
                pl.BlockSpec((1, Hp, Wp, Cin), lambda n: (n, 0, 0, 0)),
                pl.BlockSpec((25, Cin, Cout), lambda n: (0, 0, 0)),
                pl.BlockSpec((1, Cout), lambda n: (0, 0)),
            ],
            out_specs=pl.BlockSpec((1, H2 // 2, W4, Cout), lambda n: (n, 0, 0, 0)),
            scratch_shapes=[pltpu.VMEM((RS * W2, Cout), jnp.float32)],
        ),
        compiler_params=pltpu.CompilerParams(
            dimension_semantics=("parallel",),
            vmem_limit_bytes=vmem_limit,
        ),
    )(x_padded, w, b)


# -----------------------------------------------------------------------------
# Fused fc1 + ReLU + (eval dropout = identity) + fc2, K-tiled weight streaming.
# w1 is pre-split into (hd_split, F, Hdp) so each (tk, Hdp) block is one
# contiguous DMA slab.
# -----------------------------------------------------------------------------
def _pick_tk(F, Hdp, target_bytes):
    tk = max(512, (target_bytes // (Hdp * 2)) // 512 * 512)
    tk = min(tk, F)
    while tk > 128 and F % tk != 0:
        tk //= 2
    if F % tk != 0:
        tk = F
    return tk


def mlp_fc1_relu_fc2(x, w1, b1, w2, *, w1_buf_bytes, vmem_limit):
    """x: (N, F) bf16 ; w1: (S, F, Hdp) bf16 ; b1: (S, 1, Hdp) f32 ; w2: (S, Hdp, O) f32.
       Returns (S, N, O) partial fc2 outputs; caller sums over S and adds fc2 bias."""
    N, F = x.shape
    S, Fw, Hdp = w1.shape
    assert Fw == F
    O = w2.shape[-1]
    tk = _pick_tk(F, Hdp, w1_buf_bytes)

    def kernel(x_ref, w1_ref, b1_ref, w2_ref, o_ref, h_ref):
        k = pl.program_id(1)

        @pl.when(k == 0)
        def _():
            h_ref[...] = jnp.zeros_like(h_ref)

        h_ref[...] += jnp.dot(x_ref[...], w1_ref[0],
                              preferred_element_type=jnp.float32)

        @pl.when(k == pl.num_programs(1) - 1)
        def _():
            h = jnp.maximum(h_ref[...] + b1_ref[0], 0.0)      # fc1 bias + ReLU
            # TODO(synk): nn.Dropout(p=0.5) is identity in eval mode; train-mode
            # stochastic masking (pltpu.prng_*) is not implemented here.
            o_ref[0] = jnp.dot(h, w2_ref[0], preferred_element_type=jnp.float32)

    return pl.pallas_call(
        kernel,
        out_shape=jax.ShapeDtypeStruct((S, N, O), jnp.float32),
        grid_spec=pltpu.PrefetchScalarGridSpec(
            num_scalar_prefetch=0,
            grid=(S, F // tk),
            in_specs=[
                pl.BlockSpec((N, tk), lambda j, k: (0, k)),
                # Dense (1, tk, Hdp) slab of the pre-split weight array.
                pl.BlockSpec((1, tk, Hdp), lambda j, k: (j, k, 0)),
                pl.BlockSpec((1, 1, Hdp), lambda j, k: (j, 0, 0)),
                pl.BlockSpec((1, Hdp, O), lambda j, k: (j, 0, 0)),
            ],
            out_specs=pl.BlockSpec((1, N, O), lambda j, k: (j, 0, 0)),
            scratch_shapes=[pltpu.VMEM((N, Hdp), jnp.float32)],
        ),
        compiler_params=pltpu.CompilerParams(
            dimension_semantics=("parallel", "arbitrary"),
            vmem_limit_bytes=vmem_limit,
        ),
    )(x, w1, b1, w2)


# -----------------------------------------------------------------------------
# One-time weight re-layout + full forward pass
# -----------------------------------------------------------------------------
def prepare_params(params, H, W, hd_split):
    H4, W4 = H // 4, W // 4
    F, Hd = params["fc1_w"].shape
    assert F == 128 * H4 * W4 and Hd % hd_split == 0
    Hdp = Hd // hd_split
    # Fold the NCHW flatten into fc1's rows (the conv output is consumed in its
    # natural NHWC flatten), then pre-split the Hd columns into hd_split
    # contiguous slabs so every (tk, Hdp) weight block is a dense DMA.
    fc1 = jnp.transpose(params["fc1_w"].reshape(128, H4, W4, Hd),
                        (1, 2, 0, 3)).reshape(F, Hd)
    fc1 = jnp.transpose(fc1.reshape(F, hd_split, Hdp), (1, 0, 2))       # (S, F, Hdp)
    return {
        "conv1_w": params["conv1_w"].reshape(25, 64).astype(jnp.bfloat16),
        "conv1_b": params["conv1_b"].reshape(1, 64),
        "conv2_w": params["conv2_w"].reshape(25, 64, 128).astype(jnp.bfloat16),
        "conv2_b": params["conv2_b"].reshape(1, 128),
        # TODO(synk): optional int8 (v5e/v6e) / fp8 (v7x) fc1 weight stream would
        # halve the dominant HBM cost; kept bf16 pending a numerics gate.
        "fc1_w": fc1.astype(jnp.bfloat16),
        "fc1_b": params["fc1_b"].reshape(hd_split, 1, Hdp),
        "fc2_w": params["fc2_w"].reshape(hd_split, Hdp, -1),
        "fc2_b": params["fc2_b"],
    }


def classifier_forward(x, prep, cfg):
    # x: (N, 1, H, W) NCHW; H, W multiples of 4.
    N, Cin, H, W = x.shape
    assert Cin == 1 and H % 4 == 0 and W % 4 == 0
    vmem = cfg["vmem_limit"]

    # conv1 im2col: fold all 25 5x5 taps of the single input channel into the
    # contraction dim on the wrapper side (cheap since Cin == 1), cast to bf16.
    xp = jnp.pad(x[:, 0], ((0, 0), (2, 2), (2, 2)))                    # (N, H+4, W+4)
    x1 = jnp.stack([xp[:, kh:kh + H, kw:kw + W]
                    for kh in range(5) for kw in range(5)],
                   axis=-1).astype(jnp.bfloat16)                       # (N, H, W, 25)
    y1 = conv1_relu_pool(x1, prep["conv1_w"], prep["conv1_b"],
                         vmem_limit=vmem)                              # (N, H/2, W/2, 64) bf16

    # conv2: taps folded inside the kernel from the padded NHWC activation
    # (no wrapper-side 5x/25x im2col blow-up between the pallas_calls).
    y1p = jnp.pad(y1, ((0, 0), (2, 2), (2, 2), (0, 0)))                # (N, H/2+4, W/2+4, 64)
    y2 = conv2_relu_pool(y1p, prep["conv2_w"], prep["conv2_b"],
                         vmem_limit=vmem)                              # (N, H/4, W/4, 128) bf16

    # Natural NHWC flatten; fc1 rows were permuted to match in prepare_params.
    flat = y2.reshape(N, -1)                                           # bf16
    partials = mlp_fc1_relu_fc2(flat, prep["fc1_w"], prep["fc1_b"], prep["fc2_w"],
                                w1_buf_bytes=cfg["w1_buf_bytes"], vmem_limit=vmem)
    return jnp.sum(partials, axis=0) + prep["fc2_b"]                   # (N, 2) f32


def init_params(key, H, W):
    F = 128 * (H // 4) * (W // 4)   # same formula as the module's fc1 in_features
    ks = jax.random.split(key, 8)
    s = 0.05
    return {
        "conv1_w": s * jax.random.normal(ks[0], (5, 5, 1, 64), jnp.float32),    # HWIO
        "conv1_b": s * jax.random.normal(ks[1], (64,), jnp.float32),
        "conv2_w": s * jax.random.normal(ks[2], (5, 5, 64, 128), jnp.float32),  # HWIO
        "conv2_b": s * jax.random.normal(ks[3], (128,), jnp.float32),
        "fc1_w":   s * jax.random.normal(ks[4], (F, 1024), jnp.float32),
        "fc1_b":   s * jax.random.normal(ks[5], (1024,), jnp.float32),
        "fc2_w":   s * jax.random.normal(ks[6], (1024, 2), jnp.float32),
        "fc2_b":   s * jax.random.normal(ks[7], (2,), jnp.float32),
    }


def reference_forward(x, params):
    """Pure-JAX reference (same math as the PyTorch module, eval mode)."""
    xn = jnp.transpose(x, (0, 2, 3, 1))                               # NCHW -> NHWC
    y = lax.conv_general_dilated(xn, params["conv1_w"], (1, 1), ((2, 2), (2, 2)),
                                 dimension_numbers=("NHWC", "HWIO", "NHWC"),
                                 precision=lax.Precision.HIGHEST)
    y = jnp.maximum(y + params["conv1_b"], 0.0)
    y = lax.reduce_window(y, -jnp.inf, lax.max, (1, 2, 2, 1), (1, 2, 2, 1), "VALID")
    y = lax.conv_general_dilated(y, params["conv2_w"], (1, 1), ((2, 2), (2, 2)),
                                 dimension_numbers=("NHWC", "HWIO", "NHWC"),
                                 precision=lax.Precision.HIGHEST)
    y = jnp.maximum(y + params["conv2_b"], 0.0)
    y = lax.reduce_window(y, -jnp.inf, lax.max, (1, 2, 2, 1), (1, 2, 2, 1), "VALID")
    flat = jnp.transpose(y, (0, 3, 1, 2)).reshape(x.shape[0], -1)     # NCHW flatten
    h = jnp.maximum(flat @ params["fc1_w"] + params["fc1_b"], 0.0)
    return h @ params["fc2_w"] + params["fc2_b"]


if __name__ == "__main__":
    key = jax.random.PRNGKey(0)
    kx, kp = jax.random.split(key)

    N, H, W = 2, 16, 16   # scaled-down spatial size (module implies 192x128)
    x = jax.random.normal(kx, (N, 1, H, W), jnp.float32)
    params = init_params(kp, H, W)

    cfg = _chip_config()
    prep = prepare_params(params, H, W, cfg["hd_split"])

    fwd = jax.jit(lambda xx, pp: classifier_forward(xx, pp, cfg))
    out = fwd(x, prep)
    jax.block_until_ready(out)
    assert out.shape == (N, 2) and out.dtype == jnp.float32

    ref = reference_forward(x, params)
    err = float(jnp.max(jnp.abs(out - ref)))
    tol = 5e-2 * max(1.0, float(jnp.max(jnp.abs(ref))))
    if err > tol:
        raise AssertionError(f"Pallas output mismatch vs reference: max abs err {err} (tol {tol})")

    print("KERNEL_OK")
</pallas_src>

<mosaic_0001>
module attributes {stable_mosaic.version = 11 : i64} {
  func.func @kernel(%arg0: i32, %arg1: i32, %arg2: memref<1x16x16x25xbf16, #tpu.memory_space<vmem>>, %arg3: memref<25x64xbf16, #tpu.memory_space<vmem>>, %arg4: memref<1x64xf32, #tpu.memory_space<vmem>>, %arg5: memref<1x8x8x64xbf16, #tpu.memory_space<vmem>>, %arg6: memref<256x64xf32, #tpu.memory_space<vmem>>) attributes {dimension_semantics = [#tpu.dimension_semantics<parallel>, #tpu.dimension_semantics<parallel>], iteration_bounds = array<i64: 2, 1>, scalar_prefetch = 0 : i64, scratch_operands = 1 : i64, tpu.core_type = #tpu.core_type<tc>, window_params = [{transform_indices = @transform_0, window_bounds = array<i64: 1, 16, 16, 25>}, {pipeline_mode = #tpu.pipeline_mode<synchronous>, transform_indices = @transform_1, window_bounds = array<i64: 25, 64>}, {pipeline_mode = #tpu.pipeline_mode<synchronous>, transform_indices = @transform_2, window_bounds = array<i64: 1, 64>}, {transform_indices = @transform_3, window_bounds = array<i64: 1, 8, 8, 64>}]} {
    %c0 = arith.constant 0 : index
    %c0_0 = arith.constant 0 : index
    %c0_1 = arith.constant 0 : index
    %c0_2 = arith.constant 0 : index
    %0 = vector.load %arg2[%c0, %c0_0, %c0_1, %c0_2] : memref<1x16x16x25xbf16, #tpu.memory_space<vmem>>, vector<1x16x16x25xbf16>
    %1 = vector.shape_cast %0 : vector<1x16x16x25xbf16> to vector<16x16x25xbf16>
    %2 = vector.shape_cast %1 : vector<16x16x25xbf16> to vector<256x25xbf16>
    %c0_3 = arith.constant 0 : index
    %c0_4 = arith.constant 0 : index
    %3 = vector.load %arg3[%c0_3, %c0_4] : memref<25x64xbf16, #tpu.memory_space<vmem>>, vector<25x64xbf16>
    %cst = arith.constant dense<0.000000e+00> : vector<256x64xf32>
    %4 = tpu.matmul %2, %3, %cst {dimension_numbers = #tpu.dot_dimension_numbers<[1], [0], [0], [1], [0, 0, 1, 1], [], []>} : vector<256x25xbf16>, vector<25x64xbf16>, vector<256x64xf32> -> vector<256x64xf32>
    %c0_5 = arith.constant 0 : index
    %c0_6 = arith.constant 0 : index
    %5 = vector.load %arg4[%c0_5, %c0_6] : memref<1x64xf32, #tpu.memory_space<vmem>>, vector<1x64xf32>
    %6 = vector.broadcast %5 : vector<1x64xf32> to vector<256x64xf32>
    %7 = arith.addf %4, %6 : vector<256x64xf32>
    %cst_7 = arith.constant 0.000000e+00 : f32
    %8 = vector.broadcast %cst_7 : f32 to vector<256x64xf32>
    %9 = arith.maximumf %7, %8 : vector<256x64xf32>
    %c0_8 = arith.constant 0 : index
    %c0_9 = arith.constant 0 : index
    %10 = vector.load %arg6[%c0_8, %c0_9] : memref<256x64xf32, #tpu.memory_space<vmem>>, vector<256x64xf32>
    tpu.vector_store %arg6[%c0_8, %c0_9], %9 {strides = array<i32>} : memref<256x64xf32, #tpu.memory_space<vmem>>, vector<256x64xf32>,
    %c0_10 = arith.constant 0 : index
    %c0_11 = arith.constant 0 : index
    %11 = tpu.strided_load %arg6[%c0_10, %c0_11] {strides = array<i32: 2, 1>} : memref<256x64xf32, #tpu.memory_space<vmem>>, vector<128x64xf32>
    %c1 = arith.constant 1 : index
    %c0_12 = arith.constant 0 : index
    %12 = tpu.strided_load %arg6[%c1, %c0_12] {strides = array<i32: 2, 1>} : memref<256x64xf32, #tpu.memory_space<vmem>>, vector<128x64xf32>
    %13 = arith.maximumf %11, %12 : vector<128x64xf32>
    %14 = vector.shape_cast %13 : vector<128x64xf32> to vector<8x16x64xf32>
    %15 = vector.extract_strided_slice %14 {offsets = [0, 0, 0], sizes = [8, 8, 64], strides = [1, 1, 1]} : vector<8x16x64xf32> to vector<8x8x64xf32>
    %16 = vector.extract_strided_slice %14 {offsets = [0, 8, 0], sizes = [8, 8, 64], strides = [1, 1, 1]} : vector<8x16x64xf32> to vector<8x8x64xf32>
    %17 = arith.maximumf %15, %16 : vector<8x8x64xf32>
    %18 = arith.truncf %17 : vector<8x8x64xf32> to vector<8x8x64xbf16>
    %c0_13 = arith.constant 0 : index
    %c0_14 = arith.constant 0 : index
    %c0_15 = arith.constant 0 : index
    %c0_16 = arith.constant 0 : index
    %19 = vector.load %arg5[%c0_13, %c0_14, %c0_15, %c0_16] : memref<1x8x8x64xbf16, #tpu.memory_space<vmem>>, vector<1x8x8x64xbf16>
    %20 = vector.shape_cast %19 : vector<1x8x8x64xbf16> to vector<8x8x64xbf16>
    %21 = vector.shape_cast %18 : vector<8x8x64xbf16> to vector<1x8x8x64xbf16>
    tpu.vector_store %arg5[%c0_13, %c0_14, %c0_15, %c0_16], %21 {strides = array<i32>} : memref<1x8x8x64xbf16, #tpu.memory_space<vmem>>, vector<1x8x8x64xbf16>,
    return
  }
  func.func @transform_0(%arg0: i32, %arg1: i32) -> (i32, i32, i32, i32) {
    %c0_i32 = arith.constant 0 : i32
    %c0_i32_0 = arith.constant 0 : i32
    %c0_i32_1 = arith.constant 0 : i32
    return %arg0, %arg1, %c0_i32, %c0_i32_0 : i32, i32, i32, i32
  }
  func.func @transform_1(%arg0: i32, %arg1: i32) -> (i32, i32) {
    %c0_i32 = arith.constant 0 : i32
    %c0_i32_0 = arith.constant 0 : i32
    %c0_i32_1 = arith.constant 0 : i32
    return %c0_i32, %c0_i32_0 : i32, i32
  }
  func.func @transform_2(%arg0: i32, %arg1: i32) -> (i32, i32) {
    %c0_i32 = arith.constant 0 : i32
    %c0_i32_0 = arith.constant 0 : i32
    %c0_i32_1 = arith.constant 0 : i32
    return %c0_i32, %c0_i32_0 : i32, i32
  }
  func.func @transform_3(%arg0: i32, %arg1: i32) -> (i32, i32, i32, i32) {
    %c0_i32 = arith.constant 0 : i32
    %c0_i32_0 = arith.constant 0 : i32
    %c0_i32_1 = arith.constant 0 : i32
    return %arg0, %arg1, %c0_i32, %c0_i32_0 : i32, i32, i32, i32
  }
}

module attributes {stable_mosaic.version = 11 : i64} {
  func.func @kernel(%arg0: i32, %arg1: memref<1x12x12x64xbf16, #tpu.memory_space<vmem>>, %arg2: memref<25x64x128xbf16, #tpu.memory_space<vmem>>, %arg3: memref<1x128xf32, #tpu.memory_space<vmem>>, %arg4: memref<1x4x4x128xbf16, #tpu.memory_space<vmem>>, %arg5: memref<64x128xf32, #tpu.memory_space<vmem>>) attributes {dimension_semantics = [#tpu.dimension_semantics<parallel>], iteration_bounds = array<i64: 2>, scalar_prefetch = 0 : i64, scratch_operands = 1 : i64, tpu.core_type = #tpu.core_type<tc>, window_params = [{transform_indices = @transform_0, window_bounds = array<i64: 1, 12, 12, 64>}, {pipeline_mode = #tpu.pipeline_mode<synchronous>, transform_indices = @transform_1, window_bounds = array<i64: 25, 64, 128>}, {pipeline_mode = #tpu.pipeline_mode<synchronous>, transform_indices = @transform_2, window_bounds = array<i64: 1, 128>}, {transform_indices = @transform_3, window_bounds = array<i64: 1, 4, 4, 128>}]} {
    %c0 = arith.constant 0 : index
    %c0_0 = arith.constant 0 : index
    %0 = vector.load %arg3[%c0, %c0_0] : memref<1x128xf32, #tpu.memory_space<vmem>>, vector<1x128xf32>
    %cst = arith.constant 0.000000e+00 : f32
    %1 = vector.broadcast %cst : f32 to vector<64x128xf32>
    %c0_1 = arith.constant 0 : index
    %c0_2 = arith.constant 0 : index
    %2 = vector.load %arg5[%c0_1, %c0_2] : memref<64x128xf32, #tpu.memory_space<vmem>>, vector<64x128xf32>
    tpu.vector_store %arg5[%c0_1, %c0_2], %1 {strides = array<i32>} : memref<64x128xf32, #tpu.memory_space<vmem>>, vector<64x128xf32>,
    %c0_3 = arith.constant 0 : index
    %c0_4 = arith.constant 0 : index
    %c0_5 = arith.constant 0 : index
    %c0_6 = arith.constant 0 : index
    %3 = vector.load %arg1[%c0_3, %c0_4, %c0_5, %c0_6] : memref<1x12x12x64xbf16, #tpu.memory_space<vmem>>, vector<1x8x8x64xbf16>
    %4 = vector.shape_cast %3 : vector<1x8x8x64xbf16> to vector<8x8x64xbf16>
    %c0_7 = arith.constant 0 : index
    %c0_8 = arith.constant 0 : index
    %5 = vector.load %arg5[%c0_7, %c0_8] : memref<64x128xf32, #tpu.memory_space<vmem>>, vector<64x128xf32>
    %6 = vector.shape_cast %4 : vector<8x8x64xbf16> to vector<64x64xbf16>
    %c0_9 = arith.constant 0 : index
    %c0_10 = arith.constant 0 : index
    %c0_11 = arith.constant 0 : index
    %7 = vector.load %arg2[%c0_9, %c0_10, %c0_11] : memref<25x64x128xbf16, #tpu.memory_space<vmem>>, vector<1x64x128xbf16>
    %8 = vector.shape_cast %7 : vector<1x64x128xbf16> to vector<64x128xbf16>
    %cst_12 = arith.constant dense<0.000000e+00> : vector<64x128xf32>
    %9 = tpu.matmul %6, %8, %cst_12 {dimension_numbers = #tpu.dot_dimension_numbers<[1], [0], [0], [1], [0, 0, 1, 1], [], []>} : vector<64x64xbf16>, vector<64x128xbf16>, vector<64x128xf32> -> vector<64x128xf32>
    %10 = arith.addf %5, %9 : vector<64x128xf32>
    %c0_13 = arith.constant 0 : index
    %c0_14 = arith.constant 0 : index
    %11 = vector.load %arg5[%c0_13, %c0_14] : memref<64x128xf32, #tpu.memory_space<vmem>>, vector<64x128xf32>
    tpu.vector_store %arg5[%c0_13, %c0_14], %10 {strides = array<i32>} : memref<64x128xf32, #tpu.memory_space<vmem>>, vector<64x128xf32>,
    %c0_15 = arith.constant 0 : index
    %c0_16 = arith.constant 0 : index
    %c1 = arith.constant 1 : index
    %c0_17 = arith.constant 0 : index
    %12 = vector.load %arg1[%c0_15, %c0_16, %c1, %c0_17] : memref<1x12x12x64xbf16, #tpu.memory_space<vmem>>, vector<1x8x8x64xbf16>
    %13 = vector.shape_cast %12 : vector<1x8x8x64xbf16> to vector<8x8x64xbf16>
    %c0_18 = arith.constant 0 : index
    %c0_19 = arith.constant 0 : index
    %14 = vector.load %arg5[%c0_18, %c0_19] : memref<64x128xf32, #tpu.memory_space<vmem>>, vector<64x128xf32>
    %15 = vector.shape_cast %13 : vector<8x8x64xbf16> to vector<64x64xbf16>
    %c1_20 = arith.constant 1 : index
    %c0_21 = arith.constant 0 : index
    %c0_22 = arith.constant 0 : index
    %16 = vector.load %arg2[%c1_20, %c0_21, %c0_22] : memref<25x64x128xbf16, #tpu.memory_space<vmem>>, vector<1x64x128xbf16>
    %17 = vector.shape_cast %16 : vector<1x64x128xbf16> to vector<64x128xbf16>
    %cst_23 = arith.constant dense<0.000000e+00> : vector<64x128xf32>
    %18 = tpu.matmul %15, %17, %cst_23 {dimension_numbers = #tpu.dot_dimension_numbers<[1], [0], [0], [1], [0, 0, 1, 1], [], []>} : vector<64x64xbf16>, vector<64x128xbf16>, vector<64x128xf32> -> vector<64x128xf32>
    %19 = arith.addf %14, %18 : vector<64x128xf32>
    %c0_24 = arith.constant 0 : index
    %c0_25 = arith.constant 0 : index
    %20 = vector.load %arg5[%c0_24, %c0_25] : memref<64x128xf32, #tpu.memory_space<vmem>>, vector<64x128xf32>
    tpu.vector_store %arg5[%c0_24, %c0_25], %19 {strides = array<i32>} : memref<64x128xf32, #tpu.memory_space<vmem>>, vector<64x128xf32>,
    %c0_26 = arith.constant 0 : index
    %c0_27 = arith.constant 0 : index
    %c2 = arith.constant 2 : index
    %c0_28 = arith.constant 0 : index
    %21 = vector.load %arg1[%c0_26, %c0_27, %c2, %c0_28] : memref<1x12x12x64xbf16, #tpu.memory_space<vmem>>, vector<1x8x8x64xbf16>
    %22 = vector.shape_cast %21 : vector<1x8x8x64xbf16> to vector<8x8x64xbf16>
    %c0_29 = arith.constant 0 : index
    %c0_30 = arith.constant 0 : index
    %23 = vector.load %arg5[%c0_29, %c0_30] : memref<64x128xf32, #tpu.memory_space<vmem>>, vector<64x128xf32>
    %24 = vector.shape_cast %22 : vector<8x8x64xbf16> to vector<64x64xbf16>
    %c2_31 = arith.constant 2 : index
    %c0_32 = arith.constant 0 : index
    %c0_33 = arith.constant 0 : index
    %25 = vector.load %arg2[%c2_31, %c0_32, %c0_33] : memref<25x64x128xbf16, #tpu.memory_space<vmem>>, vector<1x64x128xbf16>
    %26 = vector.shape_cast %25 : vector<1x64x128xbf16> to vector<64x128xbf16>
    %cst_34 = arith.constant dense<0.000000e+00> : vector<64x128xf32>
    %27 = tpu.matmul %24, %26, %cst_34 {dimension_numbers = #tpu.dot_dimension_numbers<[1], [0], [0], [1], [0, 0, 1, 1], [], []>} : vector<64x64xbf16>, vector<64x128xbf16>, vector<64x128xf32> -> vector<64x128xf32>
    %28 = arith.addf %23, %27 : vector<64x128xf32>
    %c0_35 = arith.constant 0 : index
    %c0_36 = arith.constant 0 : index
    %29 = vector.load %arg5[%c0_35, %c0_36] : memref<64x128xf32, #tpu.memory_space<vmem>>, vector<64x128xf32>
    tpu.vector_store %arg5[%c0_35, %c0_36], %28 {strides = array<i32>} : memref<64x128xf32, #tpu.memory_space<vmem>>, vector<64x128xf32>,
    %c0_37 = arith.constant 0 : index
    %c0_38 = arith.constant 0 : index
    %c3 = arith.constant 3 : index
    %c0_39 = arith.constant 0 : index
    %30 = vector.load %arg1[%c0_37, %c0_38, %c3, %c0_39] : memref<1x12x12x64xbf16, #tpu.memory_space<vmem>>, vector<1x8x8x64xbf16>
    %31 = vector.shape_cast %30 : vector<1x8x8x64xbf16> to vector<8x8x64xbf16>
    %c0_40 = arith.constant 0 : index
    %c0_41 = arith.constant 0 : index
    %32 = vector.load %arg5[%c0_40, %c0_41] : memref<64x128xf32, #tpu.memory_space<vmem>>, vector<64x128xf32>
    %33 = vector.shape_cast %31 : vector<8x8x64xbf16> to vector<64x64xbf16>
    %c3_42 = arith.constant 3 : index
    %c0_43 = arith.constant 0 : index
    %c0_44 = arith.constant 0 : index
    %34 = vector.load %arg2[%c3_42, %c0_43, %c0_44] : memref<25x64x128xbf16, #tpu.memory_space<vmem>>, vector<1x64x128xbf16>
    %35 = vector.shape_cast %34 : vector<1x64x128xbf16> to vector<64x128xbf16>
    %cst_45 = arith.constant dense<0.000000e+00> : vector<64x128xf32>
    %36 = tpu.matmul %33, %35, %cst_45 {dimension_numbers = #tpu.dot_dimension_numbers<[1], [0], [0], [1], [0, 0, 1, 1], [], []>} : vector<64x64xbf16>, vector<64x128xbf16>, vector<64x128xf32> -> vector<64x128xf32>
    %37 = arith.addf %32, %36 : vector<64x128xf32>
    %c0_46 = arith.constant 0 : index
    %c0_47 = arith.constant 0 : index
    %38 = vector.load %arg5[%c0_46, %c0_47] : memref<64x128xf32, #tpu.memory_space<vmem>>, vector<64x128xf32>
    tpu.vector_store %arg5[%c0_46, %c0_47], %37 {strides = array<i32>} : memref<64x128xf32, #tpu.memory_space<vmem>>, vector<64x128xf32>,
    %c0_48 = arith.constant 0 : index
    %c0_49 = arith.constant 0 : index
    %c4 = arith.constant 4 : index
    %c0_50 = arith.constant 0 : index
    %39 = vector.load %arg1[%c0_48, %c0_49, %c4, %c0_50] : memref<1x12x12x64xbf16, #tpu.memory_space<vmem>>, vector<1x8x8x64xbf16>
    %40 = vector.shape_cast %39 : vector<1x8x8x64xbf16> to vector<8x8x64xbf16>
    %c0_51 = arith.constant 0 : index
    %c0_52 = arith.constant 0 : index
    %41 = vector.load %arg5[%c0_51, %c0_52] : memref<64x128xf32, #tpu.memory_space<vmem>>, vector<64x128xf32>
    %42 = vector.shape_cast %40 : vector<8x8x64xbf16> to vector<64x64xbf16>
    %c4_53 = arith.constant 4 : index
    %c0_54 = arith.constant 0 : index
    %c0_55 = arith.constant 0 : index
    %43 = vector.load %arg2[%c4_53, %c0_54, %c0_55] : memref<25x64x128xbf16, #tpu.memory_space<vmem>>, vector<1x64x128xbf16>
    %44 = vector.shape_cast %43 : vector<1x64x128xbf16> to vector<64x128xbf16>
    %cst_56 = arith.constant dense<0.000000e+00> : vector<64x128xf32>
    %45 = tpu.matmul %42, %44, %cst_56 {dimension_numbers = #tpu.dot_dimension_numbers<[1], [0], [0], [1], [0, 0, 1, 1], [], []>} : vector<64x64xbf16>, vector<64x128xbf16>, vector<64x128xf32> -> vector<64x128xf32>
    %46 = arith.addf %41, %45 : vector<64x128xf32>
    %c0_57 = arith.constant 0 : index
    %c0_58 = arith.constant 0 : index
    %47 = vector.load %arg5[%c0_57, %c0_58] : memref<64x128xf32, #tpu.memory_space<vmem>>, vector<64x128xf32>
    tpu.vector_store %arg5[%c0_57, %c0_58], %46 {strides = array<i32>} : memref<64x128xf32, #tpu.memory_space<vmem>>, vector<64x128xf32>,
    %c0_59 = arith.constant 0 : index
    %c1_60 = arith.constant 1 : index
    %c0_61 = arith.constant 0 : index
    %c0_62 = arith.constant 0 : index
    %48 = vector.load %arg1[%c0_59, %c1_60, %c0_61, %c0_62] : memref<1x12x12x64xbf16, #tpu.memory_space<vmem>>, vector<1x8x8x64xbf16>
    %49 = vector.shape_cast %48 : vector<1x8x8x64xbf16> to vector<8x8x64xbf16>
    %c0_63 = arith.constant 0 : index
    %c0_64 = arith.constant 0 : index
    %50 = vector.load %arg5[%c0_63, %c0_64] : memref<64x128xf32, #tpu.memory_space<vmem>>, vector<64x128xf32>
    %51 = vector.shape_cast %49 : vector<8x8x64xbf16> to vector<64x64xbf16>
    %c5 = arith.constant 5 : index
    %c0_65 = arith.constant 0 : index
    %c0_66 = arith.constant 0 : index
    %52 = vector.load %arg2[%c5, %c0_65, %c0_66] : memref<25x64x128xbf16, #tpu.memory_space<vmem>>, vector<1x64x128xbf16>
    %53 = vector.shape_cast %52 : vector<1x64x128xbf16> to vector<64x128xbf16>
    %cst_67 = arith.constant dense<0.000000e+00> : vector<64x128xf32>
    %54 = tpu.matmul %51, %53, %cst_67 {dimension_numbers = #tpu.dot_dimension_numbers<[1], [0], [0], [1], [0, 0, 1, 1], [], []>} : vector<64x64xbf16>, vector<64x128xbf16>, vector<64x128xf32> -> vector<64x128xf32>
    %55 = arith.addf %50, %54 : vector<64x128xf32>
    %c0_68 = arith.constant 0 : index
    %c0_69 = arith.constant 0 : index
    %56 = vector.load %arg5[%c0_68, %c0_69] : memref<64x128xf32, #tpu.memory_space<vmem>>, vector<64x128xf32>
    tpu.vector_store %arg5[%c0_68, %c0_69], %55 {strides = array<i32>} : memref<64x128xf32, #tpu.memory_space<vmem>>, vector<64x128xf32>,
    %c0_70 = arith.constant 0 : index
    %c1_71 = arith.constant 1 : index
    %c1_72 = arith.constant 1 : index
    %c0_73 = arith.constant 0 : index
    %57 = vector.load %arg1[%c0_70, %c1_71, %c1_72, %c0_73] : memref<1x12x12x64xbf16, #tpu.memory_space<vmem>>, vector<1x8x8x64xbf16>
    %58 = vector.shape_cast %57 : vector<1x8x8x64xbf16> to vector<8x8x64xbf16>
    %c0_74 = arith.constant 0 : index
    %c0_75 = arith.constant 0 : index
    %59 = vector.load %arg5[%c0_74, %c0_75] : memref<64x128xf32, #tpu.memory_space<vmem>>, vector<64x128xf32>
    %60 = vector.shape_cast %58 : vector<8x8x64xbf16> to vector<64x64xbf16>
    %c6 = arith.constant 6 : index
    %c0_76 = arith.constant 0 : index
    %c0_77 = arith.constant 0 : index
    %61 = vector.load %arg2[%c6, %c0_76, %c0_77] : memref<25x64x128xbf16, #tpu.memory_space<vmem>>, vector<1x64x128xbf16>
    %62 = vector.shape_cast %61 : vector<1x64x128xbf16> to vector<64x128xbf16>
    %cst_78 = arith.constant dense<0.000000e+00> : vector<64x128xf32>
    %63 = tpu.matmul %60, %62, %cst_78 {dimension_numbers = #tpu.dot_dimension_numbers<[1], [0], [0], [1], [0, 0, 1, 1], [], []>} : vector<64x64xbf16>, vector<64x128xbf16>, vector<64x128xf32> -> vector<64x128xf32>
    %64 = arith.addf %59, %63 : vector<64x128xf32>
    %c0_79 = arith.constant 0 : index
    %c0_80 = arith.constant 0 : index
    %65 = vector.load %arg5[%c0_79, %c0_80] : memref<64x128xf32, #tpu.memory_space<vmem>>, vector<64x128xf32>
    tpu.vector_store %arg5[%c0_79, %c0_80], %64 {strides = array<i32>} : memref<64x128xf32, #tpu.memory_space<vmem>>, vector<64x128xf32>,
    %c0_81 = arith.constant 0 : index
    %c1_82 = arith.constant 1 : index
    %c2_83 = arith.constant 2 : index
    %c0_84 = arith.constant 0 : index
    %66 = vector.load %arg1[%c0_81, %c1_82, %c2_83, %c0_84] : memref<1x12x12x64xbf16, #tpu.memory_space<vmem>>, vector<1x8x8x64xbf16>
    %67 = vector.shape_cast %66 : vector<1x8x8x64xbf16> to vector<8x8x64xbf16>
    %c0_85 = arith.constant 0 : index
    %c0_86 = arith.constant 0 : index
    %68 = vector.load %arg5[%c0_85, %c0_86] : memref<64x128xf32, #tpu.memory_space<vmem>>, vector<64x128xf32>
    %69 = vector.shape_cast %67 : vector<8x8x64xbf16> to vector<64x64xbf16>
    %c7 = arith.constant 7 : index
    %c0_87 = arith.constant 0 : index
    %c0_88 = arith.constant 0 : index
    %70 = vector.load %arg2[%c7, %c0_87, %c0_88] : memref<25x64x128xbf16, #tpu.memory_space<vmem>>, vector<1x64x128xbf16>
    %71 = vector.shape_cast %70 : vector<1x64x128xbf16> to vector<64x128xbf16>
    %cst_89 = arith.constant dense<0.000000e+00> : vector<64x128xf32>
    %72 = tpu.matmul %69, %71, %cst_89 {dimension_numbers = #tpu.dot_dimension_numbers<[1], [0], [0], [1], [0, 0, 1, 1], [], []>} : vector<64x64xbf16>, vector<64x128xbf16>, vector<64x128xf32> -> vector<64x128xf32>
    %73 = arith.addf %68, %72 : vector<64x128xf32>
    %c0_90 = arith.constant 0 : index
    %c0_91 = arith.constant 0 : index
    %74 = vector.load %arg5[%c0_90, %c0_91] : memref<64x128xf32, #tpu.memory_space<vmem>>, vector<64x128xf32>
    tpu.vector_store %arg5[%c0_90, %c0_91], %73 {strides = array<i32>} : memref<64x128xf32, #tpu.memory_space<vmem>>, vector<64x128xf32>,
    %c0_92 = arith.constant 0 : index
    %c1_93 = arith.constant 1 : index
    %c3_94 = arith.constant 3 : index
    %c0_95 = arith.constant 0 : index
    %75 = vector.load %arg1[%c0_92, %c1_93, %c3_94, %c0_95] : memref<1x12x12x64xbf16, #tpu.memory_space<vmem>>, vector<1x8x8x64xbf16>
    %76 = vector.shape_cast %75 : vector<1x8x8x64xbf16> to vector<8x8x64xbf16>
    %c0_96 = arith.constant 0 : index
    %c0_97 = arith.constant 0 : index
    %77 = vector.load %arg5[%c0_96, %c0_97] : memref<64x128xf32, #tpu.memory_space<vmem>>, vector<64x128xf32>
    %78 = vector.shape_cast %76 : vector<8x8x64xbf16> to vector<64x64xbf16>
    %c8 = arith.constant 8 : index
    %c0_98 = arith.constant 0 : index
    %c0_99 = arith.constant 0 : index
    %79 = vector.load %arg2[%c8, %c0_98, %c0_99] : memref<25x64x128xbf16, #tpu.memory_space<vmem>>, vector<1x64x128xbf16>
    %80 = vector.shape_cast %79 : vector<1x64x128xbf16> to vector<64x128xbf16>
    %cst_100 = arith.constant dense<0.000000e+00> : vector<64x128xf32>
    %81 = tpu.matmul %78, %80, %cst_100 {dimension_numbers = #tpu.dot_dimension_numbers<[1], [0], [0], [1], [0, 0, 1, 1], [], []>} : vector<64x64xbf16>, vector<64x128xbf16>, vector<64x128xf32> -> vector<64x128xf32>
    %82 = arith.addf %77, %81 : vector<64x128xf32>
    %c0_101 = arith.constant 0 : index
    %c0_102 = arith.constant 0 : index
    %83 = vector.load %arg5[%c0_101, %c0_102] : memref<64x128xf32, #tpu.memory_space<vmem>>, vector<64x128xf32>
    tpu.vector_store %arg5[%c0_101, %c0_102], %82 {strides = array<i32>} : memref<64x128xf32, #tpu.memory_space<vmem>>, vector<64x128xf32>,
    %c0_103 = arith.constant 0 : index
    %c1_104 = arith.constant 1 : index
    %c4_105 = arith.constant 4 : index
    %c0_106 = arith.constant 0 : index
    %84 = vector.load %arg1[%c0_103, %c1_104, %c4_105, %c0_106] : memref<1x12x12x64xbf16, #tpu.memory_space<vmem>>, vector<1x8x8x64xbf16>
    %85 = vector.shape_cast %84 : vector<1x8x8x64xbf16> to vector<8x8x64xbf16>
    %c0_107 = arith.constant 0 : index
    %c0_108 = arith.constant 0 : index
    %86 = vector.load %arg5[%c0_107, %c0_108] : memref<64x128xf32, #tpu.memory_space<vmem>>, vector<64x128xf32>
    %87 = vector.shape_cast %85 : vector<8x8x64xbf16> to vector<64x64xbf16>
    %c9 = arith.constant 9 : index
    %c0_109 = arith.constant 0 : index
    %c0_110 = arith.constant 0 : index
    %88 = vector.load %arg2[%c9, %c0_109, %c0_110] : memref<25x64x128xbf16, #tpu.memory_space<vmem>>, vector<1x64x128xbf16>
    %89 = vector.shape_cast %88 : vector<1x64x128xbf16> to vector<64x128xbf16>
    %cst_111 = arith.constant dense<0.000000e+00> : vector<64x128xf32>
    %90 = tpu.matmul %87, %89, %cst_111 {dimension_numbers = #tpu.dot_dimension_numbers<[1], [0], [0], [1], [0, 0, 1, 1], [], []>} : vector<64x64xbf16>, vector<64x128xbf16>, vector<64x128xf32> -> vector<64x128xf32>
    %91 = arith.addf %86, %90 : vector<64x128xf32>
    %c0_112 = arith.constant 0 : index
    %c0_113 = arith.constant 0 : index
    %92 = vector.load %arg5[%c0_112, %c0_113] : memref<64x128xf32, #tpu.memory_space<vmem>>, vector<64x128xf32>
    tpu.vector_store %arg5[%c0_112, %c0_113], %91 {strides = array<i32>} : memref<64x128xf32, #tpu.memory_space<vmem>>, vector<64x128xf32>,
    %c0_114 = arith.constant 0 : index
    %c2_115 = arith.constant 2 : index
    %c0_116 = arith.constant 0 : index
    %c0_117 = arith.constant 0 : index
    %93 = vector.load %arg1[%c0_114, %c2_115, %c0_116, %c0_117] : memref<1x12x12x64xbf16, #tpu.memory_space<vmem>>, vector<1x8x8x64xbf16>
    %94 = vector.shape_cast %93 : vector<1x8x8x64xbf16> to vector<8x8x64xbf16>
    %c0_118 = arith.constant 0 : index
    %c0_119 = arith.constant 0 : index
    %95 = vector.load %arg5[%c0_118, %c0_119] : memref<64x128xf32, #tpu.memory_space<vmem>>, vector<64x128xf32>
    %96 = vector.shape_cast %94 : vector<8x8x64xbf16> to vector<64x64xbf16>
    %c10 = arith.constant 10 : index
    %c0_120 = arith.constant 0 : index
    %c0_121 = arith.constant 0 : index
    %97 = vector.load %arg2[%c10, %c0_120, %c0_121] : memref<25x64x128xbf16, #tpu.memory_space<vmem>>, vector<1x64x128xbf16>
    %98 = vector.shape_cast %97 : vector<1x64x128xbf16> to vector<64x128xbf16>
    %cst_122 = arith.constant dense<0.000000e+00> : vector<64x128xf32>
    %99 = tpu.matmul %96, %98, %cst_122 {dimension_numbers = #tpu.dot_dimension_numbers<[1], [0], [0], [1], [0, 0, 1, 1], [], []>} : vector<64x64xbf16>, vector<64x128xbf16>, vector<64x128xf32> -> vector<64x128xf32>
    %100 = arith.addf %95, %99 : vector<64x128xf32>
    %c0_123 = arith.constant 0 : index
    %c0_124 = arith.constant 0 : index
    %101 = vector.load %arg5[%c0_123, %c0_124] : memref<64x128xf32, #tpu.memory_space<vmem>>, vector<64x128xf32>
    tpu.vector_store %arg5[%c0_123, %c0_124], %100 {strides = array<i32>} : memref<64x128xf32, #tpu.memory_space<vmem>>, vector<64x128xf32>,
    %c0_125 = arith.constant 0 : index
    %c2_126 = arith.constant 2 : index
    %c1_127 = arith.constant 1 : index
    %c0_128 = arith.constant 0 : index
    %102 = vector.load %arg1[%c0_125, %c2_126, %c1_127, %c0_128] : memref<1x12x12x64xbf16, #tpu.memory_space<vmem>>, vector<1x8x8x64xbf16>
    %103 = vector.shape_cast %102 : vector<1x8x8x64xbf16> to vector<8x8x64xbf16>
    %c0_129 = arith.constant 0 : index
    %c0_130 = arith.constant 0 : index
    %104 = vector.load %arg5[%c0_129, %c0_130] : memref<64x128xf32, #tpu.memory_space<vmem>>, vector<64x128xf32>
    %105 = vector.shape_cast %103 : vector<8x8x64xbf16> to vector<64x64xbf16>
    %c11 = arith.constant 11 : index
    %c0_131 = arith.constant 0 : index
    %c0_132 = arith.constant 0 : index
    %106 = vector.load %arg2[%c11, %c0_131, %c0_132] : memref<25x64x128xbf16, #tpu.memory_space<vmem>>, vector<1x64x128xbf16>
    %107 = vector.shape_cast %106 : vector<1x64x128xbf16> to vector<64x128xbf16>
    %cst_133 = arith.constant dense<0.000000e+00> : vector<64x128xf32>
    %108 = tpu.matmul %105, %107, %cst_133 {dimension_numbers = #tpu.dot_dimension_numbers<[1], [0], [0], [1], [0, 0, 1, 1], [], []>} : vector<64x64xbf16>, vector<64x128xbf16>, vector<64x128xf32> -> vector<64x128xf32>
    %109 = arith.addf %104, %108 : vector<64x128xf32>
    %c0_134 = arith.constant 0 : index
    %c0_135 = arith.constant 0 : index
    %110 = vector.load %arg5[%c0_134, %c0_135] : memref<64x128xf32, #tpu.memory_space<vmem>>, vector<64x128xf32>
    tpu.vector_store %arg5[%c0_134, %c0_135], %109 {strides = array<i32>} : memref<64x128xf32, #tpu.memory_space<vmem>>, vector<64x128xf32>,
    %c0_136 = arith.constant 0 : index
    %c2_137 = arith.constant 2 : index
    %c2_138 = arith.constant 2 : index
    %c0_139 = arith.constant 0 : index
    %111 = vector.load %arg1[%c0_136, %c2_137, %c2_138, %c0_139] : memref<1x12x12x64xbf16, #tpu.memory_space<vmem>>, vector<1x8x8x64xbf16>
    %112 = vector.shape_cast %111 : vector<1x8x8x64xbf16> to vector<8x8x64xbf16>
    %c0_140 = arith.constant 0 : index
    %c0_141 = arith.constant 0 : index
    %113 = vector.load %arg5[%c0_140, %c0_141] : memref<64x128xf32, #tpu.memory_space<vmem>>, vector<64x128xf32>
    %114 = vector.shape_cast %112 : vector<8x8x64xbf16> to vector<64x64xbf16>
    %c12 = arith.constant 12 : index
    %c0_142 = arith.constant 0 : index
    %c0_143 = arith.constant 0 : index
    %115 = vector.load %arg2[%c12, %c0_142, %c0_143] : memref<25x64x128xbf16, #tpu.memory_space<vmem>>, vector<1x64x128xbf16>
    %116 = vector.shape_cast %115 : vector<1x64x128xbf16> to vector<64x128xbf16>
    %cst_144 = arith.constant dense<0.000000e+00> : vector<64x128xf32>
    %117 = tpu.matmul %114, %116, %cst_144 {dimension_numbers = #tpu.dot_dimension_numbers<[1], [0], [0], [1], [0, 0, 1, 1], [], []>} : vector<64x64xbf16>, vector<64x128xbf16>, vector<64x128xf32> -> vector<64x128xf32>
    %118 = arith.addf %113, %117 : vector<64x128xf32>
    %c0_145 = arith.constant 0 : index
    %c0_146 = arith.constant 0 : index
    %119 = vector.load %arg5[%c0_145, %c0_146] : memref<64x128xf32, #tpu.memory_space<vmem>>, vector<64x128xf32>
    tpu.vector_store %arg5[%c0_145, %c0_146], %118 {strides = array<i32>} : memref<64x128xf32, #tpu.memory_space<vmem>>, vector<64x128xf32>,
    %c0_147 = arith.constant 0 : index
    %c2_148 = arith.constant 2 : index
    %c3_149 = arith.constant 3 : index
    %c0_150 = arith.constant 0 : index
    %120 = vector.load %arg1[%c0_147, %c2_148, %c3_149, %c0_150] : memref<1x12x12x64xbf16, #tpu.memory_space<vmem>>, vector<1x8x8x64xbf16>
    %121 = vector.shape_cast %120 : vector<1x8x8x64xbf16> to vector<8x8x64xbf16>
    %c0_151 = arith.constant 0 : index
    %c0_152 = arith.constant 0 : index
    %122 = vector.load %arg5[%c0_151, %c0_152] : memref<64x128xf32, #tpu.memory_space<vmem>>, vector<64x128xf32>
    %123 = vector.shape_cast %121 : vector<8x8x64xbf16> to vector<64x64xbf16>
    %c13 = arith.constant 13 : index
    %c0_153 = arith.constant 0 : index
    %c0_154 = arith.constant 0 : index
    %124 = vector.load %arg2[%c13, %c0_153, %c0_154] : memref<25x64x128xbf16, #tpu.memory_space<vmem>>, vector<1x64x128xbf16>
    %125 = vector.shape_cast %124 : vector<1x64x128xbf16> to vector<64x128xbf16>
    %cst_155 = arith.constant dense<0.000000e+00> : vector<64x128xf32>
    %126 = tpu.matmul %123, %125, %cst_155 {dimension_numbers = #tpu.dot_dimension_numbers<[1], [0], [0], [1], [0, 0, 1, 1], [], []>} : vector<64x64xbf16>, vector<64x128xbf16>, vector<64x128xf32> -> vector<64x128xf32>
    %127 = arith.addf %122, %126 : vector<64x128xf32>
    %c0_156 = arith.constant 0 : index
    %c0_157 = arith.constant 0 : index
    %128 = vector.load %arg5[%c0_156, %c0_157] : memref<64x128xf32, #tpu.memory_space<vmem>>, vector<64x128xf32>
    tpu.vector_store %arg5[%c0_156, %c0_157], %127 {strides = array<i32>} : memref<64x128xf32, #tpu.memory_space<vmem>>, vector<64x128xf32>,
    %c0_158 = arith.constant 0 : index
    %c2_159 = arith.constant 2 : index
    %c4_160 = arith.constant 4 : index
    %c0_161 = arith.constant 0 : index
    %129 = vector.load %arg1[%c0_158, %c2_159, %c4_160, %c0_161] : memref<1x12x12x64xbf16, #tpu.memory_space<vmem>>, vector<1x8x8x64xbf16>
    %130 = vector.shape_cast %129 : vector<1x8x8x64xbf16> to vector<8x8x64xbf16>
    %c0_162 = arith.constant 0 : index
    %c0_163 = arith.constant 0 : index
    %131 = vector.load %arg5[%c0_162, %c0_163] : memref<64x128xf32, #tpu.memory_space<vmem>>, vector<64x128xf32>
    %132 = vector.shape_cast %130 : vector<8x8x64xbf16> to vector<64x64xbf16>
    %c14 = arith.constant 14 : index
    %c0_164 = arith.constant 0 : index
    %c0_165 = arith.constant 0 : index
    %133 = vector.load %arg2[%c14, %c0_164, %c0_165] : memref<25x64x128xbf16, #tpu.memory_space<vmem>>, vector<1x64x128xbf16>
    %134 = vector.shape_cast %133 : vector<1x64x128xbf16> to vector<64x128xbf16>
    %cst_166 = arith.constant dense<0.000000e+00> : vector<64x128xf32>
    %135 = tpu.matmul %132, %134, %cst_166 {dimension_numbers = #tpu.dot_dimension_numbers<[1], [0], [0], [1], [0, 0, 1, 1], [], []>} : vector<64x64xbf16>, vector<64x128xbf16>, vector<64x128xf32> -> vector<64x128xf32>
    %136 = arith.addf %131, %135 : vector<64x128xf32>
    %c0_167 = arith.constant 0 : index
    %c0_168 = arith.constant 0 : index
    %137 = vector.load %arg5[%c0_167, %c0_168] : memref<64x128xf32, #tpu.memory_space<vmem>>, vector<64x128xf32>
    tpu.vector_store %arg5[%c0_167, %c0_168], %136 {strides = array<i32>} : memref<64x128xf32, #tpu.memory_space<vmem>>, vector<64x128xf32>,
    %c0_169 = arith.constant 0 : index
    %c3_170 = arith.constant 3 : index
    %c0_171 = arith.constant 0 : index
    %c0_172 = arith.constant 0 : index
    %138 = vector.load %arg1[%c0_169, %c3_170, %c0_171, %c0_172] : memref<1x12x12x64xbf16, #tpu.memory_space<vmem>>, vector<1x8x8x64xbf16>
    %139 = vector.shape_cast %138 : vector<1x8x8x64xbf16> to vector<8x8x64xbf16>
    %c0_173 = arith.constant 0 : index
    %c0_174 = arith.constant 0 : index
    %140 = vector.load %arg5[%c0_173, %c0_174] : memref<64x128xf32, #tpu.memory_space<vmem>>, vector<64x128xf32>
    %141 = vector.shape_cast %139 : vector<8x8x64xbf16> to vector<64x64xbf16>
    %c15 = arith.constant 15 : index
    %c0_175 = arith.constant 0 : index
    %c0_176 = arith.constant 0 : index
    %142 = vector.load %arg2[%c15, %c0_175, %c0_176] : memref<25x64x128xbf16, #tpu.memory_space<vmem>>, vector<1x64x128xbf16>
    %143 = vector.shape_cast %142 : vector<1x64x128xbf16> to vector<64x128xbf16>
    %cst_177 = arith.constant dense<0.000000e+00> : vector<64x128xf32>
    %144 = tpu.matmul %141, %143, %cst_177 {dimension_numbers = #tpu.dot_dimension_numbers<[1], [0], [0], [1], [0, 0, 1, 1], [], []>} : vector<64x64xbf16>, vector<64x128xbf16>, vector<64x128xf32> -> vector<64x128xf32>
    %145 = arith.addf %140, %144 : vector<64x128xf32>
    %c0_178 = arith.constant 0 : index
    %c0_179 = arith.constant 0 : index
    %146 = vector.load %arg5[%c0_178, %c0_179] : memref<64x128xf32, #tpu.memory_space<vmem>>, vector<64x128xf32>
    tpu.vector_store %arg5[%c0_178, %c0_179], %145 {strides = array<i32>} : memref<64x128xf32, #tpu.memory_space<vmem>>, vector<64x128xf32>,
    %c0_180 = arith.constant 0 : index
    %c3_181 = arith.constant 3 : index
    %c1_182 = arith.constant 1 : index
    %c0_183 = arith.constant 0 : index
    %147 = vector.load %arg1[%c0_180, %c3_181, %c1_182, %c0_183] : memref<1x12x12x64xbf16, #tpu.memory_space<vmem>>, vector<1x8x8x64xbf16>
    %148 = vector.shape_cast %147 : vector<1x8x8x64xbf16> to vector<8x8x64xbf16>
    %c0_184 = arith.constant 0 : index
    %c0_185 = arith.constant 0 : index
    %149 = vector.load %arg5[%c0_184, %c0_185] : memref<64x128xf32, #tpu.memory_space<vmem>>, vector<64x128xf32>
    %150 = vector.shape_cast %148 : vector<8x8x64xbf16> to vector<64x64xbf16>
    %c16 = arith.constant 16 : index
    %c0_186 = arith.constant 0 : index
    %c0_187 = arith.constant 0 : index
    %151 = vector.load %arg2[%c16, %c0_186, %c0_187] : memref<25x64x128xbf16, #tpu.memory_space<vmem>>, vector<1x64x128xbf16>
    %152 = vector.shape_cast %151 : vector<1x64x128xbf16> to vector<64x128xbf16>
    %cst_188 = arith.constant dense<0.000000e+00> : vector<64x128xf32>
    %153 = tpu.matmul %150, %152, %cst_188 {dimension_numbers = #tpu.dot_dimension_numbers<[1], [0], [0], [1], [0, 0, 1, 1], [], []>} : vector<64x64xbf16>, vector<64x128xbf16>, vector<64x128xf32> -> vector<64x128xf32>
    %154 = arith.addf %149, %153 : vector<64x128xf32>
    %c0_189 = arith.constant 0 : index
    %c0_190 = arith.constant 0 : index
    %155 = vector.load %arg5[%c0_189, %c0_190] : memref<64x128xf32, #tpu.memory_space<vmem>>, vector<64x128xf32>
    tpu.vector_store %arg5[%c0_189, %c0_190], %154 {strides = array<i32>} : memref<64x128xf32, #tpu.memory_space<vmem>>, vector<64x128xf32>,
    %c0_191 = arith.constant 0 : index
    %c3_192 = arith.constant 3 : index
    %c2_193 = arith.constant 2 : index
    %c0_194 = arith.constant 0 : index
    %156 = vector.load %arg1[%c0_191, %c3_192, %c2_193, %c0_194] : memref<1x12x12x64xbf16, #tpu.memory_space<vmem>>, vector<1x8x8x64xbf16>
    %157 = vector.shape_cast %156 : vector<1x8x8x64xbf16> to vector<8x8x64xbf16>
    %c0_195 = arith.constant 0 : index
    %c0_196 = arith.constant 0 : index
    %158 = vector.load %arg5[%c0_195, %c0_196] : memref<64x128xf32, #tpu.memory_space<vmem>>, vector<64x128xf32>
    %159 = vector.shape_cast %157 : vector<8x8x64xbf16> to vector<64x64xbf16>
    %c17 = arith.constant 17 : index
    %c0_197 = arith.constant 0 : index
    %c0_198 = arith.constant 0 : index
    %160 = vector.load %arg2[%c17, %c0_197, %c0_198] : memref<25x64x128xbf16, #tpu.memory_space<vmem>>, vector<1x64x128xbf16>
    %161 = vector.shape_cast %160 : vector<1x64x128xbf16> to vector<64x128xbf16>
    %cst_199 = arith.constant dense<0.000000e+00> : vector<64x128xf32>
    %162 = tpu.matmul %159, %161, %cst_199 {dimension_numbers = #tpu.dot_dimension_numbers<[1], [0], [0], [1], [0, 0, 1, 1], [], []>} : vector<64x64xbf16>, vector<64x128xbf16>, vector<64x128xf32> -> vector<64x128xf32>
    %163 = arith.addf %158, %162 : vector<64x128xf32>
    %c0_200 = arith.constant 0 : index
    %c0_201 = arith.constant 0 : index
    %164 = vector.load %arg5[%c0_200, %c0_201] : memref<64x128xf32, #tpu.memory_space<vmem>>, vector<64x128xf32>
    tpu.vector_store %arg5[%c0_200, %c0_201], %163 {strides = array<i32>} : memref<64x128xf32, #tpu.memory_space<vmem>>, vector<64x128xf32>,
    %c0_202 = arith.constant 0 : index
    %c3_203 = arith.constant 3 : index
    %c3_204 = arith.constant 3 : index
    %c0_205 = arith.constant 0 : index
    %165 = vector.load %arg1[%c0_202, %c3_203, %c3_204, %c0_205] : memref<1x12x12x64xbf16, #tpu.memory_space<vmem>>, vector<1x8x8x64xbf16>
    %166 = vector.shape_cast %165 : vector<1x8x8x64xbf16> to vector<8x8x64xbf16>
    %c0_206 = arith.constant 0 : index
    %c0_207 = arith.constant 0 : index
    %167 = vector.load %arg5[%c0_206, %c0_207] : memref<64x128xf32, #tpu.memory_space<vmem>>, vector<64x128xf32>
    %168 = vector.shape_cast %166 : vector<8x8x64xbf16> to vector<64x64xbf16>
    %c18 = arith.constant 18 : index
    %c0_208 = arith.constant 0 : index
    %c0_209 = arith.constant 0 : index
    %169 = vector.load %arg2[%c18, %c0_208, %c0_209] : memref<25x64x128xbf16, #tpu.memory_space<vmem>>, vector<1x64x128xbf16>
    %170 = vector.shape_cast %169 : vector<1x64x128xbf16> to vector<64x128xbf16>
    %cst_210 = arith.constant dense<0.000000e+00> : vector<64x128xf32>
    %171 = tpu.matmul %168, %170, %cst_210 {dimension_numbers = #tpu.dot_dimension_numbers<[1], [0], [0], [1], [0, 0, 1, 1], [], []>} : vector<64x64xbf16>, vector<64x128xbf16>, vector<64x128xf32> -> vector<64x128xf32>
    %172 = arith.addf %167, %171 : vector<64x128xf32>
    %c0_211 = arith.constant 0 : index
    %c0_212 = arith.constant 0 : index
    %173 = vector.load %arg5[%c0_211, %c0_212] : memref<64x128xf32, #tpu.memory_space<vmem>>, vector<64x128xf32>
    tpu.vector_store %arg5[%c0_211, %c0_212], %172 {strides = array<i32>} : memref<64x128xf32, #tpu.memory_space<vmem>>, vector<64x128xf32>,
    %c0_213 = arith.constant 0 : index
    %c3_214 = arith.constant 3 : index
    %c4_215 = arith.constant 4 : index
    %c0_216 = arith.constant 0 : index
    %174 = vector.load %arg1[%c0_213, %c3_214, %c4_215, %c0_216] : memref<1x12x12x64xbf16, #tpu.memory_space<vmem>>, vector<1x8x8x64xbf16>
    %175 = vector.shape_cast %174 : vector<1x8x8x64xbf16> to vector<8x8x64xbf16>
    %c0_217 = arith.constant 0 : index
    %c0_218 = arith.constant 0 : index
    %176 = vector.load %arg5[%c0_217, %c0_218] : memref<64x128xf32, #tpu.memory_space<vmem>>, vector<64x128xf32>
    %177 = vector.shape_cast %175 : vector<8x8x64xbf16> to vector<64x64xbf16>
    %c19 = arith.constant 19 : index
    %c0_219 = arith.constant 0 : index
    %c0_220 = arith.constant 0 : index
    %178 = vector.load %arg2[%c19, %c0_219, %c0_220] : memref<25x64x128xbf16, #tpu.memory_space<vmem>>, vector<1x64x128xbf16>
    %179 = vector.shape_cast %178 : vector<1x64x128xbf16> to vector<64x128xbf16>
    %cst_221 = arith.constant dense<0.000000e+00> : vector<64x128xf32>
    %180 = tpu.matmul %177, %179, %cst_221 {dimension_numbers = #tpu.dot_dimension_numbers<[1], [0], [0], [1], [0, 0, 1, 1], [], []>} : vector<64x64xbf16>, vector<64x128xbf16>, vector<64x128xf32> -> vector<64x128xf32>
    %181 = arith.addf %176, %180 : vector<64x128xf32>
    %c0_222 = arith.constant 0 : index
    %c0_223 = arith.constant 0 : index
    %182 = vector.load %arg5[%c0_222, %c0_223] : memref<64x128xf32, #tpu.memory_space<vmem>>, vector<64x128xf32>
    tpu.vector_store %arg5[%c0_222, %c0_223], %181 {strides = array<i32>} : memref<64x128xf32, #tpu.memory_space<vmem>>, vector<64x128xf32>,
    %c0_224 = arith.constant 0 : index
    %c4_225 = arith.constant 4 : index
    %c0_226 = arith.constant 0 : index
    %c0_227 = arith.constant 0 : index
    %183 = vector.load %arg1[%c0_224, %c4_225, %c0_226, %c0_227] : memref<1x12x12x64xbf16, #tpu.memory_space<vmem>>, vector<1x8x8x64xbf16>
    %184 = vector.shape_cast %183 : vector<1x8x8x64xbf16> to vector<8x8x64xbf16>
    %c0_228 = arith.constant 0 : index
    %c0_229 = arith.constant 0 : index
    %185 = vector.load %arg5[%c0_228, %c0_229] : memref<64x128xf32, #tpu.memory_space<vmem>>, vector<64x128xf32>
    %186 = vector.shape_cast %184 : vector<8x8x64xbf16> to vector<64x64xbf16>
    %c20 = arith.constant 20 : index
    %c0_230 = arith.constant 0 : index
    %c0_231 = arith.constant 0 : index
    %187 = vector.load %arg2[%c20, %c0_230, %c0_231] : memref<25x64x128xbf16, #tpu.memory_space<vmem>>, vector<1x64x128xbf16>
    %188 = vector.shape_cast %187 : vector<1x64x128xbf16> to vector<64x128xbf16>
    %cst_232 = arith.constant dense<0.000000e+00> : vector<64x128xf32>
    %189 = tpu.matmul %186, %188, %cst_232 {dimension_numbers = #tpu.dot_dimension_numbers<[1], [0], [0], [1], [0, 0, 1, 1], [], []>} : vector<64x64xbf16>, vector<64x128xbf16>, vector<64x128xf32> -> vector<64x128xf32>
    %190 = arith.addf %185, %189 : vector<64x128xf32>
    %c0_233 = arith.constant 0 : index
    %c0_234 = arith.constant 0 : index
    %191 = vector.load %arg5[%c0_233, %c0_234] : memref<64x128xf32, #tpu.memory_space<vmem>>, vector<64x128xf32>
    tpu.vector_store %arg5[%c0_233, %c0_234], %190 {strides = array<i32>} : memref<64x128xf32, #tpu.memory_space<vmem>>, vector<64x128xf32>,
    %c0_235 = arith.constant 0 : index
    %c4_236 = arith.constant 4 : index
    %c1_237 = arith.constant 1 : index
    %c0_238 = arith.constant 0 : index
    %192 = vector.load %arg1[%c0_235, %c4_236, %c1_237, %c0_238] : memref<1x12x12x64xbf16, #tpu.memory_space<vmem>>, vector<1x8x8x64xbf16>
    %193 = vector.shape_cast %192 : vector<1x8x8x64xbf16> to vector<8x8x64xbf16>
    %c0_239 = arith.constant 0 : index
    %c0_240 = arith.constant 0 : index
    %194 = vector.load %arg5[%c0_239, %c0_240] : memref<64x128xf32, #tpu.memory_space<vmem>>, vector<64x128xf32>
    %195 = vector.shape_cast %193 : vector<8x8x64xbf16> to vector<64x64xbf16>
    %c21 = arith.constant 21 : index
    %c0_241 = arith.constant 0 : index
    %c0_242 = arith.constant 0 : index
    %196 = vector.load %arg2[%c21, %c0_241, %c0_242] : memref<25x64x128xbf16, #tpu.memory_space<vmem>>, vector<1x64x128xbf16>
    %197 = vector.shape_cast %196 : vector<1x64x128xbf16> to vector<64x128xbf16>
    %cst_243 = arith.constant dense<0.000000e+00> : vector<64x128xf32>
    %198 = tpu.matmul %195, %197, %cst_243 {dimension_numbers = #tpu.dot_dimension_numbers<[1], [0], [0], [1], [0, 0, 1, 1], [], []>} : vector<64x64xbf16>, vector<64x128xbf16>, vector<64x128xf32> -> vector<64x128xf32>
    %199 = arith.addf %194, %198 : vector<64x128xf32>
    %c0_244 = arith.constant 0 : index
    %c0_245 = arith.constant 0 : index
    %200 = vector.load %arg5[%c0_244, %c0_245] : memref<64x128xf32, #tpu.memory_space<vmem>>, vector<64x128xf32>
    tpu.vector_store %arg5[%c0_244, %c0_245], %199 {strides = array<i32>} : memref<64x128xf32, #tpu.memory_space<vmem>>, vector<64x128xf32>,
    %c0_246 = arith.constant 0 : index
    %c4_247 = arith.constant 4 : index
    %c2_248 = arith.constant 2 : index
    %c0_249 = arith.constant 0 : index
    %201 = vector.load %arg1[%c0_246, %c4_247, %c2_248, %c0_249] : memref<1x12x12x64xbf16, #tpu.memory_space<vmem>>, vector<1x8x8x64xbf16>
    %202 = vector.shape_cast %201 : vector<1x8x8x64xbf16> to vector<8x8x64xbf16>
    %c0_250 = arith.constant 0 : index
    %c0_251 = arith.constant 0 : index
    %203 = vector.load %arg5[%c0_250, %c0_251] : memref<64x128xf32, #tpu.memory_space<vmem>>, vector<64x128xf32>
    %204 = vector.shape_cast %202 : vector<8x8x64xbf16> to vector<64x64xbf16>
    %c22 = arith.constant 22 : index
    %c0_252 = arith.constant 0 : index
    %c0_253 = arith.constant 0 : index
    %205 = vector.load %arg2[%c22, %c0_252, %c0_253] : memref<25x64x128xbf16, #tpu.memory_space<vmem>>, vector<1x64x128xbf16>
    %206 = vector.shape_cast %205 : vector<1x64x128xbf16> to vector<64x128xbf16>
    %cst_254 = arith.constant dense<0.000000e+00> : vector<64x128xf32>
    %207 = tpu.matmul %204, %206, %cst_254 {dimension_numbers = #tpu.dot_dimension_numbers<[1], [0], [0], [1], [0, 0, 1, 1], [], []>} : vector<64x64xbf16>, vector<64x128xbf16>, vector<64x128xf32> -> vector<64x128xf32>
    %208 = arith.addf %203, %207 : vector<64x128xf32>
    %c0_255 = arith.constant 0 : index
    %c0_256 = arith.constant 0 : index
    %209 = vector.load %arg5[%c0_255, %c0_256] : memref<64x128xf32, #tpu.memory_space<vmem>>, vector<64x128xf32>
    tpu.vector_store %arg5[%c0_255, %c0_256], %208 {strides = array<i32>} : memref<64x128xf32, #tpu.memory_space<vmem>>, vector<64x128xf32>,
    %c0_257 = arith.constant 0 : index
    %c4_258 = arith.constant 4 : index
    %c3_259 = arith.constant 3 : index
    %c0_260 = arith.constant 0 : index
    %210 = vector.load %arg1[%c0_257, %c4_258, %c3_259, %c0_260] : memref<1x12x12x64xbf16, #tpu.memory_space<vmem>>, vector<1x8x8x64xbf16>
    %211 = vector.shape_cast %210 : vector<1x8x8x64xbf16> to vector<8x8x64xbf16>
    %c0_261 = arith.constant 0 : index
    %c0_262 = arith.constant 0 : index
    %212 = vector.load %arg5[%c0_261, %c0_262] : memref<64x128xf32, #tpu.memory_space<vmem>>, vector<64x128xf32>
    %213 = vector.shape_cast %211 : vector<8x8x64xbf16> to vector<64x64xbf16>
    %c23 = arith.constant 23 : index
    %c0_263 = arith.constant 0 : index
    %c0_264 = arith.constant 0 : index
    %214 = vector.load %arg2[%c23, %c0_263, %c0_264] : memref<25x64x128xbf16, #tpu.memory_space<vmem>>, vector<1x64x128xbf16>
    %215 = vector.shape_cast %214 : vector<1x64x128xbf16> to vector<64x128xbf16>
    %cst_265 = arith.constant dense<0.000000e+00> : vector<64x128xf32>
    %216 = tpu.matmul %213, %215, %cst_265 {dimension_numbers = #tpu.dot_dimension_numbers<[1], [0], [0], [1], [0, 0, 1, 1], [], []>} : vector<64x64xbf16>, vector<64x128xbf16>, vector<64x128xf32> -> vector<64x128xf32>
    %217 = arith.addf %212, %216 : vector<64x128xf32>
    %c0_266 = arith.constant 0 : index
    %c0_267 = arith.constant 0 : index
    %218 = vector.load %arg5[%c0_266, %c0_267] : memref<64x128xf32, #tpu.memory_space<vmem>>, vector<64x128xf32>
    tpu.vector_store %arg5[%c0_266, %c0_267], %217 {strides = array<i32>} : memref<64x128xf32, #tpu.memory_space<vmem>>, vector<64x128xf32>,
    %c0_268 = arith.constant 0 : index
    %c4_269 = arith.constant 4 : index
    %c4_270 = arith.constant 4 : index
    %c0_271 = arith.constant 0 : index
    %219 = vector.load %arg1[%c0_268, %c4_269, %c4_270, %c0_271] : memref<1x12x12x64xbf16, #tpu.memory_space<vmem>>, vector<1x8x8x64xbf16>
    %220 = vector.shape_cast %219 : vector<1x8x8x64xbf16> to vector<8x8x64xbf16>
    %c0_272 = arith.constant 0 : index
    %c0_273 = arith.constant 0 : index
    %221 = vector.load %arg5[%c0_272, %c0_273] : memref<64x128xf32, #tpu.memory_space<vmem>>, vector<64x128xf32>
    %222 = vector.shape_cast %220 : vector<8x8x64xbf16> to vector<64x64xbf16>
    %c24 = arith.constant 24 : index
    %c0_274 = arith.constant 0 : index
    %c0_275 = arith.constant 0 : index
    %223 = vector.load %arg2[%c24, %c0_274, %c0_275] : memref<25x64x128xbf16, #tpu.memory_space<vmem>>, vector<1x64x128xbf16>
    %224 = vector.shape_cast %223 : vector<1x64x128xbf16> to vector<64x128xbf16>
    %cst_276 = arith.constant dense<0.000000e+00> : vector<64x128xf32>
    %225 = tpu.matmul %222, %224, %cst_276 {dimension_numbers = #tpu.dot_dimension_numbers<[1], [0], [0], [1], [0, 0, 1, 1], [], []>} : vector<64x64xbf16>, vector<64x128xbf16>, vector<64x128xf32> -> vector<64x128xf32>
    %226 = arith.addf %221, %225 : vector<64x128xf32>
    %c0_277 = arith.constant 0 : index
    %c0_278 = arith.constant 0 : index
    %227 = vector.load %arg5[%c0_277, %c0_278] : memref<64x128xf32, #tpu.memory_space<vmem>>, vector<64x128xf32>
    tpu.vector_store %arg5[%c0_277, %c0_278], %226 {strides = array<i32>} : memref<64x128xf32, #tpu.memory_space<vmem>>, vector<64x128xf32>,
    %c0_279 = arith.constant 0 : index
    %c0_280 = arith.constant 0 : index
    %228 = vector.load %arg5[%c0_279, %c0_280] : memref<64x128xf32, #tpu.memory_space<vmem>>, vector<64x128xf32>
    %229 = vector.broadcast %0 : vector<1x128xf32> to vector<64x128xf32>
    %230 = arith.addf %228, %229 : vector<64x128xf32>
    %cst_281 = arith.constant 0.000000e+00 : f32
    %231 = vector.broadcast %cst_281 : f32 to vector<64x128xf32>
    %232 = arith.maximumf %230, %231 : vector<64x128xf32>
    %c0_282 = arith.constant 0 : index
    %c0_283 = arith.constant 0 : index
    %233 = vector.load %arg5[%c0_282, %c0_283] : memref<64x128xf32, #tpu.memory_space<vmem>>, vector<64x128xf32>
    tpu.vector_store %arg5[%c0_282, %c0_283], %232 {strides = array<i32>} : memref<64x128xf32, #tpu.memory_space<vmem>>, vector<64x128xf32>,
    %c0_284 = arith.constant 0 : index
    %c0_285 = arith.constant 0 : index
    %234 = tpu.strided_load %arg5[%c0_284, %c0_285] {strides = array<i32: 2, 1>} : memref<64x128xf32, #tpu.memory_space<vmem>>, vector<32x128xf32>
    %c1_286 = arith.constant 1 : index
    %c0_287 = arith.constant 0 : index
    %235 = tpu.strided_load %arg5[%c1_286, %c0_287] {strides = array<i32: 2, 1>} : memref<64x128xf32, #tpu.memory_space<vmem>>, vector<32x128xf32>
    %236 = arith.maximumf %234, %235 : vector<32x128xf32>
    %237 = vector.shape_cast %236 : vector<32x128xf32> to vector<4x8x128xf32>
    %238 = vector.extract_strided_slice %237 {offsets = [0, 0, 0], sizes = [4, 4, 128], strides = [1, 1, 1]} : vector<4x8x128xf32> to vector<4x4x128xf32>
    %239 = vector.extract_strided_slice %237 {offsets = [0, 4, 0], sizes = [4, 4, 128], strides = [1, 1, 1]} : vector<4x8x128xf32> to vector<4x4x128xf32>
    %240 = arith.maximumf %238, %239 : vector<4x4x128xf32>
    %241 = arith.truncf %240 : vector<4x4x128xf32> to vector<4x4x128xbf16>
    %c0_288 = arith.constant 0 : index
    %c0_289 = arith.constant 0 : index
    %c0_290 = arith.constant 0 : index
    %c0_291 = arith.constant 0 : index
    %242 = vector.load %arg4[%c0_288, %c0_289, %c0_290, %c0_291] : memref<1x4x4x128xbf16, #tpu.memory_space<vmem>>, vector<1x4x4x128xbf16>
    %243 = vector.shape_cast %242 : vector<1x4x4x128xbf16> to vector<4x4x128xbf16>
    %244 = vector.shape_cast %241 : vector<4x4x128xbf16> to vector<1x4x4x128xbf16>
    tpu.vector_store %arg4[%c0_288, %c0_289, %c0_290, %c0_291], %244 {strides = array<i32>} : memref<1x4x4x128xbf16, #tpu.memory_space<vmem>>, vector<1x4x4x128xbf16>,
    return
  }
  func.func @transform_0(%arg0: i32) -> (i32, i32, i32, i32) {
    %c0_i32 = arith.constant 0 : i32
    %c0_i32_0 = arith.constant 0 : i32
    %c0_i32_1 = arith.constant 0 : i32
    %c0_i32_2 = arith.constant 0 : i32
    return %arg0, %c0_i32, %c0_i32_0, %c0_i32_1 : i32, i32, i32, i32
  }
  func.func @transform_1(%arg0: i32) -> (i32, i32, i32) {
    %c0_i32 = arith.constant 0 : i32
    %c0_i32_0 = arith.constant 0 : i32
    %c0_i32_1 = arith.constant 0 : i32
    %c0_i32_2 = arith.constant 0 : i32
    return %c0_i32, %c0_i32_0, %c0_i32_1 : i32, i32, i32
  }
  func.func @transform_2(%arg0: i32) -> (i32, i32) {
    %c0_i32 = arith.constant 0 : i32
    %c0_i32_0 = arith.constant 0 : i32
    %c0_i32_1 = arith.constant 0 : i32
    return %c0_i32, %c0_i32_0 : i32, i32
  }
  func.func @transform_3(%arg0: i32) -> (i32, i32, i32, i32) {
    %c0_i32 = arith.constant 0 : i32
    %c0_i32_0 = arith.constant 0 : i32
    %c0_i32_1 = arith.constant 0 : i32
    %c0_i32_2 = arith.constant 0 : i32
    return %arg0, %c0_i32, %c0_i32_0, %c0_i32_1 : i32, i32, i32, i32
  }
}

module attributes {stable_mosaic.version = 11 : i64} {
  func.func @kernel(%arg0: i32, %arg1: i32, %arg2: memref<2x2048xbf16, #tpu.memory_space<vmem>>, %arg3: memref<1x2048x1024xbf16, #tpu.memory_space<vmem>>, %arg4: memref<1x1x1024xf32, #tpu.memory_space<vmem>>, %arg5: memref<1x1024x2xf32, #tpu.memory_space<vmem>>, %arg6: memref<1x2x2xf32, #tpu.memory_space<vmem>>, %arg7: memref<2x1024xf32, #tpu.memory_space<vmem>>) attributes {dimension_semantics = [#tpu.dimension_semantics<parallel>, #tpu.dimension_semantics<arbitrary>], iteration_bounds = array<i64: 1, 1>, scalar_prefetch = 0 : i64, scratch_operands = 1 : i64, tpu.core_type = #tpu.core_type<tc>, window_params = [{transform_indices = @transform_0, window_bounds = array<i64: 2, 2048>}, {transform_indices = @transform_1, window_bounds = array<i64: 1, 2048, 1024>}, {transform_indices = @transform_2, window_bounds = array<i64: 1, 1, 1024>}, {transform_indices = @transform_3, window_bounds = array<i64: 1, 1024, 2>}, {transform_indices = @transform_4, window_bounds = array<i64: 1, 2, 2>}]} {
    %c0_i32 = arith.constant 0 : i32
    %0 = arith.cmpi eq, %arg1, %c0_i32 : i32
    %1 = arith.extui %0 : i1 to i32
    %c0_i32_0 = arith.constant 0 : i32
    %2 = arith.cmpi ne, %1, %c0_i32_0 : i32
    scf.if %2 {
      %cst_11 = arith.constant 0.000000e+00 : f32
      %13 = vector.broadcast %cst_11 : f32 to vector<2x1024xf32>
      %c0_12 = arith.constant 0 : index
      %c0_13 = arith.constant 0 : index
      %14 = vector.load %arg7[%c0_12, %c0_13] : memref<2x1024xf32, #tpu.memory_space<vmem>>, vector<2x1024xf32>
      tpu.vector_store %arg7[%c0_12, %c0_13], %13 {strides = array<i32>} : memref<2x1024xf32, #tpu.memory_space<vmem>>, vector<2x1024xf32>,
    } else {
    }
    %c0 = arith.constant 0 : index
    %c0_1 = arith.constant 0 : index
    %3 = vector.load %arg7[%c0, %c0_1] : memref<2x1024xf32, #tpu.memory_space<vmem>>, vector<2x1024xf32>
    %c0_2 = arith.constant 0 : index
    %c0_3 = arith.constant 0 : index
    %4 = vector.load %arg2[%c0_2, %c0_3] : memref<2x2048xbf16, #tpu.memory_space<vmem>>, vector<2x2048xbf16>
    %c0_4 = arith.constant 0 : index
    %c0_5 = arith.constant 0 : index
    %c0_6 = arith.constant 0 : index
    %5 = vector.load %arg3[%c0_4, %c0_5, %c0_6] : memref<1x2048x1024xbf16, #tpu.memory_space<vmem>>, vector<1x2048x1024xbf16>
    %6 = vector.shape_cast %5 : vector<1x2048x1024xbf16> to vector<2048x1024xbf16>
    %cst = arith.constant dense<0.000000e+00> : vector<2x1024xf32>
    %7 = tpu.matmul %4, %6, %cst {dimension_numbers = #tpu.dot_dimension_numbers<[1], [0], [0], [1], [0, 0, 1, 1], [], []>} : vector<2x2048xbf16>, vector<2048x1024xbf16>, vector<2x1024xf32> -> vector<2x1024xf32>
    %8 = arith.addf %3, %7 : vector<2x1024xf32>
    %c0_7 = arith.constant 0 : index
    %c0_8 = arith.constant 0 : index
    %9 = vector.load %arg7[%c0_7, %c0_8] : memref<2x1024xf32, #tpu.memory_space<vmem>>, vector<2x1024xf32>
    tpu.vector_store %arg7[%c0_7, %c0_8], %8 {strides = array<i32>} : memref<2x1024xf32, #tpu.memory_space<vmem>>, vector<2x1024xf32>,
    %c0_i32_9 = arith.constant 0 : i32
    %10 = arith.cmpi eq, %arg1, %c0_i32_9 : i32
    %11 = arith.extui %10 : i1 to i32
    %c0_i32_10 = arith.constant 0 : i32
    %12 = arith.cmpi ne, %11, %c0_i32_10 : i32
    scf.if %12 {
      %c0_11 = arith.constant 0 : index
      %c0_12 = arith.constant 0 : index
      %13 = vector.load %arg7[%c0_11, %c0_12] : memref<2x1024xf32, #tpu.memory_space<vmem>>, vector<2x1024xf32>
      %c0_13 = arith.constant 0 : index
      %c0_14 = arith.constant 0 : index
      %c0_15 = arith.constant 0 : index
      %14 = vector.load %arg4[%c0_13, %c0_14, %c0_15] : memref<1x1x1024xf32, #tpu.memory_space<vmem>>, vector<1x1x1024xf32>
      %15 = vector.shape_cast %14 : vector<1x1x1024xf32> to vector<1x1024xf32>
      %16 = vector.broadcast %15 : vector<1x1024xf32> to vector<2x1024xf32>
      %17 = arith.addf %13, %16 : vector<2x1024xf32>
      %cst_16 = arith.constant 0.000000e+00 : f32
      %18 = vector.broadcast %cst_16 : f32 to vector<2x1024xf32>
      %19 = arith.maximumf %17, %18 : vector<2x1024xf32>
      %c0_17 = arith.constant 0 : index
      %c0_18 = arith.constant 0 : index
      %c0_19 = arith.constant 0 : index
      %20 = vector.load %arg5[%c0_17, %c0_18, %c0_19] : memref<1x1024x2xf32, #tpu.memory_space<vmem>>, vector<1x1024x2xf32>
      %21 = vector.shape_cast %20 : vector<1x1024x2xf32> to vector<1024x2xf32>
      %cst_20 = arith.constant dense<0.000000e+00> : vector<2x2xf32>
      %22 = tpu.matmul %19, %21, %cst_20 {dimension_numbers = #tpu.dot_dimension_numbers<[1], [0], [0], [1], [0, 0, 1, 1], [], []>} : vector<2x1024xf32>, vector<1024x2xf32>, vector<2x2xf32> -> vector<2x2xf32>
      %c0_21 = arith.constant 0 : index
      %c0_22 = arith.constant 0 : index
      %c0_23 = arith.constant 0 : index
      %23 = vector.load %arg6[%c0_21, %c0_22, %c0_23] : memref<1x2x2xf32, #tpu.memory_space<vmem>>, vector<1x2x2xf32>
      %24 = vector.shape_cast %23 : vector<1x2x2xf32> to vector<2x2xf32>
      %25 = vector.shape_cast %22 : vector<2x2xf32> to vector<1x2x2xf32>
      tpu.vector_store %arg6[%c0_21, %c0_22, %c0_23], %25 {strides = array<i32>} : memref<1x2x2xf32, #tpu.memory_space<vmem>>, vector<1x2x2xf32>,
    } else {
    }
    return
  }
  func.func @transform_0(%arg0: i32, %arg1: i32) -> (i32, i32) {
    %c0_i32 = arith.constant 0 : i32
    %c0_i32_0 = arith.constant 0 : i32
    return %c0_i32, %arg1 : i32, i32
  }
  func.func @transform_1(%arg0: i32, %arg1: i32) -> (i32, i32, i32) {
    %c0_i32 = arith.constant 0 : i32
    %c0_i32_0 = arith.constant 0 : i32
    return %arg0, %arg1, %c0_i32 : i32, i32, i32
  }
  func.func @transform_2(%arg0: i32, %arg1: i32) -> (i32, i32, i32) {
    %c0_i32 = arith.constant 0 : i32
    %c0_i32_0 = arith.constant 0 : i32
    %c0_i32_1 = arith.constant 0 : i32
    return %arg0, %c0_i32, %c0_i32_0 : i32, i32, i32
  }
  func.func @transform_3(%arg0: i32, %arg1: i32) -> (i32, i32, i32) {
    %c0_i32 = arith.constant 0 : i32
    %c0_i32_0 = arith.constant 0 : i32
    %c0_i32_1 = arith.constant 0 : i32
    return %arg0, %c0_i32, %c0_i32_0 : i32, i32, i32
  }
  func.func @transform_4(%arg0: i32, %arg1: i32) -> (i32, i32, i32) {
    %c0_i32 = arith.constant 0 : i32
    %c0_i32_0 = arith.constant 0 : i32
    %c0_i32_1 = arith.constant 0 : i32
    return %arg0, %c0_i32, %c0_i32_0 : i32, i32, i32
  }
}

</mosaic_0001>

<bundles_post_ra>
// kernel: _lambda_.3
= control target key start
LH: loop header
LB: loop body
LE: loop exit
PB: predicated region body
PF: predicated region fallthrough
CT: control target
= control target key end

     0   :  { %s1018_s12 = smov 0   ;;  %s1020_s13 = smov 0   ;;  %s1182_s0 = inlined_call_operand.vmem [shape: bf16[2,16,16,25], index: 0, kind: input, shape index: {}]   ;;  %s1183_s1 = inlined_call_operand.vmem [shape: bf16[25,64], index: 1, kind: input, shape index: {}]   ;;  %s1184_s2 = inlined_call_operand.vmem [shape: f32[1,64], index: 2, kind: input, shape index: {}]   ;;  %s1185_s3 = inlined_call_operand.vmem [shape: bf16[2,8,8,64], index: 3, kind: output, shape index: {}]  }
   0x1   :  { %s1022_s14 = smov 0  }
   0x2 LB: > { %s25_s15 = sadd.s32 1, %s991_s13  ;;  %p828_p0 = scmp.ge.s32.totalorder %s995_s14, 1  ;;  %s995_s14 = sphi %s1022_s14, %s13_s14   ;;  %s991_s13 = sphi %s1020_s13, %s1187_s13   ;;  %s987_s12 = sphi %s1018_s12, %s1186_s12  }
   0x3   : > { %p27_p1 = scmp.ge.s32.totalorder %s25_s15, 2  ;;  %p159_p2 = scmp.lt.s32.totalorder %s995_s14, 3 }
   0x5   : > { %s1189_s15 = smov (%p27_p1, %s25_s15), 0  ;;  %p160_p3 = pnand %p828_p0, %p159_p2 }
   0x6   : > { %v955_v0 = vld [vmem:[%s1183_s1] sm:$0xff] (!%p160_p3)   ;;  %vm397_vm0 = vcmask (!%p160_p3), 1043456   ;;  %v956_v1 = vld [vmem:[%s1183_s1 + $0x8] sm:$0x1f] (!%p160_p3)   ;;  %vm398_vm1 = vcmask (!%p160_p3), 1044480   ;;  %p193_p4 = scmp.lt.s32.totalorder (!%p160_p3), %s987_s12, 1 }
   0x7   : > { %163 = sbr.rel (%p160_p3) target bundleno = 284 (0x11c), region = 32  ;;  %890 = vmatprep.subr.bf16.mxu0 (!%p160_p3), %v955_v0  ;;  %926 = vmatprep.subr.bf16.mxu1 (!%p160_p3), %v955_v0  ;;  %v997_v2 = vmov (!%p160_p3), 65535   ;;  %vm348_vm2 = vcmask (!%p160_p3), 203776   ;;  %v1085_v22 = vld [vmem:[%s1184_s2] ss:$0 sm:$0xff] (!%p160_p3)  ;;  %vm597_vm3 = vcmask (!%p160_p3), 523264  }
   0x8   : > { %891 = vmatpush3.bf16.msra.mxu0 (!%p160_p3), %v955_v0  ;;  %928 = vmatpush3.bf16.msra.mxu1 (!%p160_p3), %v955_v0  ;;  %v399_v3 = vsel (!%p160_p3), %vm397_vm0, 4294967295, %v997_v2  ;;  %vm725_vm4 = vcmask (!%p160_p3), 519168  }
   0x9   : > { %v400_v4 = vsel (!%p160_p3), %vm398_vm1, %v399_v3, 0 }
   0xa   : > { %v402_v5 = vand.u32 (!%p160_p3), %v956_v1, %v400_v4 }
   0xc   : > { %892 = vmatprep.subr.bf16.mxu0 (!%p160_p3), %v402_v5  ;;  %927 = vmatprep.subr.bf16.mxu1 (!%p160_p3), %v402_v5 }
   0xd   : > { %893 = vmatpush3.bf16.msra.mxu0 (!%p160_p3), %v402_v5  ;;  %929 = vmatpush3.bf16.msra.mxu1 (!%p160_p3), %v402_v5 }
   0xe   : > { %s1191_s12 = smov (!%p193_p4, %s987_s12), 1 }
   0xf   : > { %s870_s20 = sshll.u32 %s1191_s12, 7  ;;  %s871_s26 = sshll.u32 %s1191_s12, 5 }
  0x10   : > { %s1048_s23 = scalar_lea.vmem %s1182_s0, %s870_s20  ;;  %s1127_s29 = scalar_lea.vmem %s1185_s3, %s871_s26 }
  0x11   : > { %v957_v6 = vld [vmem:[%s1048_s23] sm:$0xff]   ;;  %v959_v8 = vld [vmem:[%s1048_s23 + $0x8] sm:$0xff]   ;;  %v961_v10 = vld [vmem:[%s1048_s23 + $0x10] sm:$0xff]  }
  0x12   : > { %v958_v7 = vld [vmem:[%s1048_s23 + $0x40] sm:$0xff]   ;;  %894 = vmatprep.mubr.msk.bf16.mxu0 %vm348_vm2, %v957_v6  ;;  %v960_v9 = vld [vmem:[%s1048_s23 + $0x48] sm:$0xff]   ;;  %v962_v11 = vld [vmem:[%s1048_s23 + $0x50] sm:$0xff]  }
  0x13   : > { %910 = vmatprep.mubr.msk.bf16.mxu1 %vm348_vm2, %v958_v7  ;;  %895 = vmatmul.mubr.msk.bf16.vlgmr.msra.gmra.mrb[0].mxu0 %vm348_vm2, %v959_v8  ;;  %v963_v12 = vld [vmem:[%s1048_s23 + $0x18] sm:$0xff]   ;;  %v965_v14 = vld [vmem:[%s1048_s23 + $0x20] sm:$0xff]   ;;  %v967_v16 = vld [vmem:[%s1048_s23 + $0x28] sm:$0xff]  }
  0x14   : > { %911 = vmatmul.mubr.msk.bf16.vlgmr.msra.gmra.mrb[0].mxu1 %vm348_vm2, %v960_v9  ;;  %898 = vmatprep.mubr.msk.bf16.mxu0 %vm348_vm2, %v961_v10  ;;  %v964_v13 = vld [vmem:[%s1048_s23 + $0x58] sm:$0xff]   ;;  %v966_v15 = vld [vmem:[%s1048_s23 + $0x60] sm:$0xff]   ;;  %v968_v17 = vld [vmem:[%s1048_s23 + $0x68] sm:$0xff]  }
  0x15   : > { %914 = vmatprep.mubr.msk.bf16.mxu1 %vm348_vm2, %v962_v11  ;;  %v969_v18 = vld [vmem:[%s1048_s23 + $0x30] sm:$0xff]   ;;  %v971_v20 = vld [vmem:[%s1048_s23 + $0x38] sm:$0xff]  }
  0x16   : > { %v970_v19 = vld [vmem:[%s1048_s23 + $0x70] sm:$0xff]   ;;  %v972_v21 = vld [vmem:[%s1048_s23 + $0x78] sm:$0xff]  }
  0x1b   : > { %899 = vmatmul.mubr.msk.bf16.gmra.mrb[4].mxu0 %vm348_vm2, %v963_v12 }
  0x1c   : > { %915 = vmatmul.mubr.msk.bf16.gmra.mrb[4].mxu1 %vm348_vm2, %v964_v13  ;;  %902 = vmatprep.mubr.msk.bf16.mxu0 %vm348_vm2, %v965_v14 }
  0x1d   : > { %918 = vmatprep.mubr.msk.bf16.mxu1 %vm348_vm2, %v966_v15 }
  0x23   : > { %903 = vmatmul.mubr.msk.bf16.gmra.mrb[8].mxu0 %vm348_vm2, %v967_v16 }
  0x24   : > { %919 = vmatmul.mubr.msk.bf16.gmra.mrb[8].mxu1 %vm348_vm2, %v968_v17  ;;  %906 = vmatprep.mubr.msk.bf16.mxu0 %vm348_vm2, %v969_v18 }
  0x25   : > { %922 = vmatprep.mubr.msk.bf16.mxu1 %vm348_vm2, %v970_v19 }
  0x2b   : > { %907 = vmatmul.mubr.msk.bf16.gmra.mrb[12].mxu0 %vm348_vm2, %v971_v20 }
  0x2c   : > { %923 = vmatmul.mubr.msk.bf16.gmra.mrb[12].mxu1 %vm348_vm2, %v972_v21 }
  0xe6   : > { %v896_v23 = vpop.f32.mrb[0].mxu0 }
  0xe7   : > { %v447_v24 = vadd.f32 %v896_v23, %v1085_v22  ;;  %v912_v25 = vpop.f32.mrb[0].mxu1  ;;  %v438_v26 = vpop.f32.mrb[1].mxu0 }
  0xe8   : > { %v511_v27 = vadd.f32 %v912_v25, %v1085_v22  ;;  %v439_v28 = vadd.f32 %v1085_v22, %v438_v26  ;;  %v502_v29 = vpop.f32.mrb[1].mxu1  ;;  %v897_v30 = vpop.f32.mrb[2].mxu0 }
  0xe9   : > { %v567_v31 = vmax.f32 %v447_v24, 0.0  ;;  %v503_v32 = vadd.f32 %v1085_v22, %v502_v29  ;;  %v450_v33 = vadd.f32 %v897_v30, %v1085_v22  ;;  %v913_v34 = vpop.f32.mrb[2].mxu1  ;;  %v441_v35 = vpop.f32.mrb[3].mxu0 }
  0xea   : > { %v583_v36 = vmax.f32 %v511_v27, 0.0  ;;  %v565_v37 = vmax.f32 %v439_v28, 0.0  ;;  %v514_v38 = vadd.f32 %v913_v34, %v1085_v22  ;;  %v442_v39 = vadd.f32 %v1085_v22, %v441_v35  ;;  %v505_v40 = vpop.f32.mrb[3].mxu1 }
  0xeb   : > { %600 = vst.msk [vmem:[#allocation2 + $0x10] sm:$0xff] %vm597_vm3, %v567_v31  ;;  %v581_v41 = vmax.f32 %v503_v32, 0.0  ;;  %v568_v42 = vmax.f32 %v450_v33, 0.0  ;;  %v506_v43 = vadd.f32 %v1085_v22, %v505_v40 }
  0xec   : > { %616 = vst.msk [vmem:[#allocation2 + $0x90] sm:$0xff] %vm597_vm3, %v583_v36  ;;  %598 = vst.msk [vmem:[#allocation2] sm:$0xff] %vm597_vm3, %v565_v37  ;;  %v584_v44 = vmax.f32 %v514_v38, 0.0  ;;  %v566_v45 = vmax.f32 %v442_v39, 0.0 }
  0xed   : > { %614 = vst.msk [vmem:[#allocation2 + $0x80] sm:$0xff] %vm597_vm3, %v581_v41  ;;  %601 = vst.msk [vmem:[#allocation2 + $0x18] sm:$0xff] %vm597_vm3, %v568_v42  ;;  %v582_v46 = vmax.f32 %v506_v43, 0.0 }
  0xee   : > { %617 = vst.msk [vmem:[#allocation2 + $0x98] sm:$0xff] %vm597_vm3, %v584_v44  ;;  %599 = vst.msk [vmem:[#allocation2 + $0x8] sm:$0xff] %vm597_vm3, %v566_v45  ;;  %v900_v47 = vpop.f32.mrb[4].mxu0 }
  0xef   : > { %615 = vst.msk [vmem:[#allocation2 + $0x88] sm:$0xff] %vm597_vm3, %v582_v46  ;;  %v463_v48 = vadd.f32 %v900_v47, %v1085_v22  ;;  %v916_v49 = vpop.f32.mrb[4].mxu1  ;;  %v454_v50 = vpop.f32.mrb[5].mxu0 }
  0xf0   : > { %v527_v51 = vadd.f32 %v916_v49, %v1085_v22  ;;  %v455_v52 = vadd.f32 %v1085_v22, %v454_v50  ;;  %v518_v53 = vpop.f32.mrb[5].mxu1  ;;  %v901_v54 = vpop.f32.mrb[6].mxu0 }
  0xf1   : > { %v571_v55 = vmax.f32 %v463_v48, 0.0  ;;  %v519_v56 = vadd.f32 %v1085_v22, %v518_v53  ;;  %v466_v57 = vadd.f32 %v901_v54, %v1085_v22  ;;  %v917_v58 = vpop.f32.mrb[6].mxu1  ;;  %v457_v59 = vpop.f32.mrb[7].mxu0 }
  0xf2   : > { %v587_v60 = vmax.f32 %v527_v51, 0.0  ;;  %v569_v61 = vmax.f32 %v455_v52, 0.0  ;;  %v530_v62 = vadd.f32 %v917_v58, %v1085_v22  ;;  %v458_v63 = vadd.f32 %v1085_v22, %v457_v59  ;;  %v521_v0 = vpop.f32.mrb[7].mxu1 }
  0xf3   : > { %604 = vst.msk [vmem:[#allocation2 + $0x30] sm:$0xff] %vm597_vm3, %v571_v55  ;;  %v585_v1 = vmax.f32 %v519_v56, 0.0  ;;  %v572_v2 = vmax.f32 %v466_v57, 0.0  ;;  %v522_v3 = vadd.f32 %v1085_v22, %v521_v0 }
  0xf4   : > { %v632_v4 = vld [vmem:[#allocation2 + $0x10] ss:$2 sm:$0xff]  ;;  %v664_v5 = vld [vmem:[#allocation2 + $0x11] ss:$2 sm:$0xff]  ;;  %620 = vst.msk [vmem:[#allocation2 + $0xb0] sm:$0xff] %vm597_vm3, %v587_v60  ;;  %602 = vst.msk [vmem:[#allocation2 + $0x20] sm:$0xff] %vm597_vm3, %v569_v61 }
  0xf5   : > { %v588_v6 = vmax.f32 %v530_v62, 0.0  ;;  %v570_v7 = vmax.f32 %v458_v63, 0.0  ;;  %v694_v8 = vmax.f32 %v632_v4, %v664_v5  ;;  %v648_v9 = vld [vmem:[#allocation2 + $0x90] ss:$2 sm:$0xff]  ;;  %v680_v10 = vld [vmem:[#allocation2 + $0x91] ss:$2 sm:$0xff] }
  0xf6   : > { %v630_v11 = vld [vmem:[#allocation2] ss:$2 sm:$0xff]  ;;  %618 = vst.msk [vmem:[#allocation2 + $0xa0] sm:$0xff] %vm597_vm3, %v585_v1  ;;  %605 = vst.msk [vmem:[#allocation2 + $0x38] sm:$0xff] %vm597_vm3, %v572_v2  ;;  %v702_v12 = vmax.f32 %v648_v9, %v680_v10  ;;  %v662_v13 = vld [vmem:[#allocation2 + $0x1] ss:$2 sm:$0xff] }
  0xf7   : > { %v646_v14 = vld [vmem:[#allocation2 + $0x80] ss:$2 sm:$0xff]  ;;  %v678_v15 = vld [vmem:[#allocation2 + $0x81] ss:$2 sm:$0xff]  ;;  %621 = vst.msk [vmem:[#allocation2 + $0xb8] sm:$0xff] %vm597_vm3, %v588_v6  ;;  %603 = vst.msk [vmem:[#allocation2 + $0x28] sm:$0xff] %vm597_vm3, %v570_v7  ;;  %v693_v16 = vmax.f32 %v630_v11, %v662_v13 }
  0xf8   : > { %v701_v17 = vmax.f32 %v646_v14, %v678_v15  ;;  %v586_v18 = vmax.f32 %v522_v3, 0.0  ;;  %v904_v19 = vpop.f32.mrb[8].mxu0  ;;  %v920_v20 = vpop.f32.mrb[8].mxu1 }
  0xf9   : > { %v479_v21 = vadd.f32 %v904_v19, %v1085_v22  ;;  %v543_v23 = vadd.f32 %v920_v20, %v1085_v22  ;;  %v470_v24 = vpop.f32.mrb[9].mxu0  ;;  %v534_v25 = vpop.f32.mrb[9].mxu1  ;;  %v709_v26 = vmax.f32 %v693_v16, %v694_v8 }
  0xfa   : > { %v713_v27 = vmax.f32 %v701_v17, %v702_v12  ;;  %619 = vst.msk [vmem:[#allocation2 + $0xa8] sm:$0xff] %vm597_vm3, %v586_v18  ;;  %v471_v28 = vadd.f32 %v1085_v22, %v470_v24  ;;  %v535_v29 = vadd.f32 %v1085_v22, %v534_v25  ;;  %v905_v30 = vpop.f32.mrb[10].mxu0  ;;  %v921_v31 = vpop.f32.mrb[10].mxu1 }
  0xfb   : > { %v575_v32 = vmax.f32 %v479_v21, 0.0  ;;  %v591_v33 = vmax.f32 %v543_v23, 0.0  ;;  %v482_v34 = vadd.f32 %v905_v30, %v1085_v22  ;;  %v546_v35 = vadd.f32 %v921_v31, %v1085_v22  ;;  %v473_v36 = vpop.f32.mrb[11].mxu0  ;;  %v537_v37 = vpop.f32.mrb[11].mxu1 }
  0xfc   : > { %v717_v38 = vpack.c.bf16 %v709_v26, %v709_v26  ;;  %v721_v39 = vpack.c.bf16 %v713_v27, %v713_v27  ;;  %v573_v40 = vmax.f32 %v471_v28, 0.0  ;;  %v589_v41 = vmax.f32 %v535_v29, 0.0 }
  0xfd   : > { %v636_v42 = vld [vmem:[#allocation2 + $0x30] ss:$2 sm:$0xff]  ;;  %v668_v43 = vld [vmem:[#allocation2 + $0x31] ss:$2 sm:$0xff]  ;;  %608 = vst.msk [vmem:[#allocation2 + $0x50] sm:$0xff] %vm597_vm3, %v575_v32  ;;  %624 = vst.msk [vmem:[#allocation2 + $0xd0] sm:$0xff] %vm597_vm3, %v591_v33  ;;  %v474_v46 = vadd.f32 %v1085_v22, %v473_v36  ;;  %v538_v47 = vadd.f32 %v1085_v22, %v537_v37 }
  0xfe   : > { %v576_v44 = vmax.f32 %v482_v34, 0.0  ;;  %v592_v45 = vmax.f32 %v546_v35, 0.0  ;;  %726 = vst.msk [vmem:[%s1127_s29] sm:$0xf] %vm725_vm4, %v717_v38  ;;  %730 = vst.msk [vmem:[%s1127_s29 + $0x10] sm:$0xf] %vm725_vm4, %v721_v39  ;;  %v696_v48 = vmax.f32 %v636_v42, %v668_v43 }
  0xff   : > { %v652_v49 = vld [vmem:[#allocation2 + $0xb0] ss:$2 sm:$0xff]  ;;  %v684_v50 = vld [vmem:[#allocation2 + $0xb1] ss:$2 sm:$0xff]  ;;  %v634_v51 = vld [vmem:[#allocation2 + $0x20] ss:$2 sm:$0xff] }
 0x100   : > { %606 = vst.msk [vmem:[#allocation2 + $0x40] sm:$0xff] %vm597_vm3, %v573_v40  ;;  %622 = vst.msk [vmem:[#allocation2 + $0xc0] sm:$0xff] %vm597_vm3, %v589_v41  ;;  %v666_v52 = vld [vmem:[#allocation2 + $0x21] ss:$2 sm:$0xff]  ;;  %v574_v53 = vmax.f32 %v474_v46, 0.0  ;;  %v590_v54 = vmax.f32 %v538_v47, 0.0  ;;  %v704_v56 = vmax.f32 %v652_v49, %v684_v50 }
 0x101   : > { %609 = vst.msk [vmem:[#allocation2 + $0x58] sm:$0xff] %vm597_vm3, %v576_v44  ;;  %625 = vst.msk [vmem:[#allocation2 + $0xd8] sm:$0xff] %vm597_vm3, %v592_v45  ;;  %v908_v55 = vpop.f32.mrb[12].mxu0  ;;  %v695_v57 = vmax.f32 %v634_v51, %v666_v52  ;;  %v924_v59 = vpop.f32.mrb[12].mxu1  ;;  %v650_v61 = vld [vmem:[#allocation2 + $0xa0] ss:$2 sm:$0xff] }
 0x102   : > { %v495_v58 = vadd.f32 %v908_v55, %v1085_v22  ;;  %v486_v60 = vpop.f32.mrb[13].mxu0  ;;  %v682_v62 = vld [vmem:[#allocation2 + $0xa1] ss:$2 sm:$0xff]  ;;  %607 = vst.msk [vmem:[#allocation2 + $0x48] sm:$0xff] %vm597_vm3, %v574_v53  ;;  %623 = vst.msk [vmem:[#allocation2 + $0xc8] sm:$0xff] %vm597_vm3, %v590_v54  ;;  %v559_v63 = vadd.f32 %v924_v59, %v1085_v22  ;;  %v550_v1 = vpop.f32.mrb[13].mxu1 }
 0x103   : > { %v487_v0 = vadd.f32 %v1085_v22, %v486_v60  ;;  %v909_v2 = vpop.f32.mrb[14].mxu0  ;;  %v710_v3 = vmax.f32 %v695_v57, %v696_v48  ;;  %v703_v4 = vmax.f32 %v650_v61, %v682_v62  ;;  %v551_v6 = vadd.f32 %v1085_v22, %v550_v1  ;;  %v925_v7 = vpop.f32.mrb[14].mxu1 }
 0x104   : > { %v579_v5 = vmax.f32 %v495_v58, 0.0  ;;  %v489_v8 = vpop.f32.mrb[15].mxu0  ;;  %v595_v9 = vmax.f32 %v559_v63, 0.0  ;;  %v498_v11 = vadd.f32 %v909_v2, %v1085_v22  ;;  %v562_v12 = vadd.f32 %v925_v7, %v1085_v22  ;;  %v553_v13 = vpop.f32.mrb[15].mxu1 }
 0x105   : > { %v577_v10 = vmax.f32 %v487_v0, 0.0  ;;  %v718_v14 = vpack.c.bf16 %v710_v3, %v710_v3  ;;  %v714_v15 = vmax.f32 %v703_v4, %v704_v56  ;;  %v593_v16 = vmax.f32 %v551_v6, 0.0 }
 0x106   : > { %612 = vst.msk [vmem:[#allocation2 + $0x70] sm:$0xff] %vm597_vm3, %v579_v5  ;;  %v490_v17 = vadd.f32 %v1085_v22, %v489_v8  ;;  %628 = vst.msk [vmem:[#allocation2 + $0xf0] sm:$0xff] %vm597_vm3, %v595_v9  ;;  %v580_v18 = vmax.f32 %v498_v11, 0.0  ;;  %v596_v19 = vmax.f32 %v562_v12, 0.0  ;;  %v554_v20 = vadd.f32 %v1085_v22, %v553_v13 }
 0x107   : > { %610 = vst.msk [vmem:[#allocation2 + $0x60] sm:$0xff] %vm597_vm3, %v577_v10  ;;  %v722_v21 = vpack.c.bf16 %v714_v15, %v714_v15  ;;  %626 = vst.msk [vmem:[#allocation2 + $0xe0] sm:$0xff] %vm597_vm3, %v593_v16 }
 0x108   : > { %727 = vst.msk [vmem:[%s1127_s29 + $0x4] sm:$0xf] %vm725_vm4, %v718_v14  ;;  %v640_v23 = vld [vmem:[#allocation2 + $0x50] ss:$2 sm:$0xff]  ;;  %v672_v24 = vld [vmem:[#allocation2 + $0x51] ss:$2 sm:$0xff] }
 0x109   : > { %v656_v25 = vld [vmem:[#allocation2 + $0xd0] ss:$2 sm:$0xff]  ;;  %v698_v26 = vmax.f32 %v640_v23, %v672_v24  ;;  %v688_v27 = vld [vmem:[#allocation2 + $0xd1] ss:$2 sm:$0xff]  ;;  %613 = vst.msk [vmem:[#allocation2 + $0x78] sm:$0xff] %vm597_vm3, %v580_v18  ;;  %629 = vst.msk [vmem:[#allocation2 + $0xf8] sm:$0xff] %vm597_vm3, %v596_v19 }
 0x10a   : > { %v578_v28 = vmax.f32 %v490_v17, 0.0  ;;  %v594_v29 = vmax.f32 %v554_v20, 0.0  ;;  %731 = vst.msk [vmem:[%s1127_s29 + $0x14] sm:$0xf] %vm725_vm4, %v722_v21  ;;  %v706_v30 = vmax.f32 %v656_v25, %v688_v27  ;;  %v638_v22 = vld [vmem:[#allocation2 + $0x40] ss:$2 sm:$0xff] }
 0x10b   : > { %v670_v31 = vld [vmem:[#allocation2 + $0x41] ss:$2 sm:$0xff]  ;;  %v654_v32 = vld [vmem:[#allocation2 + $0xc0] ss:$2 sm:$0xff] }
 0x10c   : > { %v697_v33 = vmax.f32 %v638_v22, %v670_v31  ;;  %v686_v34 = vld [vmem:[#allocation2 + $0xc1] ss:$2 sm:$0xff]  ;;  %611 = vst.msk [vmem:[#allocation2 + $0x68] sm:$0xff] %vm597_vm3, %v578_v28  ;;  %627 = vst.msk [vmem:[#allocation2 + $0xe8] sm:$0xff] %vm597_vm3, %v594_v29 }
 0x10d   : > { %v705_v35 = vmax.f32 %v654_v32, %v686_v34 }
 0x10e   : > { %v711_v36 = vmax.f32 %v697_v33, %v698_v26 }
 0x10f   : > { %v715_v37 = vmax.f32 %v705_v35, %v706_v30 }
 0x110   : > { %v719_v38 = vpack.c.bf16 %v711_v36, %v711_v36  ;;  %v644_v40 = vld [vmem:[#allocation2 + $0x70] ss:$2 sm:$0xff]  ;;  %v676_v41 = vld [vmem:[#allocation2 + $0x71] ss:$2 sm:$0xff] }
 0x111   : > { %v723_v39 = vpack.c.bf16 %v715_v37, %v715_v37  ;;  %v660_v42 = vld [vmem:[#allocation2 + $0xf0] ss:$2 sm:$0xff]  ;;  %v700_v43 = vmax.f32 %v644_v40, %v676_v41  ;;  %v692_v44 = vld [vmem:[#allocation2 + $0xf1] ss:$2 sm:$0xff] }
 0x112   : > { %728 = vst.msk [vmem:[%s1127_s29 + $0x8] sm:$0xf] %vm725_vm4, %v719_v38  ;;  %v708_v45 = vmax.f32 %v660_v42, %v692_v44 }
 0x113   : > { %732 = vst.msk [vmem:[%s1127_s29 + $0x18] sm:$0xf] %vm725_vm4, %v723_v39  ;;  %v642_v46 = vld [vmem:[#allocation2 + $0x60] ss:$2 sm:$0xff]  ;;  %v674_v47 = vld [vmem:[#allocation2 + $0x61] ss:$2 sm:$0xff] }
 0x114   : > { %v658_v48 = vld [vmem:[#allocation2 + $0xe0] ss:$2 sm:$0xff]  ;;  %v699_v49 = vmax.f32 %v642_v46, %v674_v47  ;;  %v690_v50 = vld [vmem:[#allocation2 + $0xe1] ss:$2 sm:$0xff] }
 0x115   : > { %v707_v51 = vmax.f32 %v658_v48, %v690_v50 }
 0x116   : > { %v712_v52 = vmax.f32 %v699_v49, %v700_v43 }
 0x117   : > { %v716_v53 = vmax.f32 %v707_v51, %v708_v45 }
 0x118   : > { %v720_v54 = vpack.c.bf16 %v712_v52, %v712_v52 }
 0x119   : > { %v724_v55 = vpack.c.bf16 %v716_v53, %v716_v53 }
 0x11a   : > { %729 = vst.msk [vmem:[%s1127_s29 + $0xc] sm:$0xf] %vm725_vm4, %v720_v54 }
 0x11b   : > { %733 = vst.msk [vmem:[%s1127_s29 + $0x1c] sm:$0xf] %vm725_vm4, %v724_v55 }
 0x11c PF: > { %s13_s14 = sadd.s32 1, %s995_s14   ;;  %s1186_s12 = smov %s991_s13 }
 0x11d   : > { %p10_p5 = scmp.ge.s32.totalorder %s13_s14, 4   ;;  %s1187_s13 = smov %s1189_s15 }
 0x11f   :  { %12 = sbr.rel (!%p10_p5) target bundleno = 2 (0x2), region = 93 }

// kernel: _lambda_.4
= control target key start
LH: loop header
LB: loop body
LE: loop exit
PB: predicated region body
PF: predicated region fallthrough
CT: control target
= control target key end

     0   :  { %s8021_s12 = smov 0   ;;  %s9217_s0 = inlined_call_operand.vmem [shape: bf16[2,12,12,64], index: 0, kind: input, shape index: {}]   ;;  %s9218_s1 = inlined_call_operand.vmem [shape: bf16[25,64,128], index: 1, kind: input, shape index: {}]   ;;  %s9219_s2 = inlined_call_operand.vmem [shape: f32[1,128], index: 2, kind: input, shape index: {}]   ;;  %s9220_s3 = inlined_call_operand.vmem [shape: bf16[2,4,4,128], index: 3, kind: output, shape index: {}]  }
   0x1 LB: > { %s6143_s13 = sadd.s32 4294967295, %s7999_s12   ;;  %p6147_p0 = scmp.ge.s32.totalorder %s7999_s12, 1  ;;  %s7999_s12 = sphi %s8021_s12, %s13_s12  }
   0x2   : > { %p137_p1 = scmp.lt.s32.totalorder %s7999_s12, 3 }
   0x4   : > { %p138_p2 = pnand %p6147_p0, %p137_p1 }
   0x5   : > { %v7873_v0 = vld [vmem:[%s9218_s1] sm:$0xff] (!%p138_p2)   ;;  %p161_p3 = scmp.lt.s32.totalorder (!%p138_p2), %s6143_s13, 1  ;;  %v7875_v2 = vld [vmem:[%s9218_s1 + $0x8] sm:$0xff] (!%p138_p2)   ;;  %v7877_v4 = vld [vmem:[%s9218_s1 + $0x10] sm:$0xff] (!%p138_p2)   ;;  %vm660_vm0 = vcmask (!%p138_p2), 1042432   ;;  %vm661_vm1 = vcmask (!%p138_p2), 1046532  }
   0x6   : > { %141 = sbr.rel (%p138_p2) target bundleno = 559 (0x22f), region = 32  ;;  %v7874_v1 = vld [vmem:[%s9218_s1 + $0x180] sm:$0xff] (!%p138_p2)   ;;  %7215 = vmatprep.subr.bf16.mxu1 (!%p138_p2), %v7873_v0  ;;  %v7876_v3 = vld [vmem:[%s9218_s1 + $0x188] sm:$0xff] (!%p138_p2)   ;;  %v7878_v5 = vld [vmem:[%s9218_s1 + $0x190] sm:$0xff] (!%p138_p2)   ;;  %vm249_vm2 = vcmask (!%p138_p2), 523264   ;;  %vm1182_vm10 = vcmask (!%p138_p2), 1041408  }
   0x7   : > { %7407 = vmatprep.subr.bf16.mxu0 (!%p138_p2), %v7874_v1  ;;  %7216 = vmatpush3.bf16.msra.mxu1 (!%p138_p2), %v7873_v0  ;;  %v7879_v6 = vld [vmem:[%s9218_s1 + $0x18] sm:$0xff] (!%p138_p2)   ;;  %vm8062_vm3 = vmor (!%p138_p2), %vm660_vm0, %vm661_vm1  ;;  %v7883_v21 = vld [vmem:[%s9218_s1 + $0x20] sm:$0xff] (!%p138_p2)   ;;  %vm367_vm4 = vsmask.f32 (!%p138_p2), 3328  ;;  %vm368_vm5 = vsmask.f32 (!%p138_p2), 7440 }
   0x8   : > { %7408 = vmatpush3.bf16.msra.mxu0 (!%p138_p2), %v7874_v1  ;;  %7217 = vmatprep.subr.bf16.mxu1 (!%p138_p2), %v7875_v2  ;;  %v7880_v7 = vld [vmem:[%s9218_s1 + $0x198] sm:$0xff] (!%p138_p2)   ;;  %v7884_v32 = vld [vmem:[%s9218_s1 + $0x1a0] sm:$0xff] (!%p138_p2)   ;;  %v7885_v34 = vld [vmem:[%s9218_s1 + $0x28] sm:$0xff] (!%p138_p2)   ;;  %vm857_vm6 = vsmask.f32 (!%p138_p2), 2304  ;;  %vm1183_vm11 = vcmask (!%p138_p2), 1045508  }
   0x9   : > { %7409 = vmatprep.subr.bf16.mxu0 (!%p138_p2), %v7876_v3  ;;  %v7886_v36 = vld [vmem:[%s9218_s1 + $0x1a8] sm:$0xff] (!%p138_p2)   ;;  %v7889_v49 = vld [vmem:[%s9218_s1 + $0x30] sm:$0xff] (!%p138_p2)   ;;  %v7891_v62 = vld [vmem:[%s9218_s1 + $0x38] sm:$0xff] (!%p138_p2)   ;;  %vm858_vm7 = vsmask.f32 (!%p138_p2), 6416 }
   0xa   : > { %v7890_v60 = vld [vmem:[%s9218_s1 + $0x1b0] sm:$0xff] (!%p138_p2)   ;;  %v7892_v0 = vld [vmem:[%s9218_s1 + $0x1b8] sm:$0xff] (!%p138_p2)   ;;  %vm8147_vm8 = vmor (!%p138_p2), %vm367_vm4, %vm368_vm5 }
   0xb   : > { %7218 = vmatpush3.bf16.msra.mxu1 (!%p138_p2), %v7875_v2  ;;  %vm8167_vm9 = vmor (!%p138_p2), %vm857_vm6, %vm858_vm7 }
   0xc   : > { %7410 = vmatpush3.bf16.msra.mxu0 (!%p138_p2), %v7876_v3  ;;  %7219 = vmatprep.subr.bf16.mxu1 (!%p138_p2), %v7877_v4  ;;  %vm8268_vm12 = vmor (!%p138_p2), %vm1182_vm10, %vm1183_vm11 }
   0xd   : > { %s9230_s13 = smov (!%p161_p3, %s6143_s13), 1  ;;  %7411 = vmatprep.subr.bf16.mxu0 %v7878_v5 }
   0xe   : > { %s7863_s24 = smul.u32 96, %s9230_s13  ;;  %s7014_s26 = sshll.u32 %s9230_s13, 3 }
   0xf   : > { %7220 = vmatpush3.bf16.msra.mxu1 %v7877_v4  ;;  %s170_s29 = scalar_lea.vmem %s9220_s3, %s7014_s26 }
  0x10   : > { %s8056_s4 = scalar_lea.vmem %s9217_s0, %s7863_s24  ;;  %7412 = vmatpush3.bf16.msra.mxu0 %v7878_v5  ;;  %7221 = vmatprep.subr.bf16.mxu1 %v7879_v6 }
  0x11   : > { %v7881_v8 = vld [vmem:[%s8056_s4] ss:$8 sps:$4 sm:$0xff]   ;;  %v6511_v10 = vld [vmem:[%s8056_s4 + $0x10] sm:$0xe]  ;;  %v6512_v11 = vld [vmem:[%s8056_s4 + $0x14] sm:$0x1]  ;;  %7413 = vmatprep.subr.bf16.mxu0 %v7880_v7 }
  0x12   : > { %7223 = vmatprep.mubr.msk.bf16.mxu1 %vm249_vm2, %v7881_v8  ;;  %v6513_v12 = vld [vmem:[%s8056_s4 + $0x18] sm:$0xe]  ;;  %v6514_v13 = vld [vmem:[%s8056_s4 + $0x1c] sm:$0x1]  ;;  %v6527_v14 = vrot.slane %v6511_v10, 9  ;;  %v2997_v15 = vrot.slane %v6512_v11, 5 }
  0x13   : > { %v6528_v16 = vrot.slane %v6513_v12, 9  ;;  %v3001_v17 = vrot.slane %v6514_v13, 5  ;;  %v7882_v19 = vld [vmem:[%s8056_s4 + $0x10] ss:$8 sps:$4 sm:$0xff]   ;;  %v6515_v22 = vld [vmem:[%s8056_s4 + $0x20] sm:$0xe]  ;;  %7222 = vmatpush3.bf16.msra.mxu1 %v7879_v6 }
  0x14   : > { %v2998_v18 = vsel %vm8062_vm3, %v6527_v14, %v2997_v15  ;;  %v6516_v23 = vld [vmem:[%s8056_s4 + $0x24] sm:$0x1]  ;;  %v6517_v25 = vld [vmem:[%s8056_s4 + $0x28] sm:$0xe]  ;;  %v6518_v26 = vld [vmem:[%s8056_s4 + $0x2c] sm:$0x1]  ;;  %7414 = vmatpush3.bf16.msra.mxu0 %v7880_v7  ;;  %7231 = vmatprep.subr.bf16.mxu1 %v7883_v21 }
  0x15   : > { %v3002_v20 = vsel %vm8062_vm3, %v6528_v16, %v3001_v17  ;;  %v6529_v27 = vrot.slane %v6515_v22, 9  ;;  %v3005_v28 = vrot.slane %v6516_v23, 5  ;;  %v6530_v29 = vrot.slane %v6517_v25, 9  ;;  %7423 = vmatprep.subr.bf16.mxu0 %v7884_v32  ;;  %v7887_v37 = vld [vmem:[%s8056_s4 + $0x20] ss:$8 sps:$4 sm:$0xff]  }
  0x16   : > { %v6543_v24 = vcombine.low %v2998_v18, %v3002_v20  ;;  %v3009_v30 = vrot.slane %v6518_v26, 5  ;;  %7224 = vmatmul.mubr.msk.bf16.vlgmr.msra.gmra.mrb[0].mxu1 %vm249_vm2, %v7882_v19  ;;  %v6519_v38 = vld [vmem:[%s8056_s4 + $0x30] sm:$0xe]  ;;  %v6520_v39 = vld [vmem:[%s8056_s4 + $0x34] sm:$0x1]  ;;  %v8143_v25 = vld [vmem:[%s9218_s1 + $0x40] sm:$0xff]  }
  0x17   : > { %v3006_v31 = vsel %vm8062_vm3, %v6529_v27, %v3005_v28  ;;  %7232 = vmatpush3.bf16.msra.mxu1 %v7883_v21  ;;  %v6521_v40 = vld [vmem:[%s8056_s4 + $0x38] sm:$0xe]  ;;  %v6522_v41 = vld [vmem:[%s8056_s4 + $0x3c] sm:$0x1]  ;;  %v6531_v42 = vrot.slane %v6519_v38, 9  ;;  %v3013_v43 = vrot.slane %v6520_v39, 5  ;;  %7227 = vmatprep.mubr.msk.bf16.mxu1 %vm249_vm2, %v7887_v37 }
  0x18   : > { %7415 = vmatprep.mubr.msk.bf16.mxu0 %vm249_vm2, %v6543_v24  ;;  %v3010_v33 = vsel %vm8062_vm3, %v6530_v29, %v3009_v30  ;;  %7233 = vmatprep.subr.bf16.mxu1 %v7885_v34  ;;  %v6532_v44 = vrot.slane %v6521_v40, 9  ;;  %v3017_v45 = vrot.slane %v6522_v41, 5  ;;  %v7888_v47 = vld [vmem:[%s8056_s4 + $0x30] ss:$8 sps:$4 sm:$0xff]   ;;  %v6523_v50 = vld [vmem:[%s8056_s4 + $0x40] sm:$0xe] }
  0x19   : > { %v6544_v35 = vcombine.low %v3006_v31, %v3010_v33  ;;  %v3014_v46 = vsel %vm8062_vm3, %v6531_v42, %v3013_v43  ;;  %v6524_v51 = vld [vmem:[%s8056_s4 + $0x44] sm:$0x1]  ;;  %v6525_v53 = vld [vmem:[%s8056_s4 + $0x48] sm:$0xe]  ;;  %v6526_v54 = vld [vmem:[%s8056_s4 + $0x4c] sm:$0x1] }
  0x1a   : > { %v3018_v48 = vsel %vm8062_vm3, %v6532_v44, %v3017_v45  ;;  %v6533_v55 = vrot.slane %v6523_v50, 9  ;;  %v3021_v56 = vrot.slane %v6524_v51, 5  ;;  %v6534_v57 = vrot.slane %v6525_v53, 9  ;;  %v343_v1 = vld [vmem:[%s8056_s4] sm:$0xf] }
  0x1b   : > { %7416 = vmatmul.mubr.msk.bf16.vlgmr.msra.gmra.mrb[0].mxu0 %vm249_vm2, %v6544_v35  ;;  %7234 = vmatpush3.bf16.msra.mxu1 %v7885_v34  ;;  %v6545_v52 = vcombine.low %v3014_v46, %v3018_v48  ;;  %v3025_v58 = vrot.slane %v6526_v54, 5  ;;  %v344_v2 = vld [vmem:[%s8056_s4 + $0x4] sm:$0x1]  ;;  %v345_v3 = vld [vmem:[%s8056_s4 + $0x8] sm:$0xf]  ;;  %v371_v5 = vshrl.u32 %v343_v1, 16 }
  0x1c   : > { %7424 = vmatpush3.bf16.msra.mxu0 %v7884_v32  ;;  %7235 = vmatprep.subr.bf16.mxu1 %v7889_v49  ;;  %v3022_v59 = vsel %vm8062_vm3, %v6533_v55, %v3021_v56  ;;  %v346_v4 = vld [vmem:[%s8056_s4 + $0xc] sm:$0x1]  ;;  %v374_v6 = vshll.u32 %v343_v1, 16  ;;  %v380_v7 = vshll.u32 %v344_v2, 16  ;;  %v385_v8 = vshrl.u32 %v345_v3, 16  ;;  %v8155_v32 = vld [vmem:[%s9218_s1 + $0x1c0] sm:$0xff]  }
  0x1d   : > { %7425 = vmatprep.subr.bf16.mxu0 %v7886_v36  ;;  %7419 = vmatprep.mubr.msk.bf16.mxu0 %vm249_vm2, %v6545_v52  ;;  %v3026_v61 = vsel %vm8062_vm3, %v6534_v57, %v3025_v58  ;;  %v6555_v10 = vld [vmem:[%s8056_s4 + $0x10] sm:$0xe]  ;;  %v388_v11 = vshll.u32 %v345_v3, 16  ;;  %v394_v12 = vshll.u32 %v346_v4, 16  ;;  %v373_v13 = vrot.slane %v371_v5, 4 }
  0x1e   : > { %7228 = vmatmul.mubr.msk.bf16.gmra.mrb[4].mxu1 %vm249_vm2, %v7888_v47  ;;  %v6546_v63 = vcombine.low %v3022_v59, %v3026_v61  ;;  %v376_v14 = vrot.slane %v374_v6, 5  ;;  %v387_v15 = vrot.slane %v385_v8, 4  ;;  %v6556_v16 = vld [vmem:[%s8056_s4 + $0x14] sm:$0x3]  ;;  %v382_v17 = vrot.slane %v380_v7, 5 }
  0x1f   : > { %7236 = vmatpush3.bf16.msra.mxu1 %v7889_v49  ;;  %v390_v18 = vrot.slane %v388_v11, 5  ;;  %v396_v19 = vrot.slane %v394_v12, 5  ;;  %v6557_v20 = vld [vmem:[%s8056_s4 + $0x18] sm:$0xe]  ;;  %v3190_v22 = vshrl.u32 %v6555_v10, 16  ;;  %v3193_v23 = vshll.u32 %v6555_v10, 16 }
  0x20   : > { %7426 = vmatpush3.bf16.msra.mxu0 %v7886_v36  ;;  %7237 = vmatprep.subr.bf16.mxu1 %v7891_v62  ;;  %v377_v21 = vor.u32 %v376_v14, %v373_v13  ;;  %v3199_v24 = vshrl.u32 %v6556_v16, 16  ;;  %v6558_v28 = vld [vmem:[%s8056_s4 + $0x1c] sm:$0x3]  ;;  %v3202_v29 = vshll.u32 %v6556_v16, 16  ;;  %v3208_v30 = vshrl.u32 %v6557_v20, 16 }
  0x21   : > { %7427 = vmatprep.subr.bf16.mxu0 %v7890_v60  ;;  %v391_v27 = vor.u32 %v390_v18, %v387_v15  ;;  %v3211_v31 = vshll.u32 %v6557_v20, 16  ;;  %v3192_v34 = vrot.slane %v3190_v22, 5  ;;  %v3195_v35 = vrot.slane %v3193_v23, 6  ;;  %v347_v37 = vld [vmem:[%s8056_s4 + $0x10] sm:$0xf] }
  0x22   : > { %v378_v33 = vrot.slane %v377_v21, 4  ;;  %v3201_v36 = vrot.slane %v3199_v24, 5  ;;  %v3204_v39 = vrot.slane %v3202_v29, 6  ;;  %v3210_v40 = vrot.slane %v3208_v30, 5  ;;  %v348_v42 = vld [vmem:[%s8056_s4 + $0x14] sm:$0x1] }
  0x23   : > { %7420 = vmatmul.mubr.msk.bf16.gmra.mrb[4].mxu0 %vm249_vm2, %v6546_v63  ;;  %7238 = vmatpush3.bf16.msra.mxu1 %v7891_v62  ;;  %v392_v38 = vrot.slane %v391_v27, 4  ;;  %v3213_v41 = vrot.slane %v3211_v31, 6  ;;  %v3196_v44 = vor.u32 %v3195_v35, %v3192_v34  ;;  %v3217_v45 = vshrl.u32 %v6558_v28, 16  ;;  %v349_v51 = vld [vmem:[%s8056_s4 + $0x18] sm:$0xf] }
  0x24   : > { %7428 = vmatpush3.bf16.msra.mxu0 %v7890_v60  ;;  %7247 = vmatprep.subr.bf16.mxu1 %v8143_v25  ;;  %v383_v43 = vsel %vm8147_vm8, %v378_v33, %v382_v17  ;;  %v3220_v46 = vshll.u32 %v6558_v28, 16  ;;  %v3205_v49 = vor.u32 %v3204_v39, %v3201_v36  ;;  %v350_v52 = vld [vmem:[%s8056_s4 + $0x1c] sm:$0x1]  ;;  %v399_v53 = vshrl.u32 %v347_v37, 16  ;;  %v6559_v58 = vld [vmem:[%s8056_s4 + $0x20] sm:$0xe] }
  0x25   : > { %7429 = vmatprep.subr.bf16.mxu0 %v7892_v0  ;;  %v397_v47 = vsel %vm8147_vm8, %v392_v38, %v396_v19  ;;  %v3214_v50 = vor.u32 %v3213_v41, %v3210_v40  ;;  %v3197_v55 = vrot.slane %v3196_v44, 4  ;;  %v3219_v56 = vrot.slane %v3217_v45, 5  ;;  %v6560_v63 = vld [vmem:[%s8056_s4 + $0x24] sm:$0x3]  ;;  %v6561_v4 = vld [vmem:[%s8056_s4 + $0x28] sm:$0xe] }
  0x26   : > { %v6171_v54 = vcombine.low %v383_v43, %v397_v47  ;;  %v3222_v57 = vrot.slane %v3220_v46, 6  ;;  %v401_v60 = vrot.slane %v399_v53, 4  ;;  %v402_v61 = vshll.u32 %v347_v37, 16  ;;  %v6562_v5 = vld [vmem:[%s8056_s4 + $0x2c] sm:$0x3] }
  0x27   : > { %v3215_v59 = vrot.slane %v3214_v50, 4  ;;  %v408_v62 = vshll.u32 %v348_v42, 16  ;;  %v413_v2 = vshrl.u32 %v349_v51, 16  ;;  %v416_v3 = vshll.u32 %v349_v51, 16  ;;  %v351_v29 = vld [vmem:[%s8056_s4 + $0x20] sm:$0xf] }
  0x28   : > { %7430 = vmatpush3.bf16.msra.mxu0 %v7892_v0  ;;  %7239 = vmatprep.mubr.msk.bf16.mxu1 %vm249_vm2, %v6171_v54  ;;  %v3206_v0 = vsel %vm8167_vm9, %v3197_v55, %v3205_v49  ;;  %v3223_v1 = vor.u32 %v3222_v57, %v3219_v56  ;;  %v404_v6 = vrot.slane %v402_v61, 5  ;;  %v422_v8 = vshll.u32 %v350_v52, 16  ;;  %v352_v35 = vld [vmem:[%s8056_s4 + $0x24] sm:$0x1]  ;;  %v353_v40 = vld [vmem:[%s8056_s4 + $0x28] sm:$0xf] }
  0x29   : > { %7439 = vmatprep.subr.bf16.mxu0 %v8155_v32  ;;  %v410_v7 = vrot.slane %v408_v62, 5  ;;  %v3226_v10 = vshrl.u32 %v6559_v58, 16  ;;  %v415_v12 = vrot.slane %v413_v2, 4  ;;  %v418_v13 = vrot.slane %v416_v3, 5  ;;  %v7895_v47 = vld [vmem:[%s9218_s1 + $0x48] sm:$0xff]  }
  0x2a   : > { %v3224_v11 = vsel %vm8167_vm9, %v3215_v59, %v3223_v1  ;;  %v3229_v14 = vshll.u32 %v6559_v58, 16  ;;  %v405_v16 = vor.u32 %v404_v6, %v401_v60  ;;  %v424_v17 = vrot.slane %v422_v8, 5  ;;  %v354_v49 = vld [vmem:[%s8056_s4 + $0x2c] sm:$0x1]  ;;  %v6563_v56 = vld [vmem:[%s8056_s4 + $0x30] sm:$0xe] }
  0x2b   : > { %v6579_v15 = vcombine.low %v3206_v0, %v3224_v11  ;;  %v3228_v18 = vrot.slane %v3226_v10, 5  ;;  %v419_v19 = vor.u32 %v418_v13, %v415_v12  ;;  %v3235_v21 = vshrl.u32 %v6560_v63, 16  ;;  %v6564_v61 = vld [vmem:[%s8056_s4 + $0x34] sm:$0x3]  ;;  %v6565_v2 = vld [vmem:[%s8056_s4 + $0x38] sm:$0xe] }
  0x2c   : > { %v3231_v20 = vrot.slane %v3229_v14, 6  ;;  %v3238_v22 = vshll.u32 %v6560_v63, 16  ;;  %v406_v23 = vrot.slane %v405_v16, 4  ;;  %v3244_v24 = vshrl.u32 %v6561_v4, 16  ;;  %v7897_v8 = vld [vmem:[%s9218_s1 + $0x50] sm:$0xff]  }
  0x2d   : > { %7431 = vmatprep.mubr.msk.bf16.mxu0 %vm249_vm2, %v6579_v15  ;;  %v3247_v27 = vshll.u32 %v6561_v4, 16  ;;  %v3253_v28 = vshrl.u32 %v6562_v5, 16  ;;  %v420_v30 = vrot.slane %v419_v19, 4  ;;  %v3237_v33 = vrot.slane %v3235_v21, 5 }
  0x2e   : > { %v3232_v31 = vor.u32 %v3231_v20, %v3228_v18  ;;  %v3240_v34 = vrot.slane %v3238_v22, 6  ;;  %v411_v36 = vsel %vm8147_vm8, %v406_v23, %v410_v7  ;;  %v3246_v37 = vrot.slane %v3244_v24, 5  ;;  %v355_v18 = vld [vmem:[%s8056_s4 + $0x30] sm:$0xf]  ;;  %v356_v23 = vld [vmem:[%s8056_s4 + $0x34] sm:$0x1] }
  0x2f   : > { %v3249_v38 = vrot.slane %v3247_v27, 6  ;;  %v3255_v39 = vrot.slane %v3253_v28, 5  ;;  %v425_v41 = vsel %vm8147_vm8, %v420_v30, %v424_v17  ;;  %v3256_v44 = vshll.u32 %v6562_v5, 16  ;;  %v6566_v5 = vld [vmem:[%s8056_s4 + $0x3c] sm:$0x3] }
  0x30   : > { %v3233_v42 = vrot.slane %v3232_v31, 4  ;;  %v3241_v43 = vor.u32 %v3240_v34, %v3237_v33  ;;  %v6172_v45 = vcombine.low %v411_v36, %v425_v41  ;;  %v427_v50 = vshrl.u32 %v351_v29, 16  ;;  %v357_v30 = vld [vmem:[%s8056_s4 + $0x38] sm:$0xf] }
  0x31   : > { %v3250_v46 = vor.u32 %v3249_v38, %v3246_v37  ;;  %v430_v51 = vshll.u32 %v351_v29, 16  ;;  %v3258_v53 = vrot.slane %v3256_v44, 6  ;;  %v436_v54 = vshll.u32 %v352_v35, 16  ;;  %v7899_v31 = vld [vmem:[%s9218_s1 + $0x58] sm:$0xff]  }
  0x32   : > { %v3242_v52 = vsel %vm8167_vm9, %v3233_v42, %v3241_v43  ;;  %v441_v55 = vshrl.u32 %v353_v40, 16  ;;  %7240 = vmatmul.mubr.msk.bf16.vlgmr.msra.gmra.mrb[0].mxu1 %vm249_vm2, %v6172_v45  ;;  %v429_v58 = vrot.slane %v427_v50, 4  ;;  %v444_v60 = vshll.u32 %v353_v40, 16  ;;  %v358_v37 = vld [vmem:[%s8056_s4 + $0x3c] sm:$0x1]  ;;  %v7898_v43 = vld [vmem:[%s9218_s1 + $0x1d0] sm:$0xff]  }
  0x33   : > { %v3251_v57 = vrot.slane %v3250_v46, 4  ;;  %v432_v59 = vrot.slane %v430_v51, 5  ;;  %v3259_v62 = vor.u32 %v3258_v53, %v3255_v39  ;;  %7248 = vmatpush3.bf16.msra.mxu1 %v8143_v25  ;;  %v438_v63 = vrot.slane %v436_v54, 5  ;;  %v7896_v25 = vld [vmem:[%s9218_s1 + $0x1c8] sm:$0xff]   ;;  %v6567_v42 = vld [vmem:[%s8056_s4 + $0x40] sm:$0xe] }
  0x34   : > { %v443_v0 = vrot.slane %v441_v55, 4  ;;  %v450_v1 = vshll.u32 %v354_v49, 16  ;;  %7249 = vmatprep.subr.bf16.mxu1 %v7895_v47  ;;  %v446_v4 = vrot.slane %v444_v60, 5  ;;  %v3262_v6 = vshrl.u32 %v6563_v56, 16  ;;  %v8231_v53 = vld [vmem:[%s9218_s1 + $0x60] sm:$0xff]  }
  0x35   : > { %v433_v3 = vor.u32 %v432_v59, %v429_v58  ;;  %v3265_v7 = vshll.u32 %v6563_v56, 16  ;;  %v3260_v10 = vsel %vm8167_vm9, %v3251_v57, %v3259_v62  ;;  %v3271_v12 = vshrl.u32 %v6564_v61, 16  ;;  %v7900_v62 = vld [vmem:[%s9218_s1 + $0x1d8] sm:$0xff]  }
  0x36   : > { %v452_v11 = vrot.slane %v450_v1, 5  ;;  %v3274_v13 = vshll.u32 %v6564_v61, 16  ;;  %v6580_v14 = vcombine.low %v3242_v52, %v3260_v10  ;;  %v447_v16 = vor.u32 %v446_v4, %v443_v0  ;;  %v6569_v1 = vld [vmem:[%s8056_s4 + $0x48] sm:$0xe]  ;;  %v8247_v10 = vld [vmem:[%s9218_s1 + $0x1e0] sm:$0xff]  }
  0x37   : > { %v434_v15 = vrot.slane %v433_v3, 4  ;;  %v3264_v17 = vrot.slane %v3262_v6, 5  ;;  %7250 = vmatpush3.bf16.msra.mxu1 %v7895_v47  ;;  %v3267_v19 = vrot.slane %v3265_v7, 6  ;;  %v3273_v20 = vrot.slane %v3271_v12, 5  ;;  %v6568_v47 = vld [vmem:[%s8056_s4 + $0x44] sm:$0x3] }
  0x38   : > { %v3276_v21 = vrot.slane %v3274_v13, 6  ;;  %v3280_v22 = vshrl.u32 %v6565_v2, 16  ;;  %7432 = vmatmul.mubr.msk.bf16.vlgmr.msra.gmra.mrb[0].mxu0 %vm249_vm2, %v6580_v14  ;;  %v448_v27 = vrot.slane %v447_v16, 4  ;;  %v3283_v28 = vshll.u32 %v6565_v2, 16  ;;  %7251 = vmatprep.subr.bf16.mxu1 %v7897_v8  ;;  %v6570_v6 = vld [vmem:[%s8056_s4 + $0x4c] sm:$0x3] }
  0x39   : > { %v439_v24 = vsel %vm8147_vm8, %v434_v15, %v438_v63  ;;  %v3289_v29 = vshrl.u32 %v6566_v5, 16  ;;  %7440 = vmatpush3.bf16.msra.mxu0 %v8155_v32  ;;  %v3268_v33 = vor.u32 %v3267_v19, %v3264_v17  ;;  %v3292_v36 = vshll.u32 %v6566_v5, 16  ;;  %v620_v14 = vld [vmem:[%s8056_s4] sm:$0xe]  ;;  %v621_v15 = vld [vmem:[%s8056_s4 + $0x4] sm:$0x1] }
  0x3a   : > { %v3277_v34 = vor.u32 %v3276_v21, %v3273_v20  ;;  %v3282_v35 = vrot.slane %v3280_v22, 5  ;;  %7441 = vmatprep.subr.bf16.mxu0 %v7896_v25  ;;  %v453_v38 = vsel %vm8147_vm8, %v448_v27, %v452_v11  ;;  %v3285_v39 = vrot.slane %v3283_v28, 6  ;;  %v622_v20 = vld [vmem:[%s8056_s4 + $0x8] sm:$0xe]  ;;  %v623_v21 = vld [vmem:[%s8056_s4 + $0xc] sm:$0x1] }
  0x3b   : > { %v3291_v40 = vrot.slane %v3289_v29, 5  ;;  %v455_v41 = vshrl.u32 %v355_v18, 16  ;;  %v6173_v44 = vcombine.low %v439_v24, %v453_v38  ;;  %v3269_v32 = vrot.slane %v3268_v33, 4  ;;  %7252 = vmatpush3.bf16.msra.mxu1 %v7897_v8  ;;  %v6591_v22 = vld [vmem:[%s8056_s4 + $0x10] sm:$0xc] }
  0x3c   : > { %v3294_v45 = vrot.slane %v3292_v36, 6  ;;  %v458_v46 = vshll.u32 %v355_v18, 16  ;;  %v3286_v49 = vor.u32 %v3285_v39, %v3282_v35  ;;  %v464_v51 = vshll.u32 %v356_v23, 16  ;;  %7253 = vmatprep.subr.bf16.mxu1 %v7899_v31  ;;  %v6592_v29 = vld [vmem:[%s8056_s4 + $0x14] sm:$0x3] }
  0x3d   : > { %v457_v50 = vrot.slane %v455_v41, 4  ;;  %v469_v52 = vshrl.u32 %v357_v30, 16  ;;  %7442 = vmatpush3.bf16.msra.mxu0 %v7896_v25  ;;  %7243 = vmatprep.mubr.msk.bf16.mxu1 %vm249_vm2, %v6173_v44  ;;  %v3278_v54 = vsel %vm8167_vm9, %v3269_v32, %v3277_v34  ;;  %v472_v57 = vshll.u32 %v357_v30, 16  ;;  %v6593_v35 = vld [vmem:[%s8056_s4 + $0x18] sm:$0xc] }
  0x3e   : > { %v3295_v55 = vor.u32 %v3294_v45, %v3291_v40  ;;  %v460_v56 = vrot.slane %v458_v46, 5  ;;  %v3287_v58 = vrot.slane %v3286_v49, 4  ;;  %v466_v59 = vrot.slane %v464_v51, 5  ;;  %7443 = vmatprep.subr.bf16.mxu0 %v7898_v43  ;;  %v6594_v36 = vld [vmem:[%s8056_s4 + $0x1c] sm:$0x3] }
  0x3f   : > { %v471_v60 = vrot.slane %v469_v52, 4  ;;  %v478_v61 = vshll.u32 %v358_v37, 16  ;;  %v474_v0 = vrot.slane %v472_v57, 5  ;;  %v3298_v2 = vshrl.u32 %v6567_v42, 16  ;;  %7254 = vmatpush3.bf16.msra.mxu1 %v7899_v31  ;;  %v624_v41 = vld [vmem:[%s8056_s4 + $0x10] sm:$0xe] }
  0x40   : > { %v461_v63 = vor.u32 %v460_v56, %v457_v50  ;;  %v3301_v3 = vshll.u32 %v6567_v42, 16  ;;  %v3296_v4 = vsel %vm8167_vm9, %v3287_v58, %v3295_v55  ;;  %v3307_v7 = vshrl.u32 %v6568_v47, 16  ;;  %7263 = vmatprep.subr.bf16.mxu1 %v8231_v53  ;;  %v625_v42 = vld [vmem:[%s8056_s4 + $0x14] sm:$0x1]  ;;  %v626_v46 = vld [vmem:[%s8056_s4 + $0x18] sm:$0xe] }
  0x41   : > { %v480_v5 = vrot.slane %v478_v61, 5  ;;  %v3310_v8 = vshll.u32 %v6568_v47, 16  ;;  %v6581_v25 = vcombine.low %v3278_v54, %v3296_v4  ;;  %v475_v12 = vor.u32 %v474_v0, %v471_v60  ;;  %7444 = vmatpush3.bf16.msra.mxu0 %v7898_v43  ;;  %v627_v54 = vld [vmem:[%s8056_s4 + $0x1c] sm:$0x1]  ;;  %v6596_v4 = vld [vmem:[%s8056_s4 + $0x24] sm:$0x3] }
  0x42   : > { %v462_v11 = vrot.slane %v461_v63, 4  ;;  %v3300_v13 = vrot.slane %v3298_v2, 5  ;;  %v3303_v16 = vrot.slane %v3301_v3, 6  ;;  %v3309_v17 = vrot.slane %v3307_v7, 5  ;;  %7445 = vmatprep.subr.bf16.mxu0 %v7900_v62  ;;  %v6595_v63 = vld [vmem:[%s8056_s4 + $0x20] sm:$0xc] }
  0x43   : > { %v3312_v18 = vrot.slane %v3310_v8, 6  ;;  %v3316_v19 = vshrl.u32 %v6569_v1, 16  ;;  %7435 = vmatprep.mubr.msk.bf16.mxu0 %vm249_vm2, %v6581_v25  ;;  %v476_v24 = vrot.slane %v475_v12, 4  ;;  %v3319_v27 = vshll.u32 %v6569_v1, 16 }
  0x44   : > { %v467_v23 = vsel %vm8147_vm8, %v462_v11, %v466_v59  ;;  %v3325_v28 = vshrl.u32 %v6570_v6, 16  ;;  %v3304_v30 = vor.u32 %v3303_v16, %v3300_v13  ;;  %v3328_v34 = vshll.u32 %v6570_v6, 16  ;;  %v6598_v11 = vld [vmem:[%s8056_s4 + $0x2c] sm:$0x3] }
  0x45   : > { %v3313_v31 = vor.u32 %v3312_v18, %v3309_v17  ;;  %v3318_v33 = vrot.slane %v3316_v19, 5  ;;  %v481_v37 = vsel %vm8147_vm8, %v476_v24, %v480_v5  ;;  %v3321_v38 = vrot.slane %v3319_v27, 6  ;;  %7446 = vmatpush3.bf16.msra.mxu0 %v7900_v62  ;;  %v6597_v5 = vld [vmem:[%s8056_s4 + $0x28] sm:$0xc]  ;;  %v629_v27 = vld [vmem:[%s8056_s4 + $0x24] sm:$0x1] }
  0x46   : > { %v3327_v39 = vrot.slane %v3325_v28, 5  ;;  %v6183_v40 = vrot.slane %v620_v14, 9  ;;  %v6174_v43 = vcombine.low %v467_v23, %v481_v37  ;;  %v3305_v44 = vrot.slane %v3304_v30, 4  ;;  %7455 = vmatprep.subr.bf16.mxu0 %v8247_v10  ;;  %v630_v28 = vld [vmem:[%s8056_s4 + $0x28] sm:$0xe] }
  0x47   : > { %v3330_v32 = vrot.slane %v3328_v34, 6  ;;  %v665_v45 = vrot.slane %v621_v15, 5  ;;  %v3322_v47 = vor.u32 %v3321_v38, %v3318_v33  ;;  %v6184_v49 = vrot.slane %v622_v20, 9  ;;  %v7903_v20 = vld [vmem:[%s9218_s1 + $0x68] sm:$0xff]   ;;  %v6599_v34 = vld [vmem:[%s8056_s4 + $0x30] sm:$0xc] }
  0x48   : > { %v669_v50 = vrot.slane %v623_v21, 5  ;;  %v6607_v52 = vrot.slane %v6591_v22, 10  ;;  %7244 = vmatmul.mubr.msk.bf16.gmra.mrb[4].mxu1 %vm249_vm2, %v6174_v43  ;;  %v3314_v55 = vsel %vm8167_vm9, %v3305_v44, %v3313_v31  ;;  %v3513_v58 = vrot.slane %v6592_v29, 6  ;;  %v628_v22 = vld [vmem:[%s8056_s4 + $0x20] sm:$0xe] }
  0x49   : > { %v3331_v56 = vor.u32 %v3330_v32, %v3327_v39  ;;  %v666_v57 = vsel %vm8062_vm3, %v6183_v40, %v665_v45  ;;  %v3323_v59 = vrot.slane %v3322_v47, 4  ;;  %v6608_v61 = vrot.slane %v6593_v35, 10  ;;  %v631_v29 = vld [vmem:[%s8056_s4 + $0x2c] sm:$0x1]  ;;  %v6601_v37 = vld [vmem:[%s8056_s4 + $0x38] sm:$0xc] }
  0x4a   : > { %v670_v60 = vsel %vm8062_vm3, %v6184_v49, %v669_v50  ;;  %v3517_v62 = vrot.slane %v6594_v36, 6  ;;  %v3514_v1 = vsel %vm8268_vm12, %v6607_v52, %v3513_v58  ;;  %v6185_v2 = vrot.slane %v624_v41, 9  ;;  %v6600_v36 = vld [vmem:[%s8056_s4 + $0x34] sm:$0x3]  ;;  %v7904_v41 = vld [vmem:[%s9218_s1 + $0x1e8] sm:$0xff]  }
  0x4b   : > { %v6199_v0 = vcombine.low %v666_v57, %v670_v60  ;;  %v673_v3 = vrot.slane %v625_v42, 5  ;;  %v3332_v6 = vsel %vm8167_vm9, %v3323_v59, %v3331_v56  ;;  %v6186_v8 = vrot.slane %v626_v46, 9  ;;  %v7905_v39 = vld [vmem:[%s9218_s1 + $0x70] sm:$0xff]   ;;  %v6602_v42 = vld [vmem:[%s8056_s4 + $0x3c] sm:$0x3] }
  0x4c   : > { %v3518_v7 = vsel %vm8268_vm12, %v6608_v61, %v3517_v62  ;;  %v677_v25 = vrot.slane %v627_v54, 5  ;;  %v6582_v12 = vcombine.low %v3314_v55, %v3332_v6  ;;  %v6609_v15 = vrot.slane %v6595_v63, 10  ;;  %v632_v32 = vld [vmem:[%s8056_s4 + $0x30] sm:$0xe]  ;;  %v633_v47 = vld [vmem:[%s8056_s4 + $0x34] sm:$0x1] }
  0x4d   : > { %7255 = vmatprep.mubr.msk.bf16.mxu1 %vm249_vm2, %v6199_v0  ;;  %v6623_v13 = vcombine.low %v3514_v1, %v3518_v7  ;;  %v674_v14 = vsel %vm8062_vm3, %v6185_v2, %v673_v3  ;;  %v3521_v17 = vrot.slane %v6596_v4, 6  ;;  %v6610_v18 = vrot.slane %v6597_v5, 10  ;;  %v634_v49 = vld [vmem:[%s8056_s4 + $0x38] sm:$0xe]  ;;  %v635_v55 = vld [vmem:[%s8056_s4 + $0x3c] sm:$0x1] }
  0x4e   : > { %v678_v16 = vsel %vm8062_vm3, %v6186_v8, %v677_v25  ;;  %v3525_v19 = vrot.slane %v6598_v11, 6  ;;  %7436 = vmatmul.mubr.msk.bf16.gmra.mrb[4].mxu0 %vm249_vm2, %v6582_v12  ;;  %v6187_v30 = vrot.slane %v628_v22, 9  ;;  %v681_v31 = vrot.slane %v629_v27, 5  ;;  %v6603_v60 = vld [vmem:[%s8056_s4 + $0x40] sm:$0xc]  ;;  %v7907_v61 = vld [vmem:[%s9218_s1 + $0x78] sm:$0xff]  }
  0x4f   : > { %v6200_v21 = vcombine.low %v674_v14, %v678_v16  ;;  %7447 = vmatprep.mubr.msk.bf16.mxu0 %vm249_vm2, %v6623_v13  ;;  %v3522_v23 = vsel %vm8268_vm12, %v6609_v15, %v3521_v17  ;;  %v6188_v33 = vrot.slane %v630_v28, 9  ;;  %v685_v35 = vrot.slane %v631_v29, 5  ;;  %v6604_v0 = vld [vmem:[%s8056_s4 + $0x44] sm:$0x3]  ;;  %v6605_v1 = vld [vmem:[%s8056_s4 + $0x48] sm:$0xc] }
  0x50   : > { %v3526_v24 = vsel %vm8268_vm12, %v6610_v18, %v3525_v19  ;;  %v6611_v38 = vrot.slane %v6599_v34, 10  ;;  %v3529_v43 = vrot.slane %v6600_v36, 6  ;;  %v6612_v44 = vrot.slane %v6601_v37, 10  ;;  %v6606_v2 = vld [vmem:[%s8056_s4 + $0x4c] sm:$0x3]  ;;  %v7906_v7 = vld [vmem:[%s9218_s1 + $0x1f0] sm:$0xff]  }
  0x51   : > { %7256 = vmatmul.mubr.msk.bf16.vlgmr.msra.gmra.mrb[0].mxu1 %vm249_vm2, %v6200_v21  ;;  %v6624_v40 = vcombine.low %v3522_v23, %v3526_v24  ;;  %v686_v45 = vsel %vm8062_vm3, %v6188_v33, %v685_v35  ;;  %v3533_v46 = vrot.slane %v6602_v42, 6  ;;  %v6189_v50 = vrot.slane %v632_v32, 9  ;;  %v8353_v25 = vld [vmem:[%s9218_s1 + $0x80] sm:$0xff]   ;;  %v835_v15 = vld [vmem:[%s8056_s4 + $0x8] sm:$0xe]  ;;  %v7908_v17 = vld [vmem:[%s9218_s1 + $0x1f8] sm:$0xff]  }
  0x52   : > { %7264 = vmatpush3.bf16.msra.mxu1 %v8231_v53  ;;  %v682_v53 = vsel %vm8062_vm3, %v6187_v30, %v681_v31  ;;  %v3530_v54 = vsel %vm8268_vm12, %v6611_v38, %v3529_v43  ;;  %v689_v56 = vrot.slane %v633_v47, 5  ;;  %v6190_v57 = vrot.slane %v634_v49, 9  ;;  %v833_v13 = vld [vmem:[%s8056_s4] sm:$0xe]  ;;  %v834_v14 = vld [vmem:[%s8056_s4 + $0x4] sm:$0x3] }
  0x53   : > { %7265 = vmatprep.subr.bf16.mxu1 %v7903_v20  ;;  %v6201_v52 = vcombine.low %v682_v53, %v686_v45  ;;  %v3534_v58 = vsel %vm8268_vm12, %v6612_v44, %v3533_v46  ;;  %v693_v59 = vrot.slane %v635_v55, 5  ;;  %v6613_v4 = vrot.slane %v6603_v60, 10  ;;  %v836_v18 = vld [vmem:[%s8056_s4 + $0xc] sm:$0x3]  ;;  %v7909_v37 = vld [vmem:[%s8056_s4 + $0x18] ss:$8 sps:$4 sm:$0xff]  }
  0x54   : > { %v6625_v62 = vcombine.low %v3530_v54, %v3534_v58  ;;  %v690_v63 = vsel %vm8062_vm3, %v6189_v50, %v689_v56  ;;  %v3537_v5 = vrot.slane %v6604_v0, 6  ;;  %v6614_v6 = vrot.slane %v6605_v1, 10  ;;  %v7912_v53 = vld [vmem:[%s9218_s1 + $0x200] sm:$0xff]   ;;  %v839_v44 = vld [vmem:[%s8056_s4 + $0x18] sm:$0xe] }
  0x55   : > { %7259 = vmatprep.mubr.msk.bf16.mxu1 %vm249_vm2, %v6201_v52  ;;  %v694_v3 = vsel %vm8062_vm3, %v6190_v57, %v693_v59  ;;  %v861_v19 = vshrl.u32 %v833_v13, 16  ;;  %v870_v21 = vshrl.u32 %v834_v14, 16  ;;  %v873_v22 = vshll.u32 %v834_v14, 16  ;;  %v840_v32 = vld [vmem:[%s8056_s4 + $0x1c] sm:$0x3] }
  0x56   : > { %7266 = vmatpush3.bf16.msra.mxu1 %v7903_v20  ;;  %7448 = vmatmul.mubr.msk.bf16.vlgmr.msra.gmra.mrb[0].mxu0 %vm249_vm2, %v6624_v40  ;;  %v6202_v8 = vcombine.low %v690_v63, %v694_v3  ;;  %v3538_v11 = vsel %vm8268_vm12, %v6613_v4, %v3537_v5  ;;  %v864_v20 = vshll.u32 %v833_v13, 16  ;;  %v879_v23 = vshrl.u32 %v835_v15, 16  ;;  %v837_v40 = vld [vmem:[%s8056_s4 + $0x10] sm:$0xe] }
  0x57   : > { %7456 = vmatpush3.bf16.msra.mxu0 %v8247_v10  ;;  %7267 = vmatprep.subr.bf16.mxu1 %v7905_v39  ;;  %v3541_v10 = vrot.slane %v6606_v2, 6  ;;  %v882_v24 = vshll.u32 %v835_v15, 16  ;;  %v888_v27 = vshrl.u32 %v836_v18, 16  ;;  %v863_v28 = vrot.slane %v861_v19, 5  ;;  %v7911_v3 = vld [vmem:[%s8056_s4 + $0x28] ss:$8 sps:$4 sm:$0xff]  }
  0x58   : > { %7457 = vmatprep.subr.bf16.mxu0 %v7904_v41  ;;  %7451 = vmatprep.mubr.msk.bf16.mxu0 %vm249_vm2, %v6625_v62  ;;  %v866_v29 = vrot.slane %v864_v20, 6  ;;  %v872_v30 = vrot.slane %v870_v21, 5  ;;  %v891_v31 = vshll.u32 %v836_v18, 16  ;;  %v875_v33 = vrot.slane %v873_v22, 6  ;;  %v7914_v62 = vld [vmem:[%s9218_s1 + $0x208] sm:$0xff]   ;;  %v7918_v13 = vld [vmem:[%s9218_s1 + $0x210] sm:$0xff]  }
  0x59   : > { %7260 = vmatmul.mubr.msk.bf16.gmra.mrb[4].mxu1 %vm249_vm2, %v6202_v8  ;;  %v3542_v12 = vsel %vm8268_vm12, %v6614_v6, %v3541_v10  ;;  %v881_v34 = vrot.slane %v879_v23, 5  ;;  %v884_v35 = vrot.slane %v882_v24, 6  ;;  %v890_v36 = vrot.slane %v888_v27, 5  ;;  %v841_v15 = vld [vmem:[%s8056_s4 + $0x20] sm:$0xe] }
  0x5a   : > { %7268 = vmatpush3.bf16.msra.mxu1 %v7905_v39  ;;  %v6626_v16 = vcombine.low %v3538_v11, %v3542_v12  ;;  %v867_v38 = vor.u32 %v866_v29, %v863_v28  ;;  %v893_v39 = vrot.slane %v891_v31, 6  ;;  %v876_v42 = vor.u32 %v875_v33, %v872_v30  ;;  %v844_v20 = vld [vmem:[%s8056_s4 + $0x2c] sm:$0x3] }
  0x5b   : > { %7269 = vmatprep.subr.bf16.mxu1 %v7907_v61  ;;  %7458 = vmatpush3.bf16.msra.mxu0 %v7904_v41  ;;  %v838_v41 = vld [vmem:[%s8056_s4 + $0x14] sm:$0x3]  ;;  %v885_v43 = vor.u32 %v884_v35, %v881_v34  ;;  %v897_v45 = vshrl.u32 %v837_v40, 16  ;;  %v900_v46 = vshll.u32 %v837_v40, 16  ;;  %v915_v57 = vshrl.u32 %v839_v44, 16  ;;  %v7913_v30 = vld [vmem:[%s9218_s1 + $0x88] sm:$0xff]  }
  0x5c   : > { %7459 = vmatprep.subr.bf16.mxu0 %v7906_v7  ;;  %v868_v47 = vrot.slane %v867_v38, 4  ;;  %v894_v49 = vor.u32 %v893_v39, %v890_v36  ;;  %v906_v50 = vshrl.u32 %v838_v41, 16  ;;  %v909_v52 = vshll.u32 %v838_v41, 16  ;;  %v7915_v39 = vld [vmem:[%s8056_s4 + $0x38] ss:$8 sps:$4 sm:$0xff]  }
  0x5d   : > { %v886_v54 = vrot.slane %v885_v43, 4  ;;  %v899_v55 = vrot.slane %v897_v45, 5  ;;  %v902_v56 = vrot.slane %v900_v46, 6  ;;  %v917_v1 = vrot.slane %v915_v57, 5  ;;  %v7920_v40 = vld [vmem:[%s9218_s1 + $0x218] sm:$0xff]  }
  0x5e   : > { %7270 = vmatpush3.bf16.msra.mxu1 %v7907_v61  ;;  %7452 = vmatmul.mubr.msk.bf16.gmra.mrb[4].mxu0 %vm249_vm2, %v6626_v16  ;;  %v877_v58 = vsel %vm8167_vm9, %v868_v47, %v876_v42  ;;  %v908_v59 = vrot.slane %v906_v50, 5  ;;  %v911_v60 = vrot.slane %v909_v52, 6  ;;  %v918_v61 = vshll.u32 %v839_v44, 16  ;;  %v842_v16 = vld [vmem:[%s8056_s4 + $0x24] sm:$0x3] }
  0x5f   : > { %7279 = vmatprep.subr.bf16.mxu1 %v8353_v25  ;;  %7460 = vmatpush3.bf16.msra.mxu0 %v7906_v7  ;;  %v895_v63 = vsel %vm8167_vm9, %v886_v54, %v894_v49  ;;  %v903_v0 = vor.u32 %v902_v56, %v899_v55  ;;  %v924_v2 = vshrl.u32 %v840_v32, 16  ;;  %v927_v7 = vshll.u32 %v840_v32, 16  ;;  %v845_v44 = vld [vmem:[%s8056_s4 + $0x30] sm:$0xe]  ;;  %v846_v45 = vld [vmem:[%s8056_s4 + $0x34] sm:$0x3] }
  0x60   : > { %7461 = vmatprep.subr.bf16.mxu0 %v7908_v17  ;;  %7463 = vmatprep.mubr.msk.bf16.mxu0 %vm249_vm2, %v7909_v37  ;;  %v6219_v4 = vcombine.low %v877_v58, %v895_v63  ;;  %v912_v5 = vor.u32 %v911_v60, %v908_v59  ;;  %v920_v6 = vrot.slane %v918_v61, 6  ;;  %v933_v21 = vshrl.u32 %v841_v15, 16  ;;  %v847_v46 = vld [vmem:[%s8056_s4 + $0x38] sm:$0xe]  ;;  %v848_v47 = vld [vmem:[%s8056_s4 + $0x3c] sm:$0x3] }
  0x61   : > { %v904_v8 = vrot.slane %v903_v0, 4  ;;  %v926_v10 = vrot.slane %v924_v2, 5  ;;  %v929_v12 = vrot.slane %v927_v7, 6  ;;  %v936_v22 = vshll.u32 %v841_v15, 16  ;;  %v7916_v49 = vld [vmem:[%s9218_s1 + $0x90] sm:$0xff]   ;;  %v8419_v56 = vld [vmem:[%s9218_s1 + $0x220] sm:$0xff]  }
  0x62   : > { %7271 = vmatprep.mubr.msk.bf16.mxu1 %vm249_vm2, %v6219_v4  ;;  %v921_v11 = vor.u32 %v920_v6, %v917_v1  ;;  %v942_v23 = vshrl.u32 %v842_v16, 16  ;;  %v945_v24 = vshll.u32 %v842_v16, 16  ;;  %v935_v31 = vrot.slane %v933_v21, 5  ;;  %v7917_v4 = vld [vmem:[%s8056_s4 + $0x48] ss:$8 sps:$4 sm:$0xff]  }
  0x63   : > { %7462 = vmatpush3.bf16.msra.mxu0 %v7908_v17  ;;  %v913_v14 = vsel %vm8167_vm9, %v904_v8, %v912_v5  ;;  %v843_v17 = vld [vmem:[%s8056_s4 + $0x28] sm:$0xe]  ;;  %v930_v19 = vor.u32 %v929_v12, %v926_v10  ;;  %v938_v33 = vrot.slane %v936_v22, 6  ;;  %v960_v34 = vshrl.u32 %v844_v20, 16  ;;  %v7919_v10 = vld [vmem:[%s9218_s1 + $0x98] sm:$0xff]  }
  0x64   : > { %7471 = vmatprep.subr.bf16.mxu0 %v7912_v53  ;;  %v922_v18 = vrot.slane %v921_v11, 4  ;;  %v951_v27 = vshrl.u32 %v843_v17, 16  ;;  %v954_v28 = vshll.u32 %v843_v17, 16  ;;  %v944_v36 = vrot.slane %v942_v23, 5  ;;  %v1143_v21 = vld [vmem:[%s8056_s4 + $0x4] sm:$0x3] }
  0x65   : > { %v947_v37 = vrot.slane %v945_v24, 6  ;;  %v939_v41 = vor.u32 %v938_v33, %v935_v31  ;;  %v962_v42 = vrot.slane %v960_v34, 5  ;;  %v963_v43 = vshll.u32 %v844_v20, 16  ;;  %v1144_v22 = vld [vmem:[%s8056_s4 + $0x8] sm:$0xc] }
  0x66   : > { %7464 = vmatmul.mubr.msk.bf16.vlgmr.msra.gmra.mrb[0].mxu0 %vm249_vm2, %v7911_v3  ;;  %v931_v29 = vsel %vm8167_vm9, %v922_v18, %v930_v19  ;;  %v953_v38 = vrot.slane %v951_v27, 5  ;;  %v969_v55 = vshrl.u32 %v845_v44, 16  ;;  %v972_v57 = vshll.u32 %v845_v44, 16  ;;  %v1142_v18 = vld [vmem:[%s8056_s4] sm:$0xc] }
  0x67   : > { %7472 = vmatpush3.bf16.msra.mxu0 %v7912_v53  ;;  %v6220_v35 = vcombine.low %v913_v14, %v931_v29  ;;  %v956_v53 = vrot.slane %v954_v28, 6  ;;  %v948_v32 = vor.u32 %v947_v37, %v944_v36  ;;  %7467 = vmatprep.mubr.msk.bf16.mxu0 %vm249_vm2, %v7915_v39  ;;  %v940_v50 = vrot.slane %v939_v41, 4  ;;  %v1145_v23 = vld [vmem:[%s8056_s4 + $0xc] sm:$0x3]  ;;  %v6663_v29 = vld [vmem:[%s8056_s4 + $0x18] sm:$0xf] }
  0x68   : > { %7473 = vmatprep.subr.bf16.mxu0 %v7914_v62  ;;  %v965_v54 = vrot.slane %v963_v43, 6  ;;  %v978_v58 = vshrl.u32 %v846_v45, 16  ;;  %v981_v59 = vshll.u32 %v846_v45, 16  ;;  %v987_v60 = vshrl.u32 %v847_v46, 16  ;;  %v6665_v36 = vld [vmem:[%s8056_s4 + $0x20] sm:$0xf] }
  0x69   : > { %7272 = vmatmul.mubr.msk.bf16.vlgmr.msra.gmra.mrb[0].mxu1 %vm249_vm2, %v6220_v35  ;;  %v957_v52 = vor.u32 %v956_v53, %v953_v38  ;;  %v971_v63 = vrot.slane %v969_v55, 5  ;;  %v974_v0 = vrot.slane %v972_v57, 6  ;;  %v990_v6 = vshll.u32 %v847_v46, 16  ;;  %v6664_v35 = vld [vmem:[%s8056_s4 + $0x1c] sm:$0x1] }
  0x6a   : > { %7280 = vmatpush3.bf16.msra.mxu1 %v8353_v25  ;;  %v949_v25 = vsel %vm8167_vm9, %v940_v50, %v948_v32  ;;  %v980_v1 = vrot.slane %v978_v58, 5  ;;  %v983_v2 = vrot.slane %v981_v59, 6  ;;  %v989_v3 = vrot.slane %v987_v60, 5  ;;  %v6666_v38 = vld [vmem:[%s8056_s4 + $0x24] sm:$0x1] }
  0x6b   : > { %7474 = vmatpush3.bf16.msra.mxu0 %v7914_v62  ;;  %7281 = vmatprep.subr.bf16.mxu1 %v7913_v30  ;;  %v958_v61 = vrot.slane %v957_v52, 4  ;;  %v966_v62 = vor.u32 %v965_v54, %v962_v42  ;;  %v996_v7 = vshrl.u32 %v848_v47, 16  ;;  %v999_v8 = vshll.u32 %v848_v47, 16  ;;  %v1146_v32 = vld [vmem:[%s8056_s4 + $0x10] sm:$0xc] }
  0x6c   : > { %7475 = vmatprep.subr.bf16.mxu0 %v7918_v13  ;;  %v975_v12 = vor.u32 %v974_v0, %v971_v63  ;;  %v992_v14 = vrot.slane %v990_v6, 6  ;;  %v6231_v24 = vrot.slane %v1142_v18, 10  ;;  %v1187_v27 = vrot.slane %v1143_v21, 6  ;;  %v1147_v45 = vld [vmem:[%s8056_s4 + $0x14] sm:$0x3]  ;;  %v7923_v21 = vld [vmem:[%s9218_s1 + $0xa8] sm:$0xff]  }
  0x6d   : > { %v967_v5 = vsel %vm8167_vm9, %v958_v61, %v966_v62  ;;  %v998_v15 = vrot.slane %v996_v7, 5  ;;  %v1001_v16 = vrot.slane %v999_v8, 6  ;;  %v6232_v28 = vrot.slane %v1144_v22, 10  ;;  %v1148_v52 = vld [vmem:[%s8056_s4 + $0x18] sm:$0xc] }
  0x6e   : > { %7282 = vmatpush3.bf16.msra.mxu1 %v7913_v30  ;;  %v6221_v11 = vcombine.low %v949_v25, %v967_v5  ;;  %7468 = vmatmul.mubr.msk.bf16.gmra.mrb[4].mxu0 %vm249_vm2, %v7917_v4  ;;  %v976_v17 = vrot.slane %v975_v12, 4  ;;  %v993_v19 = vor.u32 %v992_v14, %v989_v3  ;;  %v8440_v30 = vld [vmem:[%s9218_s1 + $0xa0] sm:$0xff]   ;;  %v1191_v34 = vrot.slane %v1145_v23, 6  ;;  %v1149_v54 = vld [vmem:[%s8056_s4 + $0x1c] sm:$0x3] }
  0x6f   : > { %7476 = vmatpush3.bf16.msra.mxu0 %v7918_v13  ;;  %7283 = vmatprep.subr.bf16.mxu1 %v7916_v49  ;;  %v984_v13 = vor.u32 %v983_v2, %v980_v1  ;;  %v1002_v20 = vor.u32 %v1001_v16, %v998_v15  ;;  %v1188_v37 = vsel %vm8268_vm12, %v6231_v24, %v1187_v27  ;;  %v3869_v39 = vshrl.u32 %v6663_v29, 16  ;;  %v6667_v2 = vld [vmem:[%s8056_s4 + $0x28] sm:$0xf]  ;;  %v6668_v3 = vld [vmem:[%s8056_s4 + $0x2c] sm:$0x1] }
  0x70   : > { %7477 = vmatprep.subr.bf16.mxu0 %v7920_v40  ;;  %7275 = vmatprep.mubr.msk.bf16.mxu1 %vm249_vm2, %v6221_v11  ;;  %v994_v33 = vrot.slane %v993_v19, 4  ;;  %v3878_v41 = vshll.u32 %v6664_v35, 16  ;;  %v1192_v42 = vsel %vm8268_vm12, %v6232_v28, %v1191_v34  ;;  %v3883_v43 = vshrl.u32 %v6665_v36, 16  ;;  %v6669_v6 = vld [vmem:[%s8056_s4 + $0x30] sm:$0xf] }
  0x71   : > { %v985_v31 = vsel %vm8167_vm9, %v976_v17, %v984_v13  ;;  %v3886_v44 = vshll.u32 %v6665_v36, 16  ;;  %v6247_v47 = vcombine.low %v1188_v37, %v1192_v42  ;;  %v3892_v59 = vshll.u32 %v6666_v38, 16  ;;  %v6670_v7 = vld [vmem:[%s8056_s4 + $0x34] sm:$0x1]  ;;  %v1152_v35 = vld [vmem:[%s8056_s4 + $0x28] sm:$0xc] }
  0x72   : > { %7284 = vmatpush3.bf16.msra.mxu1 %v7916_v49  ;;  %v1003_v53 = vsel %vm8167_vm9, %v994_v33, %v1002_v20  ;;  %v3871_v49 = vrot.slane %v3869_v39, 4  ;;  %v3880_v55 = vrot.slane %v3878_v41, 5  ;;  %v3885_v57 = vrot.slane %v3883_v43, 4  ;;  %v1151_v33 = vld [vmem:[%s8056_s4 + $0x24] sm:$0x3]  ;;  %v7925_v42 = vld [vmem:[%s9218_s1 + $0xb0] sm:$0xff]  }
  0x73   : > { %7478 = vmatpush3.bf16.msra.mxu0 %v7920_v40  ;;  %7285 = vmatprep.subr.bf16.mxu1 %v7919_v10  ;;  %v3872_v40 = vshll.u32 %v6663_v29, 16  ;;  %v6222_v46 = vcombine.low %v985_v31, %v1003_v53  ;;  %v3888_v58 = vrot.slane %v3886_v44, 5  ;;  %v6233_v25 = vrot.slane %v1146_v32, 10  ;;  %v1150_v31 = vld [vmem:[%s8056_s4 + $0x20] sm:$0xc] }
  0x74   : > { %7487 = vmatprep.subr.bf16.mxu0 %v8419_v56  ;;  %v1195_v61 = vrot.slane %v1147_v45, 6  ;;  %v6234_v62 = vrot.slane %v1148_v52, 10  ;;  %v3894_v0 = vrot.slane %v3892_v59, 5  ;;  %v1199_v1 = vrot.slane %v1149_v54, 6  ;;  %v1153_v36 = vld [vmem:[%s8056_s4 + $0x2c] sm:$0x3] }
  0x75   : > { %v3874_v50 = vrot.slane %v3872_v40, 5  ;;  %7276 = vmatmul.mubr.msk.bf16.gmra.mrb[4].mxu1 %vm249_vm2, %v6222_v46  ;;  %v3889_v63 = vor.u32 %v3888_v58, %v3885_v57  ;;  %v3897_v8 = vshrl.u32 %v6667_v2, 16  ;;  %v3900_v12 = vshll.u32 %v6667_v2, 16  ;;  %v6671_v53 = vld [vmem:[%s8056_s4 + $0x38] sm:$0xf]  ;;  %v7924_v54 = vld [vmem:[%s9218_s1 + $0x228] sm:$0xff]  }
  0x76   : > { %7286 = vmatpush3.bf16.msra.mxu1 %v7919_v10  ;;  %7287 = vmatprep.mubr.msk.bf16.mxu1 %vm249_vm2, %v6247_v47  ;;  %v1196_v5 = vsel %vm8268_vm12, %v6233_v25, %v1195_v61  ;;  %v1200_v11 = vsel %vm8268_vm12, %v6234_v62, %v1199_v1  ;;  %v3906_v13 = vshll.u32 %v6668_v3, 16  ;;  %v3911_v17 = vshrl.u32 %v6669_v6, 16  ;;  %v6672_v44 = vld [vmem:[%s8056_s4 + $0x3c] sm:$0x1]  ;;  %v6673_v32 = vld [vmem:[%s8056_s4 + $0x40] sm:$0xf] }
  0x77   : > { %7295 = vmatprep.subr.bf16.mxu1 %v8440_v30  ;;  %v3875_v60 = vor.u32 %v3874_v50, %v3871_v49  ;;  %v3890_v10 = vrot.slane %v3889_v63, 4  ;;  %v6248_v15 = vcombine.low %v1196_v5, %v1200_v11  ;;  %v3899_v16 = vrot.slane %v3897_v8, 4  ;;  %v6674_v49 = vld [vmem:[%s8056_s4 + $0x44] sm:$0x1]  ;;  %v1154_v52 = vld [vmem:[%s8056_s4 + $0x30] sm:$0xc] }
  0x78   : > { %v3902_v19 = vrot.slane %v3900_v12, 5  ;;  %v3914_v20 = vshll.u32 %v6669_v6, 16  ;;  %v3913_v23 = vrot.slane %v3911_v17, 4  ;;  %v3920_v24 = vshll.u32 %v6670_v7, 16  ;;  %v1157_v1 = vld [vmem:[%s8056_s4 + $0x3c] sm:$0x3] }
  0x79   : > { %v3876_v4 = vrot.slane %v3875_v60, 4  ;;  %v3895_v18 = vsel %vm8147_vm8, %v3890_v10, %v3894_v0  ;;  %v3908_v28 = vrot.slane %v3906_v13, 5  ;;  %v6235_v37 = vrot.slane %v1150_v31, 10  ;;  %v1155_v60 = vld [vmem:[%s8056_s4 + $0x34] sm:$0x3]  ;;  %v7927_v6 = vld [vmem:[%s9218_s1 + $0xb8] sm:$0xff]  }
  0x7a   : > { %v3903_v27 = vor.u32 %v3902_v19, %v3899_v16  ;;  %v3916_v29 = vrot.slane %v3914_v20, 5  ;;  %v3922_v34 = vrot.slane %v3920_v24, 5  ;;  %v1203_v40 = vrot.slane %v1151_v33, 6  ;;  %v1156_v0 = vld [vmem:[%s8056_s4 + $0x38] sm:$0xc]  ;;  %v7926_v16 = vld [vmem:[%s9218_s1 + $0x230] sm:$0xff]  }
  0x7b   : > { %v3881_v14 = vsel %vm8147_vm8, %v3876_v4, %v3880_v55  ;;  %v6236_v41 = vrot.slane %v1152_v35, 10  ;;  %v1207_v43 = vrot.slane %v1153_v36, 6  ;;  %v3925_v45 = vshrl.u32 %v6671_v53, 16  ;;  %v6676_v20 = vld [vmem:[%s8056_s4 + $0x4c] sm:$0x1] }
  0x7c   : > { %v6687_v22 = vcombine.low %v3881_v14, %v3895_v18  ;;  %v3904_v38 = vrot.slane %v3903_v27, 4  ;;  %v3917_v39 = vor.u32 %v3916_v29, %v3913_v23  ;;  %v3928_v50 = vshll.u32 %v6671_v53, 16  ;;  %v6678_v24 = vld [vmem:[%s8056_s4 + $0x54] sm:$0x1] }
  0x7d   : > { %7288 = vmatmul.mubr.msk.bf16.vlgmr.msra.gmra.mrb[0].mxu1 %vm249_vm2, %v6248_v15  ;;  %v1208_v55 = vsel %vm8268_vm12, %v6236_v41, %v1207_v43  ;;  %v3927_v57 = vrot.slane %v3925_v45, 4  ;;  %v3934_v58 = vshll.u32 %v6672_v44, 16  ;;  %v3939_v59 = vshrl.u32 %v6673_v32, 16  ;;  %v6675_v15 = vld [vmem:[%s8056_s4 + $0x48] sm:$0xf]  ;;  %v7928_v41 = vld [vmem:[%s9218_s1 + $0x238] sm:$0xff]  }
  0x7e   : > { %7479 = vmatprep.mubr.msk.bf16.mxu0 %vm249_vm2, %v6687_v22  ;;  %7296 = vmatpush3.bf16.msra.mxu1 %v8440_v30  ;;  %v3909_v46 = vsel %vm8147_vm8, %v3904_v38, %v3908_v28  ;;  %v3918_v47 = vrot.slane %v3917_v39, 4  ;;  %v1204_v30 = vsel %vm8268_vm12, %v6235_v37, %v1203_v40  ;;  %v3930_v62 = vrot.slane %v3928_v50, 5  ;;  %v8539_v50 = vld [vmem:[%s9218_s1 + $0x240] sm:$0xff]  }
  0x7f   : > { %7297 = vmatprep.subr.bf16.mxu1 %v7923_v21  ;;  %v6249_v61 = vcombine.low %v1204_v30, %v1208_v55  ;;  %v3942_v63 = vshll.u32 %v6673_v32, 16  ;;  %v3936_v3 = vrot.slane %v3934_v58, 5  ;;  %v3941_v4 = vrot.slane %v3939_v59, 4  ;;  %v7929_v32 = vld [vmem:[%s8056_s4 + $0x8] ss:$8 sps:$4 sm:$0xff]  }
  0x80   : > { %v3923_v25 = vsel %vm8147_vm8, %v3918_v47, %v3922_v34  ;;  %v3948_v5 = vshll.u32 %v6674_v49, 16  ;;  %v3931_v7 = vor.u32 %v3930_v62, %v3927_v57  ;;  %v6237_v10 = vrot.slane %v1154_v52, 10  ;;  %v6699_v30 = vld [vmem:[%s8056_s4 + $0x18] sm:$0xe]  ;;  %v6700_v49 = vld [vmem:[%s8056_s4 + $0x1c] sm:$0x1] }
  0x81   : > { %v6688_v2 = vcombine.low %v3909_v46, %v3923_v25  ;;  %7291 = vmatprep.mubr.msk.bf16.mxu1 %vm249_vm2, %v6249_v61  ;;  %v3944_v8 = vrot.slane %v3942_v63, 5  ;;  %v1211_v11 = vrot.slane %v1155_v60, 6  ;;  %v6238_v13 = vrot.slane %v1156_v0, 10  ;;  %v6701_v52 = vld [vmem:[%s8056_s4 + $0x20] sm:$0xe]  ;;  %v7933_v61 = vld [vmem:[%s9218_s1 + $0xc8] sm:$0xff]  }
  0x82   : > { %7298 = vmatpush3.bf16.msra.mxu1 %v7923_v21  ;;  %v3950_v12 = vrot.slane %v3948_v5, 5  ;;  %v1215_v14 = vrot.slane %v1157_v1, 6  ;;  %v3932_v17 = vrot.slane %v3931_v7, 4  ;;  %v6677_v21 = vld [vmem:[%s8056_s4 + $0x50] sm:$0xf]  ;;  %v3953_v22 = vshrl.u32 %v6675_v15, 16 }
  0x83   : > { %7299 = vmatprep.subr.bf16.mxu1 %v7925_v42  ;;  %7480 = vmatmul.mubr.msk.bf16.vlgmr.msra.gmra.mrb[0].mxu0 %vm249_vm2, %v6688_v2  ;;  %v3945_v18 = vor.u32 %v3944_v8, %v3941_v4  ;;  %v1212_v19 = vsel %vm8268_vm12, %v6237_v10, %v1211_v11  ;;  %v3956_v27 = vshll.u32 %v6675_v15, 16  ;;  %v3962_v28 = vshll.u32 %v6676_v20, 16  ;;  %v7930_v63 = vld [vmem:[%s8056_s4 + $0x18] ss:$8 sps:$4 sm:$0xff]   ;;  %v6703_v2 = vld [vmem:[%s8056_s4 + $0x28] sm:$0xe] }
  0x84   : > { %7488 = vmatpush3.bf16.msra.mxu0 %v8419_v56  ;;  %v1216_v23 = vsel %vm8268_vm12, %v6238_v13, %v1215_v14  ;;  %v3967_v29 = vshrl.u32 %v6677_v21, 16  ;;  %v7931_v56 = vld [vmem:[%s9218_s1 + $0xc0] sm:$0xff]   ;;  %v3937_v31 = vsel %vm8147_vm8, %v3932_v17, %v3936_v3  ;;  %v3955_v35 = vrot.slane %v3953_v22, 4  ;;  %v6704_v3 = vld [vmem:[%s8056_s4 + $0x2c] sm:$0x1]  ;;  %v7937_v11 = vld [vmem:[%s9218_s1 + $0xd0] sm:$0xff]  }
  0x85   : > { %7489 = vmatprep.subr.bf16.mxu0 %v7924_v54  ;;  %v3946_v33 = vrot.slane %v3945_v18, 4  ;;  %v6250_v34 = vcombine.low %v1212_v19, %v1216_v23  ;;  %v3958_v36 = vrot.slane %v3956_v27, 5  ;;  %v3970_v38 = vshll.u32 %v6677_v21, 16  ;;  %v6706_v7 = vld [vmem:[%s8056_s4 + $0x34] sm:$0x1] }
  0x86   : > { %7300 = vmatpush3.bf16.msra.mxu1 %v7925_v42  ;;  %v3969_v37 = vrot.slane %v3967_v29, 4  ;;  %v3976_v40 = vshll.u32 %v6678_v24, 16  ;;  %v3964_v43 = vrot.slane %v3962_v28, 5  ;;  %v6715_v55 = vrot.slane %v6699_v30, 9  ;;  %v6707_v17 = vld [vmem:[%s8056_s4 + $0x38] sm:$0xe] }
  0x87   : > { %7301 = vmatprep.subr.bf16.mxu1 %v7927_v6  ;;  %v3951_v39 = vsel %vm8147_vm8, %v3946_v33, %v3950_v12  ;;  %7292 = vmatmul.mubr.msk.bf16.gmra.mrb[4].mxu1 %vm249_vm2, %v6250_v34  ;;  %v3959_v42 = vor.u32 %v3958_v36, %v3955_v35  ;;  %v3972_v44 = vrot.slane %v3970_v38, 5  ;;  %v4160_v57 = vrot.slane %v6700_v49, 5  ;;  %v6708_v18 = vld [vmem:[%s8056_s4 + $0x3c] sm:$0x1]  ;;  %v6709_v19 = vld [vmem:[%s8056_s4 + $0x40] sm:$0xe] }
  0x88   : > { %7490 = vmatpush3.bf16.msra.mxu0 %v7924_v54  ;;  %v6689_v53 = vcombine.low %v3937_v31, %v3951_v39  ;;  %v3978_v47 = vrot.slane %v3976_v40, 5  ;;  %7303 = vmatprep.mubr.msk.bf16.mxu1 %vm249_vm2, %v7929_v32  ;;  %v6702_v54 = vld [vmem:[%s8056_s4 + $0x24] sm:$0x1]  ;;  %v6716_v60 = vrot.slane %v6701_v52, 9  ;;  %v6717_v8 = vrot.slane %v6703_v2, 9  ;;  %v7934_v24 = vld [vmem:[%s9218_s1 + $0x248] sm:$0xff]  }
  0x89   : > { %7491 = vmatprep.subr.bf16.mxu0 %v7926_v16  ;;  %v3960_v45 = vrot.slane %v3959_v42, 4  ;;  %v3973_v46 = vor.u32 %v3972_v44, %v3969_v37  ;;  %v4164_v25 = vrot.slane %v6702_v54, 5  ;;  %v4161_v62 = vsel %vm8062_vm3, %v6715_v55, %v4160_v57  ;;  %v6710_v20 = vld [vmem:[%s8056_s4 + $0x44] sm:$0x1]  ;;  %v7939_v29 = vld [vmem:[%s9218_s1 + $0xd8] sm:$0xff]   ;;  %v7938_v42 = vld [vmem:[%s9218_s1 + $0x250] sm:$0xff]  }
  0x8a   : > { %7302 = vmatpush3.bf16.msra.mxu1 %v7927_v6  ;;  %7483 = vmatprep.mubr.msk.bf16.mxu0 %vm249_vm2, %v6689_v53  ;;  %v6705_v6 = vld [vmem:[%s8056_s4 + $0x30] sm:$0xe]  ;;  %v4168_v10 = vrot.slane %v6704_v3, 5  ;;  %v4172_v13 = vrot.slane %v6706_v7, 5  ;;  %v6719_v21 = vrot.slane %v6707_v17, 9  ;;  %v4176_v22 = vrot.slane %v6708_v18, 5 }
  0x8b   : > { %7311 = vmatprep.subr.bf16.mxu1 %v7931_v56  ;;  %v3965_v58 = vsel %vm8147_vm8, %v3960_v45, %v3964_v43  ;;  %v3974_v59 = vrot.slane %v3973_v46, 4  ;;  %v4165_v1 = vsel %vm8062_vm3, %v6716_v60, %v4164_v25  ;;  %v6718_v12 = vrot.slane %v6705_v6, 9  ;;  %v7936_v31 = vld [vmem:[%s8056_s4 + $0x38] ss:$8 sps:$4 sm:$0xff]   ;;  %v6711_v34 = vld [vmem:[%s8056_s4 + $0x48] sm:$0xe] }
  0x8c   : > { %7492 = vmatpush3.bf16.msra.mxu0 %v7926_v16  ;;  %v6731_v5 = vcombine.low %v4161_v62, %v4165_v1  ;;  %v4169_v14 = vsel %vm8062_vm3, %v6717_v8, %v4168_v10  ;;  %v7935_v16 = vld [vmem:[%s8056_s4 + $0x28] ss:$8 sps:$4 sm:$0xff]   ;;  %v6720_v27 = vrot.slane %v6709_v19, 9  ;;  %v4180_v28 = vrot.slane %v6710_v20, 5  ;;  %v6712_v35 = vld [vmem:[%s8056_s4 + $0x4c] sm:$0x1] }
  0x8d   : > { %7493 = vmatprep.subr.bf16.mxu0 %v7928_v41  ;;  %v3979_v0 = vsel %vm8147_vm8, %v3974_v59, %v3978_v47  ;;  %v4173_v15 = vsel %vm8062_vm3, %v6718_v12, %v4172_v13  ;;  %v6713_v36 = vld [vmem:[%s8056_s4 + $0x50] sm:$0xe]  ;;  %v6714_v38 = vld [vmem:[%s8056_s4 + $0x54] sm:$0x1]  ;;  %v6721_v39 = vrot.slane %v6711_v34, 9  ;;  %v4184_v40 = vrot.slane %v6712_v35, 5 }
  0x8e   : > { %v6690_v4 = vcombine.low %v3965_v58, %v3979_v0  ;;  %v6732_v23 = vcombine.low %v4169_v14, %v4173_v15  ;;  %v4181_v33 = vsel %vm8062_vm3, %v6720_v27, %v4180_v28  ;;  %v4188_v53 = vrot.slane %v6714_v38, 5  ;;  %v8600_v43 = vld [vmem:[%s9218_s1 + $0xe0] sm:$0xff]   ;;  %v6287_v45 = vld [vmem:[%s8056_s4 + $0x8] sm:$0xf]  ;;  %v6288_v46 = vld [vmem:[%s8056_s4 + $0xc] sm:$0x1] }
  0x8f   : > { %7304 = vmatmul.mubr.msk.bf16.vlgmr.msra.gmra.mrb[0].mxu1 %vm249_vm2, %v7930_v63  ;;  %v4185_v44 = vsel %vm8062_vm3, %v6721_v39, %v4184_v40  ;;  %v6289_v30 = vld [vmem:[%s8056_s4 + $0x10] sm:$0xf]  ;;  %v6290_v49 = vld [vmem:[%s8056_s4 + $0x14] sm:$0x1]  ;;  %v1543_v52 = vshrl.u32 %v6287_v45, 16  ;;  %v1552_v54 = vshll.u32 %v6288_v46, 16 }
  0x90   : > { %7494 = vmatpush3.bf16.msra.mxu0 %v7928_v41  ;;  %7312 = vmatpush3.bf16.msra.mxu1 %v7931_v56  ;;  %v4177_v56 = vsel %vm8062_vm3, %v6719_v21, %v4176_v22  ;;  %v6722_v41 = vrot.slane %v6713_v36, 9  ;;  %v1557_v55 = vshrl.u32 %v6289_v30, 16  ;;  %v1560_v57 = vshll.u32 %v6289_v30, 16  ;;  %v6743_v59 = vld [vmem:[%s8056_s4 + $0x18] sm:$0xe]  ;;  %v8624_v14 = vld [vmem:[%s9218_s1 + $0x260] sm:$0xff]  }
  0x91   : > { %7503 = vmatprep.subr.bf16.mxu0 %v8539_v50  ;;  %7484 = vmatmul.mubr.msk.bf16.gmra.mrb[4].mxu0 %vm249_vm2, %v6690_v4  ;;  %v6733_v37 = vcombine.low %v4177_v56, %v4181_v33  ;;  %v1566_v58 = vshll.u32 %v6290_v49, 16  ;;  %v1545_v60 = vrot.slane %v1543_v52, 4  ;;  %v6745_v62 = vld [vmem:[%s8056_s4 + $0x20] sm:$0xe]  ;;  %v7940_v63 = vld [vmem:[%s9218_s1 + $0x258] sm:$0xff]   ;;  %v1554_v0 = vrot.slane %v1552_v54, 5 }
  0x92   : > { %7313 = vmatprep.subr.bf16.mxu1 %v7933_v61  ;;  %7495 = vmatprep.mubr.msk.bf16.mxu0 %vm249_vm2, %v6731_v5  ;;  %v4189_v32 = vsel %vm8062_vm3, %v6722_v41, %v4188_v53  ;;  %v1559_v1 = vrot.slane %v1557_v55, 4  ;;  %v1562_v2 = vrot.slane %v1560_v57, 5  ;;  %v4353_v5 = vshrl.u32 %v6743_v59, 16  ;;  %v6746_v10 = vld [vmem:[%s8056_s4 + $0x24] sm:$0x3] }
  0x93   : > { %7307 = vmatprep.mubr.msk.bf16.mxu1 %vm249_vm2, %v7935_v16  ;;  %v6734_v47 = vcombine.low %v4185_v44, %v4189_v32  ;;  %v1568_v3 = vrot.slane %v1566_v58, 5  ;;  %v4356_v6 = vshll.u32 %v6743_v59, 16  ;;  %v4371_v12 = vshrl.u32 %v6745_v62, 16  ;;  %v6291_v19 = vld [vmem:[%s8056_s4 + $0x18] sm:$0xf] }
  0x94   : > { %7314 = vmatpush3.bf16.msra.mxu1 %v7933_v61  ;;  %v6744_v61 = vld [vmem:[%s8056_s4 + $0x1c] sm:$0x3]  ;;  %v1563_v8 = vor.u32 %v1562_v2, %v1559_v1  ;;  %v4374_v13 = vshll.u32 %v6745_v62, 16  ;;  %v4355_v16 = vrot.slane %v4353_v5, 5  ;;  %v4383_v56 = vshll.u32 %v6746_v10, 16 }
  0x95   : > { %7315 = vmatprep.subr.bf16.mxu1 %v7937_v11  ;;  %v4362_v7 = vshrl.u32 %v6744_v61, 16  ;;  %v4358_v17 = vrot.slane %v4356_v6, 6  ;;  %v4373_v22 = vrot.slane %v4371_v12, 5  ;;  %v6293_v35 = vld [vmem:[%s8056_s4 + $0x20] sm:$0xf]  ;;  %v1574_v32 = vshll.u32 %v6291_v19, 16 }
  0x96   : > { %v1564_v20 = vrot.slane %v1563_v8, 4  ;;  %v6294_v36 = vld [vmem:[%s8056_s4 + $0x24] sm:$0x1]  ;;  %v4385_v41 = vrot.slane %v4383_v56, 6  ;;  %v6747_v53 = vld [vmem:[%s8056_s4 + $0x28] sm:$0xe] }
  0x97   : > { %7308 = vmatmul.mubr.msk.bf16.gmra.mrb[4].mxu1 %vm249_vm2, %v7936_v31  ;;  %v4364_v18 = vrot.slane %v4362_v7, 5  ;;  %v4359_v28 = vor.u32 %v4358_v17, %v4355_v16  ;;  %v6748_v46 = vld [vmem:[%s8056_s4 + $0x2c] sm:$0x3]  ;;  %v1585_v49 = vshrl.u32 %v6293_v35, 16  ;;  %v1588_v52 = vshll.u32 %v6293_v35, 16 }
  0x98   : > { %7316 = vmatpush3.bf16.msra.mxu1 %v7937_v11  ;;  %v4365_v11 = vshll.u32 %v6744_v61, 16  ;;  %v1569_v31 = vsel %vm8147_vm8, %v1564_v20, %v1568_v3  ;;  %v6750_v54 = vld [vmem:[%s8056_s4 + $0x34] sm:$0x3]  ;;  %v1576_v55 = vrot.slane %v1574_v32, 5  ;;  %v1594_v58 = vshll.u32 %v6294_v36, 16 }
  0x99   : > { %7496 = vmatmul.mubr.msk.bf16.vlgmr.msra.gmra.mrb[0].mxu0 %vm249_vm2, %v6732_v23  ;;  %7317 = vmatprep.subr.bf16.mxu1 %v7939_v29  ;;  %v4376_v23 = vrot.slane %v4374_v13, 6  ;;  %v4360_v39 = vrot.slane %v4359_v28, 4  ;;  %v4389_v59 = vshrl.u32 %v6747_v53, 16  ;;  %v1590_v61 = vrot.slane %v1588_v52, 5  ;;  %v6295_v12 = vld [vmem:[%s8056_s4 + $0x28] sm:$0xf] }
  0x9a   : > { %7504 = vmatpush3.bf16.msra.mxu0 %v8539_v50  ;;  %7499 = vmatprep.mubr.msk.bf16.mxu0 %vm249_vm2, %v6733_v37  ;;  %v1546_v50 = vshll.u32 %v6287_v45, 16  ;;  %v4367_v21 = vrot.slane %v4365_v11, 6  ;;  %v1571_v37 = vshrl.u32 %v6291_v19, 16  ;;  %v4392_v62 = vshll.u32 %v6747_v53, 16  ;;  %v6753_v52 = vld [vmem:[%s8056_s4 + $0x40] sm:$0xe] }
  0x9b   : > { %7505 = vmatprep.subr.bf16.mxu0 %v7934_v24  ;;  %v4377_v34 = vor.u32 %v4376_v23, %v4373_v22  ;;  %v1596_v1 = vrot.slane %v1594_v58, 5  ;;  %v4391_v2 = vrot.slane %v4389_v59, 5  ;;  %v4398_v5 = vshrl.u32 %v6748_v46, 16  ;;  %v6297_v23 = vld [vmem:[%s8056_s4 + $0x30] sm:$0xf] }
  0x9c   : > { %7318 = vmatpush3.bf16.msra.mxu1 %v7939_v29  ;;  %v1548_v25 = vrot.slane %v1546_v50, 5  ;;  %v4380_v29 = vshrl.u32 %v6746_v10, 16  ;;  %v4368_v33 = vor.u32 %v4367_v21, %v4364_v18  ;;  %v1573_v44 = vrot.slane %v1571_v37, 4  ;;  %v6749_v50 = vld [vmem:[%s8056_s4 + $0x30] sm:$0xe] }
  0x9d   : > { %7327 = vmatprep.subr.bf16.mxu1 %v8600_v43  ;;  %v4401_v6 = vshll.u32 %v6748_v46, 16  ;;  %v4407_v8 = vshrl.u32 %v6749_v50, 16  ;;  %v4410_v10 = vshll.u32 %v6749_v50, 16  ;;  %v4416_v11 = vshrl.u32 %v6750_v54, 16  ;;  %v6296_v18 = vld [vmem:[%s8056_s4 + $0x2c] sm:$0x1] }
  0x9e   : > { %7506 = vmatpush3.bf16.msra.mxu0 %v7934_v24  ;;  %v1549_v4 = vor.u32 %v1548_v25, %v1545_v60  ;;  %v6292_v24 = vld [vmem:[%s8056_s4 + $0x1c] sm:$0x1]  ;;  %v4382_v40 = vrot.slane %v4380_v29, 5  ;;  %v1587_v25 = vrot.slane %v1585_v49, 4  ;;  %v4400_v16 = vrot.slane %v4398_v5, 5  ;;  %v7945_v59 = vld [vmem:[%s9218_s1 + $0xf0] sm:$0xff]  }
  0x9f   : > { %7507 = vmatprep.subr.bf16.mxu0 %v7938_v42  ;;  %v1580_v45 = vshll.u32 %v6292_v24, 16  ;;  %v4403_v17 = vrot.slane %v4401_v6, 6  ;;  %v4409_v20 = vrot.slane %v4407_v8, 5  ;;  %v4412_v21 = vrot.slane %v4410_v10, 6  ;;  %v6300_v8 = vld [vmem:[%s8056_s4 + $0x3c] sm:$0x1] }
  0xa0   : > { %v1550_v15 = vrot.slane %v1549_v4, 4  ;;  %v4386_v30 = vor.u32 %v4385_v41, %v4382_v40  ;;  %v1591_v3 = vor.u32 %v1590_v61, %v1587_v25  ;;  %v4394_v4 = vrot.slane %v4392_v62, 6  ;;  %v6751_v41 = vld [vmem:[%s8056_s4 + $0x38] sm:$0xe] }
  0xa1   : > { %7500 = vmatmul.mubr.msk.bf16.gmra.mrb[4].mxu0 %vm249_vm2, %v6734_v47  ;;  %v4369_v47 = vsel %vm8167_vm9, %v4360_v39, %v4368_v33  ;;  %v1582_v57 = vrot.slane %v1580_v45, 5  ;;  %v4418_v22 = vrot.slane %v4416_v11, 5  ;;  %v4404_v28 = vor.u32 %v4403_v17, %v4400_v16  ;;  %v7943_v33 = vld [vmem:[%s9218_s1 + $0xe8] sm:$0xff]   ;;  %v6752_v45 = vld [vmem:[%s8056_s4 + $0x3c] sm:$0x3] }
  0xa2   : > { %7508 = vmatpush3.bf16.msra.mxu0 %v7938_v42  ;;  %v1555_v27 = vsel %vm8147_vm8, %v1550_v15, %v1554_v0  ;;  %v4378_v42 = vrot.slane %v4377_v34, 4  ;;  %v1577_v0 = vor.u32 %v1576_v55, %v1573_v44  ;;  %v1592_v13 = vrot.slane %v1591_v3, 4  ;;  %v6298_v34 = vld [vmem:[%s8056_s4 + $0x34] sm:$0x1]  ;;  %v6754_v55 = vld [vmem:[%s8056_s4 + $0x44] sm:$0x3] }
  0xa3   : > { %7509 = vmatprep.subr.bf16.mxu0 %v7940_v63  ;;  %v6311_v38 = vcombine.low %v1555_v27, %v1569_v31  ;;  %v4395_v15 = vor.u32 %v4394_v4, %v4391_v2  ;;  %v4419_v29 = vshll.u32 %v6750_v54, 16  ;;  %v4413_v31 = vor.u32 %v4412_v21, %v4409_v20  ;;  %v6299_v3 = vld [vmem:[%s8056_s4 + $0x38] sm:$0xf]  ;;  %v6302_v21 = vld [vmem:[%s8056_s4 + $0x44] sm:$0x1] }
  0xa4   : > { %v4387_v60 = vsel %vm8167_vm9, %v4378_v42, %v4386_v30  ;;  %v1578_v7 = vrot.slane %v1577_v0, 4  ;;  %v1597_v24 = vsel %vm8147_vm8, %v1592_v13, %v1596_v1  ;;  %v1599_v35 = vshrl.u32 %v6295_v12, 16  ;;  %v7947_v16 = vld [vmem:[%s9218_s1 + $0xf8] sm:$0xff]  }
  0xa5   : > { %7319 = vmatprep.mubr.msk.bf16.mxu1 %vm249_vm2, %v6311_v38  ;;  %v4396_v27 = vrot.slane %v4395_v15, 4  ;;  %v1602_v36 = vshll.u32 %v6295_v12, 16  ;;  %v4421_v38 = vrot.slane %v4419_v29, 6  ;;  %v1608_v39 = vshll.u32 %v6296_v18, 16  ;;  %v6301_v15 = vld [vmem:[%s8056_s4 + $0x40] sm:$0xf] }
  0xa6   : > { %7510 = vmatpush3.bf16.msra.mxu0 %v7940_v63  ;;  %v6767_v63 = vcombine.low %v4369_v47, %v4387_v60  ;;  %v1583_v19 = vsel %vm8147_vm8, %v1578_v7, %v1582_v57  ;;  %v1613_v40 = vshrl.u32 %v6297_v23, 16  ;;  %v4414_v53 = vrot.slane %v4413_v31, 4  ;;  %v7946_v29 = vld [vmem:[%s9218_s1 + $0x270] sm:$0xff]  }
  0xa7   : > { %7519 = vmatprep.subr.bf16.mxu0 %v8624_v14  ;;  %v6312_v56 = vcombine.low %v1583_v19, %v1597_v24  ;;  %v4405_v37 = vsel %vm8167_vm9, %v4396_v27, %v4404_v28  ;;  %v1601_v42 = vrot.slane %v1599_v35, 4  ;;  %v1604_v44 = vrot.slane %v1602_v36, 5  ;;  %v6755_v28 = vld [vmem:[%s8056_s4 + $0x48] sm:$0xe] }
  0xa8   : > { %7511 = vmatprep.mubr.msk.bf16.mxu0 %vm249_vm2, %v6767_v63  ;;  %v1616_v32 = vshll.u32 %v6297_v23, 16  ;;  %v4422_v46 = vor.u32 %v4421_v38, %v4418_v22  ;;  %v1610_v47 = vrot.slane %v1608_v39, 5  ;;  %v1615_v30 = vrot.slane %v1613_v40, 4  ;;  %v8693_v39 = vld [vmem:[%s9218_s1 + $0x100] sm:$0xff]  }
  0xa9   : > { %7320 = vmatmul.mubr.msk.bf16.vlgmr.msra.gmra.mrb[0].mxu1 %vm249_vm2, %v6312_v56  ;;  %v1622_v49 = vshll.u32 %v6298_v34, 16  ;;  %v1605_v50 = vor.u32 %v1604_v44, %v1601_v42  ;;  %v4425_v57 = vshrl.u32 %v6751_v41, 16  ;;  %v4428_v58 = vshll.u32 %v6751_v41, 16  ;;  %v6756_v34 = vld [vmem:[%s8056_s4 + $0x4c] sm:$0x3] }
  0xaa   : > { %7328 = vmatpush3.bf16.msra.mxu1 %v8600_v43  ;;  %v1618_v54 = vrot.slane %v1616_v32, 5  ;;  %v4423_v60 = vsel %vm8167_vm9, %v4414_v53, %v4422_v46  ;;  %v7944_v43 = vld [vmem:[%s9218_s1 + $0x268] sm:$0xff]   ;;  %v4434_v61 = vshrl.u32 %v6752_v45, 16  ;;  %v4437_v62 = vshll.u32 %v6752_v45, 16 }
  0xab   : > { %7329 = vmatprep.subr.bf16.mxu1 %v7943_v33  ;;  %v1624_v25 = vrot.slane %v1622_v49, 5  ;;  %v6768_v63 = vcombine.low %v4405_v37, %v4423_v60  ;;  %v1606_v0 = vrot.slane %v1605_v50, 4  ;;  %v4427_v2 = vrot.slane %v4425_v57, 5 }
  0xac   : > { %v1619_v1 = vor.u32 %v1618_v54, %v1615_v30  ;;  %v4430_v4 = vrot.slane %v4428_v58, 6  ;;  %v4436_v5 = vrot.slane %v4434_v61, 5  ;;  %v4439_v6 = vrot.slane %v4437_v62, 6  ;;  %v6758_v58 = vld [vmem:[%s8056_s4 + $0x54] sm:$0x3] }
  0xad   : > { %v4443_v7 = vshrl.u32 %v6753_v52, 16  ;;  %7512 = vmatmul.mubr.msk.bf16.vlgmr.msra.gmra.mrb[0].mxu0 %vm249_vm2, %v6768_v63  ;;  %v1611_v10 = vsel %vm8147_vm8, %v1606_v0, %v1610_v47  ;;  %v4446_v12 = vshll.u32 %v6753_v52, 16  ;;  %v4452_v13 = vshrl.u32 %v6754_v55, 16  ;;  %v7948_v47 = vld [vmem:[%s9218_s1 + $0x278] sm:$0xff]   ;;  %v6757_v52 = vld [vmem:[%s8056_s4 + $0x50] sm:$0xe] }
  0xae   : > { %7330 = vmatpush3.bf16.msra.mxu1 %v7943_v33  ;;  %v1620_v11 = vrot.slane %v1619_v1, 4  ;;  %7520 = vmatpush3.bf16.msra.mxu0 %v8624_v14  ;;  %v4431_v17 = vor.u32 %v4430_v4, %v4427_v2  ;;  %v4440_v18 = vor.u32 %v4439_v6, %v4436_v5  ;;  %v4455_v20 = vshll.u32 %v6754_v55, 16  ;;  %v6323_v0 = vld [vmem:[%s8056_s4 + $0x8] sm:$0xe]  ;;  %v6324_v1 = vld [vmem:[%s8056_s4 + $0xc] sm:$0x1] }
  0xaf   : > { %7331 = vmatprep.subr.bf16.mxu1 %v7945_v59  ;;  %v4445_v19 = vrot.slane %v4443_v7, 5  ;;  %7521 = vmatprep.subr.bf16.mxu0 %v7944_v43  ;;  %v4448_v23 = vrot.slane %v4446_v12, 6  ;;  %v4454_v24 = vrot.slane %v4452_v13, 5  ;;  %v1627_v27 = vshrl.u32 %v6299_v3, 16  ;;  %v6325_v6 = vld [vmem:[%s8056_s4 + $0x10] sm:$0xe] }
  0xb0   : > { %v1625_v22 = vsel %vm8147_vm8, %v1620_v11, %v1624_v25  ;;  %v4432_v14 = vrot.slane %v4431_v17, 4  ;;  %v4457_v31 = vrot.slane %v4455_v20, 6  ;;  %v1630_v33 = vshll.u32 %v6299_v3, 16  ;;  %v6326_v7 = vld [vmem:[%s8056_s4 + $0x14] sm:$0x1] }
  0xb1   : > { %v6313_v56 = vcombine.low %v1611_v10, %v1625_v22  ;;  %v4449_v35 = vor.u32 %v4448_v23, %v4445_v19  ;;  %v1629_v36 = vrot.slane %v1627_v27, 4  ;;  %v1636_v37 = vshll.u32 %v6300_v8, 16  ;;  %v6779_v8 = vld [vmem:[%s8056_s4 + $0x18] sm:$0xc]  ;;  %v6781_v20 = vld [vmem:[%s8056_s4 + $0x20] sm:$0xc] }
  0xb2   : > { %7332 = vmatpush3.bf16.msra.mxu1 %v7945_v59  ;;  %v1641_v38 = vshrl.u32 %v6301_v15, 16  ;;  %7522 = vmatpush3.bf16.msra.mxu0 %v7944_v43  ;;  %v4441_v40 = vsel %vm8167_vm9, %v4432_v14, %v4440_v18  ;;  %v4458_v41 = vor.u32 %v4457_v31, %v4454_v24  ;;  %v1632_v53 = vrot.slane %v1630_v33, 5  ;;  %v8709_v43 = vld [vmem:[%s9218_s1 + $0x280] sm:$0xff]  }
  0xb3   : > { %7333 = vmatprep.subr.bf16.mxu1 %v7947_v16  ;;  %7323 = vmatprep.mubr.msk.bf16.mxu1 %vm249_vm2, %v6313_v56  ;;  %v1644_v42 = vshll.u32 %v6301_v15, 16  ;;  %v4450_v44 = vrot.slane %v4449_v35, 4  ;;  %v1638_v32 = vrot.slane %v1636_v37, 5  ;;  %v1650_v46 = vshll.u32 %v6302_v21, 16  ;;  %v6780_v15 = vld [vmem:[%s8056_s4 + $0x1c] sm:$0x3] }
  0xb4   : > { %v1643_v45 = vrot.slane %v1641_v38, 4  ;;  %7523 = vmatprep.subr.bf16.mxu0 %v7946_v29  ;;  %v1633_v30 = vor.u32 %v1632_v53, %v1629_v36  ;;  %v4461_v50 = vshrl.u32 %v6755_v28, 16  ;;  %v4464_v54 = vshll.u32 %v6755_v28, 16  ;;  %v6782_v21 = vld [vmem:[%s8056_s4 + $0x24] sm:$0x3] }
  0xb5   : > { %v1646_v49 = vrot.slane %v1644_v42, 5  ;;  %v4459_v55 = vsel %vm8167_vm9, %v4450_v44, %v4458_v41  ;;  %v1652_v57 = vrot.slane %v1650_v46, 5  ;;  %v4470_v59 = vshrl.u32 %v6756_v34, 16  ;;  %v6327_v28 = vld [vmem:[%s8056_s4 + $0x18] sm:$0xe] }
  0xb6   : > { %7334 = vmatpush3.bf16.msra.mxu1 %v7947_v16  ;;  %v4473_v60 = vshll.u32 %v6756_v34, 16  ;;  %v6769_v25 = vcombine.low %v4441_v40, %v4459_v55  ;;  %v1634_v61 = vrot.slane %v1633_v30, 4  ;;  %v4463_v63 = vrot.slane %v4461_v50, 5  ;;  %7524 = vmatpush3.bf16.msra.mxu0 %v7946_v29  ;;  %v6328_v29 = vld [vmem:[%s8056_s4 + $0x1c] sm:$0x1] }
  0xb7   : > { %7343 = vmatprep.subr.bf16.mxu1 %v8693_v39  ;;  %v1647_v62 = vor.u32 %v1646_v49, %v1643_v45  ;;  %v4466_v2 = vrot.slane %v4464_v54, 6  ;;  %v4472_v3 = vrot.slane %v4470_v59, 5  ;;  %v4479_v5 = vshrl.u32 %v6757_v52, 16  ;;  %7525 = vmatprep.subr.bf16.mxu0 %v7948_v47  ;;  %v6329_v34 = vld [vmem:[%s8056_s4 + $0x20] sm:$0xe] }
  0xb8   : > { %v4475_v4 = vrot.slane %v4473_v60, 6  ;;  %7515 = vmatprep.mubr.msk.bf16.mxu0 %vm249_vm2, %v6769_v25  ;;  %v1639_v10 = vsel %vm8147_vm8, %v1634_v61, %v1638_v32  ;;  %v4482_v12 = vshll.u32 %v6757_v52, 16  ;;  %v4488_v13 = vshrl.u32 %v6758_v58, 16  ;;  %v6330_v40 = vld [vmem:[%s8056_s4 + $0x24] sm:$0x1] }
  0xb9   : > { %v1648_v11 = vrot.slane %v1647_v62, 4  ;;  %v4467_v16 = vor.u32 %v4466_v2, %v4463_v63  ;;  %v4481_v18 = vrot.slane %v4479_v5, 5  ;;  %v4491_v19 = vshll.u32 %v6758_v58, 16  ;;  %v6783_v30 = vld [vmem:[%s8056_s4 + $0x28] sm:$0xc] }
  0xba   : > { %v4476_v17 = vor.u32 %v4475_v4, %v4472_v3  ;;  %v4484_v23 = vrot.slane %v4482_v12, 6  ;;  %v4490_v24 = vrot.slane %v4488_v13, 5  ;;  %7526 = vmatpush3.bf16.msra.mxu0 %v7948_v47  ;;  %v6339_v27 = vrot.slane %v6323_v0, 9  ;;  %v6784_v55 = vld [vmem:[%s8056_s4 + $0x2c] sm:$0x3] }
  0xbb   : > { %v1653_v22 = vsel %vm8147_vm8, %v1648_v11, %v1652_v57  ;;  %v4468_v14 = vrot.slane %v4467_v16, 4  ;;  %v4493_v31 = vrot.slane %v4491_v19, 6  ;;  %v1834_v33 = vrot.slane %v6324_v1, 5  ;;  %7535 = vmatprep.subr.bf16.mxu0 %v8709_v43  ;;  %v6785_v57 = vld [vmem:[%s8056_s4 + $0x30] sm:$0xc] }
  0xbc   : > { %v6314_v56 = vcombine.low %v1639_v10, %v1653_v22  ;;  %v4485_v35 = vor.u32 %v4484_v23, %v4481_v18  ;;  %v6340_v36 = vrot.slane %v6325_v6, 9  ;;  %v1838_v37 = vrot.slane %v6326_v7, 5  ;;  %v6786_v61 = vld [vmem:[%s8056_s4 + $0x34] sm:$0x3]  ;;  %v7951_v6 = vld [vmem:[%s9218_s1 + $0x108] sm:$0xff]  }
  0xbd   : > { %v6795_v38 = vrot.slane %v6779_v8, 10  ;;  %v4477_v41 = vsel %vm8167_vm9, %v4468_v14, %v4476_v17  ;;  %v4494_v53 = vor.u32 %v4493_v31, %v4490_v24  ;;  %v1835_v42 = vsel %vm8062_vm3, %v6339_v27, %v1834_v33  ;;  %v6331_v8 = vld [vmem:[%s8056_s4 + $0x28] sm:$0xe]  ;;  %v6332_v12 = vld [vmem:[%s8056_s4 + $0x2c] sm:$0x1]  ;;  %v7953_v24 = vld [vmem:[%s9218_s1 + $0x110] sm:$0xff]  }
  0xbe   : > { %7324 = vmatmul.mubr.msk.bf16.gmra.mrb[4].mxu1 %vm249_vm2, %v6314_v56  ;;  %v4676_v44 = vrot.slane %v6780_v15, 6  ;;  %v4486_v32 = vrot.slane %v4485_v35, 4  ;;  %v1839_v45 = vsel %vm8062_vm3, %v6340_v36, %v1838_v37  ;;  %v6796_v46 = vrot.slane %v6781_v20, 10  ;;  %v6333_v13 = vld [vmem:[%s8056_s4 + $0x30] sm:$0xe] }
  0xbf   : > { %v4680_v47 = vrot.slane %v6782_v21, 6  ;;  %v6355_v49 = vcombine.low %v1835_v42, %v1839_v45  ;;  %v6341_v50 = vrot.slane %v6327_v28, 9  ;;  %v1842_v54 = vrot.slane %v6328_v29, 5  ;;  %v6334_v15 = vld [vmem:[%s8056_s4 + $0x34] sm:$0x1]  ;;  %v7952_v28 = vld [vmem:[%s9218_s1 + $0x288] sm:$0xff]  }
  0xc0   : > { %v4677_v52 = vsel %vm8268_vm12, %v6795_v38, %v4676_v44  ;;  %v4495_v58 = vsel %vm8167_vm9, %v4486_v32, %v4494_v53  ;;  %v6342_v60 = vrot.slane %v6329_v34, 9  ;;  %v1846_v25 = vrot.slane %v6330_v40, 5  ;;  %v6787_v19 = vld [vmem:[%s8056_s4 + $0x38] sm:$0xc]  ;;  %v6788_v21 = vld [vmem:[%s8056_s4 + $0x3c] sm:$0x3] }
  0xc1   : > { %v4681_v59 = vsel %vm8268_vm12, %v6796_v46, %v4680_v47  ;;  %v6770_v62 = vcombine.low %v4477_v41, %v4495_v58  ;;  %7335 = vmatprep.mubr.msk.bf16.mxu1 %vm249_vm2, %v6355_v49  ;;  %v1843_v0 = vsel %vm8062_vm3, %v6341_v50, %v1842_v54  ;;  %v6797_v1 = vrot.slane %v6783_v30, 10  ;;  %v6789_v22 = vld [vmem:[%s8056_s4 + $0x40] sm:$0xc]  ;;  %v6790_v29 = vld [vmem:[%s8056_s4 + $0x44] sm:$0x3]  ;;  %v7955_v46 = vld [vmem:[%s9218_s1 + $0x118] sm:$0xff]  }
  0xc2   : > { %v6811_v63 = vcombine.low %v4677_v52, %v4681_v59  ;;  %v1847_v2 = vsel %vm8062_vm3, %v6342_v60, %v1846_v25  ;;  %v4684_v3 = vrot.slane %v6784_v55, 6  ;;  %v6798_v4 = vrot.slane %v6785_v57, 10  ;;  %v6335_v31 = vld [vmem:[%s8056_s4 + $0x38] sm:$0xe]  ;;  %v6336_v35 = vld [vmem:[%s8056_s4 + $0x3c] sm:$0x1] }
  0xc3   : > { %v4688_v5 = vrot.slane %v6786_v61, 6  ;;  %7516 = vmatmul.mubr.msk.bf16.gmra.mrb[4].mxu0 %vm249_vm2, %v6770_v62  ;;  %v6356_v7 = vcombine.low %v1843_v0, %v1847_v2  ;;  %v6343_v16 = vrot.slane %v6331_v8, 9  ;;  %v1850_v17 = vrot.slane %v6332_v12, 5  ;;  %v6337_v36 = vld [vmem:[%s8056_s4 + $0x40] sm:$0xe]  ;;  %v7954_v59 = vld [vmem:[%s9218_s1 + $0x290] sm:$0xff]  }
  0xc4   : > { %7527 = vmatprep.mubr.msk.bf16.mxu0 %vm249_vm2, %v6811_v63  ;;  %v4685_v10 = vsel %vm8268_vm12, %v6797_v1, %v4684_v3  ;;  %v6344_v18 = vrot.slane %v6333_v13, 9  ;;  %v1854_v20 = vrot.slane %v6334_v15, 5  ;;  %v6799_v23 = vrot.slane %v6787_v19, 10  ;;  %v6338_v41 = vld [vmem:[%s8056_s4 + $0x44] sm:$0x1]  ;;  %v7956_v3 = vld [vmem:[%s9218_s1 + $0x298] sm:$0xff]  }
  0xc5   : > { %v4689_v11 = vsel %vm8268_vm12, %v6798_v4, %v4688_v5  ;;  %v4692_v56 = vrot.slane %v6788_v21, 6  ;;  %v6800_v14 = vrot.slane %v6789_v22, 10  ;;  %v4696_v34 = vrot.slane %v6790_v29, 6  ;;  %v6791_v45 = vld [vmem:[%s8056_s4 + $0x48] sm:$0xc]  ;;  %v8809_v25 = vld [vmem:[%s9218_s1 + $0x120] sm:$0xff]  }
  0xc6   : > { %7336 = vmatmul.mubr.msk.bf16.vlgmr.msra.gmra.mrb[0].mxu1 %vm249_vm2, %v6356_v7  ;;  %v6812_v27 = vcombine.low %v4685_v10, %v4689_v11  ;;  %v1855_v33 = vsel %vm8062_vm3, %v6344_v18, %v1854_v20  ;;  %v6345_v37 = vrot.slane %v6335_v31, 9  ;;  %v1858_v53 = vrot.slane %v6336_v35, 5  ;;  %v6792_v49 = vld [vmem:[%s8056_s4 + $0x4c] sm:$0x3]  ;;  %v6793_v52 = vld [vmem:[%s8056_s4 + $0x50] sm:$0xc] }
  0xc7   : > { %7344 = vmatpush3.bf16.msra.mxu1 %v8693_v39  ;;  %v1851_v39 = vsel %vm8062_vm3, %v6343_v16, %v1850_v17  ;;  %v4693_v40 = vsel %vm8268_vm12, %v6799_v23, %v4692_v56  ;;  %v6346_v42 = vrot.slane %v6337_v36, 9  ;;  %v4697_v44 = vsel %vm8268_vm12, %v6800_v14, %v4696_v34  ;;  %v6794_v50 = vld [vmem:[%s8056_s4 + $0x54] sm:$0x3]  ;;  %v6367_v63 = vld [vmem:[%s8056_s4 + $0x8] sm:$0xe] }
  0xc8   : > { %7345 = vmatprep.subr.bf16.mxu1 %v7951_v6  ;;  %v6357_v38 = vcombine.low %v1851_v39, %v1855_v33  ;;  %v1862_v32 = vrot.slane %v6338_v41, 5  ;;  %v6813_v47 = vcombine.low %v4693_v40, %v4697_v44  ;;  %v1859_v30 = vsel %vm8062_vm3, %v6345_v37, %v1858_v53  ;;  %v6368_v0 = vld [vmem:[%s8056_s4 + $0xc] sm:$0x3]  ;;  %v6369_v1 = vld [vmem:[%s8056_s4 + $0x10] sm:$0xe]  ;;  %v7960_v39 = vld [vmem:[%s9218_s1 + $0x2a0] sm:$0xff]  }
  0xc9   : > { %v6801_v55 = vrot.slane %v6791_v45, 10  ;;  %v4700_v57 = vrot.slane %v6792_v49, 6  ;;  %v6802_v58 = vrot.slane %v6793_v52, 10  ;;  %v6370_v4 = vld [vmem:[%s8056_s4 + $0x14] sm:$0x3]  ;;  %v2027_v5 = vshrl.u32 %v6367_v63, 16 }
  0xca   : > { %7339 = vmatprep.mubr.msk.bf16.mxu1 %vm249_vm2, %v6357_v38  ;;  %v1863_v54 = vsel %vm8062_vm3, %v6346_v42, %v1862_v32  ;;  %v2036_v7 = vshrl.u32 %v6368_v0, 16  ;;  %v2039_v8 = vshll.u32 %v6368_v0, 16  ;;  %v2045_v10 = vshrl.u32 %v6369_v1, 16  ;;  %v7957_v22 = vld [vmem:[%s8056_s4 + $0x20] ss:$8 sps:$4 sm:$0xff]  }
  0xcb   : > { %7346 = vmatpush3.bf16.msra.mxu1 %v7951_v6  ;;  %7528 = vmatmul.mubr.msk.bf16.vlgmr.msra.gmra.mrb[0].mxu0 %vm249_vm2, %v6812_v27  ;;  %v6358_v60 = vcombine.low %v1859_v30, %v1863_v54  ;;  %v4701_v61 = vsel %vm8268_vm12, %v6801_v55, %v4700_v57  ;;  %v2030_v6 = vshll.u32 %v6367_v63, 16  ;;  %v2048_v11 = vshll.u32 %v6369_v1, 16  ;;  %v6371_v27 = vld [vmem:[%s8056_s4 + $0x18] sm:$0xe]  ;;  %v6373_v14 = vld [vmem:[%s8056_s4 + $0x20] sm:$0xe] }
  0xcc   : > { %7536 = vmatpush3.bf16.msra.mxu0 %v8709_v43  ;;  %7347 = vmatprep.subr.bf16.mxu1 %v7953_v24  ;;  %v4704_v43 = vrot.slane %v6794_v50, 6  ;;  %v2054_v12 = vshrl.u32 %v6370_v4, 16  ;;  %v2029_v13 = vrot.slane %v2027_v5, 5  ;;  %v2038_v16 = vrot.slane %v2036_v7, 5  ;;  %v6374_v31 = vld [vmem:[%s8056_s4 + $0x24] sm:$0x3] }
  0xcd   : > { %7537 = vmatprep.subr.bf16.mxu0 %v7952_v28  ;;  %7531 = vmatprep.mubr.msk.bf16.mxu0 %vm249_vm2, %v6813_v47  ;;  %v2032_v15 = vrot.slane %v2030_v6, 6  ;;  %v2057_v17 = vshll.u32 %v6370_v4, 16  ;;  %v2041_v18 = vrot.slane %v2039_v8, 6  ;;  %v2047_v19 = vrot.slane %v2045_v10, 5  ;;  %v7962_v47 = vld [vmem:[%s9218_s1 + $0x2a8] sm:$0xff]   ;;  %v7966_v63 = vld [vmem:[%s9218_s1 + $0x2b0] sm:$0xff]  }
  0xce   : > { %7340 = vmatmul.mubr.msk.bf16.gmra.mrb[4].mxu1 %vm249_vm2, %v6358_v60  ;;  %v4705_v62 = vsel %vm8268_vm12, %v6802_v58, %v4704_v43  ;;  %v2050_v20 = vrot.slane %v2048_v11, 6  ;;  %v2056_v21 = vrot.slane %v2054_v12, 5  ;;  %v2063_v33 = vshrl.u32 %v6371_v27, 16  ;;  %v7959_v54 = vld [vmem:[%s8056_s4 + $0x30] ss:$8 sps:$4 sm:$0xff]  }
  0xcf   : > { %7348 = vmatpush3.bf16.msra.mxu1 %v7953_v24  ;;  %v6814_v2 = vcombine.low %v4701_v61, %v4705_v62  ;;  %v2033_v23 = vor.u32 %v2032_v15, %v2029_v13  ;;  %v2059_v24 = vrot.slane %v2057_v17, 6  ;;  %v2042_v29 = vor.u32 %v2041_v18, %v2038_v16  ;;  %v6375_v1 = vld [vmem:[%s8056_s4 + $0x28] sm:$0xe]  ;;  %v6378_v6 = vld [vmem:[%s8056_s4 + $0x34] sm:$0x3] }
  0xd0   : > { %7349 = vmatprep.subr.bf16.mxu1 %v7955_v46  ;;  %7538 = vmatpush3.bf16.msra.mxu0 %v7952_v28  ;;  %v6372_v28 = vld [vmem:[%s8056_s4 + $0x1c] sm:$0x3]  ;;  %v2051_v56 = vor.u32 %v2050_v20, %v2047_v19  ;;  %v2066_v34 = vshll.u32 %v6371_v27, 16  ;;  %v2065_v41 = vrot.slane %v2063_v33, 5  ;;  %v2081_v42 = vshrl.u32 %v6373_v14, 16  ;;  %v7961_v16 = vld [vmem:[%s9218_s1 + $0x128] sm:$0xff]  }
  0xd1   : > { %7539 = vmatprep.subr.bf16.mxu0 %v7954_v59  ;;  %v2034_v35 = vrot.slane %v2033_v23, 4  ;;  %v2060_v36 = vor.u32 %v2059_v24, %v2056_v21  ;;  %v2072_v37 = vshrl.u32 %v6372_v28, 16  ;;  %v2075_v38 = vshll.u32 %v6372_v28, 16  ;;  %v7963_v24 = vld [vmem:[%s8056_s4 + $0x40] ss:$8 sps:$4 sm:$0xff]   ;;  %v7968_v27 = vld [vmem:[%s9218_s1 + $0x2b8] sm:$0xff]  }
  0xd2   : > { %v2052_v40 = vrot.slane %v2051_v56, 4  ;;  %v2068_v53 = vrot.slane %v2066_v34, 6  ;;  %v2083_v52 = vrot.slane %v2081_v42, 5  ;;  %v2090_v50 = vshrl.u32 %v6374_v31, 16  ;;  %v6380_v33 = vld [vmem:[%s8056_s4 + $0x3c] sm:$0x3] }
  0xd3   : > { %7350 = vmatpush3.bf16.msra.mxu1 %v7955_v46  ;;  %7532 = vmatmul.mubr.msk.bf16.gmra.mrb[4].mxu0 %vm249_vm2, %v6814_v2  ;;  %v2043_v44 = vsel %vm8167_vm9, %v2034_v35, %v2042_v29  ;;  %v2074_v32 = vrot.slane %v2072_v37, 5  ;;  %v2077_v45 = vrot.slane %v2075_v38, 6  ;;  %v2084_v46 = vshll.u32 %v6373_v14, 16  ;;  %v6376_v2 = vld [vmem:[%s8056_s4 + $0x2c] sm:$0x3] }
  0xd4   : > { %7359 = vmatprep.subr.bf16.mxu1 %v8809_v25  ;;  %7540 = vmatpush3.bf16.msra.mxu0 %v7954_v59  ;;  %v2061_v30 = vsel %vm8167_vm9, %v2052_v40, %v2060_v36  ;;  %v2069_v49 = vor.u32 %v2068_v53, %v2065_v41  ;;  %v2093_v59 = vshll.u32 %v6374_v31, 16  ;;  %v2092_v43 = vrot.slane %v2090_v50, 5  ;;  %v6379_v14 = vld [vmem:[%s8056_s4 + $0x38] sm:$0xe]  ;;  %v6381_v34 = vld [vmem:[%s8056_s4 + $0x40] sm:$0xe] }
  0xd5   : > { %7541 = vmatprep.subr.bf16.mxu0 %v7956_v3  ;;  %7543 = vmatprep.mubr.msk.bf16.mxu0 %vm249_vm2, %v7957_v22  ;;  %v6391_v55 = vcombine.low %v2043_v44, %v2061_v30  ;;  %v2078_v57 = vor.u32 %v2077_v45, %v2074_v32  ;;  %v2086_v58 = vrot.slane %v2084_v46, 6  ;;  %v2099_v7 = vshrl.u32 %v6375_v1, 16  ;;  %v6382_v35 = vld [vmem:[%s8056_s4 + $0x44] sm:$0x3]  ;;  %v7964_v36 = vld [vmem:[%s9218_s1 + $0x130] sm:$0xff]  }
  0xd6   : > { %v2070_v60 = vrot.slane %v2069_v49, 4  ;;  %v2095_v62 = vrot.slane %v2093_v59, 6  ;;  %v2102_v8 = vshll.u32 %v6375_v1, 16  ;;  %v2108_v10 = vshrl.u32 %v6376_v2, 16  ;;  %v8875_v53 = vld [vmem:[%s9218_s1 + $0x2c0] sm:$0xff]  }
  0xd7   : > { %7351 = vmatprep.mubr.msk.bf16.mxu1 %vm249_vm2, %v6391_v55  ;;  %v2087_v61 = vor.u32 %v2086_v58, %v2083_v52  ;;  %v2111_v11 = vshll.u32 %v6376_v2, 16  ;;  %v2101_v17 = vrot.slane %v2099_v7, 5  ;;  %v2126_v19 = vshrl.u32 %v6378_v6, 16  ;;  %v7965_v55 = vld [vmem:[%s8056_s4 + $0x50] ss:$8 sps:$4 sm:$0xff]  }
  0xd8   : > { %7542 = vmatpush3.bf16.msra.mxu0 %v7956_v3  ;;  %v2079_v0 = vsel %vm8167_vm9, %v2070_v60, %v2078_v57  ;;  %v6377_v3 = vld [vmem:[%s8056_s4 + $0x30] sm:$0xe]  ;;  %v2096_v5 = vor.u32 %v2095_v62, %v2092_v43  ;;  %v2104_v18 = vrot.slane %v2102_v8, 6  ;;  %v2110_v21 = vrot.slane %v2108_v10, 5  ;;  %v7967_v43 = vld [vmem:[%s9218_s1 + $0x138] sm:$0xff]  }
  0xd9   : > { %7551 = vmatprep.subr.bf16.mxu0 %v7960_v39  ;;  %v2088_v4 = vrot.slane %v2087_v61, 4  ;;  %v2117_v12 = vshrl.u32 %v6377_v3, 16  ;;  %v2120_v13 = vshll.u32 %v6377_v3, 16  ;;  %v2113_v22 = vrot.slane %v2111_v11, 6  ;;  %v6404_v7 = vld [vmem:[%s8056_s4 + $0xc] sm:$0x3] }
  0xda   : > { %v2105_v28 = vor.u32 %v2104_v18, %v2101_v17  ;;  %v2128_v29 = vrot.slane %v2126_v19, 5  ;;  %v2129_v56 = vshll.u32 %v6378_v6, 16  ;;  %v2135_v41 = vshrl.u32 %v6379_v14, 16  ;;  %v6405_v8 = vld [vmem:[%s8056_s4 + $0x10] sm:$0xc] }
  0xdb   : > { %7544 = vmatmul.mubr.msk.bf16.vlgmr.msra.gmra.mrb[0].mxu0 %vm249_vm2, %v7959_v54  ;;  %v2097_v15 = vsel %vm8167_vm9, %v2088_v4, %v2096_v5  ;;  %v2119_v23 = vrot.slane %v2117_v12, 5  ;;  %v2114_v31 = vor.u32 %v2113_v22, %v2110_v21  ;;  %v2138_v42 = vshll.u32 %v6379_v14, 16  ;;  %v6403_v4 = vld [vmem:[%s8056_s4 + $0x8] sm:$0xc]  ;;  %v6406_v10 = vld [vmem:[%s8056_s4 + $0x14] sm:$0x3] }
  0xdc   : > { %7552 = vmatpush3.bf16.msra.mxu0 %v7960_v39  ;;  %v6392_v20 = vcombine.low %v2079_v0, %v2097_v15  ;;  %v2122_v39 = vrot.slane %v2120_v13, 6  ;;  %7547 = vmatprep.mubr.msk.bf16.mxu0 %vm249_vm2, %v7963_v24  ;;  %v2106_v37 = vrot.slane %v2105_v28, 4  ;;  %v2131_v40 = vrot.slane %v2129_v56, 6  ;;  %v6851_v15 = vld [vmem:[%s8056_s4 + $0x20] sm:$0xf] }
  0xdd   : > { %7553 = vmatprep.subr.bf16.mxu0 %v7962_v47  ;;  %v2144_v44 = vshrl.u32 %v6380_v33, 16  ;;  %v2147_v32 = vshll.u32 %v6380_v33, 16  ;;  %v2153_v45 = vshrl.u32 %v6381_v34, 16  ;;  %v2137_v30 = vrot.slane %v2135_v41, 5  ;;  %v6853_v21 = vld [vmem:[%s8056_s4 + $0x28] sm:$0xf] }
  0xde   : > { %7352 = vmatmul.mubr.msk.bf16.vlgmr.msra.gmra.mrb[0].mxu1 %vm249_vm2, %v6392_v20  ;;  %v2123_v38 = vor.u32 %v2122_v39, %v2119_v23  ;;  %v2140_v49 = vrot.slane %v2138_v42, 6  ;;  %v2156_v58 = vshll.u32 %v6381_v34, 16  ;;  %v2162_v59 = vshrl.u32 %v6382_v35, 16  ;;  %v6852_v20 = vld [vmem:[%s8056_s4 + $0x24] sm:$0x1] }
  0xdf   : > { %7360 = vmatpush3.bf16.msra.mxu1 %v8809_v25  ;;  %v2115_v25 = vsel %vm8167_vm9, %v2106_v37, %v2114_v31  ;;  %v2146_v52 = vrot.slane %v2144_v44, 5  ;;  %v2149_v50 = vrot.slane %v2147_v32, 6  ;;  %v2155_v54 = vrot.slane %v2153_v45, 5  ;;  %v6854_v23 = vld [vmem:[%s8056_s4 + $0x2c] sm:$0x1] }
  0xe0   : > { %7554 = vmatpush3.bf16.msra.mxu0 %v7962_v47  ;;  %7361 = vmatprep.subr.bf16.mxu1 %v7961_v16  ;;  %v2124_v46 = vrot.slane %v2123_v38, 4  ;;  %v2132_v47 = vor.u32 %v2131_v40, %v2128_v29  ;;  %v2165_v60 = vshll.u32 %v6382_v35, 16  ;;  %v2141_v62 = vor.u32 %v2140_v49, %v2137_v30  ;;  %v6407_v31 = vld [vmem:[%s8056_s4 + $0x18] sm:$0xc]  ;;  %v6408_v33 = vld [vmem:[%s8056_s4 + $0x1c] sm:$0x3] }
  0xe1   : > { %7555 = vmatprep.subr.bf16.mxu0 %v7966_v63  ;;  %v2158_v0 = vrot.slane %v2156_v58, 6  ;;  %v2164_v1 = vrot.slane %v2162_v59, 5  ;;  %v6419_v11 = vrot.slane %v6403_v4, 10  ;;  %v2350_v12 = vrot.slane %v6404_v7, 6  ;;  %v6409_v38 = vld [vmem:[%s8056_s4 + $0x20] sm:$0xc] }
  0xe2   : > { %v2133_v57 = vsel %vm8167_vm9, %v2124_v46, %v2132_v47  ;;  %v2167_v2 = vrot.slane %v2165_v60, 6  ;;  %v2142_v3 = vrot.slane %v2141_v62, 4  ;;  %v6420_v13 = vrot.slane %v6405_v8, 10  ;;  %v6410_v40 = vld [vmem:[%s8056_s4 + $0x24] sm:$0x3]  ;;  %v7971_v7 = vld [vmem:[%s9218_s1 + $0x148] sm:$0xff]  }
  0xe3   : > { %7362 = vmatpush3.bf16.msra.mxu1 %v7961_v16  ;;  %v6393_v61 = vcombine.low %v2115_v25, %v2133_v57  ;;  %7548 = vmatmul.mubr.msk.bf16.gmra.mrb[4].mxu0 %vm249_vm2, %v7965_v55  ;;  %v2159_v5 = vor.u32 %v2158_v0, %v2155_v54  ;;  %v8896_v16 = vld [vmem:[%s9218_s1 + $0x140] sm:$0xff]   ;;  %v2354_v19 = vrot.slane %v6406_v10, 6  ;;  %v2351_v22 = vsel %vm8268_vm12, %v6419_v11, %v2350_v12  ;;  %v6856_v54 = vld [vmem:[%s8056_s4 + $0x34] sm:$0x1]  ;;  %v6857_v58 = vld [vmem:[%s8056_s4 + $0x38] sm:$0xf] }
  0xe4   : > { %7556 = vmatpush3.bf16.msra.mxu0 %v7966_v63  ;;  %7363 = vmatprep.subr.bf16.mxu1 %v7964_v36  ;;  %v2150_v63 = vor.u32 %v2149_v50, %v2146_v52  ;;  %v2168_v6 = vor.u32 %v2167_v2, %v2164_v1  ;;  %v5032_v24 = vshrl.u32 %v6851_v15, 16  ;;  %v5041_v28 = vshll.u32 %v6852_v20, 16  ;;  %v6855_v50 = vld [vmem:[%s8056_s4 + $0x30] sm:$0xf]  ;;  %v6858_v59 = vld [vmem:[%s8056_s4 + $0x3c] sm:$0x1] }
  0xe5   : > { %7557 = vmatprep.subr.bf16.mxu0 %v7968_v27  ;;  %7355 = vmatprep.mubr.msk.bf16.mxu1 %vm249_vm2, %v6393_v61  ;;  %v2160_v18 = vrot.slane %v2159_v5, 4  ;;  %v2355_v29 = vsel %vm8268_vm12, %v6420_v13, %v2354_v19  ;;  %v5046_v56 = vshrl.u32 %v6853_v21, 16  ;;  %v5049_v14 = vshll.u32 %v6853_v21, 16  ;;  %v6413_v20 = vld [vmem:[%s8056_s4 + $0x30] sm:$0xc] }
  0xe6   : > { %v2151_v17 = vsel %vm8167_vm9, %v2142_v3, %v2150_v63  ;;  %v6435_v35 = vcombine.low %v2351_v22, %v2355_v29  ;;  %v5043_v41 = vrot.slane %v5041_v28, 5  ;;  %v5055_v32 = vshll.u32 %v6854_v23, 16  ;;  %v6414_v21 = vld [vmem:[%s8056_s4 + $0x34] sm:$0x3] }
  0xe7   : > { %7364 = vmatpush3.bf16.msra.mxu1 %v7964_v36  ;;  %v2169_v39 = vsel %vm8167_vm9, %v2160_v18, %v2168_v6  ;;  %v5034_v36 = vrot.slane %v5032_v24, 4  ;;  %v5048_v42 = vrot.slane %v5046_v56, 4  ;;  %v5051_v44 = vrot.slane %v5049_v14, 5  ;;  %v6412_v18 = vld [vmem:[%s8056_s4 + $0x2c] sm:$0x3]  ;;  %v7973_v29 = vld [vmem:[%s9218_s1 + $0x150] sm:$0xff]  }
  0xe8   : > { %7558 = vmatpush3.bf16.msra.mxu0 %v7968_v27  ;;  %7365 = vmatprep.subr.bf16.mxu1 %v7967_v43  ;;  %v5035_v27 = vshll.u32 %v6851_v15, 16  ;;  %v6394_v34 = vcombine.low %v2151_v17, %v2169_v39  ;;  %v6421_v25 = vrot.slane %v6407_v31, 10  ;;  %v2358_v46 = vrot.slane %v6408_v33, 6  ;;  %v6411_v17 = vld [vmem:[%s8056_s4 + $0x28] sm:$0xc] }
  0xe9   : > { %7567 = vmatprep.subr.bf16.mxu0 %v8875_v53  ;;  %v6422_v47 = vrot.slane %v6409_v38, 10  ;;  %v5052_v30 = vor.u32 %v5051_v44, %v5048_v42  ;;  %v5057_v49 = vrot.slane %v5055_v32, 5  ;;  %v2362_v52 = vrot.slane %v6410_v40, 6  ;;  %v6859_v39 = vld [vmem:[%s8056_s4 + $0x40] sm:$0xf]  ;;  %v7972_v40 = vld [vmem:[%s9218_s1 + $0x2c8] sm:$0xff]  }
  0xea   : > { %v5037_v37 = vrot.slane %v5035_v27, 5  ;;  %7356 = vmatmul.mubr.msk.bf16.gmra.mrb[4].mxu1 %vm249_vm2, %v6394_v34  ;;  %v2359_v57 = vsel %vm8268_vm12, %v6421_v25, %v2358_v46  ;;  %v5060_v60 = vshrl.u32 %v6855_v50, 16  ;;  %v5063_v62 = vshll.u32 %v6855_v50, 16  ;;  %v6860_v14 = vld [vmem:[%s8056_s4 + $0x44] sm:$0x1] }
  0xeb   : > { %7366 = vmatpush3.bf16.msra.mxu1 %v7967_v43  ;;  %7367 = vmatprep.mubr.msk.bf16.mxu1 %vm249_vm2, %v6435_v35  ;;  %v5053_v43 = vrot.slane %v5052_v30, 4  ;;  %v2363_v61 = vsel %vm8268_vm12, %v6422_v47, %v2362_v52  ;;  %v5069_v63 = vshll.u32 %v6856_v54, 16  ;;  %v5074_v3 = vshrl.u32 %v6857_v58, 16  ;;  %v6861_v31 = vld [vmem:[%s8056_s4 + $0x48] sm:$0xf] }
  0xec   : > { %7375 = vmatprep.subr.bf16.mxu1 %v8896_v16  ;;  %v5038_v45 = vor.u32 %v5037_v37, %v5034_v36  ;;  %v6436_v1 = vcombine.low %v2359_v57, %v2363_v61  ;;  %v5062_v2 = vrot.slane %v5060_v60, 4  ;;  %v5065_v5 = vrot.slane %v5063_v62, 5  ;;  %v6862_v36 = vld [vmem:[%s8056_s4 + $0x4c] sm:$0x1]  ;;  %v6415_v38 = vld [vmem:[%s8056_s4 + $0x38] sm:$0xc] }
  0xed   : > { %v5058_v4 = vsel %vm8147_vm8, %v5053_v43, %v5057_v49  ;;  %v5077_v6 = vshll.u32 %v6857_v58, 16  ;;  %v5076_v10 = vrot.slane %v5074_v3, 4  ;;  %v5083_v11 = vshll.u32 %v6858_v59, 16  ;;  %v6417_v49 = vld [vmem:[%s8056_s4 + $0x40] sm:$0xc]  ;;  %v7975_v58 = vld [vmem:[%s9218_s1 + $0x158] sm:$0xff]  }
  0xee   : > { %v5039_v55 = vrot.slane %v5038_v45, 4  ;;  %v5066_v12 = vor.u32 %v5065_v5, %v5062_v2  ;;  %v5071_v13 = vrot.slane %v5069_v63, 5  ;;  %v6423_v22 = vrot.slane %v6411_v17, 10  ;;  %v6416_v45 = vld [vmem:[%s8056_s4 + $0x3c] sm:$0x3]  ;;  %v7974_v2 = vld [vmem:[%s9218_s1 + $0x2d0] sm:$0xff]  }
  0xef   : > { %v5079_v15 = vrot.slane %v5077_v6, 5  ;;  %v5085_v19 = vrot.slane %v5083_v11, 5  ;;  %v2366_v27 = vrot.slane %v6412_v18, 6  ;;  %v6424_v28 = vrot.slane %v6413_v20, 10  ;;  %v6418_v52 = vld [vmem:[%s8056_s4 + $0x44] sm:$0x3] }
  0xf0   : > { %v5044_v0 = vsel %vm8147_vm8, %v5039_v55, %v5043_v41  ;;  %v5067_v23 = vrot.slane %v5066_v12, 4  ;;  %v2370_v56 = vrot.slane %v6414_v21, 6  ;;  %v5088_v33 = vshrl.u32 %v6859_v39, 16  ;;  %v6864_v6 = vld [vmem:[%s8056_s4 + $0x54] sm:$0x1] }
  0xf1   : > { %v6875_v8 = vcombine.low %v5044_v0, %v5058_v4  ;;  %v5080_v24 = vor.u32 %v5079_v15, %v5076_v10  ;;  %v5091_v37 = vshll.u32 %v6859_v39, 16  ;;  %v5097_v44 = vshll.u32 %v6860_v14, 16  ;;  %v6866_v11 = vld [vmem:[%s8056_s4 + $0x5c] sm:$0x1] }
  0xf2   : > { %7368 = vmatmul.mubr.msk.bf16.vlgmr.msra.gmra.mrb[0].mxu1 %vm249_vm2, %v6436_v1  ;;  %v5072_v34 = vsel %vm8147_vm8, %v5067_v23, %v5071_v13  ;;  %v2371_v41 = vsel %vm8268_vm12, %v6424_v28, %v2370_v56  ;;  %v5090_v42 = vrot.slane %v5088_v33, 4  ;;  %v5102_v32 = vshrl.u32 %v6861_v31, 16  ;;  %v6863_v1 = vld [vmem:[%s8056_s4 + $0x50] sm:$0xf]  ;;  %v7976_v28 = vld [vmem:[%s9218_s1 + $0x2d8] sm:$0xff]  }
  0xf3   : > { %7559 = vmatprep.mubr.msk.bf16.mxu0 %vm249_vm2, %v6875_v8  ;;  %7376 = vmatpush3.bf16.msra.mxu1 %v8896_v16  ;;  %v5081_v35 = vrot.slane %v5080_v24, 4  ;;  %v2367_v16 = vsel %vm8268_vm12, %v6423_v22, %v2366_v27  ;;  %v5093_v47 = vrot.slane %v5091_v37, 5  ;;  %v5105_v30 = vshll.u32 %v6861_v31, 16  ;;  %v7977_v31 = vld [vmem:[%s8056_s4 + $0x10] ss:$8 sps:$4 sm:$0xff]   ;;  %v8995_v37 = vld [vmem:[%s9218_s1 + $0x2e0] sm:$0xff]  }
  0xf4   : > { %7377 = vmatprep.subr.bf16.mxu1 %v7971_v7  ;;  %v6437_v46 = vcombine.low %v2367_v16, %v2371_v41  ;;  %v5099_v54 = vrot.slane %v5097_v44, 5  ;;  %v5104_v55 = vrot.slane %v5102_v32, 4  ;;  %v5111_v57 = vshll.u32 %v6862_v36, 16  ;;  %v6887_v16 = vld [vmem:[%s8056_s4 + $0x20] sm:$0xe] }
  0xf5   : > { %v5086_v25 = vsel %vm8147_vm8, %v5081_v35, %v5085_v19  ;;  %v5094_v59 = vor.u32 %v5093_v47, %v5090_v42  ;;  %v5107_v60 = vrot.slane %v5105_v30, 5  ;;  %v6425_v43 = vrot.slane %v6415_v38, 10  ;;  %v6888_v36 = vld [vmem:[%s8056_s4 + $0x24] sm:$0x1]  ;;  %v6889_v38 = vld [vmem:[%s8056_s4 + $0x28] sm:$0xe] }
  0xf6   : > { %v6876_v50 = vcombine.low %v5072_v34, %v5086_v25  ;;  %7371 = vmatprep.mubr.msk.bf16.mxu1 %vm249_vm2, %v6437_v46  ;;  %v2374_v61 = vrot.slane %v6416_v45, 6  ;;  %v5113_v62 = vrot.slane %v5111_v57, 5  ;;  %v6426_v63 = vrot.slane %v6417_v49, 10  ;;  %v7981_v46 = vld [vmem:[%s9218_s1 + $0x168] sm:$0xff]  }
  0xf7   : > { %7378 = vmatpush3.bf16.msra.mxu1 %v7971_v7  ;;  %v2378_v0 = vrot.slane %v6418_v52, 6  ;;  %v5095_v3 = vrot.slane %v5094_v59, 4  ;;  %v5108_v4 = vor.u32 %v5107_v60, %v5104_v55  ;;  %v6865_v7 = vld [vmem:[%s8056_s4 + $0x58] sm:$0xf]  ;;  %v5116_v8 = vshrl.u32 %v6863_v1, 16 }
  0xf8   : > { %7379 = vmatprep.subr.bf16.mxu1 %v7973_v29  ;;  %7560 = vmatmul.mubr.msk.bf16.vlgmr.msra.gmra.mrb[0].mxu0 %vm249_vm2, %v6876_v50  ;;  %v2375_v5 = vsel %vm8268_vm12, %v6425_v43, %v2374_v61  ;;  %v5119_v12 = vshll.u32 %v6863_v1, 16  ;;  %v5125_v13 = vshll.u32 %v6864_v6, 16  ;;  %v5130_v15 = vshrl.u32 %v6865_v7, 16  ;;  %v7978_v30 = vld [vmem:[%s8056_s4 + $0x20] ss:$8 sps:$4 sm:$0xff]   ;;  %v7985_v61 = vld [vmem:[%s9218_s1 + $0x170] sm:$0xff]  }
  0xf9   : > { %7568 = vmatpush3.bf16.msra.mxu0 %v8875_v53  ;;  %v2379_v10 = vsel %vm8268_vm12, %v6426_v63, %v2378_v0  ;;  %v7979_v53 = vld [vmem:[%s9218_s1 + $0x160] sm:$0xff]   ;;  %v5100_v17 = vsel %vm8147_vm8, %v5095_v3, %v5099_v54  ;;  %v5109_v18 = vrot.slane %v5108_v4, 4  ;;  %v5118_v20 = vrot.slane %v5116_v8, 4  ;;  %v6891_v50 = vld [vmem:[%s8056_s4 + $0x30] sm:$0xe] }
  0xfa   : > { %7569 = vmatprep.subr.bf16.mxu0 %v7972_v40  ;;  %v6438_v19 = vcombine.low %v2375_v5, %v2379_v10  ;;  %v5121_v21 = vrot.slane %v5119_v12, 5  ;;  %v5132_v22 = vrot.slane %v5130_v15, 4  ;;  %v5133_v23 = vshll.u32 %v6865_v7, 16  ;;  %v6892_v54 = vld [vmem:[%s8056_s4 + $0x34] sm:$0x1]  ;;  %v7987_v15 = vld [vmem:[%s9218_s1 + $0x178] sm:$0xff]  }
  0xfb   : > { %7380 = vmatpush3.bf16.msra.mxu1 %v7973_v29  ;;  %v5114_v24 = vsel %vm8147_vm8, %v5109_v18, %v5113_v62  ;;  %v5139_v27 = vshll.u32 %v6866_v11, 16  ;;  %v5127_v56 = vrot.slane %v5125_v13, 5  ;;  %v6903_v41 = vrot.slane %v6887_v16, 9  ;;  %v6894_v59 = vld [vmem:[%s8056_s4 + $0x3c] sm:$0x1]  ;;  %v7982_v11 = vld [vmem:[%s9218_s1 + $0x2e8] sm:$0xff]  }
  0xfc   : > { %7381 = vmatprep.subr.bf16.mxu1 %v7975_v58  ;;  %7372 = vmatmul.mubr.msk.bf16.gmra.mrb[4].mxu1 %vm249_vm2, %v6438_v19  ;;  %v6877_v39 = vcombine.low %v5100_v17, %v5114_v24  ;;  %v5122_v29 = vor.u32 %v5121_v21, %v5118_v20  ;;  %v5135_v14 = vrot.slane %v5133_v23, 5  ;;  %v5323_v42 = vrot.slane %v6888_v36, 5  ;;  %v6895_v3 = vld [vmem:[%s8056_s4 + $0x40] sm:$0xe]  ;;  %v6896_v4 = vld [vmem:[%s8056_s4 + $0x44] sm:$0x1] }
  0xfd   : > { %7570 = vmatpush3.bf16.msra.mxu0 %v7972_v40  ;;  %v5141_v35 = vrot.slane %v5139_v27, 5  ;;  %7383 = vmatprep.mubr.msk.bf16.mxu1 %vm249_vm2, %v7977_v31  ;;  %v6890_v40 = vld [vmem:[%s8056_s4 + $0x2c] sm:$0x1]  ;;  %v6904_v45 = vrot.slane %v6889_v38, 9  ;;  %v6905_v60 = vrot.slane %v6891_v50, 9  ;;  %v5331_v43 = vrot.slane %v6892_v54, 5 }
  0xfe   : > { %7571 = vmatprep.subr.bf16.mxu0 %v7974_v2  ;;  %7563 = vmatprep.mubr.msk.bf16.mxu0 %vm249_vm2, %v6877_v39  ;;  %v5123_v33 = vrot.slane %v5122_v29, 4  ;;  %v5136_v34 = vor.u32 %v5135_v14, %v5132_v22  ;;  %v5327_v25 = vrot.slane %v6890_v40, 5  ;;  %v5324_v47 = vsel %vm8062_vm3, %v6903_v41, %v5323_v42  ;;  %v6897_v5 = vld [vmem:[%s8056_s4 + $0x48] sm:$0xe]  ;;  %v6898_v6 = vld [vmem:[%s8056_s4 + $0x4c] sm:$0x1] }
  0xff   : > { %7382 = vmatpush3.bf16.msra.mxu1 %v7975_v58  ;;  %v6893_v58 = vld [vmem:[%s8056_s4 + $0x38] sm:$0xe]  ;;  %v5335_v63 = vrot.slane %v6894_v59, 5  ;;  %v5332_v0 = vsel %vm8062_vm3, %v6905_v60, %v5331_v43  ;;  %v6907_v7 = vrot.slane %v6895_v3, 9  ;;  %v5339_v8 = vrot.slane %v6896_v4, 5  ;;  %v7986_v29 = vld [vmem:[%s9218_s1 + $0x2f0] sm:$0xff]  }
 0x100   : > { %7391 = vmatprep.subr.bf16.mxu1 %v7979_v53  ;;  %v5128_v44 = vsel %vm8147_vm8, %v5123_v33, %v5127_v56  ;;  %v5137_v32 = vrot.slane %v5136_v34, 4  ;;  %v5328_v52 = vsel %vm8062_vm3, %v6904_v45, %v5327_v25  ;;  %v6906_v62 = vrot.slane %v6893_v58, 9  ;;  %v7984_v17 = vld [vmem:[%s8056_s4 + $0x40] ss:$8 sps:$4 sm:$0xff]   ;;  %v6899_v19 = vld [vmem:[%s8056_s4 + $0x50] sm:$0xe] }
 0x101   : > { %7572 = vmatpush3.bf16.msra.mxu0 %v7974_v2  ;;  %v6919_v57 = vcombine.low %v5324_v47, %v5328_v52  ;;  %v7983_v2 = vld [vmem:[%s8056_s4 + $0x30] ss:$8 sps:$4 sm:$0xff]   ;;  %v6908_v12 = vrot.slane %v6897_v5, 9  ;;  %v5343_v13 = vrot.slane %v6898_v6, 5  ;;  %v6900_v20 = vld [vmem:[%s8056_s4 + $0x54] sm:$0x1] }
 0x102   : > { %7573 = vmatprep.subr.bf16.mxu0 %v7976_v28  ;;  %v5142_v49 = vsel %vm8147_vm8, %v5137_v32, %v5141_v35  ;;  %v5336_v1 = vsel %vm8062_vm3, %v6906_v62, %v5335_v63  ;;  %v6901_v21 = vld [vmem:[%s8056_s4 + $0x58] sm:$0xe]  ;;  %v6902_v23 = vld [vmem:[%s8056_s4 + $0x5c] sm:$0x1]  ;;  %v6909_v24 = vrot.slane %v6899_v19, 9  ;;  %v5347_v27 = vrot.slane %v6900_v20, 5 }
 0x103   : > { %v6878_v55 = vcombine.low %v5128_v44, %v5142_v49  ;;  %v6920_v10 = vcombine.low %v5332_v0, %v5336_v1  ;;  %v5344_v18 = vsel %vm8062_vm3, %v6908_v12, %v5343_v13  ;;  %v5351_v39 = vrot.slane %v6902_v23, 5  ;;  %v9056_v56 = vld [vmem:[%s9218_s1 + $0x300] sm:$0xff]   ;;  %v6475_v33 = vld [vmem:[%s8056_s4 + $0x10] sm:$0xf]  ;;  %v6476_v34 = vld [vmem:[%s8056_s4 + $0x14] sm:$0x1] }
 0x104   : > { %7384 = vmatmul.mubr.msk.bf16.vlgmr.msra.gmra.mrb[0].mxu1 %vm249_vm2, %v7978_v30  ;;  %v5348_v14 = vsel %vm8062_vm3, %v6909_v24, %v5347_v27  ;;  %v6477_v16 = vld [vmem:[%s8056_s4 + $0x18] sm:$0xf]  ;;  %v6478_v36 = vld [vmem:[%s8056_s4 + $0x1c] sm:$0x1]  ;;  %v2706_v38 = vshrl.u32 %v6475_v33, 16  ;;  %v2715_v40 = vshll.u32 %v6476_v34, 16 }
 0x105   : > { %7574 = vmatpush3.bf16.msra.mxu0 %v7976_v28  ;;  %7392 = vmatpush3.bf16.msra.mxu1 %v7979_v53  ;;  %v5340_v53 = vsel %vm8062_vm3, %v6907_v7, %v5339_v8  ;;  %v6910_v28 = vrot.slane %v6901_v21, 9  ;;  %v2720_v41 = vshrl.u32 %v6477_v16, 16  ;;  %v2723_v42 = vshll.u32 %v6477_v16, 16  ;;  %v6931_v32 = vld [vmem:[%s8056_s4 + $0x20] sm:$0xe]  ;;  %v7988_v47 = vld [vmem:[%s9218_s1 + $0x2f8] sm:$0xff]  }
 0x106   : > { %7583 = vmatprep.subr.bf16.mxu0 %v8995_v37  ;;  %7564 = vmatmul.mubr.msk.bf16.gmra.mrb[4].mxu0 %vm249_vm2, %v6878_v55  ;;  %v6921_v22 = vcombine.low %v5340_v53, %v5344_v18  ;;  %v2729_v44 = vshll.u32 %v6478_v36, 16  ;;  %v2708_v45 = vrot.slane %v2706_v38, 4  ;;  %v6932_v25 = vld [vmem:[%s8056_s4 + $0x24] sm:$0x3]  ;;  %v2717_v30 = vrot.slane %v2715_v40, 5 }
 0x107   : > { %7393 = vmatprep.subr.bf16.mxu1 %v7981_v46  ;;  %7575 = vmatprep.mubr.msk.bf16.mxu0 %vm249_vm2, %v6919_v57  ;;  %v5352_v31 = vsel %vm8062_vm3, %v6910_v28, %v5351_v39  ;;  %v2722_v49 = vrot.slane %v2720_v41, 4  ;;  %v2725_v52 = vrot.slane %v2723_v42, 5  ;;  %v5516_v55 = vshrl.u32 %v6931_v32, 16  ;;  %v6934_v60 = vld [vmem:[%s8056_s4 + $0x2c] sm:$0x3] }
 0x108   : > { %7387 = vmatprep.mubr.msk.bf16.mxu1 %vm249_vm2, %v7983_v2  ;;  %v6922_v35 = vcombine.low %v5348_v14, %v5352_v31  ;;  %v2731_v50 = vrot.slane %v2729_v44, 5  ;;  %v5519_v57 = vshll.u32 %v6931_v32, 16  ;;  %v5525_v58 = vshrl.u32 %v6932_v25, 16  ;;  %v6479_v3 = vld [vmem:[%s8056_s4 + $0x20] sm:$0xf] }
 0x109   : > { %7394 = vmatpush3.bf16.msra.mxu1 %v7981_v46  ;;  %v6933_v46 = vld [vmem:[%s8056_s4 + $0x28] sm:$0xe]  ;;  %v2726_v59 = vor.u32 %v2725_v52, %v2722_v49  ;;  %v5528_v43 = vshll.u32 %v6932_v25, 16  ;;  %v5518_v0 = vrot.slane %v5516_v55, 5  ;;  %v5546_v12 = vshll.u32 %v6934_v60, 16 }
 0x10a   : > { %7395 = vmatprep.subr.bf16.mxu1 %v7985_v61  ;;  %v5537_v62 = vshll.u32 %v6933_v46, 16  ;;  %v5521_v1 = vrot.slane %v5519_v57, 6  ;;  %v5527_v2 = vrot.slane %v5525_v58, 5  ;;  %v6480_v13 = vld [vmem:[%s8056_s4 + $0x24] sm:$0x1]  ;;  %v2734_v20 = vshrl.u32 %v6479_v3, 16 }
 0x10b   : > { %v2727_v4 = vrot.slane %v2726_v59, 4  ;;  %v5530_v5 = vrot.slane %v5528_v43, 6  ;;  %v6482_v19 = vld [vmem:[%s8056_s4 + $0x2c] sm:$0x1]  ;;  %v6935_v21 = vld [vmem:[%s8056_s4 + $0x30] sm:$0xe] }
 0x10c   : > { %7388 = vmatmul.mubr.msk.bf16.gmra.mrb[4].mxu1 %vm249_vm2, %v7984_v17  ;;  %v5539_v7 = vrot.slane %v5537_v62, 6  ;;  %v5548_v27 = vrot.slane %v5546_v12, 6  ;;  %v2736_v39 = vrot.slane %v2734_v20, 4  ;;  %v2743_v14 = vshll.u32 %v6480_v13, 16  ;;  %v6936_v31 = vld [vmem:[%s8056_s4 + $0x34] sm:$0x3] }
 0x10d   : > { %7396 = vmatpush3.bf16.msra.mxu1 %v7985_v61  ;;  %v5534_v61 = vshrl.u32 %v6933_v46, 16  ;;  %v2732_v53 = vsel %vm8147_vm8, %v2727_v4, %v2731_v50  ;;  %v5531_v17 = vor.u32 %v5530_v5, %v5527_v2  ;;  %v6937_v40 = vld [vmem:[%s8056_s4 + $0x38] sm:$0xe]  ;;  %v5552_v41 = vshrl.u32 %v6935_v21, 16  ;;  %v9106_v13 = vld [vmem:[%s9218_s1 + $0x308] sm:$0xff]  }
 0x10e   : > { %7576 = vmatmul.mubr.msk.bf16.vlgmr.msra.gmra.mrb[0].mxu0 %vm249_vm2, %v6920_v10  ;;  %7397 = vmatprep.subr.bf16.mxu1 %v7987_v15  ;;  %v5522_v10 = vor.u32 %v5521_v1, %v5518_v0  ;;  %v2745_v38 = vrot.slane %v2743_v14, 5  ;;  %v5561_v50 = vshrl.u32 %v6936_v31, 16  ;;  %v5570_v57 = vshrl.u32 %v6937_v40, 16  ;;  %v6484_v0 = vld [vmem:[%s8056_s4 + $0x34] sm:$0x1] }
 0x10f   : > { %7584 = vmatpush3.bf16.msra.mxu0 %v8995_v37  ;;  %7579 = vmatprep.mubr.msk.bf16.mxu0 %vm249_vm2, %v6921_v22  ;;  %v2709_v37 = vshll.u32 %v6475_v33, 16  ;;  %v5536_v6 = vrot.slane %v5534_v61, 5  ;;  %v5573_v58 = vshll.u32 %v6937_v40, 16  ;;  %v6485_v5 = vld [vmem:[%s8056_s4 + $0x38] sm:$0xf]  ;;  %v2771_v20 = vshll.u32 %v6484_v0, 16 }
 0x110   : > { %7585 = vmatprep.subr.bf16.mxu0 %v7982_v11  ;;  %v5523_v23 = vrot.slane %v5522_v10, 4  ;;  %v5563_v62 = vrot.slane %v5561_v50, 5  ;;  %v5572_v2 = vrot.slane %v5570_v57, 5  ;;  %v9120_v40 = vld [vmem:[%s9218_s1 + $0x310] sm:$0xff]   ;;  %v6489_v0 = vld [vmem:[%s8056_s4 + $0x48] sm:$0xf] }
 0x111   : > { %7398 = vmatpush3.bf16.msra.mxu1 %v7987_v15  ;;  %v2711_v9 = vrot.slane %v2709_v37, 5  ;;  %v6481_v15 = vld [vmem:[%s8056_s4 + $0x28] sm:$0xf]  ;;  %v5540_v18 = vor.u32 %v5539_v7, %v5536_v6  ;;  %v2757_v37 = vshll.u32 %v6482_v19, 16  ;;  %v2773_v14 = vrot.slane %v2771_v20, 5 }
 0x112   : > { %7615 = vmatprep.subr.bf16.mxu1 %v9056_v56  ;;  %v5532_v33 = vsel %vm8167_vm9, %v5523_v23, %v5531_v17  ;;  %v2751_v16 = vshll.u32 %v6481_v15, 16  ;;  %v2807_v20 = vshll.u32 %v6489_v0, 16 }
 0x113   : > { %7586 = vmatpush3.bf16.msra.mxu0 %v7982_v11  ;;  %v2712_v54 = vor.u32 %v2711_v9, %v2708_v45  ;;  %v5543_v11 = vshrl.u32 %v6934_v60, 16  ;;  %v5541_v28 = vrot.slane %v5540_v18, 4  ;;  %v6938_v45 = vld [vmem:[%s8056_s4 + $0x3c] sm:$0x3]  ;;  %v5555_v9 = vshll.u32 %v6935_v21, 16 }
 0x114   : > { %7587 = vmatprep.subr.bf16.mxu0 %v7986_v29  ;;  %v2753_v32 = vrot.slane %v2751_v16, 5  ;;  %v5579_v59 = vshrl.u32 %v6938_v45, 16  ;;  %v6483_v60 = vld [vmem:[%s8056_s4 + $0x30] sm:$0xf]  ;;  %v5582_v10 = vshll.u32 %v6938_v45, 16  ;;  %v2776_v21 = vshrl.u32 %v6485_v5, 16 }
 0x115   : > { %v2713_v63 = vrot.slane %v2712_v54, 4  ;;  %v5545_v24 = vrot.slane %v5543_v11, 5  ;;  %v5557_v52 = vrot.slane %v5555_v9, 6  ;;  %v5564_v54 = vshll.u32 %v6936_v31, 16  ;;  %v6487_v45 = vld [vmem:[%s8056_s4 + $0x40] sm:$0xf] }
 0x116   : > { %7580 = vmatmul.mubr.msk.bf16.gmra.mrb[4].mxu0 %vm249_vm2, %v6922_v35  ;;  %v2748_v35 = vshrl.u32 %v6481_v15, 16  ;;  %v5581_v4 = vrot.slane %v5579_v59, 5  ;;  %v6486_v15 = vld [vmem:[%s8056_s4 + $0x3c] sm:$0x1]  ;;  %v2765_v17 = vshll.u32 %v6483_v60, 16  ;;  %v5584_v19 = vrot.slane %v5582_v10, 6 }
 0x117   : > { %7588 = vmatpush3.bf16.msra.mxu0 %v7986_v29  ;;  %v2718_v8 = vsel %vm8147_vm8, %v2713_v63, %v2717_v30  ;;  %v2737_v29 = vshll.u32 %v6479_v3, 16  ;;  %v5549_v34 = vor.u32 %v5548_v27, %v5545_v24  ;;  %v5554_v30 = vrot.slane %v5552_v41, 5  ;;  %v9133_v59 = vld [vmem:[%s9218_s1 + $0x318] sm:$0xff]  }
 0x118   : > { %7589 = vmatprep.subr.bf16.mxu0 %v7988_v47  ;;  %v6499_v22 = vcombine.low %v2718_v8, %v2732_v53  ;;  %v2750_v44 = vrot.slane %v2748_v35, 4  ;;  %v5566_v63 = vrot.slane %v5564_v54, 6  ;;  %v5575_v3 = vrot.slane %v5573_v58, 6 }
 0x119   : > { %v2739_v36 = vrot.slane %v2737_v29, 5  ;;  %v5550_v42 = vsel %vm8167_vm9, %v5541_v28, %v5549_v34  ;;  %v5558_v61 = vor.u32 %v5557_v52, %v5554_v30  ;;  %v2762_v53 = vshrl.u32 %v6483_v60, 16  ;;  %v6941_v34 = vld [vmem:[%s8056_s4 + $0x48] sm:$0xe] }
 0x11a   : > { %7399 = vmatprep.mubr.msk.bf16.mxu1 %vm249_vm2, %v6499_v22  ;;  %v6955_v25 = vcombine.low %v5532_v33, %v5550_v42  ;;  %v2754_v49 = vor.u32 %v2753_v32, %v2750_v44  ;;  %v5567_v8 = vor.u32 %v5566_v63, %v5563_v62  ;;  %v5576_v12 = vor.u32 %v5575_v3, %v5572_v2  ;;  %v6939_v22 = vld [vmem:[%s8056_s4 + $0x40] sm:$0xe]  ;;  %v6488_v63 = vld [vmem:[%s8056_s4 + $0x44] sm:$0x1] }
 0x11b   : > { %7590 = vmatpush3.bf16.msra.mxu0 %v7988_v47  ;;  %v2740_v46 = vor.u32 %v2739_v36, %v2736_v39  ;;  %v2759_v47 = vrot.slane %v2757_v37, 5  ;;  %v5559_v7 = vrot.slane %v5558_v61, 4  ;;  %v2764_v24 = vrot.slane %v2762_v53, 4  ;;  %v6940_v39 = vld [vmem:[%s8056_s4 + $0x44] sm:$0x3] }
 0x11c   : > { %7599 = vmatprep.subr.bf16.mxu0 %v9056_v56  ;;  %7591 = vmatprep.mubr.msk.bf16.mxu0 %vm249_vm2, %v6955_v25  ;;  %v2755_v43 = vrot.slane %v2754_v49, 4  ;;  %v5577_v23 = vrot.slane %v5576_v12, 4  ;;  %v2767_v27 = vrot.slane %v2765_v17, 5  ;;  %v2779_v28 = vshll.u32 %v6485_v5, 16  ;;  %v6942_v36 = vld [vmem:[%s8056_s4 + $0x4c] sm:$0x3] }
 0x11d   : > { %v2741_v55 = vrot.slane %v2740_v46, 4  ;;  %v5568_v18 = vsel %vm8167_vm9, %v5559_v7, %v5567_v8  ;;  %v5585_v29 = vor.u32 %v5584_v19, %v5581_v4  ;;  %v2778_v31 = vrot.slane %v2776_v21, 4  ;;  %v6943_v53 = vld [vmem:[%s8056_s4 + $0x50] sm:$0xe]  ;;  %v6944_v21 = vld [vmem:[%s8056_s4 + $0x54] sm:$0x3] }
 0x11e   : > { %v2760_v6 = vsel %vm8147_vm8, %v2755_v43, %v2759_v47  ;;  %v2785_v33 = vshll.u32 %v6486_v15, 16  ;;  %v2768_v35 = vor.u32 %v2767_v27, %v2764_v24  ;;  %v2781_v16 = vrot.slane %v2779_v28, 5 }
 0x11f   : > { %v2746_v1 = vsel %vm8147_vm8, %v2741_v55, %v2745_v38  ;;  %v5588_v38 = vshrl.u32 %v6939_v22, 16  ;;  %v5591_v37 = vshll.u32 %v6939_v22, 16  ;;  %v5586_v41 = vsel %vm8167_vm9, %v5577_v23, %v5585_v29 }
 0x120   : > { %v6500_v11 = vcombine.low %v2746_v1, %v2760_v6  ;;  %v2787_v42 = vrot.slane %v2785_v33, 5  ;;  %v5597_v44 = vshrl.u32 %v6940_v39, 16  ;;  %v5600_v32 = vshll.u32 %v6940_v39, 16 }
 0x121   : > { %v6956_v9 = vcombine.low %v5568_v18, %v5586_v41  ;;  %v2769_v25 = vrot.slane %v2768_v35, 4  ;;  %v2782_v46 = vor.u32 %v2781_v16, %v2778_v31  ;;  %v5590_v47 = vrot.slane %v5588_v38, 5 }
 0x122   : > { %7400 = vmatmul.mubr.msk.bf16.vlgmr.msra.gmra.mrb[0].mxu1 %vm249_vm2, %v6500_v11  ;;  %v5593_v30 = vrot.slane %v5591_v37, 6  ;;  %v5599_v49 = vrot.slane %v5597_v44, 5  ;;  %v5602_v52 = vrot.slane %v5600_v32, 6  ;;  %v5606_v50 = vshrl.u32 %v6941_v34, 16  ;;  %v6968_v44 = vld [vmem:[%s8056_s4 + $0x24] sm:$0x3] }
 0x123   : > { %7619 = vmatpush3.bf16.msra.mxu1 %v9056_v56  ;;  %7592 = vmatmul.mubr.msk.bf16.vlgmr.msra.gmra.mrb[0].mxu0 %vm249_vm2, %v6956_v9  ;;  %v2774_v54 = vsel %vm8147_vm8, %v2769_v25, %v2773_v14  ;;  %v2783_v55 = vrot.slane %v2782_v46, 4  ;;  %v5609_v57 = vshll.u32 %v6941_v34, 16  ;;  %v5615_v58 = vshrl.u32 %v6942_v36, 16  ;;  %v6946_v34 = vld [vmem:[%s8056_s4 + $0x5c] sm:$0x3] }
 0x124   : > { %7616 = vmatprep.subr.bf16.mxu1 %v9106_v13  ;;  %7600 = vmatpush3.bf16.msra.mxu0 %v9056_v56  ;;  %v5594_v60 = vor.u32 %v5593_v30, %v5590_v47  ;;  %v5603_v43 = vor.u32 %v5602_v52, %v5599_v49  ;;  %v5608_v61 = vrot.slane %v5606_v50, 5  ;;  %v5618_v62 = vshll.u32 %v6942_v36, 16  ;;  %v6490_v56 = vld [vmem:[%s8056_s4 + $0x4c] sm:$0x1]  ;;  %v6969_v46 = vld [vmem:[%s8056_s4 + $0x28] sm:$0xc] }
 0x125   : > { %7601 = vmatprep.subr.bf16.mxu0 %v9106_v13  ;;  %v2788_v1 = vsel %vm8147_vm8, %v2783_v55, %v2787_v42  ;;  %v5611_v2 = vrot.slane %v5609_v57, 6  ;;  %v5617_v3 = vrot.slane %v5615_v58, 5  ;;  %v2790_v4 = vshrl.u32 %v6487_v45, 16  ;;  %v6967_v42 = vld [vmem:[%s8056_s4 + $0x20] sm:$0xc] }
 0x126   : > { %v6501_v5 = vcombine.low %v2774_v54, %v2788_v1  ;;  %v5595_v6 = vrot.slane %v5594_v60, 4  ;;  %v5620_v7 = vrot.slane %v5618_v62, 6  ;;  %v2793_v8 = vshll.u32 %v6487_v45, 16  ;;  %v6970_v52 = vld [vmem:[%s8056_s4 + $0x2c] sm:$0x3] }
 0x127   : > { %7620 = vmatpush3.bf16.msra.mxu1 %v9106_v13  ;;  %v5612_v10 = vor.u32 %v5611_v2, %v5608_v61  ;;  %v2792_v11 = vrot.slane %v2790_v4, 4  ;;  %v2799_v12 = vshll.u32 %v6488_v63, 16  ;;  %v2804_v15 = vshrl.u32 %v6489_v0, 16  ;;  %v6971_v58 = vld [vmem:[%s8056_s4 + $0x30] sm:$0xc] }
 0x128   : > { %7617 = vmatprep.subr.bf16.mxu1 %v9120_v40  ;;  %7602 = vmatpush3.bf16.msra.mxu0 %v9106_v13  ;;  %v5604_v17 = vsel %vm8167_vm9, %v5595_v6, %v5603_v43  ;;  %v5621_v18 = vor.u32 %v5620_v7, %v5617_v3  ;;  %v2795_v19 = vrot.slane %v2793_v8, 5  ;;  %v2813_v27 = vshll.u32 %v6490_v56, 16  ;;  %v6945_v13 = vld [vmem:[%s8056_s4 + $0x58] sm:$0xe]  ;;  %v6972_v60 = vld [vmem:[%s8056_s4 + $0x34] sm:$0x3] }
 0x129   : > { %7403 = vmatprep.mubr.msk.bf16.mxu1 %vm249_vm2, %v6501_v5  ;;  %v5613_v22 = vrot.slane %v5612_v10, 4  ;;  %v2801_v23 = vrot.slane %v2799_v12, 5  ;;  %v2806_v24 = vrot.slane %v2804_v15, 4  ;;  %7603 = vmatprep.subr.bf16.mxu0 %v9120_v40  ;;  %v2809_v39 = vrot.slane %v2807_v20, 5  ;;  %v6973_v0 = vld [vmem:[%s8056_s4 + $0x38] sm:$0xc] }
 0x12a   : > { %v2796_v28 = vor.u32 %v2795_v19, %v2792_v11  ;;  %v5624_v29 = vshrl.u32 %v6943_v53, 16  ;;  %v5627_v14 = vshll.u32 %v6943_v53, 16  ;;  %v2815_v33 = vrot.slane %v2813_v27, 5  ;;  %v6974_v1 = vld [vmem:[%s8056_s4 + $0x3c] sm:$0x3] }
 0x12b   : > { %7621 = vmatpush3.bf16.msra.mxu1 %v9120_v40  ;;  %v5622_v31 = vsel %vm8167_vm9, %v5613_v22, %v5621_v18  ;;  %v5633_v35 = vshrl.u32 %v6944_v21, 16  ;;  %v5636_v16 = vshll.u32 %v6944_v21, 16  ;;  %v2810_v37 = vor.u32 %v2809_v39, %v2806_v24  ;;  %v6975_v6 = vld [vmem:[%s8056_s4 + $0x40] sm:$0xc]  ;;  %v6976_v8 = vld [vmem:[%s8056_s4 + $0x44] sm:$0x3] }
 0x12c   : > { %7618 = vmatprep.subr.bf16.mxu1 %v9133_v59  ;;  %v6957_v36 = vcombine.low %v5604_v17, %v5622_v31  ;;  %v2797_v38 = vrot.slane %v2796_v28, 4  ;;  %v5626_v41 = vrot.slane %v5624_v29, 5  ;;  %7604 = vmatpush3.bf16.msra.mxu0 %v9120_v40  ;;  %v5629_v32 = vrot.slane %v5627_v14, 6  ;;  %v6977_v10 = vld [vmem:[%s8056_s4 + $0x48] sm:$0xc] }
 0x12d   : > { %v5635_v45 = vrot.slane %v5633_v35, 5  ;;  %v5638_v9 = vrot.slane %v5636_v16, 6  ;;  %v5642_v25 = vshrl.u32 %v6945_v13, 16  ;;  %7605 = vmatprep.subr.bf16.mxu0 %v9133_v59  ;;  %v2811_v30 = vrot.slane %v2810_v37, 4  ;;  %v6978_v15 = vld [vmem:[%s8056_s4 + $0x4c] sm:$0x3] }
 0x12e   : > { %7595 = vmatprep.mubr.msk.bf16.mxu0 %vm249_vm2, %v6957_v36  ;;  %v2802_v47 = vsel %vm8147_vm8, %v2797_v38, %v2801_v23  ;;  %v5645_v40 = vshll.u32 %v6945_v13, 16  ;;  %v5651_v49 = vshrl.u32 %v6946_v34, 16  ;;  %v5630_v50 = vor.u32 %v5629_v32, %v5626_v41  ;;  %v6979_v53 = vld [vmem:[%s8056_s4 + $0x50] sm:$0xc]  ;;  %v6980_v21 = vld [vmem:[%s8056_s4 + $0x54] sm:$0x3] }
 0x12f   : > { %7622 = vmatpush3.bf16.msra.mxu1 %v9133_v59  ;;  %v5639_v54 = vor.u32 %v5638_v9, %v5635_v45  ;;  %v5644_v55 = vrot.slane %v5642_v25, 5  ;;  %v5654_v57 = vshll.u32 %v6946_v34, 16  ;;  %v2816_v43 = vsel %vm8147_vm8, %v2811_v30, %v2815_v33  ;;  %v6981_v22 = vld [vmem:[%s8056_s4 + $0x58] sm:$0xc]  ;;  %v6982_v39 = vld [vmem:[%s8056_s4 + $0x5c] sm:$0x3] }
 0x130   : > { %v5647_v61 = vrot.slane %v5645_v40, 6  ;;  %v5653_v62 = vrot.slane %v5651_v49, 5  ;;  %7606 = vmatpush3.bf16.msra.mxu0 %v9133_v59  ;;  %v6983_v63 = vrot.slane %v6967_v42, 10  ;;  %v6502_v2 = vcombine.low %v2802_v47, %v2816_v43 }
 0x131   : > { %v5631_v3 = vrot.slane %v5630_v50, 4  ;;  %v5656_v4 = vrot.slane %v5654_v57, 6  ;;  %v5839_v5 = vrot.slane %v6968_v44, 6  ;;  %v6984_v26 = vrot.slane %v6969_v46, 10 }
 0x132   : > { %v5648_v7 = vor.u32 %v5647_v61, %v5644_v55  ;;  %v5843_v56 = vrot.slane %v6970_v52, 6  ;;  %7404 = vmatmul.mubr.msk.bf16.gmra.mrb[4].mxu1 %vm249_vm2, %v6502_v2  ;;  %v6985_v12 = vrot.slane %v6971_v58, 10  ;;  %v5847_v20 = vrot.slane %v6972_v60, 6 }
 0x133   : > { %v5657_v59 = vor.u32 %v5656_v4, %v5653_v62  ;;  %v5840_v11 = vsel %vm8268_vm12, %v6983_v63, %v5839_v5  ;;  %v5640_v17 = vsel %vm8167_vm9, %v5631_v3, %v5639_v54  ;;  %v6986_v23 = vrot.slane %v6973_v0, 10  ;;  %v7011_v62 = vld [vmem:[%s9219_s2] ss:$0 sm:$0xff] }
 0x134   : > { %v5649_v18 = vrot.slane %v5648_v7, 4  ;;  %v5844_v19 = vsel %vm8268_vm12, %v6984_v26, %v5843_v56  ;;  %v5851_v24 = vrot.slane %v6974_v1, 6  ;;  %v6987_v27 = vrot.slane %v6975_v6, 10 }
 0x135   : > { %v5855_v28 = vrot.slane %v6976_v8, 6  ;;  %v6999_v29 = vcombine.low %v5840_v11, %v5844_v19  ;;  %v6988_v14 = vrot.slane %v6977_v10, 10  ;;  %v5859_v31 = vrot.slane %v6978_v15, 6 }
 0x136   : > { %v5658_v13 = vsel %vm8167_vm9, %v5649_v18, %v5657_v59  ;;  %v6989_v35 = vrot.slane %v6979_v53, 10  ;;  %v5863_v36 = vrot.slane %v6980_v21, 6  ;;  %v6990_v38 = vrot.slane %v6981_v22, 10 }
 0x137   : > { %v6958_v33 = vcombine.low %v5640_v17, %v5658_v13  ;;  %v5856_v34 = vsel %vm8268_vm12, %v6987_v27, %v5855_v28  ;;  %v5860_v16 = vsel %vm8268_vm12, %v6988_v14, %v5859_v31  ;;  %v5867_v37 = vrot.slane %v6982_v39, 6 }
 0x138   : > { %v7001_v41 = vcombine.low %v5856_v34, %v5860_v16  ;;  %v5848_v48 = vsel %vm8268_vm12, %v6985_v12, %v5847_v20  ;;  %v5852_v42 = vsel %vm8268_vm12, %v6986_v23, %v5851_v24  ;;  %v5864_v44 = vsel %vm8268_vm12, %v6989_v35, %v5863_v36 }
 0x139   : > { %7596 = vmatmul.mubr.msk.bf16.gmra.mrb[4].mxu0 %vm249_vm2, %v6958_v33  ;;  %v5868_v32 = vsel %vm8268_vm12, %v6990_v38, %v5867_v37  ;;  %v7000_v9 = vcombine.low %v5848_v48, %v5852_v42 }
 0x13a   : > { %7607 = vmatprep.mubr.msk.bf16.mxu0 %vm249_vm2, %v6999_v29  ;;  %7611 = vmatprep.mubr.msk.bf16.mxu1 %vm249_vm2, %v7001_v41  ;;  %v7002_v45 = vcombine.low %v5864_v44, %v5868_v32 }
 0x13c   : > { %7612 = vmatmul.mubr.msk.bf16.vlgmr.msra.gmra.mrb[8].mxu1 %vm249_vm2, %v7002_v45 }
 0x141   : > { %7608 = vmatmul.mubr.msk.bf16.vlgmr.msra.gmra.mrb[0].mxu0 %vm249_vm2, %v7000_v9 }
 0x1f5   : > { %v7401_v25 = vpop.f32.mrb[0].mxu1 }
 0x1f6   : > { %v2908_v46 = vpop.f32.mrb[1].mxu1 }
 0x1f7   : > { %v7402_v47 = vpop.f32.mrb[2].mxu1 }
 0x1f8   : > { %v2911_v30 = vpop.f32.mrb[3].mxu1 }
 0x205   : > { %v7405_v40 = vpop.f32.mrb[4].mxu1 }
 0x206   : > { %v2924_v49 = vpop.f32.mrb[5].mxu1 }
 0x207   : > { %v7406_v52 = vpop.f32.mrb[6].mxu1 }
 0x208   : > { %v2927_v50 = vpop.f32.mrb[7].mxu1 }
 0x20c   : > { %v7597_v54 = vpop.f32.mrb[4].mxu0 }
 0x20d   : > { %v7652_v55 = vadd.f32 %v7597_v54, %v7405_v40  ;;  %v5766_v51 = vpop.f32.mrb[5].mxu0 }
 0x20e   : > { %v7661_v57 = vadd.f32 %v5766_v51, %v2924_v49  ;;  %v7598_v58 = vpop.f32.mrb[6].mxu0 }
 0x20f   : > { %v7670_v60 = vadd.f32 %v7598_v58, %v7406_v52  ;;  %v5769_v43 = vpop.f32.mrb[7].mxu0  ;;  %v7613_v63 = vpop.f32.mrb[8].mxu1 }
 0x210   : > { %v7679_v61 = vadd.f32 %v5769_v43, %v2927_v50  ;;  %v7655_v0 = vadd.f32 %v7652_v55, %v7613_v63  ;;  %v5976_v1 = vpop.f32.mrb[9].mxu1 }
 0x211   : > { %v7664_v2 = vadd.f32 %v7661_v57, %v5976_v1  ;;  %v7614_v3 = vpop.f32.mrb[10].mxu1 }
 0x212   : > { %v6027_v4 = vadd.f32 %v7655_v0, %v7011_v62  ;;  %v7673_v5 = vadd.f32 %v7670_v60, %v7614_v3  ;;  %v5979_v6 = vpop.f32.mrb[11].mxu1 }
 0x213   : > { %v6025_v26 = vadd.f32 %v7664_v2, %v7011_v62  ;;  %v7682_v56 = vadd.f32 %v7679_v61, %v5979_v6 }
 0x214   : > { %v7609_v7 = vpop.f32.mrb[0].mxu0  ;;  %v6035_v59 = vmax.f32 %v6027_v4, 0.0  ;;  %v6028_v11 = vadd.f32 %v7673_v5, %v7011_v62 }
 0x215   : > { %v7628_v8 = vadd.f32 %v7609_v7, %v7401_v25  ;;  %v5960_v10 = vpop.f32.mrb[1].mxu0  ;;  %v6033_v53 = vmax.f32 %v6025_v26, 0.0  ;;  %v6026_v17 = vadd.f32 %v7682_v56, %v7011_v62 }
 0x216   : > { %v7634_v12 = vadd.f32 %v5960_v10, %v2908_v46  ;;  %v7610_v15 = vpop.f32.mrb[2].mxu0  ;;  %6043 = vst [vmem:[#allocation2 + $0x30] sm:$0xff] %v6035_v59  ;;  %v6036_v21 = vmax.f32 %v6028_v11, 0.0 }
 0x217   : > { %v6023_v18 = vadd.f32 %v7628_v8, %v7011_v62  ;;  %v7640_v19 = vadd.f32 %v7610_v15, %v7402_v47  ;;  %v5963_v20 = vpop.f32.mrb[3].mxu0  ;;  %6041 = vst [vmem:[#allocation2 + $0x20] sm:$0xff] %v6033_v53  ;;  %v6034_v24 = vmax.f32 %v6026_v17, 0.0 }
 0x218   : > { %v6021_v22 = vadd.f32 %v7634_v12, %v7011_v62  ;;  %v7646_v23 = vadd.f32 %v5963_v20, %v2911_v30  ;;  %6044 = vst [vmem:[#allocation2 + $0x38] sm:$0xff] %v6036_v21 }
 0x219   : > { %v6031_v27 = vmax.f32 %v6023_v18, 0.0  ;;  %v6024_v28 = vadd.f32 %v7640_v19, %v7011_v62  ;;  %6042 = vst [vmem:[#allocation2 + $0x28] sm:$0xff] %v6034_v24 }
 0x21a   : > { %v6029_v39 = vmax.f32 %v6021_v22, 0.0  ;;  %v6022_v13 = vadd.f32 %v7646_v23, %v7011_v62 }
 0x21b   : > { %6039 = vst [vmem:[#allocation2 + $0x10] sm:$0xff] %v6031_v27  ;;  %v6032_v29 = vmax.f32 %v6024_v28, 0.0 }
 0x21c   : > { %6037 = vst [vmem:[#allocation2] sm:$0xff] %v6029_v39  ;;  %v6030_v14 = vmax.f32 %v6022_v13, 0.0 }
 0x21d   : > { %6040 = vst [vmem:[#allocation2 + $0x18] sm:$0xff] %v6032_v29 }
 0x21e   : > { %6038 = vst [vmem:[#allocation2 + $0x8] sm:$0xff] %v6030_v14 }
 0x21f   : > { %v6051_v31 = vld [vmem:[#allocation2 + $0x30] ss:$2 sm:$0xff]  ;;  %v6059_v33 = vld [vmem:[#allocation2 + $0x31] ss:$2 sm:$0xff] }
 0x220   : > { %v6063_v34 = vmax.f32 %v6051_v31, %v6059_v33  ;;  %v6049_v35 = vld [vmem:[#allocation2 + $0x20] ss:$2 sm:$0xff]  ;;  %v6057_v16 = vld [vmem:[#allocation2 + $0x21] ss:$2 sm:$0xff] }
 0x221   : > { %v6062_v36 = vmax.f32 %v6049_v35, %v6057_v16 }
 0x222   : > { %v6071_v38 = vrot.slane %v6063_v34, 4 }
 0x223   : > { %v6070_v48 = vrot.slane %v6062_v36, 4 }
 0x224   : > { %v6047_v37 = vld [vmem:[#allocation2 + $0x10] ss:$2 sm:$0xff]  ;;  %v6055_v41 = vld [vmem:[#allocation2 + $0x11] ss:$2 sm:$0xff]  ;;  %v6079_v45 = vmax.f32 %v6063_v34, %v6071_v38 }
 0x225   : > { %v6061_v42 = vmax.f32 %v6047_v37, %v6055_v41  ;;  %v6045_v44 = vld [vmem:[#allocation2] ss:$2 sm:$0xff]  ;;  %v6053_v32 = vld [vmem:[#allocation2 + $0x1] ss:$2 sm:$0xff]  ;;  %v6078_v25 = vmax.f32 %v6062_v36, %v6070_v48 }
 0x226   : > { %v6060_v9 = vmax.f32 %v6045_v44, %v6053_v32  ;;  %v6083_v47 = vpack.c.bf16 %v6079_v45, %v6079_v45 }
 0x227   : > { %v6069_v46 = vrot.slane %v6061_v42, 4  ;;  %v6082_v40 = vpack.c.bf16 %v6078_v25, %v6078_v25 }
 0x228   : > { %v6068_v30 = vrot.slane %v6060_v9, 4  ;;  %6087 = vst [vmem:[%s170_s29 + $0x6] sm:$0x3] %v6083_v47 }
 0x229   : > { %v6077_v49 = vmax.f32 %v6061_v42, %v6069_v46  ;;  %6086 = vst [vmem:[%s170_s29 + $0x4] sm:$0x3] %v6082_v40 }
 0x22a   : > { %v6076_v52 = vmax.f32 %v6060_v9, %v6068_v30 }
 0x22b   : > { %v6081_v50 = vpack.c.bf16 %v6077_v49, %v6077_v49 }
 0x22c   : > { %v6080_v54 = vpack.c.bf16 %v6076_v52, %v6076_v52 }
 0x22d   : > { %6085 = vst [vmem:[%s170_s29 + $0x2] sm:$0x3] %v6081_v50 }
 0x22e   : > { %6084 = vst [vmem:[%s170_s29] sm:$0x3] %v6080_v54 }
 0x22f PF: > { %s13_s12 = sadd.s32 1, %s7999_s12  }
 0x230   : > { %p10_p4 = scmp.ge.s32.totalorder %s13_s12, 4  }
 0x232   :  { %12 = sbr.rel (!%p10_p4) target bundleno = 1 (0x1), region = 97 }

// kernel: _lambda_.5
= control target key start
LH: loop header
LB: loop body
LE: loop exit
PB: predicated region body
PF: predicated region fallthrough
CT: control target
= control target key end

     0   :  { %v9592_v32 = vmov 1966171168   ;;  %v1057_v34 = vlaneseq  ;;  %vm8178_vm0 = vcmask 9216   ;;  %s13298_s1 = inlined_call_operand.vmem [shape: bf16[1,2048,1024], index: 1, kind: input, shape index: {}]   ;;  %s13299_s0 = inlined_call_operand.vmem [shape: bf16[2,2048], index: 0, kind: input, shape index: {}]   ;;  %s13300_s2 = inlined_call_operand.vmem [shape: f32[1,1,1024], index: 2, kind: input, shape index: {}]   ;;  %s13301_s3 = inlined_call_operand.vmem [shape: f32[1,1024,2], index: 3, kind: input, shape index: {}]   ;;  %s13302_s4 = inlined_call_operand.vmem [shape: f32[1,2,2], index: 4, kind: output, shape index: {}]  }
   0x1   :  { %v27_v0 = vld [vmem:[%s13298_s1] sm:$0xff]  ;;  %v28_v2 = vld [vmem:[%s13298_s1 + $0x8] sm:$0xff]  ;;  %v1055_v33 = vunpack.c.l.s4 %v9592_v32 }
   0x2   :  { %v31_v1 = vld [vmem:[%s13298_s1 + $0x20] sm:$0xff]  ;;  %v32_v4 = vld [vmem:[%s13298_s1 + $0x28] sm:$0xff]  ;;  %v9685_v44 = vshrl.u32 %v1057_v34, 7 }
   0x3   :  { %v8185_v3 = vcombine.high %v27_v0, %v31_v1  ;;  %v8184_v5 = vcombine.low %v27_v0, %v31_v1  ;;  %v35_v6 = vld [vmem:[%s13298_s1 + $0x40] sm:$0xff]  ;;  %v8187_v8 = vcombine.high %v28_v2, %v32_v4  ;;  %v8186_v9 = vcombine.low %v28_v2, %v32_v4  ;;  %v36_v11 = vld [vmem:[%s13298_s1 + $0x48] sm:$0xff] }
   0x4   :  { %v39_v7 = vld [vmem:[%s13298_s1 + $0x60] sm:$0xff]  ;;  %v40_v12 = vld [vmem:[%s13298_s1 + $0x68] sm:$0xff]  ;;  %v1056_v43 = vunpack.c.0.s8 %v1055_v33 }
   0x5   :  { %v8193_v10 = vcombine.high %v35_v6, %v39_v7  ;;  %v43_v13 = vld [vmem:[%s13298_s1 + $0x80] sm:$0xff]  ;;  %6287 = vmatprep.subr.bf16.mxu0 %v8185_v3  ;;  %v8195_v14 = vcombine.high %v36_v11, %v40_v12  ;;  %v44_v16 = vld [vmem:[%s13298_s1 + $0x88] sm:$0xff]  ;;  %6615 = vmatprep.subr.bf16.mxu1 %v8187_v8  ;;  %v8192_v18 = vcombine.low %v35_v6, %v39_v7 }
   0x6   :  { %v47_v15 = vld [vmem:[%s13298_s1 + $0xa0] sm:$0xff]  ;;  %v48_v17 = vld [vmem:[%s13298_s1 + $0xa8] sm:$0xff]  ;;  %6288 = vmatpush1.bf16.msra.mxu0 %v8184_v5  ;;  %6616 = vmatpush1.bf16.msra.mxu1 %v8186_v9  ;;  %v8194_v19 = vcombine.low %v36_v11, %v40_v12  ;;  %v9700_v53 = vsub.s32 %v1056_v43, %v9685_v44 }
   0x7   :  { %6289 = vmatprep.subr.bf16.mxu0 %v8193_v10  ;;  %v8201_v20 = vcombine.high %v43_v13, %v47_v15  ;;  %6617 = vmatprep.subr.bf16.mxu1 %v8195_v14  ;;  %v8203_v21 = vcombine.high %v44_v16, %v48_v17  ;;  %v51_v22 = vld [vmem:[%s13298_s1 + $0xc0] sm:$0xff]  ;;  %v52_v24 = vld [vmem:[%s13298_s1 + $0xc8] sm:$0xff]  ;;  %v8200_v26 = vcombine.low %v43_v13, %v47_v15 }
   0x8   :  { %v55_v23 = vld [vmem:[%s13298_s1 + $0xe0] sm:$0xff]  ;;  %v56_v25 = vld [vmem:[%s13298_s1 + $0xe8] sm:$0xff]  ;;  %v8202_v27 = vcombine.low %v44_v16, %v48_v17 }
   0x9   :  { %v8209_v28 = vcombine.high %v51_v22, %v55_v23  ;;  %v8211_v29 = vcombine.high %v52_v24, %v56_v25  ;;  %v59_v30 = vld [vmem:[%s13298_s1 + $0x100] sm:$0xff]  ;;  %v60_v35 = vld [vmem:[%s13298_s1 + $0x108] sm:$0xff]  ;;  %v8208_v37 = vcombine.low %v51_v22, %v55_v23  ;;  %v8210_v38 = vcombine.low %v52_v24, %v56_v25 }
   0xa   :  { %6290 = vmatpush1.bf16.msra.mxu0 %v8192_v18  ;;  %6618 = vmatpush1.bf16.msra.mxu1 %v8194_v19  ;;  %v63_v31 = vld [vmem:[%s13298_s1 + $0x120] sm:$0xff]  ;;  %v64_v36 = vld [vmem:[%s13298_s1 + $0x128] sm:$0xff] }
   0xb   :  { %6291 = vmatprep.subr.bf16.mxu0 %v8201_v20  ;;  %6619 = vmatprep.subr.bf16.mxu1 %v8203_v21  ;;  %v8217_v39 = vcombine.high %v59_v30, %v63_v31  ;;  %v8219_v40 = vcombine.high %v60_v35, %v64_v36  ;;  %v67_v41 = vld [vmem:[%s13298_s1 + $0x140] sm:$0xff]  ;;  %v68_v45 = vld [vmem:[%s13298_s1 + $0x148] sm:$0xff]  ;;  %v8216_v47 = vcombine.low %v59_v30, %v63_v31 }
   0xc   :  { %v71_v42 = vld [vmem:[%s13298_s1 + $0x160] sm:$0xff]  ;;  %v72_v46 = vld [vmem:[%s13298_s1 + $0x168] sm:$0xff]  ;;  %v8218_v48 = vcombine.low %v60_v35, %v64_v36 }
   0xd   :  { %v8225_v49 = vcombine.high %v67_v41, %v71_v42  ;;  %v8227_v50 = vcombine.high %v68_v45, %v72_v46  ;;  %v75_v51 = vld [vmem:[%s13298_s1 + $0x180] sm:$0xff]  ;;  %v76_v54 = vld [vmem:[%s13298_s1 + $0x188] sm:$0xff]  ;;  %v8224_v56 = vcombine.low %v67_v41, %v71_v42  ;;  %v8226_v57 = vcombine.low %v68_v45, %v72_v46 }
   0xe   :  { %6292 = vmatpush1.bf16.msra.mxu0 %v8200_v26  ;;  %6620 = vmatpush1.bf16.msra.mxu1 %v8202_v27  ;;  %v79_v52 = vld [vmem:[%s13298_s1 + $0x1a0] sm:$0xff]  ;;  %v80_v55 = vld [vmem:[%s13298_s1 + $0x1a8] sm:$0xff] }
   0xf   :  { %6293 = vmatprep.subr.bf16.mxu0 %v8209_v28  ;;  %6621 = vmatprep.subr.bf16.mxu1 %v8211_v29  ;;  %v8233_v58 = vcombine.high %v75_v51, %v79_v52  ;;  %v9711_v59 = vld [vmem:[%s13299_s0] sm:$0xff]  ;;  %v8235_v60 = vcombine.high %v76_v54, %v80_v55  ;;  %v84_v0 = vld [vmem:[%s13298_s1 + $0x1c8] sm:$0xff]  ;;  %v8232_v2 = vcombine.low %v75_v51, %v79_v52 }
  0x10   :  { %v83_v61 = vld [vmem:[%s13298_s1 + $0x1c0] sm:$0xff]  ;;  %v9721_v63 = vrot.slane %v9711_v59, %v9700_v53  ;;  %v88_v1 = vld [vmem:[%s13298_s1 + $0x1e8] sm:$0xff]  ;;  %v8234_v4 = vcombine.low %v76_v54, %v80_v55 }
  0x11   :  { %v87_v62 = vld [vmem:[%s13298_s1 + $0x1e0] sm:$0xff]  ;;  %v8243_v6 = vcombine.high %v84_v0, %v88_v1  ;;  %v92_v10 = vld [vmem:[%s13298_s1 + $0x208] sm:$0xff]  ;;  %v8242_v13 = vcombine.low %v84_v0, %v88_v1 }
  0x12   :  { %6294 = vmatpush1.bf16.msra.mxu0 %v8208_v37  ;;  %6622 = vmatpush1.bf16.msra.mxu1 %v8210_v38  ;;  %v1068_v3 = vcombine.high %v9721_v63, %v9721_v63  ;;  %v8241_v5 = vcombine.high %v83_v61, %v87_v62  ;;  %v91_v7 = vld [vmem:[%s13298_s1 + $0x200] sm:$0xff]  ;;  %v96_v11 = vld [vmem:[%s13298_s1 + $0x228] sm:$0xff]  ;;  %v8240_v12 = vcombine.low %v83_v61, %v87_v62 }
  0x13   :  { %6295 = vmatprep.subr.bf16.mxu0 %v8217_v39  ;;  %6623 = vmatprep.subr.bf16.mxu1 %v8219_v40  ;;  %v95_v8 = vld [vmem:[%s13298_s1 + $0x220] sm:$0xff]  ;;  %v8251_v15 = vcombine.high %v92_v10, %v96_v11  ;;  %v100_v18 = vld [vmem:[%s13298_s1 + $0x248] sm:$0xff]  ;;  %v8250_v21 = vcombine.low %v92_v10, %v96_v11 }
  0x14   :  { %v9738_v9 = vrot.slane %v1068_v3, %v9700_v53  ;;  %v8249_v14 = vcombine.high %v91_v7, %v95_v8  ;;  %v99_v16 = vld [vmem:[%s13298_s1 + $0x240] sm:$0xff]  ;;  %v104_v19 = vld [vmem:[%s13298_s1 + $0x268] sm:$0xff]  ;;  %v8248_v20 = vcombine.low %v91_v7, %v95_v8 }
  0x15   :  { %v103_v17 = vld [vmem:[%s13298_s1 + $0x260] sm:$0xff]  ;;  %v8259_v23 = vcombine.high %v100_v18, %v104_v19  ;;  %v108_v26 = vld [vmem:[%s13298_s1 + $0x288] sm:$0xff]  ;;  %v8258_v29 = vcombine.low %v100_v18, %v104_v19 }
  0x16   :  { %6296 = vmatpush1.bf16.msra.mxu0 %v8216_v47  ;;  %6624 = vmatpush1.bf16.msra.mxu1 %v8218_v48  ;;  %v8257_v22 = vcombine.high %v99_v16, %v103_v17  ;;  %v107_v24 = vld [vmem:[%s13298_s1 + $0x280] sm:$0xff]  ;;  %v112_v27 = vld [vmem:[%s13298_s1 + $0x2a8] sm:$0xff]  ;;  %v8256_v28 = vcombine.low %v99_v16, %v103_v17 }
  0x17   :  { %6297 = vmatprep.subr.bf16.mxu0 %v8225_v49  ;;  %6625 = vmatprep.subr.bf16.mxu1 %v8227_v50  ;;  %v111_v25 = vld [vmem:[%s13298_s1 + $0x2a0] sm:$0xff]  ;;  %v8267_v31 = vcombine.high %v108_v26, %v112_v27  ;;  %v116_v34 = vld [vmem:[%s13298_s1 + $0x2c8] sm:$0xff]  ;;  %v8266_v37 = vcombine.low %v108_v26, %v112_v27 }
  0x18   :  { %6319 = vmatprep.mubr.bf16.mxu0 %v9738_v9  ;;  %6647 = vmatprep.mubr.bf16.mxu1 %v9738_v9  ;;  %v8265_v30 = vcombine.high %v107_v24, %v111_v25  ;;  %v115_v32 = vld [vmem:[%s13298_s1 + $0x2c0] sm:$0xff]  ;;  %v120_v35 = vld [vmem:[%s13298_s1 + $0x2e8] sm:$0xff]  ;;  %v8264_v36 = vcombine.low %v107_v24, %v111_v25 }
  0x19   :  { %v119_v33 = vld [vmem:[%s13298_s1 + $0x2e0] sm:$0xff]  ;;  %v8275_v39 = vcombine.high %v116_v34, %v120_v35  ;;  %v124_v42 = vld [vmem:[%s13298_s1 + $0x308] sm:$0xff]  ;;  %v8274_v46 = vcombine.low %v116_v34, %v120_v35 }
  0x1a   :  { %6298 = vmatpush1.bf16.msra.mxu0 %v8224_v56  ;;  %6626 = vmatpush1.bf16.msra.mxu1 %v8226_v57  ;;  %v8273_v38 = vcombine.high %v115_v32, %v119_v33  ;;  %v123_v40 = vld [vmem:[%s13298_s1 + $0x300] sm:$0xff]  ;;  %v128_v43 = vld [vmem:[%s13298_s1 + $0x328] sm:$0xff]  ;;  %v8272_v45 = vcombine.low %v115_v32, %v119_v33 }
  0x1b   :  { %6299 = vmatprep.subr.bf16.mxu0 %v8233_v58  ;;  %6627 = vmatprep.subr.bf16.mxu1 %v8235_v60  ;;  %v127_v41 = vld [vmem:[%s13298_s1 + $0x320] sm:$0xff]  ;;  %v8283_v48 = vcombine.high %v124_v42, %v128_v43  ;;  %v132_v51 = vld [vmem:[%s13298_s1 + $0x348] sm:$0xff]  ;;  %v8282_v55 = vcombine.low %v124_v42, %v128_v43 }
  0x1c   :  { %v8281_v47 = vcombine.high %v123_v40, %v127_v41  ;;  %v131_v49 = vld [vmem:[%s13298_s1 + $0x340] sm:$0xff]  ;;  %v136_v52 = vld [vmem:[%s13298_s1 + $0x368] sm:$0xff]  ;;  %v8280_v54 = vcombine.low %v123_v40, %v127_v41 }
  0x1d   :  { %v135_v50 = vld [vmem:[%s13298_s1 + $0x360] sm:$0xff]  ;;  %v8291_v57 = vcombine.high %v132_v51, %v136_v52  ;;  %v140_v61 = vld [vmem:[%s13298_s1 + $0x388] sm:$0xff]  ;;  %v8290_v1 = vcombine.low %v132_v51, %v136_v52 }
  0x1e   :  { %6300 = vmatpush1.bf16.msra.mxu0 %v8232_v2  ;;  %6628 = vmatpush1.bf16.msra.mxu1 %v8234_v4  ;;  %v8289_v56 = vcombine.high %v131_v49, %v135_v50  ;;  %v139_v58 = vld [vmem:[%s13298_s1 + $0x380] sm:$0xff]  ;;  %v144_v62 = vld [vmem:[%s13298_s1 + $0x3a8] sm:$0xff]  ;;  %v8288_v0 = vcombine.low %v131_v49, %v135_v50 }
  0x1f   :  { %6301 = vmatprep.subr.bf16.mxu0 %v8241_v5  ;;  %6629 = vmatprep.subr.bf16.mxu1 %v8243_v6  ;;  %v143_v60 = vld [vmem:[%s13298_s1 + $0x3a0] sm:$0xff]  ;;  %v8299_v3 = vcombine.high %v140_v61, %v144_v62  ;;  %v148_v6 = vld [vmem:[%s13298_s1 + $0x3c8] sm:$0xff]  ;;  %v8298_v10 = vcombine.low %v140_v61, %v144_v62 }
  0x20   :  { %v8297_v2 = vcombine.high %v139_v58, %v143_v60  ;;  %v147_v4 = vld [vmem:[%s13298_s1 + $0x3c0] sm:$0xff]  ;;  %v152_v7 = vld [vmem:[%s13298_s1 + $0x3e8] sm:$0xff]  ;;  %v8296_v8 = vcombine.low %v139_v58, %v143_v60 }
  0x21   :  { %v151_v5 = vld [vmem:[%s13298_s1 + $0x3e0] sm:$0xff]  ;;  %v160_v16 = vld [vmem:[%s13298_s1 + $0x428] sm:$0xff]  ;;  %v8306_v18 = vcombine.low %v148_v6, %v152_v7 }
  0x22   :  { %6302 = vmatpush1.bf16.msra.mxu0 %v8240_v12  ;;  %6630 = vmatpush1.bf16.msra.mxu1 %v8242_v13  ;;  %v8305_v11 = vcombine.high %v147_v4, %v151_v5  ;;  %v8307_v12 = vcombine.high %v148_v6, %v152_v7  ;;  %v155_v13 = vld [vmem:[%s13298_s1 + $0x400] sm:$0xff]  ;;  %v8304_v17 = vcombine.low %v147_v4, %v151_v5  ;;  %v164_v24 = vld [vmem:[%s13298_s1 + $0x448] sm:$0xff] }
  0x23   :  { %6303 = vmatprep.subr.bf16.mxu0 %v8249_v14  ;;  %6631 = vmatprep.subr.bf16.mxu1 %v8251_v15  ;;  %v159_v14 = vld [vmem:[%s13298_s1 + $0x420] sm:$0xff]  ;;  %v156_v15 = vld [vmem:[%s13298_s1 + $0x408] sm:$0xff] }
  0x24   :  { %v8313_v19 = vcombine.high %v155_v13, %v159_v14  ;;  %v168_v25 = vld [vmem:[%s13298_s1 + $0x468] sm:$0xff]  ;;  %v8312_v26 = vcombine.low %v155_v13, %v159_v14  ;;  %v8314_v27 = vcombine.low %v156_v15, %v160_v16 }
  0x25   :  { %v172_v32 = vld [vmem:[%s13298_s1 + $0x488] sm:$0xff]  ;;  %v8322_v35 = vcombine.low %v164_v24, %v168_v25 }
  0x26   :  { %6304 = vmatpush1.bf16.msra.mxu0 %v8248_v20  ;;  %6632 = vmatpush1.bf16.msra.mxu1 %v8250_v21  ;;  %v8315_v20 = vcombine.high %v156_v15, %v160_v16  ;;  %v163_v21 = vld [vmem:[%s13298_s1 + $0x440] sm:$0xff]  ;;  %v176_v33 = vld [vmem:[%s13298_s1 + $0x4a8] sm:$0xff] }
  0x27   :  { %6305 = vmatprep.subr.bf16.mxu0 %v8257_v22  ;;  %6633 = vmatprep.subr.bf16.mxu1 %v8259_v23  ;;  %v167_v22 = vld [vmem:[%s13298_s1 + $0x460] sm:$0xff]  ;;  %v9852_v23 = vrot.slane %v9721_v63, %v9700_v53  ;;  %v180_v40 = vld [vmem:[%s13298_s1 + $0x4c8] sm:$0xff]  ;;  %v8330_v43 = vcombine.low %v172_v32, %v176_v33 }
  0x28   :  { %v171_v63 = vld [vmem:[%s13298_s1 + $0x480] sm:$0xff]  ;;  %v8320_v34 = vcombine.low %v163_v21, %v167_v22  ;;  %v184_v41 = vld [vmem:[%s13298_s1 + $0x4e8] sm:$0xff] }
  0x29   :  { %v188_v49 = vld [vmem:[%s13298_s1 + $0x508] sm:$0xff]  ;;  %v8338_v52 = vcombine.low %v180_v40, %v184_v41 }
  0x2a   :  { %6306 = vmatpush1.bf16.msra.mxu0 %v8256_v28  ;;  %6634 = vmatpush1.bf16.msra.mxu1 %v8258_v29  ;;  %v8321_v28 = vcombine.high %v163_v21, %v167_v22  ;;  %v8323_v29 = vcombine.high %v164_v24, %v168_v25  ;;  %v192_v50 = vld [vmem:[%s13298_s1 + $0x528] sm:$0xff] }
  0x2b   :  { %6307 = vmatprep.subr.bf16.mxu0 %v8265_v30  ;;  %6635 = vmatprep.subr.bf16.mxu1 %v8267_v31  ;;  %v175_v30 = vld [vmem:[%s13298_s1 + $0x4a0] sm:$0xff]  ;;  %v9868_v31 = vcombine.high %v9738_v9, %v9738_v9  ;;  %v196_v58 = vld [vmem:[%s13298_s1 + $0x548] sm:$0xff]  ;;  %v8346_v62 = vcombine.low %v188_v49, %v192_v50 }
  0x2c   :  { %v8328_v42 = vcombine.low %v171_v63, %v175_v30  ;;  %v200_v60 = vld [vmem:[%s13298_s1 + $0x568] sm:$0xff] }
  0x2d   :  { %v204_v4 = vld [vmem:[%s13298_s1 + $0x588] sm:$0xff]  ;;  %v8354_v7 = vcombine.low %v196_v58, %v200_v60 }
  0x2e   :  { %6308 = vmatpush1.bf16.msra.mxu0 %v8264_v36  ;;  %6636 = vmatpush1.bf16.msra.mxu1 %v8266_v37  ;;  %v8329_v36 = vcombine.high %v171_v63, %v175_v30  ;;  %v8331_v37 = vcombine.high %v172_v32, %v176_v33  ;;  %v208_v5 = vld [vmem:[%s13298_s1 + $0x5a8] sm:$0xff] }
  0x2f   :  { %6309 = vmatprep.subr.bf16.mxu0 %v8273_v38  ;;  %6637 = vmatprep.subr.bf16.mxu1 %v8275_v39  ;;  %v179_v38 = vld [vmem:[%s13298_s1 + $0x4c0] sm:$0xff]  ;;  %v212_v13 = vld [vmem:[%s13298_s1 + $0x5c8] sm:$0xff]  ;;  %v8362_v16 = vcombine.low %v204_v4, %v208_v5 }
  0x30   :  { %v183_v39 = vld [vmem:[%s13298_s1 + $0x4e0] sm:$0xff]  ;;  %v216_v14 = vld [vmem:[%s13298_s1 + $0x5e8] sm:$0xff] }
  0x31   :  { %v8336_v51 = vcombine.low %v179_v38, %v183_v39  ;;  %v220_v21 = vld [vmem:[%s13298_s1 + $0x608] sm:$0xff]  ;;  %v8370_v25 = vcombine.low %v212_v13, %v216_v14 }
  0x32   :  { %6310 = vmatpush1.bf16.msra.mxu0 %v8272_v45  ;;  %6638 = vmatpush1.bf16.msra.mxu1 %v8274_v46  ;;  %v8337_v45 = vcombine.high %v179_v38, %v183_v39  ;;  %v8339_v46 = vcombine.high %v180_v40, %v184_v41  ;;  %v224_v22 = vld [vmem:[%s13298_s1 + $0x628] sm:$0xff] }
  0x33   :  { %6311 = vmatprep.subr.bf16.mxu0 %v8281_v47  ;;  %6639 = vmatprep.subr.bf16.mxu1 %v8283_v48  ;;  %v187_v47 = vld [vmem:[%s13298_s1 + $0x500] sm:$0xff]  ;;  %v228_v63 = vld [vmem:[%s13298_s1 + $0x648] sm:$0xff]  ;;  %v8378_v33 = vcombine.low %v220_v21, %v224_v22 }
  0x34   :  { %v191_v48 = vld [vmem:[%s13298_s1 + $0x520] sm:$0xff]  ;;  %v232_v30 = vld [vmem:[%s13298_s1 + $0x668] sm:$0xff] }
  0x35   :  { %v8344_v61 = vcombine.low %v187_v47, %v191_v48  ;;  %v236_v38 = vld [vmem:[%s13298_s1 + $0x688] sm:$0xff]  ;;  %v8386_v41 = vcombine.low %v228_v63, %v232_v30 }
  0x36   :  { %6312 = vmatpush1.bf16.msra.mxu0 %v8280_v54  ;;  %6640 = vmatpush1.bf16.msra.mxu1 %v8282_v55  ;;  %v8345_v54 = vcombine.high %v187_v47, %v191_v48  ;;  %v8347_v55 = vcombine.high %v188_v49, %v192_v50  ;;  %v240_v39 = vld [vmem:[%s13298_s1 + $0x6a8] sm:$0xff] }
  0x37   :  { %6313 = vmatprep.subr.bf16.mxu0 %v8289_v56  ;;  %6641 = vmatprep.subr.bf16.mxu1 %v8291_v57  ;;  %v195_v56 = vld [vmem:[%s13298_s1 + $0x540] sm:$0xff]  ;;  %v244_v47 = vld [vmem:[%s13298_s1 + $0x6c8] sm:$0xff]  ;;  %v8394_v50 = vcombine.low %v236_v38, %v240_v39 }
  0x38   :  { %v199_v57 = vld [vmem:[%s13298_s1 + $0x560] sm:$0xff]  ;;  %v248_v48 = vld [vmem:[%s13298_s1 + $0x6e8] sm:$0xff] }
  0x39   :  { %v8352_v6 = vcombine.low %v195_v56, %v199_v57 }
  0x3a   :  { %6314 = vmatpush1.bf16.msra.mxu0 %v8288_v0  ;;  %6642 = vmatpush1.bf16.msra.mxu1 %v8290_v1  ;;  %v8353_v0 = vcombine.high %v195_v56, %v199_v57  ;;  %v8355_v1 = vcombine.high %v196_v58, %v200_v60  ;;  %v252_v56 = vld [vmem:[%s13298_s1 + $0x708] sm:$0xff]  ;;  %v8402_v60 = vcombine.low %v244_v47, %v248_v48 }
  0x3b   :  { %6315 = vmatprep.subr.bf16.mxu0 %v8297_v2  ;;  %6643 = vmatprep.subr.bf16.mxu1 %v8299_v3  ;;  %v203_v2 = vld [vmem:[%s13298_s1 + $0x580] sm:$0xff]  ;;  %v256_v57 = vld [vmem:[%s13298_s1 + $0x728] sm:$0xff] }
  0x3c   :  { %v207_v3 = vld [vmem:[%s13298_s1 + $0x5a0] sm:$0xff] }
  0x3d   :  { %v8360_v15 = vcombine.low %v203_v2, %v207_v3 }
  0x3e   :  { %6316 = vmatpush1.bf16.msra.mxu0 %v8296_v8  ;;  %6644 = vmatpush1.bf16.msra.mxu1 %v8298_v10  ;;  %v8361_v8 = vcombine.high %v203_v2, %v207_v3  ;;  %v8363_v10 = vcombine.high %v204_v4, %v208_v5  ;;  %v260_v2 = vld [vmem:[%s13298_s1 + $0x748] sm:$0xff]  ;;  %v8410_v5 = vcombine.low %v252_v56, %v256_v57 }
  0x3f   :  { %6317 = vmatprep.subr.bf16.mxu0 %v8305_v11  ;;  %6645 = vmatprep.subr.bf16.mxu1 %v8307_v12  ;;  %v211_v11 = vld [vmem:[%s13298_s1 + $0x5c0] sm:$0xff]  ;;  %v264_v3 = vld [vmem:[%s13298_s1 + $0x768] sm:$0xff] }
  0x40   :  { %v215_v12 = vld [vmem:[%s13298_s1 + $0x5e0] sm:$0xff] }
  0x41   :  { %v8368_v24 = vcombine.low %v211_v11, %v215_v12 }
  0x42   :  { %6318 = vmatpush1.bf16.msra.mxu0 %v8304_v17  ;;  %6646 = vmatpush1.bf16.msra.mxu1 %v8306_v18  ;;  %v8369_v17 = vcombine.high %v211_v11, %v215_v12  ;;  %v8371_v18 = vcombine.high %v212_v13, %v216_v14  ;;  %v268_v11 = vld [vmem:[%s13298_s1 + $0x788] sm:$0xff]  ;;  %v8418_v14 = vcombine.low %v260_v2, %v264_v3 }
  0x43   :  { %6328 = vmatprep.subr.bf16.mxu0 %v8313_v19  ;;  %6656 = vmatprep.subr.bf16.mxu1 %v8315_v20  ;;  %v219_v19 = vld [vmem:[%s13298_s1 + $0x600] sm:$0xff]  ;;  %v272_v12 = vld [vmem:[%s13298_s1 + $0x7a8] sm:$0xff] }
  0x44   :  { %v223_v20 = vld [vmem:[%s13298_s1 + $0x620] sm:$0xff] }
  0x45   :  { %6320 = vmatmul.mubr.bf16.vlgmr.msra.gmra.mrb[0].mxu0 %v9852_v23  ;;  %6648 = vmatmul.mubr.bf16.vlgmr.msra.gmra.mrb[0].mxu1 %v9852_v23  ;;  %v8376_v32 = vcombine.low %v219_v19, %v223_v20 }
  0x46   :  { %6329 = vmatpush1.bf16.msra.mxu0 %v8312_v26  ;;  %6657 = vmatpush1.bf16.msra.mxu1 %v8314_v27  ;;  %v8377_v26 = vcombine.high %v219_v19, %v223_v20  ;;  %v8379_v27 = vcombine.high %v220_v21, %v224_v22  ;;  %v1053_v19 = vcombine.high %v9711_v59, %v9711_v59  ;;  %v276_v20 = vld [vmem:[%s13298_s1 + $0x7c8] sm:$0xff]  ;;  %v283_v59 = vld [vmem:[%s13298_s1 + $0x800] sm:$0xff] }
  0x47   :  { %6330 = vmatprep.subr.bf16.mxu0 %v8321_v28  ;;  %6658 = vmatprep.subr.bf16.mxu1 %v8323_v29  ;;  %v227_v28 = vld [vmem:[%s13298_s1 + $0x640] sm:$0xff]  ;;  %v280_v21 = vld [vmem:[%s13298_s1 + $0x7e8] sm:$0xff] }
  0x48   :  { %6360 = vmatprep.mubr.bf16.mxu0 %v9868_v31  ;;  %6688 = vmatprep.mubr.bf16.mxu1 %v9868_v31  ;;  %v231_v29 = vld [vmem:[%s13298_s1 + $0x660] sm:$0xff] }
  0x49   :  { %v8384_v40 = vcombine.low %v227_v28, %v231_v29 }
  0x4a   :  { %6331 = vmatpush1.bf16.msra.mxu0 %v8320_v34  ;;  %6659 = vmatpush1.bf16.msra.mxu1 %v8322_v35  ;;  %v8385_v34 = vcombine.high %v227_v28, %v231_v29  ;;  %v8387_v35 = vcombine.high %v228_v63, %v232_v30  ;;  %v10045_v28 = vrot.slane %v1053_v19, %v9700_v53  ;;  %v284_v29 = vld [vmem:[%s13298_s1 + $0x808] sm:$0xff]  ;;  %v331_v19 = vld [vmem:[%s13298_s1 + $0x980] sm:$0xff] }
  0x4b   :  { %6332 = vmatprep.subr.bf16.mxu0 %v8329_v36  ;;  %6660 = vmatprep.subr.bf16.mxu1 %v8331_v37  ;;  %v235_v36 = vld [vmem:[%s13298_s1 + $0x680] sm:$0xff]  ;;  %v288_v63 = vld [vmem:[%s13298_s1 + $0x828] sm:$0xff] }
  0x4c   :  { %v239_v37 = vld [vmem:[%s13298_s1 + $0x6a0] sm:$0xff] }
  0x4d   :  { %v8392_v49 = vcombine.low %v235_v36, %v239_v37 }
  0x4e   :  { %6333 = vmatpush1.bf16.msra.mxu0 %v8328_v42  ;;  %6661 = vmatpush1.bf16.msra.mxu1 %v8330_v43  ;;  %v8393_v42 = vcombine.high %v235_v36, %v239_v37  ;;  %v8395_v43 = vcombine.high %v236_v38, %v240_v39  ;;  %v295_v36 = vld [vmem:[%s13298_s1 + $0x860] sm:$0xff]  ;;  %v1069_v37 = vcombine.high %v10045_v28, %v10045_v28  ;;  %v292_v39 = vld [vmem:[%s13298_s1 + $0x848] sm:$0xff] }
  0x4f   :  { %6334 = vmatprep.subr.bf16.mxu0 %v8337_v45  ;;  %6662 = vmatprep.subr.bf16.mxu1 %v8339_v46  ;;  %v243_v45 = vld [vmem:[%s13298_s1 + $0x6c0] sm:$0xff]  ;;  %v10063_v38 = vcombine.high %v9852_v23, %v9852_v23 }
  0x50   :  { %v247_v46 = vld [vmem:[%s13298_s1 + $0x6e0] sm:$0xff] }
  0x51   :  { %v8400_v58 = vcombine.low %v243_v45, %v247_v46 }
  0x52   :  { %6335 = vmatpush1.bf16.msra.mxu0 %v8336_v51  ;;  %6663 = vmatpush1.bf16.msra.mxu1 %v8338_v52  ;;  %v8401_v51 = vcombine.high %v243_v45, %v247_v46  ;;  %v8403_v52 = vcombine.high %v244_v47, %v248_v48  ;;  %v299_v46 = vld [vmem:[%s13298_s1 + $0x880] sm:$0xff]  ;;  %v10078_v48 = vrot.slane %v1069_v37, %v9700_v53 }
  0x53   :  { %6336 = vmatprep.subr.bf16.mxu0 %v8345_v54  ;;  %6664 = vmatprep.subr.bf16.mxu1 %v8347_v55  ;;  %v251_v54 = vld [vmem:[%s13298_s1 + $0x700] sm:$0xff] }
  0x54   :  { %v255_v55 = vld [vmem:[%s13298_s1 + $0x720] sm:$0xff] }
  0x55   :  { %v8408_v4 = vcombine.low %v251_v54, %v255_v55  ;;  %v303_v47 = vld [vmem:[%s13298_s1 + $0x8a0] sm:$0xff] }
  0x56   :  { %6337 = vmatpush1.bf16.msra.mxu0 %v8344_v61  ;;  %6665 = vmatpush1.bf16.msra.mxu1 %v8346_v62  ;;  %v8409_v61 = vcombine.high %v251_v54, %v255_v55  ;;  %v8411_v62 = vcombine.high %v252_v56, %v256_v57  ;;  %v8457_v54 = vcombine.high %v299_v46, %v303_v47  ;;  %v307_v56 = vld [vmem:[%s13298_s1 + $0x8c0] sm:$0xff] }
  0x57   :  { %6338 = vmatprep.subr.bf16.mxu0 %v8353_v0  ;;  %6666 = vmatprep.subr.bf16.mxu1 %v8355_v1  ;;  %v259_v0 = vld [vmem:[%s13298_s1 + $0x740] sm:$0xff] }
  0x58   :  { %v263_v1 = vld [vmem:[%s13298_s1 + $0x760] sm:$0xff] }
  0x59   :  { %v8416_v13 = vcombine.low %v259_v0, %v263_v1  ;;  %v311_v57 = vld [vmem:[%s13298_s1 + $0x8e0] sm:$0xff] }
  0x5a   :  { %6339 = vmatpush1.bf16.msra.mxu0 %v8352_v6  ;;  %6667 = vmatpush1.bf16.msra.mxu1 %v8354_v7  ;;  %v8417_v6 = vcombine.high %v259_v0, %v263_v1  ;;  %v8419_v7 = vcombine.high %v260_v2, %v264_v3  ;;  %v8465_v0 = vcombine.high %v307_v56, %v311_v57  ;;  %v315_v2 = vld [vmem:[%s13298_s1 + $0x900] sm:$0xff] }
  0x5b   :  { %6340 = vmatprep.subr.bf16.mxu0 %v8361_v8  ;;  %6668 = vmatprep.subr.bf16.mxu1 %v8363_v10  ;;  %v267_v8 = vld [vmem:[%s13298_s1 + $0x780] sm:$0xff] }
  0x5c   :  { %v271_v10 = vld [vmem:[%s13298_s1 + $0x7a0] sm:$0xff] }
  0x5d   :  { %v8424_v22 = vcombine.low %v267_v8, %v271_v10  ;;  %v319_v3 = vld [vmem:[%s13298_s1 + $0x920] sm:$0xff] }
  0x5e   :  { %6341 = vmatpush1.bf16.msra.mxu0 %v8360_v15  ;;  %6669 = vmatpush1.bf16.msra.mxu1 %v8362_v16  ;;  %v8425_v15 = vcombine.high %v267_v8, %v271_v10  ;;  %v8427_v16 = vcombine.high %v268_v11, %v272_v12  ;;  %v8473_v8 = vcombine.high %v315_v2, %v319_v3  ;;  %v351_v37 = vld [vmem:[%s13298_s1 + $0xa20] sm:$0xff] }
  0x5f   :  { %6342 = vmatprep.subr.bf16.mxu0 %v8369_v17  ;;  %6670 = vmatprep.subr.bf16.mxu1 %v8371_v18  ;;  %v275_v17 = vld [vmem:[%s13298_s1 + $0x7c0] sm:$0xff] }
  0x60   :  { %v279_v18 = vld [vmem:[%s13298_s1 + $0x7e0] sm:$0xff] }
  0x61   :  { %v8432_v30 = vcombine.low %v275_v17, %v279_v18 }
  0x62   :  { %6343 = vmatpush1.bf16.msra.mxu0 %v8368_v24  ;;  %6671 = vmatpush1.bf16.msra.mxu1 %v8370_v25  ;;  %v8426_v24 = vcombine.low %v268_v11, %v272_v12  ;;  %v8433_v25 = vcombine.high %v275_v17, %v279_v18  ;;  %v323_v11 = vld [vmem:[%s13298_s1 + $0x940] sm:$0xff] }
  0x63   :  { %6344 = vmatprep.subr.bf16.mxu0 %v8377_v26  ;;  %6672 = vmatprep.subr.bf16.mxu1 %v8379_v27  ;;  %v8435_v26 = vcombine.high %v276_v20, %v280_v21  ;;  %v287_v27 = vld [vmem:[%s13298_s1 + $0x820] sm:$0xff] }
  0x64   :  { %v327_v12 = vld [vmem:[%s13298_s1 + $0x960] sm:$0xff] }
  0x65   :  { %v8481_v17 = vcombine.high %v323_v11, %v327_v12 }
  0x66   :  { %6345 = vmatpush1.bf16.msra.mxu0 %v8376_v32  ;;  %6673 = vmatpush1.bf16.msra.mxu1 %v8378_v33  ;;  %v8434_v32 = vcombine.low %v276_v20, %v280_v21  ;;  %v8441_v33 = vcombine.high %v283_v59, %v287_v27  ;;  %v335_v20 = vld [vmem:[%s13298_s1 + $0x9a0] sm:$0xff]  ;;  %v332_v21 = vld [vmem:[%s13298_s1 + $0x988] sm:$0xff] }
  0x67   :  { %6346 = vmatprep.subr.bf16.mxu0 %v8385_v34  ;;  %6674 = vmatprep.subr.bf16.mxu1 %v8387_v35  ;;  %v8443_v34 = vcombine.high %v284_v29, %v288_v63  ;;  %v291_v35 = vld [vmem:[%s13298_s1 + $0x840] sm:$0xff] }
  0x6a   :  { %6347 = vmatpush1.bf16.msra.mxu0 %v8384_v40  ;;  %6675 = vmatpush1.bf16.msra.mxu1 %v8386_v41  ;;  %v296_v40 = vld [vmem:[%s13298_s1 + $0x868] sm:$0xff]  ;;  %v8440_v41 = vcombine.low %v283_v59, %v287_v27  ;;  %v339_v27 = vld [vmem:[%s13298_s1 + $0x9c0] sm:$0xff] }
  0x6b   :  { %6348 = vmatprep.subr.bf16.mxu0 %v8393_v42  ;;  %6676 = vmatprep.subr.bf16.mxu1 %v8395_v43  ;;  %v8442_v42 = vcombine.low %v284_v29, %v288_v63  ;;  %v8449_v43 = vcombine.high %v291_v35, %v295_v36  ;;  %v8451_v45 = vcombine.high %v292_v39, %v296_v40  ;;  %v343_v29 = vld [vmem:[%s13298_s1 + $0x9e0] sm:$0xff]  ;;  %v340_v63 = vld [vmem:[%s13298_s1 + $0x9c8] sm:$0xff] }
  0x6e   :  { %6349 = vmatpush1.bf16.msra.mxu0 %v8392_v49  ;;  %6677 = vmatpush1.bf16.msra.mxu1 %v8394_v50  ;;  %v300_v49 = vld [vmem:[%s13298_s1 + $0x888] sm:$0xff] }
  0x6f   :  { %6350 = vmatprep.subr.bf16.mxu0 %v8401_v51  ;;  %6678 = vmatprep.subr.bf16.mxu1 %v8403_v52  ;;  %v304_v50 = vld [vmem:[%s13298_s1 + $0x8a8] sm:$0xff]  ;;  %v8448_v51 = vcombine.low %v291_v35, %v295_v36  ;;  %v8450_v52 = vcombine.low %v292_v39, %v296_v40  ;;  %v347_v36 = vld [vmem:[%s13298_s1 + $0xa00] sm:$0xff] }
  0x70   :  { %v8459_v55 = vcombine.high %v300_v49, %v304_v50  ;;  %v348_v39 = vld [vmem:[%s13298_s1 + $0xa08] sm:$0xff] }
  0x71   :  { %v352_v40 = vld [vmem:[%s13298_s1 + $0xa28] sm:$0xff] }
  0x72   :  { %6351 = vmatpush1.bf16.msra.mxu0 %v8400_v58  ;;  %6679 = vmatpush1.bf16.msra.mxu1 %v8402_v60  ;;  %v308_v58 = vld [vmem:[%s13298_s1 + $0x8c8] sm:$0xff] }
  0x73   :  { %6352 = vmatprep.subr.bf16.mxu0 %v8409_v61  ;;  %6680 = vmatprep.subr.bf16.mxu1 %v8411_v62  ;;  %v312_v60 = vld [vmem:[%s13298_s1 + $0x8e8] sm:$0xff]  ;;  %v8456_v61 = vcombine.low %v299_v46, %v303_v47  ;;  %v8458_v62 = vcombine.low %v300_v49, %v304_v50  ;;  %v355_v46 = vld [vmem:[%s13298_s1 + $0xa40] sm:$0xff] }
  0x74   :  { %v8467_v1 = vcombine.high %v308_v58, %v312_v60  ;;  %v359_v47 = vld [vmem:[%s13298_s1 + $0xa60] sm:$0xff]  ;;  %v356_v49 = vld [vmem:[%s13298_s1 + $0xa48] sm:$0xff] }
  0x75   :  { %v360_v50 = vld [vmem:[%s13298_s1 + $0xa68] sm:$0xff] }
  0x76   :  { %6353 = vmatpush1.bf16.msra.mxu0 %v8408_v4  ;;  %6681 = vmatpush1.bf16.msra.mxu1 %v8410_v5  ;;  %v316_v4 = vld [vmem:[%s13298_s1 + $0x908] sm:$0xff] }
  0x77   :  { %6354 = vmatprep.subr.bf16.mxu0 %v8417_v6  ;;  %6682 = vmatprep.subr.bf16.mxu1 %v8419_v7  ;;  %v320_v5 = vld [vmem:[%s13298_s1 + $0x928] sm:$0xff]  ;;  %v8464_v6 = vcombine.low %v307_v56, %v311_v57  ;;  %v8466_v7 = vcombine.low %v308_v58, %v312_v60  ;;  %v363_v56 = vld [vmem:[%s13298_s1 + $0xa80] sm:$0xff] }
  0x78   :  { %v8475_v10 = vcombine.high %v316_v4, %v320_v5  ;;  %v367_v57 = vld [vmem:[%s13298_s1 + $0xaa0] sm:$0xff]  ;;  %v364_v58 = vld [vmem:[%s13298_s1 + $0xa88] sm:$0xff] }
  0x79   :  { %v368_v60 = vld [vmem:[%s13298_s1 + $0xaa8] sm:$0xff] }
  0x7a   :  { %6355 = vmatpush1.bf16.msra.mxu0 %v8416_v13  ;;  %6683 = vmatpush1.bf16.msra.mxu1 %v8418_v14  ;;  %v324_v13 = vld [vmem:[%s13298_s1 + $0x948] sm:$0xff] }
  0x7b   :  { %6356 = vmatprep.subr.bf16.mxu0 %v8425_v15  ;;  %6684 = vmatprep.subr.bf16.mxu1 %v8427_v16  ;;  %v328_v14 = vld [vmem:[%s13298_s1 + $0x968] sm:$0xff]  ;;  %v8472_v15 = vcombine.low %v315_v2, %v319_v3  ;;  %v8474_v16 = vcombine.low %v316_v4, %v320_v5  ;;  %v371_v2 = vld [vmem:[%s13298_s1 + $0xac0] sm:$0xff] }
  0x7c   :  { %v8483_v18 = vcombine.high %v324_v13, %v328_v14  ;;  %v375_v3 = vld [vmem:[%s13298_s1 + $0xae0] sm:$0xff]  ;;  %v372_v4 = vld [vmem:[%s13298_s1 + $0xac8] sm:$0xff] }
  0x7d   :  { %v376_v5 = vld [vmem:[%s13298_s1 + $0xae8] sm:$0xff] }
  0x7e   :  { %6357 = vmatpush1.bf16.msra.mxu0 %v8424_v22  ;;  %6685 = vmatpush1.bf16.msra.mxu1 %v8426_v24  ;;  %v336_v22 = vld [vmem:[%s13298_s1 + $0x9a8] sm:$0xff]  ;;  %v8480_v24 = vcombine.low %v323_v11, %v327_v12  ;;  %v379_v11 = vld [vmem:[%s13298_s1 + $0xb00] sm:$0xff] }
  0x7f   :  { %6358 = vmatprep.subr.bf16.mxu0 %v8433_v25  ;;  %6686 = vmatprep.subr.bf16.mxu1 %v8435_v26  ;;  %v8482_v25 = vcombine.low %v324_v13, %v328_v14  ;;  %v8489_v26 = vcombine.high %v331_v19, %v335_v20  ;;  %v8491_v59 = vcombine.high %v332_v21, %v336_v22  ;;  %v383_v12 = vld [vmem:[%s13298_s1 + $0xb20] sm:$0xff]  ;;  %v380_v13 = vld [vmem:[%s13298_s1 + $0xb08] sm:$0xff] }
  0x80   :  { %v384_v14 = vld [vmem:[%s13298_s1 + $0xb28] sm:$0xff] }
  0x82   :  { %6359 = vmatpush1.bf16.msra.mxu0 %v8432_v30  ;;  %6687 = vmatpush1.bf16.msra.mxu1 %v8434_v32  ;;  %v344_v30 = vld [vmem:[%s13298_s1 + $0x9e8] sm:$0xff]  ;;  %v8488_v32 = vcombine.low %v331_v19, %v335_v20  ;;  %v387_v19 = vld [vmem:[%s13298_s1 + $0xb40] sm:$0xff] }
  0x83   :  { %6369 = vmatprep.subr.bf16.mxu0 %v8441_v33  ;;  %6697 = vmatprep.subr.bf16.mxu1 %v8443_v34  ;;  %v8490_v33 = vcombine.low %v332_v21, %v336_v22  ;;  %v8497_v34 = vcombine.high %v339_v27, %v343_v29  ;;  %v8499_v35 = vcombine.high %v340_v63, %v344_v30  ;;  %v391_v20 = vld [vmem:[%s13298_s1 + $0xb60] sm:$0xff]  ;;  %v388_v21 = vld [vmem:[%s13298_s1 + $0xb48] sm:$0xff] }
  0x84   :  { %v392_v22 = vld [vmem:[%s13298_s1 + $0xb68] sm:$0xff] }
  0x85   :  { %6361 = vmatmul.mubr.bf16.vlgmr.msra.gmra.mrb[0].mxu0 %v10063_v38  ;;  %6689 = vmatmul.mubr.bf16.vlgmr.msra.gmra.mrb[0].mxu1 %v10063_v38 }
  0x86   :  { %6370 = vmatpush1.bf16.msra.mxu0 %v8440_v41  ;;  %6698 = vmatpush1.bf16.msra.mxu1 %v8442_v42  ;;  %v8496_v41 = vcombine.low %v339_v27, %v343_v29  ;;  %v8498_v42 = vcombine.low %v340_v63, %v344_v30  ;;  %v395_v27 = vld [vmem:[%s13298_s1 + $0xb80] sm:$0xff]  ;;  %v396_v63 = vld [vmem:[%s13298_s1 + $0xb88] sm:$0xff] }
  0x87   :  { %6371 = vmatprep.subr.bf16.mxu0 %v8449_v43  ;;  %6699 = vmatprep.subr.bf16.mxu1 %v8451_v45  ;;  %v8505_v43 = vcombine.high %v347_v36, %v351_v37  ;;  %v8507_v45 = vcombine.high %v348_v39, %v352_v40  ;;  %v399_v29 = vld [vmem:[%s13298_s1 + $0xba0] sm:$0xff]  ;;  %v400_v30 = vld [vmem:[%s13298_s1 + $0xba8] sm:$0xff] }
  0x88   :  { %6401 = vmatprep.mubr.bf16.mxu0 %v10078_v48  ;;  %6729 = vmatprep.mubr.bf16.mxu1 %v10078_v48 }
  0x8a   :  { %6372 = vmatpush1.bf16.msra.mxu0 %v8448_v51  ;;  %6700 = vmatpush1.bf16.msra.mxu1 %v8450_v52  ;;  %v8504_v51 = vcombine.low %v347_v36, %v351_v37  ;;  %v8506_v52 = vcombine.low %v348_v39, %v352_v40  ;;  %v403_v36 = vld [vmem:[%s13298_s1 + $0xbc0] sm:$0xff]  ;;  %v404_v39 = vld [vmem:[%s13298_s1 + $0xbc8] sm:$0xff] }
  0x8b   :  { %6373 = vmatprep.subr.bf16.mxu0 %v8457_v54  ;;  %6701 = vmatprep.subr.bf16.mxu1 %v8459_v55  ;;  %v8513_v54 = vcombine.high %v355_v46, %v359_v47  ;;  %v8515_v55 = vcombine.high %v356_v49, %v360_v50  ;;  %v407_v37 = vld [vmem:[%s13298_s1 + $0xbe0] sm:$0xff]  ;;  %v408_v40 = vld [vmem:[%s13298_s1 + $0xbe8] sm:$0xff] }
  0x8e   :  { %6374 = vmatpush1.bf16.msra.mxu0 %v8456_v61  ;;  %6702 = vmatpush1.bf16.msra.mxu1 %v8458_v62  ;;  %v8512_v61 = vcombine.low %v355_v46, %v359_v47  ;;  %v8514_v62 = vcombine.low %v356_v49, %v360_v50  ;;  %v411_v46 = vld [vmem:[%s13298_s1 + $0xc00] sm:$0xff]  ;;  %v412_v49 = vld [vmem:[%s13298_s1 + $0xc08] sm:$0xff] }
  0x8f   :  { %6375 = vmatprep.subr.bf16.mxu0 %v8465_v0  ;;  %6703 = vmatprep.subr.bf16.mxu1 %v8467_v1  ;;  %v8521_v0 = vcombine.high %v363_v56, %v367_v57  ;;  %v8523_v1 = vcombine.high %v364_v58, %v368_v60  ;;  %v415_v47 = vld [vmem:[%s13298_s1 + $0xc20] sm:$0xff]  ;;  %v416_v50 = vld [vmem:[%s13298_s1 + $0xc28] sm:$0xff] }
  0x92   :  { %6376 = vmatpush1.bf16.msra.mxu0 %v8464_v6  ;;  %6704 = vmatpush1.bf16.msra.mxu1 %v8466_v7  ;;  %v8520_v6 = vcombine.low %v363_v56, %v367_v57  ;;  %v8522_v7 = vcombine.low %v364_v58, %v368_v60  ;;  %v419_v56 = vld [vmem:[%s13298_s1 + $0xc40] sm:$0xff]  ;;  %v10266_v58 = vrot.slane %v10045_v28, %v9700_v53  ;;  %v420_v60 = vld [vmem:[%s13298_s1 + $0xc48] sm:$0xff] }
  0x93   :  { %6377 = vmatprep.subr.bf16.mxu0 %v8473_v8  ;;  %6705 = vmatprep.subr.bf16.mxu1 %v8475_v10  ;;  %v8529_v8 = vcombine.high %v371_v2, %v375_v3  ;;  %v8531_v10 = vcombine.high %v372_v4, %v376_v5  ;;  %v423_v57 = vld [vmem:[%s13298_s1 + $0xc60] sm:$0xff] }
  0x94   :  { %v427_v28 = vld [vmem:[%s13298_s1 + $0xc80] sm:$0xff] }
  0x96   :  { %6378 = vmatpush1.bf16.msra.mxu0 %v8472_v15  ;;  %6706 = vmatpush1.bf16.msra.mxu1 %v8474_v16  ;;  %v8528_v15 = vcombine.low %v371_v2, %v375_v3  ;;  %v8530_v16 = vcombine.low %v372_v4, %v376_v5  ;;  %v431_v3 = vld [vmem:[%s13298_s1 + $0xca0] sm:$0xff]  ;;  %v10282_v4 = vcombine.high %v10078_v48, %v10078_v48  ;;  %v428_v5 = vld [vmem:[%s13298_s1 + $0xc88] sm:$0xff] }
  0x97   :  { %6379 = vmatprep.subr.bf16.mxu0 %v8481_v17  ;;  %6707 = vmatprep.subr.bf16.mxu1 %v8483_v18  ;;  %v8537_v17 = vcombine.high %v379_v11, %v383_v12  ;;  %v8539_v18 = vcombine.high %v380_v13, %v384_v14 }
  0x9a   :  { %6380 = vmatpush1.bf16.msra.mxu0 %v8480_v24  ;;  %6708 = vmatpush1.bf16.msra.mxu1 %v8482_v25  ;;  %v8536_v24 = vcombine.low %v379_v11, %v383_v12  ;;  %v8538_v25 = vcombine.low %v380_v13, %v384_v14  ;;  %v435_v12 = vld [vmem:[%s13298_s1 + $0xcc0] sm:$0xff]  ;;  %v436_v14 = vld [vmem:[%s13298_s1 + $0xcc8] sm:$0xff] }
  0x9b   :  { %6381 = vmatprep.subr.bf16.mxu0 %v8489_v26  ;;  %6709 = vmatprep.subr.bf16.mxu1 %v8491_v59  ;;  %v8545_v26 = vcombine.high %v387_v19, %v391_v20  ;;  %v8547_v59 = vcombine.high %v388_v21, %v392_v22  ;;  %v439_v13 = vld [vmem:[%s13298_s1 + $0xce0] sm:$0xff] }
  0x9e   :  { %6382 = vmatpush1.bf16.msra.mxu0 %v8488_v32  ;;  %6710 = vmatpush1.bf16.msra.mxu1 %v8490_v33  ;;  %v8544_v32 = vcombine.low %v387_v19, %v391_v20  ;;  %v8546_v33 = vcombine.low %v388_v21, %v392_v22  ;;  %v443_v20 = vld [vmem:[%s13298_s1 + $0xd00] sm:$0xff]  ;;  %v444_v22 = vld [vmem:[%s13298_s1 + $0xd08] sm:$0xff] }
  0x9f   :  { %6383 = vmatprep.subr.bf16.mxu0 %v8497_v34  ;;  %6711 = vmatprep.subr.bf16.mxu1 %v8499_v35  ;;  %v8553_v34 = vcombine.high %v395_v27, %v399_v29  ;;  %v8555_v35 = vcombine.high %v396_v63, %v400_v30  ;;  %v447_v21 = vld [vmem:[%s13298_s1 + $0xd20] sm:$0xff] }
  0xa2   :  { %6384 = vmatpush1.bf16.msra.mxu0 %v8496_v41  ;;  %6712 = vmatpush1.bf16.msra.mxu1 %v8498_v42  ;;  %v8552_v41 = vcombine.low %v395_v27, %v399_v29  ;;  %v8554_v42 = vcombine.low %v396_v63, %v400_v30  ;;  %v451_v29 = vld [vmem:[%s13298_s1 + $0xd40] sm:$0xff]  ;;  %v452_v30 = vld [vmem:[%s13298_s1 + $0xd48] sm:$0xff] }
  0xa3   :  { %6385 = vmatprep.subr.bf16.mxu0 %v8505_v43  ;;  %6713 = vmatprep.subr.bf16.mxu1 %v8507_v45  ;;  %v8561_v43 = vcombine.high %v403_v36, %v407_v37  ;;  %v8563_v45 = vcombine.high %v404_v39, %v408_v40  ;;  %v455_v63 = vld [vmem:[%s13298_s1 + $0xd60] sm:$0xff] }
  0xa6   :  { %6386 = vmatpush1.bf16.msra.mxu0 %v8504_v51  ;;  %6714 = vmatpush1.bf16.msra.mxu1 %v8506_v52  ;;  %v8560_v51 = vcombine.low %v403_v36, %v407_v37  ;;  %v8562_v52 = vcombine.low %v404_v39, %v408_v40  ;;  %v459_v37 = vld [vmem:[%s13298_s1 + $0xd80] sm:$0xff]  ;;  %v460_v40 = vld [vmem:[%s13298_s1 + $0xd88] sm:$0xff] }
  0xa7   :  { %6387 = vmatprep.subr.bf16.mxu0 %v8513_v54  ;;  %6715 = vmatprep.subr.bf16.mxu1 %v8515_v55  ;;  %v8569_v54 = vcombine.high %v411_v46, %v415_v47  ;;  %v8571_v55 = vcombine.high %v412_v49, %v416_v50  ;;  %v463_v39 = vld [vmem:[%s13298_s1 + $0xda0] sm:$0xff] }
  0xaa   :  { %6388 = vmatpush1.bf16.msra.mxu0 %v8512_v61  ;;  %6716 = vmatpush1.bf16.msra.mxu1 %v8514_v62  ;;  %v424_v61 = vld [vmem:[%s13298_s1 + $0xc68] sm:$0xff]  ;;  %v8568_v62 = vcombine.low %v411_v46, %v415_v47  ;;  %v467_v47 = vld [vmem:[%s13298_s1 + $0xdc0] sm:$0xff] }
  0xab   :  { %6389 = vmatprep.subr.bf16.mxu0 %v8521_v0  ;;  %6717 = vmatprep.subr.bf16.mxu1 %v8523_v1  ;;  %v8570_v0 = vcombine.low %v412_v49, %v416_v50  ;;  %v8577_v1 = vcombine.high %v419_v56, %v423_v57  ;;  %v8579_v2 = vcombine.high %v420_v60, %v424_v61  ;;  %v471_v49 = vld [vmem:[%s13298_s1 + $0xde0] sm:$0xff]  ;;  %v468_v50 = vld [vmem:[%s13298_s1 + $0xdc8] sm:$0xff] }
  0xae   :  { %6390 = vmatpush1.bf16.msra.mxu0 %v8520_v6  ;;  %6718 = vmatpush1.bf16.msra.mxu1 %v8522_v7  ;;  %v432_v6 = vld [vmem:[%s13298_s1 + $0xca8] sm:$0xff]  ;;  %v8576_v7 = vcombine.low %v419_v56, %v423_v57  ;;  %v475_v57 = vld [vmem:[%s13298_s1 + $0xe00] sm:$0xff] }
  0xaf   :  { %6391 = vmatprep.subr.bf16.mxu0 %v8529_v8  ;;  %6719 = vmatprep.subr.bf16.mxu1 %v8531_v10  ;;  %v8578_v8 = vcombine.low %v420_v60, %v424_v61  ;;  %v8585_v10 = vcombine.high %v427_v28, %v431_v3  ;;  %v8587_v11 = vcombine.high %v428_v5, %v432_v6  ;;  %v479_v60 = vld [vmem:[%s13298_s1 + $0xe20] sm:$0xff]  ;;  %v476_v61 = vld [vmem:[%s13298_s1 + $0xe08] sm:$0xff] }
  0xb2   :  { %6392 = vmatpush1.bf16.msra.mxu0 %v8528_v15  ;;  %6720 = vmatpush1.bf16.msra.mxu1 %v8530_v16  ;;  %v440_v15 = vld [vmem:[%s13298_s1 + $0xce8] sm:$0xff]  ;;  %v8584_v16 = vcombine.low %v427_v28, %v431_v3  ;;  %v483_v3 = vld [vmem:[%s13298_s1 + $0xe40] sm:$0xff] }
  0xb3   :  { %6393 = vmatprep.subr.bf16.mxu0 %v8537_v17  ;;  %6721 = vmatprep.subr.bf16.mxu1 %v8539_v18  ;;  %v8586_v17 = vcombine.low %v428_v5, %v432_v6  ;;  %v8593_v18 = vcombine.high %v435_v12, %v439_v13  ;;  %v8595_v19 = vcombine.high %v436_v14, %v440_v15  ;;  %v487_v5 = vld [vmem:[%s13298_s1 + $0xe60] sm:$0xff]  ;;  %v484_v6 = vld [vmem:[%s13298_s1 + $0xe48] sm:$0xff] }
  0xb6   :  { %6394 = vmatpush1.bf16.msra.mxu0 %v8536_v24  ;;  %6722 = vmatpush1.bf16.msra.mxu1 %v8538_v25  ;;  %v448_v24 = vld [vmem:[%s13298_s1 + $0xd28] sm:$0xff]  ;;  %v8592_v25 = vcombine.low %v435_v12, %v439_v13  ;;  %v491_v13 = vld [vmem:[%s13298_s1 + $0xe80] sm:$0xff] }
  0xb7   :  { %6395 = vmatprep.subr.bf16.mxu0 %v8545_v26  ;;  %6723 = vmatprep.subr.bf16.mxu1 %v8547_v59  ;;  %v8594_v26 = vcombine.low %v436_v14, %v440_v15  ;;  %v8601_v59 = vcombine.high %v443_v20, %v447_v21  ;;  %v8603_v27 = vcombine.high %v444_v22, %v448_v24  ;;  %v495_v14 = vld [vmem:[%s13298_s1 + $0xea0] sm:$0xff]  ;;  %v492_v15 = vld [vmem:[%s13298_s1 + $0xe88] sm:$0xff] }
  0xba   :  { %6396 = vmatpush1.bf16.msra.mxu0 %v8544_v32  ;;  %6724 = vmatpush1.bf16.msra.mxu1 %v8546_v33  ;;  %v456_v32 = vld [vmem:[%s13298_s1 + $0xd68] sm:$0xff]  ;;  %v8600_v33 = vcombine.low %v443_v20, %v447_v21  ;;  %v499_v21 = vld [vmem:[%s13298_s1 + $0xec0] sm:$0xff] }
  0xbb   :  { %6397 = vmatprep.subr.bf16.mxu0 %v8553_v34  ;;  %6725 = vmatprep.subr.bf16.mxu1 %v8555_v35  ;;  %v8602_v34 = vcombine.low %v444_v22, %v448_v24  ;;  %v8609_v35 = vcombine.high %v451_v29, %v455_v63  ;;  %v8611_v36 = vcombine.high %v452_v30, %v456_v32  ;;  %v503_v22 = vld [vmem:[%s13298_s1 + $0xee0] sm:$0xff]  ;;  %v500_v24 = vld [vmem:[%s13298_s1 + $0xec8] sm:$0xff] }
  0xbe   :  { %6398 = vmatpush1.bf16.msra.mxu0 %v8552_v41  ;;  %6726 = vmatpush1.bf16.msra.mxu1 %v8554_v42  ;;  %v464_v41 = vld [vmem:[%s13298_s1 + $0xda8] sm:$0xff]  ;;  %v8608_v42 = vcombine.low %v451_v29, %v455_v63  ;;  %v507_v63 = vld [vmem:[%s13298_s1 + $0xf00] sm:$0xff] }
  0xbf   :  { %6399 = vmatprep.subr.bf16.mxu0 %v8561_v43  ;;  %6727 = vmatprep.subr.bf16.mxu1 %v8563_v45  ;;  %v8610_v43 = vcombine.low %v452_v30, %v456_v32  ;;  %v8617_v45 = vcombine.high %v459_v37, %v463_v39  ;;  %v8619_v46 = vcombine.high %v460_v40, %v464_v41  ;;  %v511_v30 = vld [vmem:[%s13298_s1 + $0xf20] sm:$0xff]  ;;  %v508_v32 = vld [vmem:[%s13298_s1 + $0xf08] sm:$0xff] }
  0xc2   :  { %6400 = vmatpush1.bf16.msra.mxu0 %v8560_v51  ;;  %6728 = vmatpush1.bf16.msra.mxu1 %v8562_v52  ;;  %v472_v51 = vld [vmem:[%s13298_s1 + $0xde8] sm:$0xff]  ;;  %v8616_v52 = vcombine.low %v459_v37, %v463_v39  ;;  %v515_v39 = vld [vmem:[%s13298_s1 + $0xf40] sm:$0xff] }
  0xc3   :  { %6410 = vmatprep.subr.bf16.mxu0 %v8569_v54  ;;  %6738 = vmatprep.subr.bf16.mxu1 %v8571_v55  ;;  %v8618_v54 = vcombine.low %v460_v40, %v464_v41  ;;  %v8625_v55 = vcombine.high %v467_v47, %v471_v49  ;;  %v8627_v56 = vcombine.high %v468_v50, %v472_v51  ;;  %v519_v40 = vld [vmem:[%s13298_s1 + $0xf60] sm:$0xff]  ;;  %v516_v41 = vld [vmem:[%s13298_s1 + $0xf48] sm:$0xff] }
  0xc5   :  { %6402 = vmatmul.mubr.bf16.vlgmr.msra.gmra.mrb[0].mxu0 %v10266_v58  ;;  %6730 = vmatmul.mubr.bf16.vlgmr.msra.gmra.mrb[0].mxu1 %v10266_v58 }
  0xc6   :  { %6411 = vmatpush1.bf16.msra.mxu0 %v8568_v62  ;;  %6739 = vmatpush1.bf16.msra.mxu1 %v8570_v0  ;;  %v480_v62 = vld [vmem:[%s13298_s1 + $0xe28] sm:$0xff]  ;;  %v8624_v0 = vcombine.low %v467_v47, %v471_v49  ;;  %v523_v49 = vld [vmem:[%s13298_s1 + $0xf80] sm:$0xff] }
  0xc7   :  { %6412 = vmatprep.subr.bf16.mxu0 %v8577_v1  ;;  %6740 = vmatprep.subr.bf16.mxu1 %v8579_v2  ;;  %v8626_v1 = vcombine.low %v468_v50, %v472_v51  ;;  %v8633_v2 = vcombine.high %v475_v57, %v479_v60  ;;  %v8635_v28 = vcombine.high %v476_v61, %v480_v62  ;;  %v527_v50 = vld [vmem:[%s13298_s1 + $0xfa0] sm:$0xff]  ;;  %v524_v51 = vld [vmem:[%s13298_s1 + $0xf88] sm:$0xff] }
  0xc8   :  { %6442 = vmatprep.mubr.bf16.mxu0 %v10282_v4  ;;  %6770 = vmatprep.mubr.bf16.mxu1 %v10282_v4 }
  0xca   :  { %6413 = vmatpush1.bf16.msra.mxu0 %v8576_v7  ;;  %6741 = vmatpush1.bf16.msra.mxu1 %v8578_v8  ;;  %v488_v7 = vld [vmem:[%s13298_s1 + $0xe68] sm:$0xff]  ;;  %v8632_v8 = vcombine.low %v475_v57, %v479_v60  ;;  %v531_v60 = vld [vmem:[%s13298_s1 + $0xfc0] sm:$0xff] }
  0xcb   :  { %6414 = vmatprep.subr.bf16.mxu0 %v8585_v10  ;;  %6742 = vmatprep.subr.bf16.mxu1 %v8587_v11  ;;  %v8634_v10 = vcombine.low %v476_v61, %v480_v62  ;;  %v8641_v11 = vcombine.high %v483_v3, %v487_v5  ;;  %v8643_v12 = vcombine.high %v484_v6, %v488_v7  ;;  %v535_v61 = vld [vmem:[%s13298_s1 + $0xfe0] sm:$0xff]  ;;  %v532_v62 = vld [vmem:[%s13298_s1 + $0xfc8] sm:$0xff] }
  0xce   :  { %6415 = vmatpush1.bf16.msra.mxu0 %v8584_v16  ;;  %6743 = vmatpush1.bf16.msra.mxu1 %v8586_v17  ;;  %v496_v16 = vld [vmem:[%s13298_s1 + $0xea8] sm:$0xff]  ;;  %v8640_v17 = vcombine.low %v483_v3, %v487_v5  ;;  %v8689_v3 = vcombine.high %v531_v60, %v535_v61 }
  0xcf   :  { %6416 = vmatprep.subr.bf16.mxu0 %v8593_v18  ;;  %6744 = vmatprep.subr.bf16.mxu1 %v8595_v19  ;;  %v8642_v18 = vcombine.low %v484_v6, %v488_v7  ;;  %v8649_v19 = vcombine.high %v491_v13, %v495_v14  ;;  %v8651_v20 = vcombine.high %v492_v15, %v496_v16  ;;  %v539_v6 = vld [vmem:[%s13298_s1 + $0x1000] sm:$0xff] }
  0xd0   :  { %v543_v7 = vld [vmem:[%s13298_s1 + $0x1020] sm:$0xff] }
  0xd2   :  { %6417 = vmatpush1.bf16.msra.mxu0 %v8592_v25  ;;  %6745 = vmatpush1.bf16.msra.mxu1 %v8594_v26  ;;  %v504_v25 = vld [vmem:[%s13298_s1 + $0xee8] sm:$0xff]  ;;  %v8648_v26 = vcombine.low %v491_v13, %v495_v14  ;;  %v8697_v14 = vcombine.high %v539_v6, %v543_v7 }
  0xd3   :  { %6418 = vmatprep.subr.bf16.mxu0 %v8601_v59  ;;  %6746 = vmatprep.subr.bf16.mxu1 %v8603_v27  ;;  %v8650_v59 = vcombine.low %v492_v15, %v496_v16  ;;  %v8657_v27 = vcombine.high %v499_v21, %v503_v22  ;;  %v8659_v29 = vcombine.high %v500_v24, %v504_v25  ;;  %v547_v16 = vld [vmem:[%s13298_s1 + $0x1040] sm:$0xff] }
  0xd6   :  { %6419 = vmatpush1.bf16.msra.mxu0 %v8600_v33  ;;  %6747 = vmatpush1.bf16.msra.mxu1 %v8602_v34  ;;  %v512_v33 = vld [vmem:[%s13298_s1 + $0xf28] sm:$0xff]  ;;  %v8656_v34 = vcombine.low %v499_v21, %v503_v22  ;;  %v8696_v22 = vcombine.low %v539_v6, %v543_v7 }
  0xd7   :  { %6420 = vmatprep.subr.bf16.mxu0 %v8609_v35  ;;  %6748 = vmatprep.subr.bf16.mxu1 %v8611_v36  ;;  %v8658_v35 = vcombine.low %v500_v24, %v504_v25  ;;  %v8665_v36 = vcombine.high %v507_v63, %v511_v30  ;;  %v8667_v37 = vcombine.high %v508_v32, %v512_v33  ;;  %v552_v21 = vld [vmem:[%s13298_s1 + $0x1068] sm:$0xff] }
  0xd8   :  { %v588_v6 = vld [vmem:[%s13298_s1 + $0x1188] sm:$0xff] }
  0xd9   :  { %v592_v7 = vld [vmem:[%s13298_s1 + $0x11a8] sm:$0xff] }
  0xda   :  { %6421 = vmatpush1.bf16.msra.mxu0 %v8608_v42  ;;  %6749 = vmatpush1.bf16.msra.mxu1 %v8610_v43  ;;  %v520_v42 = vld [vmem:[%s13298_s1 + $0xf68] sm:$0xff]  ;;  %v8664_v43 = vcombine.low %v507_v63, %v511_v30 }
  0xdb   :  { %6422 = vmatprep.subr.bf16.mxu0 %v8617_v45  ;;  %6750 = vmatprep.subr.bf16.mxu1 %v8619_v46  ;;  %v8666_v45 = vcombine.low %v508_v32, %v512_v33  ;;  %v8673_v46 = vcombine.high %v515_v39, %v519_v40  ;;  %v8675_v47 = vcombine.high %v516_v41, %v520_v42  ;;  %v556_v63 = vld [vmem:[%s13298_s1 + $0x1088] sm:$0xff] }
  0xdc   :  { %v560_v30 = vld [vmem:[%s13298_s1 + $0x10a8] sm:$0xff] }
  0xde   :  { %6423 = vmatpush1.bf16.msra.mxu0 %v8616_v52  ;;  %6751 = vmatpush1.bf16.msra.mxu1 %v8618_v54  ;;  %v528_v52 = vld [vmem:[%s13298_s1 + $0xfa8] sm:$0xff]  ;;  %v8672_v54 = vcombine.low %v515_v39, %v519_v40 }
  0xdf   :  { %6424 = vmatprep.subr.bf16.mxu0 %v8625_v55  ;;  %6752 = vmatprep.subr.bf16.mxu1 %v8627_v56  ;;  %v8674_v55 = vcombine.low %v516_v41, %v520_v42  ;;  %v8681_v56 = vcombine.high %v523_v49, %v527_v50  ;;  %v8683_v57 = vcombine.high %v524_v51, %v528_v52  ;;  %v564_v39 = vld [vmem:[%s13298_s1 + $0x10c8] sm:$0xff] }
  0xe0   :  { %v568_v40 = vld [vmem:[%s13298_s1 + $0x10e8] sm:$0xff]  ;;  %v8714_v42 = vcombine.low %v556_v63, %v560_v30 }
  0xe2   :  { %6425 = vmatpush1.bf16.msra.mxu0 %v8624_v0  ;;  %6753 = vmatpush1.bf16.msra.mxu1 %v8626_v1  ;;  %v536_v0 = vld [vmem:[%s13298_s1 + $0xfe8] sm:$0xff] }
  0xe3   :  { %6426 = vmatprep.subr.bf16.mxu0 %v8633_v2  ;;  %6754 = vmatprep.subr.bf16.mxu1 %v8635_v28  ;;  %v10453_v1 = vld [vmem:[%s13299_s0 + $0x8] sm:$0xff]  ;;  %v8680_v2 = vcombine.low %v523_v49, %v527_v50  ;;  %v8682_v28 = vcombine.low %v524_v51, %v528_v52  ;;  %v8691_v5 = vcombine.high %v532_v62, %v536_v0 }
  0xe4   :  { %v8690_v13 = vcombine.low %v532_v62, %v536_v0  ;;  %v572_v49 = vld [vmem:[%s13298_s1 + $0x1108] sm:$0xff]  ;;  %v8722_v52 = vcombine.low %v564_v39, %v568_v40 }
  0xe5   :  { %v576_v50 = vld [vmem:[%s13298_s1 + $0x1128] sm:$0xff] }
  0xe6   :  { %6427 = vmatpush1.bf16.msra.mxu0 %v8632_v8  ;;  %6755 = vmatpush1.bf16.msra.mxu1 %v8634_v10  ;;  %v10463_v8 = vrot.slane %v10453_v1, %v9700_v53  ;;  %v540_v10 = vld [vmem:[%s13298_s1 + $0x1008] sm:$0xff]  ;;  %v8730_v0 = vcombine.low %v572_v49, %v576_v50 }
  0xe7   :  { %6428 = vmatprep.subr.bf16.mxu0 %v8641_v11  ;;  %6756 = vmatprep.subr.bf16.mxu1 %v8643_v12  ;;  %v544_v11 = vld [vmem:[%s13298_s1 + $0x1028] sm:$0xff]  ;;  %v8688_v12 = vcombine.low %v531_v60, %v535_v61 }
  0xe8   :  { %v8699_v15 = vcombine.high %v540_v10, %v544_v11  ;;  %v8698_v24 = vcombine.low %v540_v10, %v544_v11  ;;  %v580_v60 = vld [vmem:[%s13298_s1 + $0x1148] sm:$0xff] }
  0xe9   :  { %v584_v61 = vld [vmem:[%s13298_s1 + $0x1168] sm:$0xff] }
  0xea   :  { %6429 = vmatpush1.bf16.msra.mxu0 %v8640_v17  ;;  %6757 = vmatpush1.bf16.msra.mxu1 %v8642_v18  ;;  %v551_v17 = vld [vmem:[%s13298_s1 + $0x1060] sm:$0xff]  ;;  %v1117_v18 = vcombine.high %v10463_v8, %v10463_v8  ;;  %v8738_v11 = vcombine.low %v580_v60, %v584_v61 }
  0xeb   :  { %6430 = vmatprep.subr.bf16.mxu0 %v8649_v19  ;;  %6758 = vmatprep.subr.bf16.mxu1 %v8651_v20  ;;  %v10481_v19 = vcombine.high %v10266_v58, %v10266_v58  ;;  %v548_v20 = vld [vmem:[%s13298_s1 + $0x1048] sm:$0xff]  ;;  %v8705_v25 = vcombine.high %v547_v16, %v551_v17  ;;  %v8704_v32 = vcombine.low %v547_v16, %v551_v17 }
  0xec   :  { %v8706_v33 = vcombine.low %v548_v20, %v552_v21  ;;  %v596_v16 = vld [vmem:[%s13298_s1 + $0x11c8] sm:$0xff] }
  0xed   :  { %v600_v17 = vld [vmem:[%s13298_s1 + $0x11e8] sm:$0xff] }
  0xee   :  { %6431 = vmatpush1.bf16.msra.mxu0 %v8648_v26  ;;  %6759 = vmatpush1.bf16.msra.mxu1 %v8650_v59  ;;  %v8707_v26 = vcombine.high %v548_v20, %v552_v21  ;;  %v555_v59 = vld [vmem:[%s13298_s1 + $0x1080] sm:$0xff]  ;;  %v8746_v20 = vcombine.low %v588_v6, %v592_v7 }
  0xef   :  { %6432 = vmatprep.subr.bf16.mxu0 %v8657_v27  ;;  %6760 = vmatprep.subr.bf16.mxu1 %v8659_v29  ;;  %v559_v27 = vld [vmem:[%s13298_s1 + $0x10a0] sm:$0xff]  ;;  %v10496_v29 = vrot.slane %v1117_v18, %v9700_v53 }
  0xf0   :  { %v8712_v41 = vcombine.low %v555_v59, %v559_v27 }
  0xf2   :  { %6433 = vmatpush1.bf16.msra.mxu0 %v8656_v34  ;;  %6761 = vmatpush1.bf16.msra.mxu1 %v8658_v35  ;;  %v8713_v34 = vcombine.high %v555_v59, %v559_v27  ;;  %v8715_v35 = vcombine.high %v556_v63, %v560_v30  ;;  %v608_v59 = vld [vmem:[%s13298_s1 + $0x1228] sm:$0xff]  ;;  %v8754_v63 = vcombine.low %v596_v16, %v600_v17 }
  0xf3   :  { %6434 = vmatprep.subr.bf16.mxu0 %v8665_v36  ;;  %6762 = vmatprep.subr.bf16.mxu1 %v8667_v37  ;;  %v563_v36 = vld [vmem:[%s13298_s1 + $0x10c0] sm:$0xff] }
  0xf4   :  { %v567_v37 = vld [vmem:[%s13298_s1 + $0x10e0] sm:$0xff] }
  0xf5   :  { %v8720_v51 = vcombine.low %v563_v36, %v567_v37 }
  0xf6   :  { %6435 = vmatpush1.bf16.msra.mxu0 %v8664_v43  ;;  %6763 = vmatpush1.bf16.msra.mxu1 %v8666_v45  ;;  %v8721_v43 = vcombine.high %v563_v36, %v567_v37  ;;  %v8723_v45 = vcombine.high %v564_v39, %v568_v40  ;;  %v616_v36 = vld [vmem:[%s13298_s1 + $0x1268] sm:$0xff] }
  0xf7   :  { %6436 = vmatprep.subr.bf16.mxu0 %v8673_v46  ;;  %6764 = vmatprep.subr.bf16.mxu1 %v8675_v47  ;;  %v571_v46 = vld [vmem:[%s13298_s1 + $0x1100] sm:$0xff] }
  0xf8   :  { %v575_v47 = vld [vmem:[%s13298_s1 + $0x1120] sm:$0xff] }
  0xf9   :  { %v8728_v62 = vcombine.low %v571_v46, %v575_v47 }
  0xfa   :  { %6437 = vmatpush1.bf16.msra.mxu0 %v8672_v54  ;;  %6765 = vmatpush1.bf16.msra.mxu1 %v8674_v55  ;;  %v8729_v54 = vcombine.high %v571_v46, %v575_v47  ;;  %v8731_v55 = vcombine.high %v572_v49, %v576_v50  ;;  %v624_v46 = vld [vmem:[%s13298_s1 + $0x12a8] sm:$0xff] }
  0xfb   :  { %6438 = vmatprep.subr.bf16.mxu0 %v8681_v56  ;;  %6766 = vmatprep.subr.bf16.mxu1 %v8683_v57  ;;  %v579_v56 = vld [vmem:[%s13298_s1 + $0x1140] sm:$0xff] }
  0xfc   :  { %v583_v57 = vld [vmem:[%s13298_s1 + $0x1160] sm:$0xff] }
  0xfd   :  { %v8736_v10 = vcombine.low %v579_v56, %v583_v57 }
  0xfe   :  { %6439 = vmatpush1.bf16.msra.mxu0 %v8680_v2  ;;  %6767 = vmatpush1.bf16.msra.mxu1 %v8682_v28  ;;  %v8737_v2 = vcombine.high %v579_v56, %v583_v57  ;;  %v8739_v28 = vcombine.high %v580_v60, %v584_v61  ;;  %v632_v56 = vld [vmem:[%s13298_s1 + $0x12e8] sm:$0xff] }
  0xff   :  { %6440 = vmatprep.subr.bf16.mxu0 %v8689_v3  ;;  %6768 = vmatprep.subr.bf16.mxu1 %v8691_v5  ;;  %v587_v3 = vld [vmem:[%s13298_s1 + $0x1180] sm:$0xff] }
 0x100   :  { %v591_v5 = vld [vmem:[%s13298_s1 + $0x11a0] sm:$0xff] }
 0x101   :  { %v8744_v18 = vcombine.low %v587_v3, %v591_v5 }
 0x102   :  { %6441 = vmatpush1.bf16.msra.mxu0 %v8688_v12  ;;  %6769 = vmatpush1.bf16.msra.mxu1 %v8690_v13  ;;  %v8745_v12 = vcombine.high %v587_v3, %v591_v5  ;;  %v8747_v13 = vcombine.high %v588_v6, %v592_v7  ;;  %v640_v3 = vld [vmem:[%s13298_s1 + $0x1328] sm:$0xff] }
 0x103   :  { %6451 = vmatprep.subr.bf16.mxu0 %v8697_v14  ;;  %6779 = vmatprep.subr.bf16.mxu1 %v8699_v15  ;;  %v595_v14 = vld [vmem:[%s13298_s1 + $0x11c0] sm:$0xff] }
 0x104   :  { %v599_v15 = vld [vmem:[%s13298_s1 + $0x11e0] sm:$0xff] }
 0x105   :  { %6443 = vmatmul.mubr.bf16.vlgmr.msra.gmra.mrb[0].mxu0 %v10481_v19  ;;  %6771 = vmatmul.mubr.bf16.vlgmr.msra.gmra.mrb[0].mxu1 %v10481_v19  ;;  %v8753_v21 = vcombine.high %v595_v14, %v599_v15  ;;  %v8752_v27 = vcombine.low %v595_v14, %v599_v15  ;;  %v648_v14 = vld [vmem:[%s13298_s1 + $0x1368] sm:$0xff] }
 0x106   :  { %6452 = vmatpush1.bf16.msra.mxu0 %v8696_v22  ;;  %6780 = vmatpush1.bf16.msra.mxu1 %v8698_v24  ;;  %v8755_v22 = vcombine.high %v596_v16, %v600_v17  ;;  %v603_v24 = vld [vmem:[%s13298_s1 + $0x1200] sm:$0xff] }
 0x107   :  { %6453 = vmatprep.subr.bf16.mxu0 %v8705_v25  ;;  %6781 = vmatprep.subr.bf16.mxu1 %v8707_v26  ;;  %v607_v25 = vld [vmem:[%s13298_s1 + $0x1220] sm:$0xff]  ;;  %v604_v26 = vld [vmem:[%s13298_s1 + $0x1208] sm:$0xff] }
 0x108   :  { %6483 = vmatprep.mubr.bf16.mxu0 %v10496_v29  ;;  %6811 = vmatprep.mubr.bf16.mxu1 %v10496_v29  ;;  %v8761_v30 = vcombine.high %v603_v24, %v607_v25  ;;  %v8760_v37 = vcombine.low %v603_v24, %v607_v25  ;;  %v8762_v39 = vcombine.low %v604_v26, %v608_v59  ;;  %v656_v24 = vld [vmem:[%s13298_s1 + $0x13a8] sm:$0xff] }
 0x10a   :  { %6454 = vmatpush1.bf16.msra.mxu0 %v8704_v32  ;;  %6782 = vmatpush1.bf16.msra.mxu1 %v8706_v33  ;;  %v8763_v32 = vcombine.high %v604_v26, %v608_v59  ;;  %v611_v33 = vld [vmem:[%s13298_s1 + $0x1240] sm:$0xff] }
 0x10b   :  { %6455 = vmatprep.subr.bf16.mxu0 %v8713_v34  ;;  %6783 = vmatprep.subr.bf16.mxu1 %v8715_v35  ;;  %v615_v34 = vld [vmem:[%s13298_s1 + $0x1260] sm:$0xff]  ;;  %v612_v35 = vld [vmem:[%s13298_s1 + $0x1248] sm:$0xff] }
 0x10c   :  { %v8769_v40 = vcombine.high %v611_v33, %v615_v34  ;;  %v8768_v47 = vcombine.low %v611_v33, %v615_v34  ;;  %v8770_v49 = vcombine.low %v612_v35, %v616_v36  ;;  %v664_v33 = vld [vmem:[%s13298_s1 + $0x13e8] sm:$0xff] }
 0x10e   :  { %6456 = vmatpush1.bf16.msra.mxu0 %v8712_v41  ;;  %6784 = vmatpush1.bf16.msra.mxu1 %v8714_v42  ;;  %v8771_v41 = vcombine.high %v612_v35, %v616_v36  ;;  %v619_v42 = vld [vmem:[%s13298_s1 + $0x1280] sm:$0xff] }
 0x10f   :  { %6457 = vmatprep.subr.bf16.mxu0 %v8721_v43  ;;  %6785 = vmatprep.subr.bf16.mxu1 %v8723_v45  ;;  %v623_v43 = vld [vmem:[%s13298_s1 + $0x12a0] sm:$0xff]  ;;  %v620_v45 = vld [vmem:[%s13298_s1 + $0x1288] sm:$0xff] }
 0x110   :  { %v8777_v50 = vcombine.high %v619_v42, %v623_v43  ;;  %v8776_v57 = vcombine.low %v619_v42, %v623_v43  ;;  %v8778_v60 = vcombine.low %v620_v45, %v624_v46  ;;  %v672_v42 = vld [vmem:[%s13298_s1 + $0x1428] sm:$0xff] }
 0x112   :  { %6458 = vmatpush1.bf16.msra.mxu0 %v8720_v51  ;;  %6786 = vmatpush1.bf16.msra.mxu1 %v8722_v52  ;;  %v8779_v51 = vcombine.high %v620_v45, %v624_v46  ;;  %v627_v52 = vld [vmem:[%s13298_s1 + $0x12c0] sm:$0xff] }
 0x113   :  { %6459 = vmatprep.subr.bf16.mxu0 %v8729_v54  ;;  %6787 = vmatprep.subr.bf16.mxu1 %v8731_v55  ;;  %v631_v54 = vld [vmem:[%s13298_s1 + $0x12e0] sm:$0xff]  ;;  %v628_v55 = vld [vmem:[%s13298_s1 + $0x12c8] sm:$0xff] }
 0x114   :  { %v8785_v61 = vcombine.high %v627_v52, %v631_v54  ;;  %v8784_v5 = vcombine.low %v627_v52, %v631_v54  ;;  %v8786_v6 = vcombine.low %v628_v55, %v632_v56  ;;  %v676_v52 = vld [vmem:[%s13298_s1 + $0x1448] sm:$0xff] }
 0x115   :  { %v680_v54 = vld [vmem:[%s13298_s1 + $0x1468] sm:$0xff] }
 0x116   :  { %6460 = vmatpush1.bf16.msra.mxu0 %v8728_v62  ;;  %6788 = vmatpush1.bf16.msra.mxu1 %v8730_v0  ;;  %v8787_v62 = vcombine.high %v628_v55, %v632_v56  ;;  %v635_v0 = vld [vmem:[%s13298_s1 + $0x1300] sm:$0xff] }
 0x117   :  { %6461 = vmatprep.subr.bf16.mxu0 %v8737_v2  ;;  %6789 = vmatprep.subr.bf16.mxu1 %v8739_v28  ;;  %v639_v2 = vld [vmem:[%s13298_s1 + $0x1320] sm:$0xff]  ;;  %v636_v28 = vld [vmem:[%s13298_s1 + $0x1308] sm:$0xff] }
 0x118   :  { %v8793_v7 = vcombine.high %v635_v0, %v639_v2  ;;  %v8792_v15 = vcombine.low %v635_v0, %v639_v2  ;;  %v8794_v16 = vcombine.low %v636_v28, %v640_v3  ;;  %v684_v0 = vld [vmem:[%s13298_s1 + $0x1488] sm:$0xff] }
 0x119   :  { %v688_v2 = vld [vmem:[%s13298_s1 + $0x14a8] sm:$0xff] }
 0x11a   :  { %6462 = vmatpush1.bf16.msra.mxu0 %v8736_v10  ;;  %6790 = vmatpush1.bf16.msra.mxu1 %v8738_v11  ;;  %v8795_v10 = vcombine.high %v636_v28, %v640_v3  ;;  %v643_v11 = vld [vmem:[%s13298_s1 + $0x1340] sm:$0xff]  ;;  %v8834_v3 = vcombine.low %v676_v52, %v680_v54 }
 0x11b   :  { %6463 = vmatprep.subr.bf16.mxu0 %v8745_v12  ;;  %6791 = vmatprep.subr.bf16.mxu1 %v8747_v13  ;;  %v647_v12 = vld [vmem:[%s13298_s1 + $0x1360] sm:$0xff]  ;;  %v644_v13 = vld [vmem:[%s13298_s1 + $0x1348] sm:$0xff] }
 0x11c   :  { %v8801_v17 = vcombine.high %v643_v11, %v647_v12  ;;  %v8800_v25 = vcombine.low %v643_v11, %v647_v12  ;;  %v8802_v26 = vcombine.low %v644_v13, %v648_v14  ;;  %v692_v11 = vld [vmem:[%s13298_s1 + $0x14c8] sm:$0xff] }
 0x11d   :  { %v696_v12 = vld [vmem:[%s13298_s1 + $0x14e8] sm:$0xff] }
 0x11e   :  { %6464 = vmatpush1.bf16.msra.mxu0 %v8744_v18  ;;  %6792 = vmatpush1.bf16.msra.mxu1 %v8746_v20  ;;  %v8803_v18 = vcombine.high %v644_v13, %v648_v14  ;;  %v651_v20 = vld [vmem:[%s13298_s1 + $0x1380] sm:$0xff]  ;;  %v8842_v14 = vcombine.low %v684_v0, %v688_v2 }
 0x11f   :  { %6465 = vmatprep.subr.bf16.mxu0 %v8753_v21  ;;  %6793 = vmatprep.subr.bf16.mxu1 %v8755_v22  ;;  %v655_v21 = vld [vmem:[%s13298_s1 + $0x13a0] sm:$0xff]  ;;  %v652_v22 = vld [vmem:[%s13298_s1 + $0x1388] sm:$0xff] }
 0x120   :  { %v8809_v59 = vcombine.high %v651_v20, %v655_v21  ;;  %v8808_v34 = vcombine.low %v651_v20, %v655_v21  ;;  %v8810_v35 = vcombine.low %v652_v22, %v656_v24  ;;  %v700_v20 = vld [vmem:[%s13298_s1 + $0x1508] sm:$0xff] }
 0x121   :  { %v704_v21 = vld [vmem:[%s13298_s1 + $0x1528] sm:$0xff] }
 0x122   :  { %6466 = vmatpush1.bf16.msra.mxu0 %v8752_v27  ;;  %6794 = vmatpush1.bf16.msra.mxu1 %v8754_v63  ;;  %v8811_v27 = vcombine.high %v652_v22, %v656_v24  ;;  %v659_v63 = vld [vmem:[%s13298_s1 + $0x13c0] sm:$0xff]  ;;  %v8850_v24 = vcombine.low %v692_v11, %v696_v12 }
 0x123   :  { %6467 = vmatprep.subr.bf16.mxu0 %v8761_v30  ;;  %6795 = vmatprep.subr.bf16.mxu1 %v8763_v32  ;;  %v663_v30 = vld [vmem:[%s13298_s1 + $0x13e0] sm:$0xff]  ;;  %v660_v32 = vld [vmem:[%s13298_s1 + $0x13c8] sm:$0xff] }
 0x124   :  { %v8817_v36 = vcombine.high %v659_v63, %v663_v30  ;;  %v8816_v43 = vcombine.low %v659_v63, %v663_v30  ;;  %v8818_v45 = vcombine.low %v660_v32, %v664_v33  ;;  %v708_v63 = vld [vmem:[%s13298_s1 + $0x1548] sm:$0xff] }
 0x125   :  { %v712_v30 = vld [vmem:[%s13298_s1 + $0x1568] sm:$0xff] }
 0x126   :  { %6468 = vmatpush1.bf16.msra.mxu0 %v8760_v37  ;;  %6796 = vmatpush1.bf16.msra.mxu1 %v8762_v39  ;;  %v8819_v37 = vcombine.high %v660_v32, %v664_v33  ;;  %v667_v39 = vld [vmem:[%s13298_s1 + $0x1400] sm:$0xff]  ;;  %v8858_v33 = vcombine.low %v700_v20, %v704_v21 }
 0x127   :  { %6469 = vmatprep.subr.bf16.mxu0 %v8769_v40  ;;  %6797 = vmatprep.subr.bf16.mxu1 %v8771_v41  ;;  %v671_v40 = vld [vmem:[%s13298_s1 + $0x1420] sm:$0xff]  ;;  %v668_v41 = vld [vmem:[%s13298_s1 + $0x1408] sm:$0xff] }
 0x128   :  { %v8825_v46 = vcombine.high %v667_v39, %v671_v40  ;;  %v8824_v55 = vcombine.low %v667_v39, %v671_v40  ;;  %v8826_v56 = vcombine.low %v668_v41, %v672_v42  ;;  %v716_v39 = vld [vmem:[%s13298_s1 + $0x1588] sm:$0xff] }
 0x129   :  { %v720_v40 = vld [vmem:[%s13298_s1 + $0x15a8] sm:$0xff] }
 0x12a   :  { %6470 = vmatpush1.bf16.msra.mxu0 %v8768_v47  ;;  %6798 = vmatpush1.bf16.msra.mxu1 %v8770_v49  ;;  %v8827_v47 = vcombine.high %v668_v41, %v672_v42  ;;  %v675_v49 = vld [vmem:[%s13298_s1 + $0x1440] sm:$0xff]  ;;  %v8866_v42 = vcombine.low %v708_v63, %v712_v30 }
 0x12b   :  { %6471 = vmatprep.subr.bf16.mxu0 %v8777_v50  ;;  %6799 = vmatprep.subr.bf16.mxu1 %v8779_v51  ;;  %v679_v50 = vld [vmem:[%s13298_s1 + $0x1460] sm:$0xff]  ;;  %v10684_v51 = vrot.slane %v10463_v8, %v9700_v53 }
 0x12c   :  { %v683_v8 = vld [vmem:[%s13298_s1 + $0x1480] sm:$0xff]  ;;  %v8832_v28 = vcombine.low %v675_v49, %v679_v50 }
 0x12e   :  { %6472 = vmatpush1.bf16.msra.mxu0 %v8776_v57  ;;  %6800 = vmatpush1.bf16.msra.mxu1 %v8778_v60  ;;  %v8833_v57 = vcombine.high %v675_v49, %v679_v50  ;;  %v8835_v60 = vcombine.high %v676_v52, %v680_v54  ;;  %v724_v49 = vld [vmem:[%s13298_s1 + $0x15c8] sm:$0xff]  ;;  %v8874_v54 = vcombine.low %v716_v39, %v720_v40 }
 0x12f   :  { %6473 = vmatprep.subr.bf16.mxu0 %v8785_v61  ;;  %6801 = vmatprep.subr.bf16.mxu1 %v8787_v62  ;;  %v687_v61 = vld [vmem:[%s13298_s1 + $0x14a0] sm:$0xff]  ;;  %v10700_v62 = vcombine.high %v10496_v29, %v10496_v29  ;;  %v728_v50 = vld [vmem:[%s13298_s1 + $0x15e8] sm:$0xff] }
 0x130   :  { %v8840_v13 = vcombine.low %v683_v8, %v687_v61 }
 0x132   :  { %6474 = vmatpush1.bf16.msra.mxu0 %v8784_v5  ;;  %6802 = vmatpush1.bf16.msra.mxu1 %v8786_v6  ;;  %v8841_v5 = vcombine.high %v683_v8, %v687_v61  ;;  %v8843_v6 = vcombine.high %v684_v0, %v688_v2  ;;  %v732_v8 = vld [vmem:[%s13298_s1 + $0x1608] sm:$0xff]  ;;  %v8882_v2 = vcombine.low %v724_v49, %v728_v50 }
 0x133   :  { %6475 = vmatprep.subr.bf16.mxu0 %v8793_v7  ;;  %6803 = vmatprep.subr.bf16.mxu1 %v8795_v10  ;;  %v691_v7 = vld [vmem:[%s13298_s1 + $0x14c0] sm:$0xff]  ;;  %v736_v61 = vld [vmem:[%s13298_s1 + $0x1628] sm:$0xff] }
 0x134   :  { %v695_v10 = vld [vmem:[%s13298_s1 + $0x14e0] sm:$0xff] }
 0x135   :  { %v8848_v22 = vcombine.low %v691_v7, %v695_v10 }
 0x136   :  { %6476 = vmatpush1.bf16.msra.mxu0 %v8792_v15  ;;  %6804 = vmatpush1.bf16.msra.mxu1 %v8794_v16  ;;  %v8849_v15 = vcombine.high %v691_v7, %v695_v10  ;;  %v8851_v16 = vcombine.high %v692_v11, %v696_v12  ;;  %v740_v7 = vld [vmem:[%s13298_s1 + $0x1648] sm:$0xff]  ;;  %v8890_v12 = vcombine.low %v732_v8, %v736_v61 }
 0x137   :  { %6477 = vmatprep.subr.bf16.mxu0 %v8801_v17  ;;  %6805 = vmatprep.subr.bf16.mxu1 %v8803_v18  ;;  %v699_v17 = vld [vmem:[%s13298_s1 + $0x1500] sm:$0xff]  ;;  %v744_v10 = vld [vmem:[%s13298_s1 + $0x1668] sm:$0xff] }
 0x138   :  { %v703_v18 = vld [vmem:[%s13298_s1 + $0x1520] sm:$0xff] }
 0x139   :  { %v8856_v32 = vcombine.low %v699_v17, %v703_v18 }
 0x13a   :  { %6478 = vmatpush1.bf16.msra.mxu0 %v8800_v25  ;;  %6806 = vmatpush1.bf16.msra.mxu1 %v8802_v26  ;;  %v8857_v25 = vcombine.high %v699_v17, %v703_v18  ;;  %v8859_v26 = vcombine.high %v700_v20, %v704_v21  ;;  %v748_v17 = vld [vmem:[%s13298_s1 + $0x1688] sm:$0xff]  ;;  %v8898_v21 = vcombine.low %v740_v7, %v744_v10 }
 0x13b   :  { %6479 = vmatprep.subr.bf16.mxu0 %v8809_v59  ;;  %6807 = vmatprep.subr.bf16.mxu1 %v8811_v27  ;;  %v707_v59 = vld [vmem:[%s13298_s1 + $0x1540] sm:$0xff]  ;;  %v752_v18 = vld [vmem:[%s13298_s1 + $0x16a8] sm:$0xff] }
 0x13c   :  { %v711_v27 = vld [vmem:[%s13298_s1 + $0x1560] sm:$0xff] }
 0x13d   :  { %v8864_v41 = vcombine.low %v707_v59, %v711_v27 }
 0x13e   :  { %6480 = vmatpush1.bf16.msra.mxu0 %v8808_v34  ;;  %6808 = vmatpush1.bf16.msra.mxu1 %v8810_v35  ;;  %v8865_v34 = vcombine.high %v707_v59, %v711_v27  ;;  %v8867_v35 = vcombine.high %v708_v63, %v712_v30  ;;  %v756_v59 = vld [vmem:[%s13298_s1 + $0x16c8] sm:$0xff]  ;;  %v8906_v30 = vcombine.low %v748_v17, %v752_v18 }
 0x13f   :  { %6481 = vmatprep.subr.bf16.mxu0 %v8817_v36  ;;  %6809 = vmatprep.subr.bf16.mxu1 %v8819_v37  ;;  %v715_v36 = vld [vmem:[%s13298_s1 + $0x1580] sm:$0xff]  ;;  %v760_v27 = vld [vmem:[%s13298_s1 + $0x16e8] sm:$0xff] }
 0x140   :  { %v719_v37 = vld [vmem:[%s13298_s1 + $0x15a0] sm:$0xff] }
 0x141   :  { %v8872_v52 = vcombine.low %v715_v36, %v719_v37 }
 0x142   :  { %6482 = vmatpush1.bf16.msra.mxu0 %v8816_v43  ;;  %6810 = vmatpush1.bf16.msra.mxu1 %v8818_v45  ;;  %v8873_v43 = vcombine.high %v715_v36, %v719_v37  ;;  %v8875_v45 = vcombine.high %v716_v39, %v720_v40  ;;  %v764_v36 = vld [vmem:[%s13298_s1 + $0x1708] sm:$0xff]  ;;  %v8914_v40 = vcombine.low %v756_v59, %v760_v27 }
 0x143   :  { %6492 = vmatprep.subr.bf16.mxu0 %v8825_v46  ;;  %6820 = vmatprep.subr.bf16.mxu1 %v8827_v47  ;;  %v723_v46 = vld [vmem:[%s13298_s1 + $0x15c0] sm:$0xff]  ;;  %v768_v37 = vld [vmem:[%s13298_s1 + $0x1728] sm:$0xff] }
 0x144   :  { %v727_v47 = vld [vmem:[%s13298_s1 + $0x15e0] sm:$0xff] }
 0x145   :  { %6484 = vmatmul.mubr.bf16.vlgmr.msra.gmra.mrb[0].mxu0 %v10684_v51  ;;  %6812 = vmatmul.mubr.bf16.vlgmr.msra.gmra.mrb[0].mxu1 %v10684_v51  ;;  %v8880_v0 = vcombine.low %v723_v46, %v727_v47 }
 0x146   :  { %6493 = vmatpush1.bf16.msra.mxu0 %v8824_v55  ;;  %6821 = vmatpush1.bf16.msra.mxu1 %v8826_v56  ;;  %v8881_v55 = vcombine.high %v723_v46, %v727_v47  ;;  %v8883_v56 = vcombine.high %v724_v49, %v728_v50  ;;  %v772_v46 = vld [vmem:[%s13298_s1 + $0x1748] sm:$0xff]  ;;  %v8922_v50 = vcombine.low %v764_v36, %v768_v37 }
 0x147   :  { %6494 = vmatprep.subr.bf16.mxu0 %v8833_v57  ;;  %6822 = vmatprep.subr.bf16.mxu1 %v8835_v60  ;;  %v731_v57 = vld [vmem:[%s13298_s1 + $0x1600] sm:$0xff]  ;;  %v776_v47 = vld [vmem:[%s13298_s1 + $0x1768] sm:$0xff] }
 0x148   :  { %6524 = vmatprep.mubr.bf16.mxu0 %v10700_v62  ;;  %6852 = vmatprep.mubr.bf16.mxu1 %v10700_v62  ;;  %v735_v60 = vld [vmem:[%s13298_s1 + $0x1620] sm:$0xff] }
 0x149   :  { %v8888_v11 = vcombine.low %v731_v57, %v735_v60 }
 0x14a   :  { %6495 = vmatpush1.bf16.msra.mxu0 %v8832_v28  ;;  %6823 = vmatpush1.bf16.msra.mxu1 %v8834_v3  ;;  %v8889_v28 = vcombine.high %v731_v57, %v735_v60  ;;  %v8891_v3 = vcombine.high %v732_v8, %v736_v61  ;;  %v780_v57 = vld [vmem:[%s13298_s1 + $0x1788] sm:$0xff]  ;;  %v8930_v61 = vcombine.low %v772_v46, %v776_v47 }
 0x14b   :  { %6496 = vmatprep.subr.bf16.mxu0 %v8841_v5  ;;  %6824 = vmatprep.subr.bf16.mxu1 %v8843_v6  ;;  %v739_v5 = vld [vmem:[%s13298_s1 + $0x1640] sm:$0xff]  ;;  %v784_v60 = vld [vmem:[%s13298_s1 + $0x17a8] sm:$0xff] }
 0x14c   :  { %v743_v6 = vld [vmem:[%s13298_s1 + $0x1660] sm:$0xff] }
 0x14d   :  { %v8896_v20 = vcombine.low %v739_v5, %v743_v6 }
 0x14e   :  { %6497 = vmatpush1.bf16.msra.mxu0 %v8840_v13  ;;  %6825 = vmatpush1.bf16.msra.mxu1 %v8842_v14  ;;  %v8897_v13 = vcombine.high %v739_v5, %v743_v6  ;;  %v8899_v14 = vcombine.high %v740_v7, %v744_v10  ;;  %v1102_v5 = vcombine.high %v10453_v1, %v10453_v1  ;;  %v788_v6 = vld [vmem:[%s13298_s1 + $0x17c8] sm:$0xff]  ;;  %v795_v1 = vld [vmem:[%s13298_s1 + $0x1800] sm:$0xff] }
 0x14f   :  { %6498 = vmatprep.subr.bf16.mxu0 %v8849_v15  ;;  %6826 = vmatprep.subr.bf16.mxu1 %v8851_v16  ;;  %v747_v15 = vld [vmem:[%s13298_s1 + $0x1680] sm:$0xff]  ;;  %v792_v7 = vld [vmem:[%s13298_s1 + $0x17e8] sm:$0xff] }
 0x150   :  { %v751_v16 = vld [vmem:[%s13298_s1 + $0x16a0] sm:$0xff] }
 0x151   :  { %v8904_v63 = vcombine.low %v747_v15, %v751_v16 }
 0x152   :  { %6499 = vmatpush1.bf16.msra.mxu0 %v8848_v22  ;;  %6827 = vmatpush1.bf16.msra.mxu1 %v8850_v24  ;;  %v8905_v22 = vcombine.high %v747_v15, %v751_v16  ;;  %v8907_v24 = vcombine.high %v748_v17, %v752_v18  ;;  %v10877_v15 = vrot.slane %v1102_v5, %v9700_v53  ;;  %v796_v16 = vld [vmem:[%s13298_s1 + $0x1808] sm:$0xff]  ;;  %v835_v5 = vld [vmem:[%s13298_s1 + $0x1940] sm:$0xff] }
 0x153   :  { %6500 = vmatprep.subr.bf16.mxu0 %v8857_v25  ;;  %6828 = vmatprep.subr.bf16.mxu1 %v8859_v26  ;;  %v755_v25 = vld [vmem:[%s13298_s1 + $0x16c0] sm:$0xff]  ;;  %v800_v17 = vld [vmem:[%s13298_s1 + $0x1828] sm:$0xff] }
 0x154   :  { %v759_v26 = vld [vmem:[%s13298_s1 + $0x16e0] sm:$0xff] }
 0x155   :  { %v8912_v39 = vcombine.low %v755_v25, %v759_v26 }
 0x156   :  { %6501 = vmatpush1.bf16.msra.mxu0 %v8856_v32  ;;  %6829 = vmatpush1.bf16.msra.mxu1 %v8858_v33  ;;  %v8913_v32 = vcombine.high %v755_v25, %v759_v26  ;;  %v8915_v33 = vcombine.high %v756_v59, %v760_v27  ;;  %v807_v25 = vld [vmem:[%s13298_s1 + $0x1860] sm:$0xff]  ;;  %v1118_v26 = vcombine.high %v10877_v15, %v10877_v15  ;;  %v804_v27 = vld [vmem:[%s13298_s1 + $0x1848] sm:$0xff] }
 0x157   :  { %6502 = vmatprep.subr.bf16.mxu0 %v8865_v34  ;;  %6830 = vmatprep.subr.bf16.mxu1 %v8867_v35  ;;  %v763_v34 = vld [vmem:[%s13298_s1 + $0x1700] sm:$0xff]  ;;  %v10895_v59 = vcombine.high %v10684_v51, %v10684_v51 }
 0x158   :  { %v767_v35 = vld [vmem:[%s13298_s1 + $0x1720] sm:$0xff] }
 0x159   :  { %v8920_v49 = vcombine.low %v763_v34, %v767_v35 }
 0x15a   :  { %6503 = vmatpush1.bf16.msra.mxu0 %v8864_v41  ;;  %6831 = vmatpush1.bf16.msra.mxu1 %v8866_v42  ;;  %v8921_v41 = vcombine.high %v763_v34, %v767_v35  ;;  %v8923_v42 = vcombine.high %v764_v36, %v768_v37  ;;  %v811_v35 = vld [vmem:[%s13298_s1 + $0x1880] sm:$0xff]  ;;  %v10910_v37 = vrot.slane %v1118_v26, %v9700_v53 }
 0x15b   :  { %6504 = vmatprep.subr.bf16.mxu0 %v8873_v43  ;;  %6832 = vmatprep.subr.bf16.mxu1 %v8875_v45  ;;  %v771_v43 = vld [vmem:[%s13298_s1 + $0x1740] sm:$0xff] }
 0x15c   :  { %v775_v45 = vld [vmem:[%s13298_s1 + $0x1760] sm:$0xff] }
 0x15d   :  { %v8928_v8 = vcombine.low %v771_v43, %v775_v45  ;;  %v815_v36 = vld [vmem:[%s13298_s1 + $0x18a0] sm:$0xff] }
 0x15e   :  { %6505 = vmatpush1.bf16.msra.mxu0 %v8872_v52  ;;  %6833 = vmatpush1.bf16.msra.mxu1 %v8874_v54  ;;  %v8929_v52 = vcombine.high %v771_v43, %v775_v45  ;;  %v8931_v54 = vcombine.high %v772_v46, %v776_v47  ;;  %v8969_v43 = vcombine.high %v811_v35, %v815_v36  ;;  %v819_v46 = vld [vmem:[%s13298_s1 + $0x18c0] sm:$0xff] }
 0x15f   :  { %6506 = vmatprep.subr.bf16.mxu0 %v8881_v55  ;;  %6834 = vmatprep.subr.bf16.mxu1 %v8883_v56  ;;  %v779_v55 = vld [vmem:[%s13298_s1 + $0x1780] sm:$0xff] }
 0x160   :  { %v783_v56 = vld [vmem:[%s13298_s1 + $0x17a0] sm:$0xff] }
 0x161   :  { %v8936_v10 = vcombine.low %v779_v55, %v783_v56  ;;  %v823_v47 = vld [vmem:[%s13298_s1 + $0x18e0] sm:$0xff] }
 0x162   :  { %6507 = vmatpush1.bf16.msra.mxu0 %v8880_v0  ;;  %6835 = vmatpush1.bf16.msra.mxu1 %v8882_v2  ;;  %v8937_v0 = vcombine.high %v779_v55, %v783_v56  ;;  %v8939_v2 = vcombine.high %v780_v57, %v784_v60  ;;  %v8977_v55 = vcombine.high %v819_v46, %v823_v47  ;;  %v855_v26 = vld [vmem:[%s13298_s1 + $0x19e0] sm:$0xff] }
 0x163   :  { %6508 = vmatprep.subr.bf16.mxu0 %v8889_v28  ;;  %6836 = vmatprep.subr.bf16.mxu1 %v8891_v3  ;;  %v787_v28 = vld [vmem:[%s13298_s1 + $0x17c0] sm:$0xff] }
 0x164   :  { %v791_v3 = vld [vmem:[%s13298_s1 + $0x17e0] sm:$0xff] }
 0x165   :  { %v8944_v18 = vcombine.low %v787_v28, %v791_v3 }
 0x166   :  { %6509 = vmatpush1.bf16.msra.mxu0 %v8888_v11  ;;  %6837 = vmatpush1.bf16.msra.mxu1 %v8890_v12  ;;  %v8938_v11 = vcombine.low %v780_v57, %v784_v60  ;;  %v8945_v12 = vcombine.high %v787_v28, %v791_v3  ;;  %v827_v57 = vld [vmem:[%s13298_s1 + $0x1900] sm:$0xff] }
 0x167   :  { %6510 = vmatprep.subr.bf16.mxu0 %v8897_v13  ;;  %6838 = vmatprep.subr.bf16.mxu1 %v8899_v14  ;;  %v8947_v13 = vcombine.high %v788_v6, %v792_v7  ;;  %v799_v14 = vld [vmem:[%s13298_s1 + $0x1820] sm:$0xff] }
 0x168   :  { %v831_v60 = vld [vmem:[%s13298_s1 + $0x1920] sm:$0xff] }
 0x169   :  { %v8985_v28 = vcombine.high %v827_v57, %v831_v60 }
 0x16a   :  { %6511 = vmatpush1.bf16.msra.mxu0 %v8896_v20  ;;  %6839 = vmatpush1.bf16.msra.mxu1 %v8898_v21  ;;  %v8946_v20 = vcombine.low %v788_v6, %v792_v7  ;;  %v8953_v21 = vcombine.high %v795_v1, %v799_v14  ;;  %v839_v6 = vld [vmem:[%s13298_s1 + $0x1960] sm:$0xff]  ;;  %v836_v7 = vld [vmem:[%s13298_s1 + $0x1948] sm:$0xff] }
 0x16b   :  { %6512 = vmatprep.subr.bf16.mxu0 %v8905_v22  ;;  %6840 = vmatprep.subr.bf16.mxu1 %v8907_v24  ;;  %v8955_v22 = vcombine.high %v796_v16, %v800_v17  ;;  %v803_v24 = vld [vmem:[%s13298_s1 + $0x1840] sm:$0xff] }
 0x16e   :  { %6513 = vmatpush1.bf16.msra.mxu0 %v8904_v63  ;;  %6841 = vmatpush1.bf16.msra.mxu1 %v8906_v30  ;;  %v808_v63 = vld [vmem:[%s13298_s1 + $0x1868] sm:$0xff]  ;;  %v8952_v30 = vcombine.low %v795_v1, %v799_v14  ;;  %v843_v14 = vld [vmem:[%s13298_s1 + $0x1980] sm:$0xff] }
 0x16f   :  { %6514 = vmatprep.subr.bf16.mxu0 %v8913_v32  ;;  %6842 = vmatprep.subr.bf16.mxu1 %v8915_v33  ;;  %v8954_v32 = vcombine.low %v796_v16, %v800_v17  ;;  %v8961_v33 = vcombine.high %v803_v24, %v807_v25  ;;  %v8963_v34 = vcombine.high %v804_v27, %v808_v63  ;;  %v847_v16 = vld [vmem:[%s13298_s1 + $0x19a0] sm:$0xff]  ;;  %v844_v17 = vld [vmem:[%s13298_s1 + $0x1988] sm:$0xff] }
 0x172   :  { %6515 = vmatpush1.bf16.msra.mxu0 %v8912_v39  ;;  %6843 = vmatpush1.bf16.msra.mxu1 %v8914_v40  ;;  %v812_v39 = vld [vmem:[%s13298_s1 + $0x1888] sm:$0xff] }
 0x173   :  { %6516 = vmatprep.subr.bf16.mxu0 %v8921_v41  ;;  %6844 = vmatprep.subr.bf16.mxu1 %v8923_v42  ;;  %v816_v40 = vld [vmem:[%s13298_s1 + $0x18a8] sm:$0xff]  ;;  %v8960_v41 = vcombine.low %v803_v24, %v807_v25  ;;  %v8962_v42 = vcombine.low %v804_v27, %v808_v63  ;;  %v851_v25 = vld [vmem:[%s13298_s1 + $0x19c0] sm:$0xff] }
 0x174   :  { %v8971_v45 = vcombine.high %v812_v39, %v816_v40  ;;  %v852_v27 = vld [vmem:[%s13298_s1 + $0x19c8] sm:$0xff] }
 0x175   :  { %v856_v63 = vld [vmem:[%s13298_s1 + $0x19e8] sm:$0xff] }
 0x176   :  { %6517 = vmatpush1.bf16.msra.mxu0 %v8920_v49  ;;  %6845 = vmatpush1.bf16.msra.mxu1 %v8922_v50  ;;  %v820_v49 = vld [vmem:[%s13298_s1 + $0x18c8] sm:$0xff] }
 0x177   :  { %6518 = vmatprep.subr.bf16.mxu0 %v8929_v52  ;;  %6846 = vmatprep.subr.bf16.mxu1 %v8931_v54  ;;  %v824_v50 = vld [vmem:[%s13298_s1 + $0x18e8] sm:$0xff]  ;;  %v8968_v52 = vcombine.low %v811_v35, %v815_v36  ;;  %v8970_v54 = vcombine.low %v812_v39, %v816_v40  ;;  %v859_v35 = vld [vmem:[%s13298_s1 + $0x1a00] sm:$0xff] }
 0x178   :  { %v8979_v56 = vcombine.high %v820_v49, %v824_v50  ;;  %v863_v36 = vld [vmem:[%s13298_s1 + $0x1a20] sm:$0xff]  ;;  %v860_v39 = vld [vmem:[%s13298_s1 + $0x1a08] sm:$0xff] }
 0x179   :  { %v864_v40 = vld [vmem:[%s13298_s1 + $0x1a28] sm:$0xff] }
 0x17a   :  { %6519 = vmatpush1.bf16.msra.mxu0 %v8928_v8  ;;  %6847 = vmatpush1.bf16.msra.mxu1 %v8930_v61  ;;  %v828_v8 = vld [vmem:[%s13298_s1 + $0x1908] sm:$0xff] }
 0x17b   :  { %6520 = vmatprep.subr.bf16.mxu0 %v8937_v0  ;;  %6848 = vmatprep.subr.bf16.mxu1 %v8939_v2  ;;  %v832_v61 = vld [vmem:[%s13298_s1 + $0x1928] sm:$0xff]  ;;  %v8976_v0 = vcombine.low %v819_v46, %v823_v47  ;;  %v8978_v2 = vcombine.low %v820_v49, %v824_v50  ;;  %v867_v46 = vld [vmem:[%s13298_s1 + $0x1a40] sm:$0xff] }
 0x17c   :  { %v8987_v3 = vcombine.high %v828_v8, %v832_v61  ;;  %v871_v47 = vld [vmem:[%s13298_s1 + $0x1a60] sm:$0xff]  ;;  %v868_v49 = vld [vmem:[%s13298_s1 + $0x1a48] sm:$0xff] }
 0x17d   :  { %v872_v50 = vld [vmem:[%s13298_s1 + $0x1a68] sm:$0xff] }
 0x17e   :  { %6521 = vmatpush1.bf16.msra.mxu0 %v8936_v10  ;;  %6849 = vmatpush1.bf16.msra.mxu1 %v8938_v11  ;;  %v840_v10 = vld [vmem:[%s13298_s1 + $0x1968] sm:$0xff]  ;;  %v8984_v11 = vcombine.low %v827_v57, %v831_v60  ;;  %v875_v57 = vld [vmem:[%s13298_s1 + $0x1a80] sm:$0xff] }
 0x17f   :  { %6522 = vmatprep.subr.bf16.mxu0 %v8945_v12  ;;  %6850 = vmatprep.subr.bf16.mxu1 %v8947_v13  ;;  %v8986_v12 = vcombine.low %v828_v8, %v832_v61  ;;  %v8993_v13 = vcombine.high %v835_v5, %v839_v6  ;;  %v8995_v1 = vcombine.high %v836_v7, %v840_v10  ;;  %v879_v60 = vld [vmem:[%s13298_s1 + $0x1aa0] sm:$0xff]  ;;  %v876_v8 = vld [vmem:[%s13298_s1 + $0x1a88] sm:$0xff] }
 0x180   :  { %v880_v61 = vld [vmem:[%s13298_s1 + $0x1aa8] sm:$0xff] }
 0x182   :  { %6523 = vmatpush1.bf16.msra.mxu0 %v8944_v18  ;;  %6851 = vmatpush1.bf16.msra.mxu1 %v8946_v20  ;;  %v848_v18 = vld [vmem:[%s13298_s1 + $0x19a8] sm:$0xff]  ;;  %v8992_v20 = vcombine.low %v835_v5, %v839_v6  ;;  %v883_v5 = vld [vmem:[%s13298_s1 + $0x1ac0] sm:$0xff] }
 0x183   :  { %6533 = vmatprep.subr.bf16.mxu0 %v8953_v21  ;;  %6861 = vmatprep.subr.bf16.mxu1 %v8955_v22  ;;  %v8994_v21 = vcombine.low %v836_v7, %v840_v10  ;;  %v9001_v22 = vcombine.high %v843_v14, %v847_v16  ;;  %v9003_v24 = vcombine.high %v844_v17, %v848_v18  ;;  %v887_v6 = vld [vmem:[%s13298_s1 + $0x1ae0] sm:$0xff]  ;;  %v884_v7 = vld [vmem:[%s13298_s1 + $0x1ac8] sm:$0xff] }
 0x184   :  { %v888_v10 = vld [vmem:[%s13298_s1 + $0x1ae8] sm:$0xff] }
 0x185   :  { %6525 = vmatmul.mubr.bf16.vlgmr.msra.gmra.mrb[0].mxu0 %v10895_v59  ;;  %6853 = vmatmul.mubr.bf16.vlgmr.msra.gmra.mrb[0].mxu1 %v10895_v59 }
 0x186   :  { %6534 = vmatpush1.bf16.msra.mxu0 %v8952_v30  ;;  %6862 = vmatpush1.bf16.msra.mxu1 %v8954_v32  ;;  %v9000_v30 = vcombine.low %v843_v14, %v847_v16  ;;  %v9002_v32 = vcombine.low %v844_v17, %v848_v18  ;;  %v891_v14 = vld [vmem:[%s13298_s1 + $0x1b00] sm:$0xff]  ;;  %v892_v17 = vld [vmem:[%s13298_s1 + $0x1b08] sm:$0xff] }
 0x187   :  { %6535 = vmatprep.subr.bf16.mxu0 %v8961_v33  ;;  %6863 = vmatprep.subr.bf16.mxu1 %v8963_v34  ;;  %v9009_v33 = vcombine.high %v851_v25, %v855_v26  ;;  %v9011_v34 = vcombine.high %v852_v27, %v856_v63  ;;  %v895_v16 = vld [vmem:[%s13298_s1 + $0x1b20] sm:$0xff]  ;;  %v896_v18 = vld [vmem:[%s13298_s1 + $0x1b28] sm:$0xff] }
 0x188   :  { %6565 = vmatprep.mubr.bf16.mxu0 %v10910_v37  ;;  %6893 = vmatprep.mubr.bf16.mxu1 %v10910_v37 }
 0x18a   :  { %6536 = vmatpush1.bf16.msra.mxu0 %v8960_v41  ;;  %6864 = vmatpush1.bf16.msra.mxu1 %v8962_v42  ;;  %v9008_v41 = vcombine.low %v851_v25, %v855_v26  ;;  %v9010_v42 = vcombine.low %v852_v27, %v856_v63  ;;  %v899_v25 = vld [vmem:[%s13298_s1 + $0x1b40] sm:$0xff]  ;;  %v900_v27 = vld [vmem:[%s13298_s1 + $0x1b48] sm:$0xff] }
 0x18b   :  { %6537 = vmatprep.subr.bf16.mxu0 %v8969_v43  ;;  %6865 = vmatprep.subr.bf16.mxu1 %v8971_v45  ;;  %v9017_v43 = vcombine.high %v859_v35, %v863_v36  ;;  %v9019_v45 = vcombine.high %v860_v39, %v864_v40  ;;  %v903_v26 = vld [vmem:[%s13298_s1 + $0x1b60] sm:$0xff]  ;;  %v904_v63 = vld [vmem:[%s13298_s1 + $0x1b68] sm:$0xff] }
 0x18e   :  { %6538 = vmatpush1.bf16.msra.mxu0 %v8968_v52  ;;  %6866 = vmatpush1.bf16.msra.mxu1 %v8970_v54  ;;  %v9016_v52 = vcombine.low %v859_v35, %v863_v36  ;;  %v9018_v54 = vcombine.low %v860_v39, %v864_v40  ;;  %v907_v35 = vld [vmem:[%s13298_s1 + $0x1b80] sm:$0xff]  ;;  %v908_v39 = vld [vmem:[%s13298_s1 + $0x1b88] sm:$0xff] }
 0x18f   :  { %6539 = vmatprep.subr.bf16.mxu0 %v8977_v55  ;;  %6867 = vmatprep.subr.bf16.mxu1 %v8979_v56  ;;  %v9025_v55 = vcombine.high %v867_v46, %v871_v47  ;;  %v9027_v56 = vcombine.high %v868_v49, %v872_v50  ;;  %v911_v36 = vld [vmem:[%s13298_s1 + $0x1ba0] sm:$0xff]  ;;  %v912_v40 = vld [vmem:[%s13298_s1 + $0x1ba8] sm:$0xff] }
 0x192   :  { %6540 = vmatpush1.bf16.msra.mxu0 %v8976_v0  ;;  %6868 = vmatpush1.bf16.msra.mxu1 %v8978_v2  ;;  %v9024_v0 = vcombine.low %v867_v46, %v871_v47  ;;  %v9026_v2 = vcombine.low %v868_v49, %v872_v50  ;;  %v915_v46 = vld [vmem:[%s13298_s1 + $0x1bc0] sm:$0xff]  ;;  %v916_v49 = vld [vmem:[%s13298_s1 + $0x1bc8] sm:$0xff] }
 0x193   :  { %6541 = vmatprep.subr.bf16.mxu0 %v8985_v28  ;;  %6869 = vmatprep.subr.bf16.mxu1 %v8987_v3  ;;  %v9033_v28 = vcombine.high %v875_v57, %v879_v60  ;;  %v9035_v3 = vcombine.high %v876_v8, %v880_v61  ;;  %v919_v47 = vld [vmem:[%s13298_s1 + $0x1be0] sm:$0xff]  ;;  %v920_v50 = vld [vmem:[%s13298_s1 + $0x1be8] sm:$0xff] }
 0x196   :  { %6542 = vmatpush1.bf16.msra.mxu0 %v8984_v11  ;;  %6870 = vmatpush1.bf16.msra.mxu1 %v8986_v12  ;;  %v9032_v11 = vcombine.low %v875_v57, %v879_v60  ;;  %v9034_v12 = vcombine.low %v876_v8, %v880_v61  ;;  %v923_v57 = vld [vmem:[%s13298_s1 + $0x1c00] sm:$0xff]  ;;  %v924_v8 = vld [vmem:[%s13298_s1 + $0x1c08] sm:$0xff] }
 0x197   :  { %6543 = vmatprep.subr.bf16.mxu0 %v8993_v13  ;;  %6871 = vmatprep.subr.bf16.mxu1 %v8995_v1  ;;  %v9041_v13 = vcombine.high %v883_v5, %v887_v6  ;;  %v9043_v1 = vcombine.high %v884_v7, %v888_v10  ;;  %v927_v60 = vld [vmem:[%s13298_s1 + $0x1c20] sm:$0xff]  ;;  %v928_v61 = vld [vmem:[%s13298_s1 + $0x1c28] sm:$0xff] }
 0x19a   :  { %6544 = vmatpush1.bf16.msra.mxu0 %v8992_v20  ;;  %6872 = vmatpush1.bf16.msra.mxu1 %v8994_v21  ;;  %v9040_v20 = vcombine.low %v883_v5, %v887_v6  ;;  %v9042_v21 = vcombine.low %v884_v7, %v888_v10  ;;  %v931_v5 = vld [vmem:[%s13298_s1 + $0x1c40] sm:$0xff]  ;;  %v11098_v7 = vrot.slane %v10877_v15, %v9700_v53  ;;  %v932_v10 = vld [vmem:[%s13298_s1 + $0x1c48] sm:$0xff] }
 0x19b   :  { %6545 = vmatprep.subr.bf16.mxu0 %v9001_v22  ;;  %6873 = vmatprep.subr.bf16.mxu1 %v9003_v24  ;;  %v9049_v22 = vcombine.high %v891_v14, %v895_v16  ;;  %v9051_v24 = vcombine.high %v892_v17, %v896_v18  ;;  %v935_v6 = vld [vmem:[%s13298_s1 + $0x1c60] sm:$0xff] }
 0x19c   :  { %v939_v53 = vld [vmem:[%s13298_s1 + $0x1c80] sm:$0xff] }
 0x19d   :  { %v943_v15 = vld [vmem:[%s13298_s1 + $0x1ca0] sm:$0xff] }
 0x19e   :  { %6546 = vmatpush1.bf16.msra.mxu0 %v9000_v30  ;;  %6874 = vmatpush1.bf16.msra.mxu1 %v9002_v32  ;;  %v9048_v30 = vcombine.low %v891_v14, %v895_v16  ;;  %v9050_v32 = vcombine.low %v892_v17, %v896_v18  ;;  %v11114_v16 = vcombine.high %v10910_v37, %v10910_v37  ;;  %v940_v17 = vld [vmem:[%s13298_s1 + $0x1c88] sm:$0xff] }
 0x19f   :  { %6547 = vmatprep.subr.bf16.mxu0 %v9009_v33  ;;  %6875 = vmatprep.subr.bf16.mxu1 %v9011_v34  ;;  %v9057_v33 = vcombine.high %v899_v25, %v903_v26  ;;  %v9059_v34 = vcombine.high %v900_v27, %v904_v63  ;;  %v944_v18 = vld [vmem:[%s13298_s1 + $0x1ca8] sm:$0xff] }
 0x1a2   :  { %6548 = vmatpush1.bf16.msra.mxu0 %v9008_v41  ;;  %6876 = vmatpush1.bf16.msra.mxu1 %v9010_v42  ;;  %v9056_v41 = vcombine.low %v899_v25, %v903_v26  ;;  %v9058_v42 = vcombine.low %v900_v27, %v904_v63  ;;  %v947_v25 = vld [vmem:[%s13298_s1 + $0x1cc0] sm:$0xff]  ;;  %v948_v27 = vld [vmem:[%s13298_s1 + $0x1cc8] sm:$0xff] }
 0x1a3   :  { %6549 = vmatprep.subr.bf16.mxu0 %v9017_v43  ;;  %6877 = vmatprep.subr.bf16.mxu1 %v9019_v45  ;;  %v9065_v43 = vcombine.high %v907_v35, %v911_v36  ;;  %v9067_v45 = vcombine.high %v908_v39, %v912_v40  ;;  %v951_v26 = vld [vmem:[%s13298_s1 + $0x1ce0] sm:$0xff]  ;;  %v952_v63 = vld [vmem:[%s13298_s1 + $0x1ce8] sm:$0xff] }
 0x1a6   :  { %6550 = vmatpush1.bf16.msra.mxu0 %v9016_v52  ;;  %6878 = vmatpush1.bf16.msra.mxu1 %v9018_v54  ;;  %v9064_v52 = vcombine.low %v907_v35, %v911_v36  ;;  %v9066_v54 = vcombine.low %v908_v39, %v912_v40  ;;  %v955_v35 = vld [vmem:[%s13298_s1 + $0x1d00] sm:$0xff]  ;;  %v956_v39 = vld [vmem:[%s13298_s1 + $0x1d08] sm:$0xff] }
 0x1a7   :  { %6551 = vmatprep.subr.bf16.mxu0 %v9025_v55  ;;  %6879 = vmatprep.subr.bf16.mxu1 %v9027_v56  ;;  %v9073_v55 = vcombine.high %v915_v46, %v919_v47  ;;  %v9075_v56 = vcombine.high %v916_v49, %v920_v50  ;;  %v959_v36 = vld [vmem:[%s13298_s1 + $0x1d20] sm:$0xff]  ;;  %v960_v40 = vld [vmem:[%s13298_s1 + $0x1d28] sm:$0xff] }
 0x1aa   :  { %6552 = vmatpush1.bf16.msra.mxu0 %v9024_v0  ;;  %6880 = vmatpush1.bf16.msra.mxu1 %v9026_v2  ;;  %v9072_v0 = vcombine.low %v915_v46, %v919_v47  ;;  %v9074_v2 = vcombine.low %v916_v49, %v920_v50  ;;  %v963_v46 = vld [vmem:[%s13298_s1 + $0x1d40] sm:$0xff]  ;;  %v964_v49 = vld [vmem:[%s13298_s1 + $0x1d48] sm:$0xff] }
 0x1ab   :  { %6553 = vmatprep.subr.bf16.mxu0 %v9033_v28  ;;  %6881 = vmatprep.subr.bf16.mxu1 %v9035_v3  ;;  %v9081_v28 = vcombine.high %v923_v57, %v927_v60  ;;  %v9083_v3 = vcombine.high %v924_v8, %v928_v61  ;;  %v967_v47 = vld [vmem:[%s13298_s1 + $0x1d60] sm:$0xff]  ;;  %v968_v50 = vld [vmem:[%s13298_s1 + $0x1d68] sm:$0xff] }
 0x1ae   :  { %6554 = vmatpush1.bf16.msra.mxu0 %v9032_v11  ;;  %6882 = vmatpush1.bf16.msra.mxu1 %v9034_v12  ;;  %v936_v11 = vld [vmem:[%s13298_s1 + $0x1c68] sm:$0xff]  ;;  %v9080_v12 = vcombine.low %v923_v57, %v927_v60  ;;  %v971_v57 = vld [vmem:[%s13298_s1 + $0x1d80] sm:$0xff] }
 0x1af   :  { %6555 = vmatprep.subr.bf16.mxu0 %v9041_v13  ;;  %6883 = vmatprep.subr.bf16.mxu1 %v9043_v1  ;;  %v9082_v13 = vcombine.low %v924_v8, %v928_v61  ;;  %v9089_v1 = vcombine.high %v931_v5, %v935_v6  ;;  %v9091_v14 = vcombine.high %v932_v10, %v936_v11  ;;  %v975_v60 = vld [vmem:[%s13298_s1 + $0x1da0] sm:$0xff]  ;;  %v972_v8 = vld [vmem:[%s13298_s1 + $0x1d88] sm:$0xff] }
 0x1b0   :  { %v976_v61 = vld [vmem:[%s13298_s1 + $0x1da8] sm:$0xff] }
 0x1b2   :  { %6556 = vmatpush1.bf16.msra.mxu0 %v9040_v20  ;;  %6884 = vmatpush1.bf16.msra.mxu1 %v9042_v21  ;;  %v9088_v20 = vcombine.low %v931_v5, %v935_v6  ;;  %v9090_v21 = vcombine.low %v932_v10, %v936_v11  ;;  %v979_v5 = vld [vmem:[%s13298_s1 + $0x1dc0] sm:$0xff]  ;;  %v980_v10 = vld [vmem:[%s13298_s1 + $0x1dc8] sm:$0xff] }
 0x1b3   :  { %6557 = vmatprep.subr.bf16.mxu0 %v9049_v22  ;;  %6885 = vmatprep.subr.bf16.mxu1 %v9051_v24  ;;  %v9097_v22 = vcombine.high %v939_v53, %v943_v15  ;;  %v9099_v24 = vcombine.high %v940_v17, %v944_v18  ;;  %v983_v6 = vld [vmem:[%s13298_s1 + $0x1de0] sm:$0xff]  ;;  %v984_v11 = vld [vmem:[%s13298_s1 + $0x1de8] sm:$0xff] }
 0x1b6   :  { %6558 = vmatpush1.bf16.msra.mxu0 %v9048_v30  ;;  %6886 = vmatpush1.bf16.msra.mxu1 %v9050_v32  ;;  %v9096_v30 = vcombine.low %v939_v53, %v943_v15  ;;  %v9098_v32 = vcombine.low %v940_v17, %v944_v18  ;;  %v987_v53 = vld [vmem:[%s13298_s1 + $0x1e00] sm:$0xff]  ;;  %v988_v17 = vld [vmem:[%s13298_s1 + $0x1e08] sm:$0xff] }
 0x1b7   :  { %6559 = vmatprep.subr.bf16.mxu0 %v9057_v33  ;;  %6887 = vmatprep.subr.bf16.mxu1 %v9059_v34  ;;  %v9105_v33 = vcombine.high %v947_v25, %v951_v26  ;;  %v9107_v34 = vcombine.high %v948_v27, %v952_v63  ;;  %v991_v15 = vld [vmem:[%s13298_s1 + $0x1e20] sm:$0xff]  ;;  %v992_v18 = vld [vmem:[%s13298_s1 + $0x1e28] sm:$0xff] }
 0x1ba   :  { %6560 = vmatpush1.bf16.msra.mxu0 %v9056_v41  ;;  %6888 = vmatpush1.bf16.msra.mxu1 %v9058_v42  ;;  %v9104_v41 = vcombine.low %v947_v25, %v951_v26  ;;  %v9106_v42 = vcombine.low %v948_v27, %v952_v63  ;;  %v995_v25 = vld [vmem:[%s13298_s1 + $0x1e40] sm:$0xff]  ;;  %v996_v27 = vld [vmem:[%s13298_s1 + $0x1e48] sm:$0xff] }
 0x1bb   :  { %6561 = vmatprep.subr.bf16.mxu0 %v9065_v43  ;;  %6889 = vmatprep.subr.bf16.mxu1 %v9067_v45  ;;  %v9113_v43 = vcombine.high %v955_v35, %v959_v36  ;;  %v9115_v45 = vcombine.high %v956_v39, %v960_v40  ;;  %v999_v26 = vld [vmem:[%s13298_s1 + $0x1e60] sm:$0xff]  ;;  %v1000_v63 = vld [vmem:[%s13298_s1 + $0x1e68] sm:$0xff] }
 0x1be   :  { %6562 = vmatpush1.bf16.msra.mxu0 %v9064_v52  ;;  %6890 = vmatpush1.bf16.msra.mxu1 %v9066_v54  ;;  %v9112_v52 = vcombine.low %v955_v35, %v959_v36  ;;  %v9114_v54 = vcombine.low %v956_v39, %v960_v40  ;;  %v1003_v35 = vld [vmem:[%s13298_s1 + $0x1e80] sm:$0xff]  ;;  %v1004_v39 = vld [vmem:[%s13298_s1 + $0x1e88] sm:$0xff] }
 0x1bf   :  { %6563 = vmatprep.subr.bf16.mxu0 %v9073_v55  ;;  %6891 = vmatprep.subr.bf16.mxu1 %v9075_v56  ;;  %v9121_v55 = vcombine.high %v963_v46, %v967_v47  ;;  %v9123_v56 = vcombine.high %v964_v49, %v968_v50  ;;  %v1007_v36 = vld [vmem:[%s13298_s1 + $0x1ea0] sm:$0xff]  ;;  %v1008_v40 = vld [vmem:[%s13298_s1 + $0x1ea8] sm:$0xff] }
 0x1c2   :  { %6564 = vmatpush1.bf16.msra.mxu0 %v9072_v0  ;;  %6892 = vmatpush1.bf16.msra.mxu1 %v9074_v2  ;;  %v9120_v0 = vcombine.low %v963_v46, %v967_v47  ;;  %v9122_v2 = vcombine.low %v964_v49, %v968_v50  ;;  %v1011_v46 = vld [vmem:[%s13298_s1 + $0x1ec0] sm:$0xff]  ;;  %v1012_v49 = vld [vmem:[%s13298_s1 + $0x1ec8] sm:$0xff] }
 0x1c3   :  { %6574 = vmatprep.subr.bf16.mxu0 %v9081_v28  ;;  %6902 = vmatprep.subr.bf16.mxu1 %v9083_v3  ;;  %v9129_v28 = vcombine.high %v971_v57, %v975_v60  ;;  %v9131_v3 = vcombine.high %v972_v8, %v976_v61  ;;  %v1015_v47 = vld [vmem:[%s13298_s1 + $0x1ee0] sm:$0xff]  ;;  %v1016_v50 = vld [vmem:[%s13298_s1 + $0x1ee8] sm:$0xff] }
 0x1c5   :  { %6566 = vmatmul.mubr.bf16.vlgmr.msra.gmra.mrb[0].mxu0 %v11098_v7  ;;  %6894 = vmatmul.mubr.bf16.vlgmr.msra.gmra.mrb[0].mxu1 %v11098_v7 }
 0x1c6   :  { %6575 = vmatpush1.bf16.msra.mxu0 %v9080_v12  ;;  %6903 = vmatpush1.bf16.msra.mxu1 %v9082_v13  ;;  %v9128_v12 = vcombine.low %v971_v57, %v975_v60  ;;  %v9130_v13 = vcombine.low %v972_v8, %v976_v61  ;;  %v1019_v57 = vld [vmem:[%s13298_s1 + $0x1f00] sm:$0xff]  ;;  %v1020_v8 = vld [vmem:[%s13298_s1 + $0x1f08] sm:$0xff] }
 0x1c7   :  { %6576 = vmatprep.subr.bf16.mxu0 %v9089_v1  ;;  %6904 = vmatprep.subr.bf16.mxu1 %v9091_v14  ;;  %v9137_v1 = vcombine.high %v979_v5, %v983_v6  ;;  %v9139_v14 = vcombine.high %v980_v10, %v984_v11  ;;  %v1023_v60 = vld [vmem:[%s13298_s1 + $0x1f20] sm:$0xff]  ;;  %v1024_v61 = vld [vmem:[%s13298_s1 + $0x1f28] sm:$0xff] }
 0x1c8   :  { %6606 = vmatprep.mubr.bf16.mxu0 %v11114_v16  ;;  %6934 = vmatprep.mubr.bf16.mxu1 %v11114_v16 }
 0x1ca   :  { %6577 = vmatpush1.bf16.msra.mxu0 %v9088_v20  ;;  %6905 = vmatpush1.bf16.msra.mxu1 %v9090_v21  ;;  %v9136_v20 = vcombine.low %v979_v5, %v983_v6  ;;  %v9138_v21 = vcombine.low %v980_v10, %v984_v11  ;;  %v1027_v5 = vld [vmem:[%s13298_s1 + $0x1f40] sm:$0xff]  ;;  %v1028_v10 = vld [vmem:[%s13298_s1 + $0x1f48] sm:$0xff] }
 0x1cb   :  { %6578 = vmatprep.subr.bf16.mxu0 %v9097_v22  ;;  %6906 = vmatprep.subr.bf16.mxu1 %v9099_v24  ;;  %v9145_v22 = vcombine.high %v987_v53, %v991_v15  ;;  %v9147_v24 = vcombine.high %v988_v17, %v992_v18  ;;  %v1031_v6 = vld [vmem:[%s13298_s1 + $0x1f60] sm:$0xff]  ;;  %v1032_v11 = vld [vmem:[%s13298_s1 + $0x1f68] sm:$0xff] }
 0x1ce   :  { %6579 = vmatpush1.bf16.msra.mxu0 %v9096_v30  ;;  %6907 = vmatpush1.bf16.msra.mxu1 %v9098_v32  ;;  %v9144_v30 = vcombine.low %v987_v53, %v991_v15  ;;  %v9146_v32 = vcombine.low %v988_v17, %v992_v18  ;;  %v1035_v53 = vld [vmem:[%s13298_s1 + $0x1f80] sm:$0xff]  ;;  %v1036_v17 = vld [vmem:[%s13298_s1 + $0x1f88] sm:$0xff] }
 0x1cf   :  { %6580 = vmatprep.subr.bf16.mxu0 %v9105_v33  ;;  %6908 = vmatprep.subr.bf16.mxu1 %v9107_v34  ;;  %v9153_v33 = vcombine.high %v995_v25, %v999_v26  ;;  %v9155_v34 = vcombine.high %v996_v27, %v1000_v63  ;;  %v1039_v15 = vld [vmem:[%s13298_s1 + $0x1fa0] sm:$0xff]  ;;  %v1040_v18 = vld [vmem:[%s13298_s1 + $0x1fa8] sm:$0xff] }
 0x1d2   :  { %6581 = vmatpush1.bf16.msra.mxu0 %v9104_v41  ;;  %6909 = vmatpush1.bf16.msra.mxu1 %v9106_v42  ;;  %v9152_v41 = vcombine.low %v995_v25, %v999_v26  ;;  %v9154_v42 = vcombine.low %v996_v27, %v1000_v63  ;;  %v1043_v25 = vld [vmem:[%s13298_s1 + $0x1fc0] sm:$0xff]  ;;  %v1044_v27 = vld [vmem:[%s13298_s1 + $0x1fc8] sm:$0xff] }
 0x1d3   :  { %6582 = vmatprep.subr.bf16.mxu0 %v9113_v43  ;;  %6910 = vmatprep.subr.bf16.mxu1 %v9115_v45  ;;  %v9161_v43 = vcombine.high %v1003_v35, %v1007_v36  ;;  %v9163_v45 = vcombine.high %v1004_v39, %v1008_v40  ;;  %v1047_v26 = vld [vmem:[%s13298_s1 + $0x1fe0] sm:$0xff]  ;;  %v1048_v63 = vld [vmem:[%s13298_s1 + $0x1fe8] sm:$0xff] }
 0x1d6   :  { %6583 = vmatpush1.bf16.msra.mxu0 %v9112_v52  ;;  %6911 = vmatpush1.bf16.msra.mxu1 %v9114_v54  ;;  %v9160_v52 = vcombine.low %v1003_v35, %v1007_v36  ;;  %v9162_v54 = vcombine.low %v1004_v39, %v1008_v40  ;;  %v29_v35 = vld [vmem:[%s13298_s1 + $0x10] sm:$0xff]  ;;  %v30_v39 = vld [vmem:[%s13298_s1 + $0x18] sm:$0xff] }
 0x1d7   :  { %6584 = vmatprep.subr.bf16.mxu0 %v9121_v55  ;;  %6912 = vmatprep.subr.bf16.mxu1 %v9123_v56  ;;  %v9169_v55 = vcombine.high %v1011_v46, %v1015_v47  ;;  %v9171_v56 = vcombine.high %v1012_v49, %v1016_v50  ;;  %v33_v36 = vld [vmem:[%s13298_s1 + $0x30] sm:$0xff]  ;;  %v34_v40 = vld [vmem:[%s13298_s1 + $0x38] sm:$0xff] }
 0x1da   :  { %6585 = vmatpush1.bf16.msra.mxu0 %v9120_v0  ;;  %6913 = vmatpush1.bf16.msra.mxu1 %v9122_v2  ;;  %v9168_v0 = vcombine.low %v1011_v46, %v1015_v47  ;;  %v9170_v2 = vcombine.low %v1012_v49, %v1016_v50  ;;  %v37_v46 = vld [vmem:[%s13298_s1 + $0x50] sm:$0xff]  ;;  %v11302_v49 = vcombine.high %v11098_v7, %v11098_v7  ;;  %v38_v50 = vld [vmem:[%s13298_s1 + $0x58] sm:$0xff] }
 0x1db   :  { %6586 = vmatprep.subr.bf16.mxu0 %v9129_v28  ;;  %6914 = vmatprep.subr.bf16.mxu1 %v9131_v3  ;;  %v9177_v28 = vcombine.high %v1019_v57, %v1023_v60  ;;  %v9179_v3 = vcombine.high %v1020_v8, %v1024_v61  ;;  %v41_v47 = vld [vmem:[%s13298_s1 + $0x70] sm:$0xff] }
 0x1de   :  { %6587 = vmatpush1.bf16.msra.mxu0 %v9128_v12  ;;  %6915 = vmatpush1.bf16.msra.mxu1 %v9130_v13  ;;  %v9176_v12 = vcombine.low %v1019_v57, %v1023_v60  ;;  %v9178_v13 = vcombine.low %v1020_v8, %v1024_v61  ;;  %v45_v60 = vld [vmem:[%s13298_s1 + $0x90] sm:$0xff]  ;;  %v46_v61 = vld [vmem:[%s13298_s1 + $0x98] sm:$0xff] }
 0x1df   :  { %6588 = vmatprep.subr.bf16.mxu0 %v9137_v1  ;;  %6916 = vmatprep.subr.bf16.mxu1 %v9139_v14  ;;  %v9185_v1 = vcombine.high %v1027_v5, %v1031_v6  ;;  %v9187_v14 = vcombine.high %v1028_v10, %v1032_v11  ;;  %v49_v8 = vld [vmem:[%s13298_s1 + $0xb0] sm:$0xff] }
 0x1e2   :  { %6589 = vmatpush1.bf16.msra.mxu0 %v9136_v20  ;;  %6917 = vmatpush1.bf16.msra.mxu1 %v9138_v21  ;;  %v9184_v20 = vcombine.low %v1027_v5, %v1031_v6  ;;  %v9186_v21 = vcombine.low %v1028_v10, %v1032_v11  ;;  %v53_v6 = vld [vmem:[%s13298_s1 + $0xd0] sm:$0xff]  ;;  %v54_v11 = vld [vmem:[%s13298_s1 + $0xd8] sm:$0xff] }
 0x1e3   :  { %6590 = vmatprep.subr.bf16.mxu0 %v9145_v22  ;;  %6918 = vmatprep.subr.bf16.mxu1 %v9147_v24  ;;  %v9193_v22 = vcombine.high %v1035_v53, %v1039_v15  ;;  %v9195_v24 = vcombine.high %v1036_v17, %v1040_v18  ;;  %v57_v10 = vld [vmem:[%s13298_s1 + $0xf0] sm:$0xff] }
 0x1e6   :  { %6591 = vmatpush1.bf16.msra.mxu0 %v9144_v30  ;;  %6919 = vmatpush1.bf16.msra.mxu1 %v9146_v32  ;;  %v9192_v30 = vcombine.low %v1035_v53, %v1039_v15  ;;  %v9194_v32 = vcombine.low %v1036_v17, %v1040_v18  ;;  %v61_v15 = vld [vmem:[%s13298_s1 + $0x110] sm:$0xff]  ;;  %v66_v18 = vld [vmem:[%s13298_s1 + $0x138] sm:$0xff] }
 0x1e7   :  { %6592 = vmatprep.subr.bf16.mxu0 %v9153_v33  ;;  %6920 = vmatprep.subr.bf16.mxu1 %v9155_v34  ;;  %v9201_v33 = vcombine.high %v1043_v25, %v1047_v26  ;;  %v9203_v34 = vcombine.high %v1044_v27, %v1048_v63  ;;  %v65_v17 = vld [vmem:[%s13298_s1 + $0x130] sm:$0xff] }
 0x1ea   :  { %6593 = vmatpush1.bf16.msra.mxu0 %v9152_v41  ;;  %6921 = vmatpush1.bf16.msra.mxu1 %v9154_v42  ;;  %v9200_v41 = vcombine.low %v1043_v25, %v1047_v26  ;;  %v9202_v42 = vcombine.low %v1044_v27, %v1048_v63  ;;  %v69_v25 = vld [vmem:[%s13298_s1 + $0x150] sm:$0xff]  ;;  %v70_v27 = vld [vmem:[%s13298_s1 + $0x158] sm:$0xff] }
 0x1eb   :  { %6594 = vmatprep.subr.bf16.mxu0 %v9161_v43  ;;  %6922 = vmatprep.subr.bf16.mxu1 %v9163_v45  ;;  %v8189_v43 = vcombine.high %v29_v35, %v33_v36  ;;  %v8191_v45 = vcombine.high %v30_v39, %v34_v40  ;;  %v73_v26 = vld [vmem:[%s13298_s1 + $0x170] sm:$0xff]  ;;  %v74_v63 = vld [vmem:[%s13298_s1 + $0x178] sm:$0xff] }
 0x1ee   :  { %6595 = vmatpush1.bf16.msra.mxu0 %v9160_v52  ;;  %6923 = vmatpush1.bf16.msra.mxu1 %v9162_v54  ;;  %v42_v52 = vld [vmem:[%s13298_s1 + $0x78] sm:$0xff]  ;;  %v8188_v54 = vcombine.low %v29_v35, %v33_v36  ;;  %v77_v35 = vld [vmem:[%s13298_s1 + $0x190] sm:$0xff] }
 0x1ef   :  { %6596 = vmatprep.subr.bf16.mxu0 %v9169_v55  ;;  %6924 = vmatprep.subr.bf16.mxu1 %v9171_v56  ;;  %v8190_v55 = vcombine.low %v30_v39, %v34_v40  ;;  %v8197_v56 = vcombine.high %v37_v46, %v41_v47  ;;  %v8199_v57 = vcombine.high %v38_v50, %v42_v52  ;;  %v81_v36 = vld [vmem:[%s13298_s1 + $0x1b0] sm:$0xff]  ;;  %v78_v39 = vld [vmem:[%s13298_s1 + $0x198] sm:$0xff] }
 0x1f0   :  { %v82_v40 = vld [vmem:[%s13298_s1 + $0x1b8] sm:$0xff] }
 0x1f2   :  { %6597 = vmatpush1.bf16.msra.mxu0 %v9168_v0  ;;  %6925 = vmatpush1.bf16.msra.mxu1 %v9170_v2  ;;  %v50_v0 = vld [vmem:[%s13298_s1 + $0xb8] sm:$0xff]  ;;  %v8196_v2 = vcombine.low %v37_v46, %v41_v47  ;;  %v85_v46 = vld [vmem:[%s13298_s1 + $0x1d0] sm:$0xff] }
 0x1f3   :  { %6598 = vmatprep.subr.bf16.mxu0 %v9177_v28  ;;  %6926 = vmatprep.subr.bf16.mxu1 %v9179_v3  ;;  %v8198_v28 = vcombine.low %v38_v50, %v42_v52  ;;  %v8205_v3 = vcombine.high %v45_v60, %v49_v8  ;;  %v8207_v5 = vcombine.high %v46_v61, %v50_v0  ;;  %v89_v47 = vld [vmem:[%s13298_s1 + $0x1f0] sm:$0xff]  ;;  %v86_v50 = vld [vmem:[%s13298_s1 + $0x1d8] sm:$0xff] }
 0x1f4   :  { %v90_v52 = vld [vmem:[%s13298_s1 + $0x1f8] sm:$0xff] }
 0x1f6   :  { %6599 = vmatpush1.bf16.msra.mxu0 %v9176_v12  ;;  %6927 = vmatpush1.bf16.msra.mxu1 %v9178_v13  ;;  %v58_v12 = vld [vmem:[%s13298_s1 + $0xf8] sm:$0xff]  ;;  %v8204_v13 = vcombine.low %v45_v60, %v49_v8  ;;  %v93_v60 = vld [vmem:[%s13298_s1 + $0x210] sm:$0xff] }
 0x1f7   :  { %6600 = vmatprep.subr.bf16.mxu0 %v9185_v1  ;;  %6928 = vmatprep.subr.bf16.mxu1 %v9187_v14  ;;  %v8206_v1 = vcombine.low %v46_v61, %v50_v0  ;;  %v8213_v14 = vcombine.high %v53_v6, %v57_v10  ;;  %v8215_v53 = vcombine.high %v54_v11, %v58_v12  ;;  %v97_v8 = vld [vmem:[%s13298_s1 + $0x230] sm:$0xff]  ;;  %v94_v61 = vld [vmem:[%s13298_s1 + $0x218] sm:$0xff] }
 0x1f8   :  { %v98_v0 = vld [vmem:[%s13298_s1 + $0x238] sm:$0xff] }
 0x1fa   :  { %6601 = vmatpush1.bf16.msra.mxu0 %v9184_v20  ;;  %6929 = vmatpush1.bf16.msra.mxu1 %v9186_v21  ;;  %v8212_v20 = vcombine.low %v53_v6, %v57_v10  ;;  %v8214_v21 = vcombine.low %v54_v11, %v58_v12  ;;  %v101_v6 = vld [vmem:[%s13298_s1 + $0x250] sm:$0xff]  ;;  %v102_v11 = vld [vmem:[%s13298_s1 + $0x258] sm:$0xff] }
 0x1fb   :  { %6602 = vmatprep.subr.bf16.mxu0 %v9193_v22  ;;  %6930 = vmatprep.subr.bf16.mxu1 %v9195_v24  ;;  %v8221_v22 = vcombine.high %v61_v15, %v65_v17  ;;  %v105_v10 = vld [vmem:[%s13298_s1 + $0x270] sm:$0xff]  ;;  %v106_v12 = vld [vmem:[%s13298_s1 + $0x278] sm:$0xff] }
 0x1fe   :  { %6603 = vmatpush1.bf16.msra.mxu0 %v9192_v30  ;;  %6931 = vmatpush1.bf16.msra.mxu1 %v9194_v32  ;;  %v8220_v30 = vcombine.low %v61_v15, %v65_v17  ;;  %v109_v15 = vld [vmem:[%s13298_s1 + $0x290] sm:$0xff] }
 0x1ff   :  { %6604 = vmatprep.subr.bf16.mxu0 %v9201_v33  ;;  %6932 = vmatprep.subr.bf16.mxu1 %v9203_v34  ;;  %v8229_v33 = vcombine.high %v69_v25, %v73_v26  ;;  %v8231_v34 = vcombine.high %v70_v27, %v74_v63  ;;  %v113_v17 = vld [vmem:[%s13298_s1 + $0x2b0] sm:$0xff] }
 0x202   :  { %6605 = vmatpush1.bf16.msra.mxu0 %v9200_v41  ;;  %6933 = vmatpush1.bf16.msra.mxu1 %v9202_v42  ;;  %v8228_v41 = vcombine.low %v69_v25, %v73_v26  ;;  %v8230_v42 = vcombine.low %v70_v27, %v74_v63  ;;  %v117_v25 = vld [vmem:[%s13298_s1 + $0x2d0] sm:$0xff]  ;;  %v118_v27 = vld [vmem:[%s13298_s1 + $0x2d8] sm:$0xff] }
 0x203   :  { %6943 = vmatprep.subr.bf16.mxu0 %v8189_v43  ;;  %7271 = vmatprep.subr.bf16.mxu1 %v8191_v45  ;;  %v8237_v43 = vcombine.high %v77_v35, %v81_v36  ;;  %v8239_v45 = vcombine.high %v78_v39, %v82_v40  ;;  %v121_v26 = vld [vmem:[%s13298_s1 + $0x2f0] sm:$0xff]  ;;  %v122_v63 = vld [vmem:[%s13298_s1 + $0x2f8] sm:$0xff] }
 0x205   :  { %6607 = vmatmul.mubr.bf16.vlgmr.msra.gmra.mrb[0].mxu0 %v11302_v49  ;;  %6935 = vmatmul.mubr.bf16.vlgmr.msra.gmra.mrb[0].mxu1 %v11302_v49 }
 0x206   :  { %6944 = vmatpush1.bf16.msra.mxu0 %v8188_v54  ;;  %7272 = vmatpush1.bf16.msra.mxu1 %v8190_v55  ;;  %v8236_v54 = vcombine.low %v77_v35, %v81_v36  ;;  %v8238_v55 = vcombine.low %v78_v39, %v82_v40  ;;  %v125_v35 = vld [vmem:[%s13298_s1 + $0x310] sm:$0xff]  ;;  %v126_v39 = vld [vmem:[%s13298_s1 + $0x318] sm:$0xff] }
 0x207   :  { %6945 = vmatprep.subr.bf16.mxu0 %v8197_v56  ;;  %7273 = vmatprep.subr.bf16.mxu1 %v8199_v57  ;;  %v8245_v56 = vcombine.high %v85_v46, %v89_v47  ;;  %v8247_v57 = vcombine.high %v86_v50, %v90_v52  ;;  %v129_v36 = vld [vmem:[%s13298_s1 + $0x330] sm:$0xff]  ;;  %v130_v40 = vld [vmem:[%s13298_s1 + $0x338] sm:$0xff] }
 0x208   :  { %6975 = vmatprep.mubr.bf16.mxu0 %v9738_v9  ;;  %7303 = vmatprep.mubr.bf16.mxu1 %v9738_v9  ;;  %v62_v9 = vld [vmem:[%s13298_s1 + $0x118] sm:$0xff] }
 0x209   :  { %v8223_v24 = vcombine.high %v62_v9, %v66_v18  ;;  %v8222_v32 = vcombine.low %v62_v9, %v66_v18  ;;  %v110_v9 = vld [vmem:[%s13298_s1 + $0x298] sm:$0xff] }
 0x20a   :  { %6946 = vmatpush1.bf16.msra.mxu0 %v8196_v2  ;;  %7274 = vmatpush1.bf16.msra.mxu1 %v8198_v28  ;;  %v8244_v2 = vcombine.low %v85_v46, %v89_v47  ;;  %v8246_v28 = vcombine.low %v86_v50, %v90_v52  ;;  %v114_v18 = vld [vmem:[%s13298_s1 + $0x2b8] sm:$0xff]  ;;  %v133_v46 = vld [vmem:[%s13298_s1 + $0x350] sm:$0xff] }
 0x20b   :  { %6947 = vmatprep.subr.bf16.mxu0 %v8205_v3  ;;  %7275 = vmatprep.subr.bf16.mxu1 %v8207_v5  ;;  %v8253_v3 = vcombine.high %v93_v60, %v97_v8  ;;  %v8255_v5 = vcombine.high %v94_v61, %v98_v0  ;;  %v137_v47 = vld [vmem:[%s13298_s1 + $0x370] sm:$0xff]  ;;  %v134_v50 = vld [vmem:[%s13298_s1 + $0x358] sm:$0xff] }
 0x20c   :  { %v138_v52 = vld [vmem:[%s13298_s1 + $0x378] sm:$0xff] }
 0x20e   :  { %6948 = vmatpush1.bf16.msra.mxu0 %v8204_v13  ;;  %7276 = vmatpush1.bf16.msra.mxu1 %v8206_v1  ;;  %v8252_v13 = vcombine.low %v93_v60, %v97_v8  ;;  %v8254_v1 = vcombine.low %v94_v61, %v98_v0  ;;  %v141_v60 = vld [vmem:[%s13298_s1 + $0x390] sm:$0xff]  ;;  %v142_v61 = vld [vmem:[%s13298_s1 + $0x398] sm:$0xff] }
 0x20f   :  { %6949 = vmatprep.subr.bf16.mxu0 %v8213_v14  ;;  %7277 = vmatprep.subr.bf16.mxu1 %v8215_v53  ;;  %v8261_v14 = vcombine.high %v101_v6, %v105_v10  ;;  %v8263_v53 = vcombine.high %v102_v11, %v106_v12  ;;  %v145_v8 = vld [vmem:[%s13298_s1 + $0x3b0] sm:$0xff]  ;;  %v146_v0 = vld [vmem:[%s13298_s1 + $0x3b8] sm:$0xff] }
 0x212   :  { %6950 = vmatpush1.bf16.msra.mxu0 %v8212_v20  ;;  %7278 = vmatpush1.bf16.msra.mxu1 %v8214_v21  ;;  %v8260_v20 = vcombine.low %v101_v6, %v105_v10  ;;  %v8262_v21 = vcombine.low %v102_v11, %v106_v12  ;;  %v149_v6 = vld [vmem:[%s13298_s1 + $0x3d0] sm:$0xff]  ;;  %v150_v11 = vld [vmem:[%s13298_s1 + $0x3d8] sm:$0xff] }
 0x213   :  { %6951 = vmatprep.subr.bf16.mxu0 %v8221_v22  ;;  %7279 = vmatprep.subr.bf16.mxu1 %v8223_v24  ;;  %v8269_v22 = vcombine.high %v109_v15, %v113_v17  ;;  %v8271_v24 = vcombine.high %v110_v9, %v114_v18  ;;  %v153_v10 = vld [vmem:[%s13298_s1 + $0x3f0] sm:$0xff]  ;;  %v154_v12 = vld [vmem:[%s13298_s1 + $0x3f8] sm:$0xff] }
 0x216   :  { %6952 = vmatpush1.bf16.msra.mxu0 %v8220_v30  ;;  %7280 = vmatpush1.bf16.msra.mxu1 %v8222_v32  ;;  %v8268_v30 = vcombine.low %v109_v15, %v113_v17  ;;  %v8270_v32 = vcombine.low %v110_v9, %v114_v18  ;;  %v157_v15 = vld [vmem:[%s13298_s1 + $0x410] sm:$0xff]  ;;  %v158_v9 = vld [vmem:[%s13298_s1 + $0x418] sm:$0xff] }
 0x217   :  { %6953 = vmatprep.subr.bf16.mxu0 %v8229_v33  ;;  %7281 = vmatprep.subr.bf16.mxu1 %v8231_v34  ;;  %v8277_v33 = vcombine.high %v117_v25, %v121_v26  ;;  %v8279_v34 = vcombine.high %v118_v27, %v122_v63  ;;  %v161_v17 = vld [vmem:[%s13298_s1 + $0x430] sm:$0xff]  ;;  %v162_v18 = vld [vmem:[%s13298_s1 + $0x438] sm:$0xff] }
 0x21a   :  { %6954 = vmatpush1.bf16.msra.mxu0 %v8228_v41  ;;  %7282 = vmatpush1.bf16.msra.mxu1 %v8230_v42  ;;  %v8276_v41 = vcombine.low %v117_v25, %v121_v26  ;;  %v8278_v42 = vcombine.low %v118_v27, %v122_v63  ;;  %v165_v25 = vld [vmem:[%s13298_s1 + $0x450] sm:$0xff]  ;;  %v166_v27 = vld [vmem:[%s13298_s1 + $0x458] sm:$0xff] }
 0x21b   :  { %6955 = vmatprep.subr.bf16.mxu0 %v8237_v43  ;;  %7283 = vmatprep.subr.bf16.mxu1 %v8239_v45  ;;  %v8285_v43 = vcombine.high %v125_v35, %v129_v36  ;;  %v8287_v45 = vcombine.high %v126_v39, %v130_v40  ;;  %v169_v26 = vld [vmem:[%s13298_s1 + $0x470] sm:$0xff]  ;;  %v170_v63 = vld [vmem:[%s13298_s1 + $0x478] sm:$0xff] }
 0x21e   :  { %6956 = vmatpush1.bf16.msra.mxu0 %v8236_v54  ;;  %7284 = vmatpush1.bf16.msra.mxu1 %v8238_v55  ;;  %v8284_v54 = vcombine.low %v125_v35, %v129_v36  ;;  %v8286_v55 = vcombine.low %v126_v39, %v130_v40  ;;  %v173_v35 = vld [vmem:[%s13298_s1 + $0x490] sm:$0xff]  ;;  %v174_v39 = vld [vmem:[%s13298_s1 + $0x498] sm:$0xff] }
 0x21f   :  { %6957 = vmatprep.subr.bf16.mxu0 %v8245_v56  ;;  %7285 = vmatprep.subr.bf16.mxu1 %v8247_v57  ;;  %v8293_v56 = vcombine.high %v133_v46, %v137_v47  ;;  %v8295_v57 = vcombine.high %v134_v50, %v138_v52  ;;  %v177_v36 = vld [vmem:[%s13298_s1 + $0x4b0] sm:$0xff]  ;;  %v178_v40 = vld [vmem:[%s13298_s1 + $0x4b8] sm:$0xff] }
 0x222   :  { %6958 = vmatpush1.bf16.msra.mxu0 %v8244_v2  ;;  %7286 = vmatpush1.bf16.msra.mxu1 %v8246_v28  ;;  %v8292_v2 = vcombine.low %v133_v46, %v137_v47  ;;  %v8294_v28 = vcombine.low %v134_v50, %v138_v52  ;;  %v181_v46 = vld [vmem:[%s13298_s1 + $0x4d0] sm:$0xff]  ;;  %v186_v50 = vld [vmem:[%s13298_s1 + $0x4f8] sm:$0xff]  ;;  %v8332_v52 = vcombine.low %v173_v35, %v177_v36 }
 0x223   :  { %6959 = vmatprep.subr.bf16.mxu0 %v8253_v3  ;;  %7287 = vmatprep.subr.bf16.mxu1 %v8255_v5  ;;  %v8301_v3 = vcombine.high %v141_v60, %v145_v8  ;;  %v8303_v5 = vcombine.high %v142_v61, %v146_v0  ;;  %v185_v47 = vld [vmem:[%s13298_s1 + $0x4f0] sm:$0xff] }
 0x226   :  { %6960 = vmatpush1.bf16.msra.mxu0 %v8252_v13  ;;  %7288 = vmatpush1.bf16.msra.mxu1 %v8254_v1  ;;  %v8300_v13 = vcombine.low %v141_v60, %v145_v8  ;;  %v8302_v1 = vcombine.low %v142_v61, %v146_v0  ;;  %v193_v60 = vld [vmem:[%s13298_s1 + $0x530] sm:$0xff]  ;;  %v194_v8 = vld [vmem:[%s13298_s1 + $0x538] sm:$0xff]  ;;  %v8340_v61 = vcombine.low %v181_v46, %v185_v47 }
 0x227   :  { %6961 = vmatprep.subr.bf16.mxu0 %v8261_v14  ;;  %7289 = vmatprep.subr.bf16.mxu1 %v8263_v53  ;;  %v8309_v14 = vcombine.high %v149_v6, %v153_v10  ;;  %v8311_v53 = vcombine.high %v150_v11, %v154_v12 }
 0x22a   :  { %6962 = vmatpush1.bf16.msra.mxu0 %v8260_v20  ;;  %7290 = vmatpush1.bf16.msra.mxu1 %v8262_v21  ;;  %v8308_v20 = vcombine.low %v149_v6, %v153_v10  ;;  %v8310_v21 = vcombine.low %v150_v11, %v154_v12  ;;  %v198_v6 = vld [vmem:[%s13298_s1 + $0x558] sm:$0xff] }
 0x22b   :  { %6963 = vmatprep.subr.bf16.mxu0 %v8269_v22  ;;  %7291 = vmatprep.subr.bf16.mxu1 %v8271_v24  ;;  %v8317_v22 = vcombine.high %v157_v15, %v161_v17  ;;  %v8319_v24 = vcombine.high %v158_v9, %v162_v18  ;;  %v202_v10 = vld [vmem:[%s13298_s1 + $0x578] sm:$0xff] }
 0x22e   :  { %6964 = vmatpush1.bf16.msra.mxu0 %v8268_v30  ;;  %7292 = vmatpush1.bf16.msra.mxu1 %v8270_v32  ;;  %v8316_v30 = vcombine.low %v157_v15, %v161_v17  ;;  %v8318_v32 = vcombine.low %v158_v9, %v162_v18  ;;  %v206_v15 = vld [vmem:[%s13298_s1 + $0x598] sm:$0xff]  ;;  %v8358_v18 = vcombine.low %v198_v6, %v202_v10 }
 0x22f   :  { %6965 = vmatprep.subr.bf16.mxu0 %v8277_v33  ;;  %7293 = vmatprep.subr.bf16.mxu1 %v8279_v34  ;;  %v8325_v33 = vcombine.high %v165_v25, %v169_v26  ;;  %v8327_v34 = vcombine.high %v166_v27, %v170_v63  ;;  %v210_v17 = vld [vmem:[%s13298_s1 + $0x5b8] sm:$0xff] }
 0x232   :  { %6966 = vmatpush1.bf16.msra.mxu0 %v8276_v41  ;;  %7294 = vmatpush1.bf16.msra.mxu1 %v8278_v42  ;;  %v8324_v41 = vcombine.low %v165_v25, %v169_v26  ;;  %v8326_v42 = vcombine.low %v166_v27, %v170_v63  ;;  %v214_v25 = vld [vmem:[%s13298_s1 + $0x5d8] sm:$0xff]  ;;  %v8366_v63 = vcombine.low %v206_v15, %v210_v17 }
 0x233   :  { %6967 = vmatprep.subr.bf16.mxu0 %v8285_v43  ;;  %7295 = vmatprep.subr.bf16.mxu1 %v8287_v45  ;;  %v8333_v43 = vcombine.high %v173_v35, %v177_v36  ;;  %v8335_v45 = vcombine.high %v174_v39, %v178_v40  ;;  %v218_v26 = vld [vmem:[%s13298_s1 + $0x5f8] sm:$0xff] }
 0x234   :  { %v222_v35 = vld [vmem:[%s13298_s1 + $0x618] sm:$0xff] }
 0x235   :  { %v226_v36 = vld [vmem:[%s13298_s1 + $0x638] sm:$0xff] }
 0x236   :  { %6968 = vmatpush1.bf16.msra.mxu0 %v8284_v54  ;;  %7296 = vmatpush1.bf16.msra.mxu1 %v8286_v55  ;;  %v8334_v54 = vcombine.low %v174_v39, %v178_v40  ;;  %v8341_v55 = vcombine.high %v181_v46, %v185_v47  ;;  %v8374_v40 = vcombine.low %v214_v25, %v218_v26  ;;  %v230_v46 = vld [vmem:[%s13298_s1 + $0x658] sm:$0xff] }
 0x237   :  { %6969 = vmatprep.subr.bf16.mxu0 %v8293_v56  ;;  %7297 = vmatprep.subr.bf16.mxu1 %v8295_v57  ;;  %v189_v57 = vld [vmem:[%s13298_s1 + $0x510] sm:$0xff]  ;;  %v234_v47 = vld [vmem:[%s13298_s1 + $0x678] sm:$0xff] }
 0x238   :  { %v8348_v11 = vcombine.low %v189_v57, %v193_v60 }
 0x23a   :  { %6970 = vmatpush1.bf16.msra.mxu0 %v8292_v2  ;;  %7298 = vmatpush1.bf16.msra.mxu1 %v8294_v28  ;;  %v8349_v2 = vcombine.high %v189_v57, %v193_v60  ;;  %v238_v57 = vld [vmem:[%s13298_s1 + $0x698] sm:$0xff] }
 0x23b   :  { %6971 = vmatprep.subr.bf16.mxu0 %v8301_v3  ;;  %7299 = vmatprep.subr.bf16.mxu1 %v8303_v5  ;;  %v197_v3 = vld [vmem:[%s13298_s1 + $0x550] sm:$0xff]  ;;  %v242_v60 = vld [vmem:[%s13298_s1 + $0x6b8] sm:$0xff] }
 0x23c   :  { %v201_v5 = vld [vmem:[%s13298_s1 + $0x570] sm:$0xff] }
 0x23d   :  { %v8356_v9 = vcombine.low %v197_v3, %v201_v5 }
 0x23e   :  { %6972 = vmatpush1.bf16.msra.mxu0 %v8300_v13  ;;  %7300 = vmatpush1.bf16.msra.mxu1 %v8302_v1  ;;  %v8357_v13 = vcombine.high %v197_v3, %v201_v5  ;;  %v8359_v1 = vcombine.high %v198_v6, %v202_v10  ;;  %v246_v3 = vld [vmem:[%s13298_s1 + $0x6d8] sm:$0xff]  ;;  %v8398_v10 = vcombine.low %v238_v57, %v242_v60 }
 0x23f   :  { %6973 = vmatprep.subr.bf16.mxu0 %v8309_v14  ;;  %7301 = vmatprep.subr.bf16.mxu1 %v8311_v53  ;;  %v205_v14 = vld [vmem:[%s13298_s1 + $0x590] sm:$0xff]  ;;  %v250_v5 = vld [vmem:[%s13298_s1 + $0x6f8] sm:$0xff] }
 0x240   :  { %v209_v53 = vld [vmem:[%s13298_s1 + $0x5b0] sm:$0xff] }
 0x241   :  { %v8364_v27 = vcombine.low %v205_v14, %v209_v53 }
 0x242   :  { %6974 = vmatpush1.bf16.msra.mxu0 %v8308_v20  ;;  %7302 = vmatpush1.bf16.msra.mxu1 %v8310_v21  ;;  %v8365_v20 = vcombine.high %v205_v14, %v209_v53  ;;  %v8367_v21 = vcombine.high %v206_v15, %v210_v17  ;;  %v254_v14 = vld [vmem:[%s13298_s1 + $0x718] sm:$0xff]  ;;  %v8406_v17 = vcombine.low %v246_v3, %v250_v5 }
 0x243   :  { %6984 = vmatprep.subr.bf16.mxu0 %v8317_v22  ;;  %7312 = vmatprep.subr.bf16.mxu1 %v8319_v24  ;;  %v213_v22 = vld [vmem:[%s13298_s1 + $0x5d0] sm:$0xff]  ;;  %v258_v53 = vld [vmem:[%s13298_s1 + $0x738] sm:$0xff] }
 0x244   :  { %v217_v24 = vld [vmem:[%s13298_s1 + $0x5f0] sm:$0xff] }
 0x245   :  { %6976 = vmatmul.mubr.bf16.vlgmr.msra.gmra.mrb[4].mxu0 %v9852_v23  ;;  %7304 = vmatmul.mubr.bf16.vlgmr.msra.gmra.mrb[4].mxu1 %v9852_v23  ;;  %v182_v23 = vld [vmem:[%s13298_s1 + $0x4d8] sm:$0xff]  ;;  %v8372_v39 = vcombine.low %v213_v22, %v217_v24 }
 0x246   :  { %6985 = vmatpush1.bf16.msra.mxu0 %v8316_v30  ;;  %7313 = vmatpush1.bf16.msra.mxu1 %v8318_v32  ;;  %v8343_v56 = vcombine.high %v182_v23, %v186_v50  ;;  %v8342_v0 = vcombine.low %v182_v23, %v186_v50  ;;  %v8373_v30 = vcombine.high %v213_v22, %v217_v24  ;;  %v262_v22 = vld [vmem:[%s13298_s1 + $0x758] sm:$0xff] }
 0x247   :  { %6986 = vmatprep.subr.bf16.mxu0 %v8325_v33  ;;  %7314 = vmatprep.subr.bf16.mxu1 %v8327_v34  ;;  %v8375_v32 = vcombine.high %v214_v25, %v218_v26  ;;  %v221_v33 = vld [vmem:[%s13298_s1 + $0x610] sm:$0xff]  ;;  %v8382_v50 = vcombine.low %v222_v35, %v226_v36  ;;  %v266_v24 = vld [vmem:[%s13298_s1 + $0x778] sm:$0xff]  ;;  %v8414_v26 = vcombine.low %v254_v14, %v258_v53 }
 0x248   :  { %7016 = vmatprep.mubr.bf16.mxu0 %v9868_v31  ;;  %7344 = vmatprep.mubr.bf16.mxu1 %v9868_v31  ;;  %v190_v31 = vld [vmem:[%s13298_s1 + $0x518] sm:$0xff]  ;;  %v225_v34 = vld [vmem:[%s13298_s1 + $0x630] sm:$0xff] }
 0x249   :  { %v8351_v28 = vcombine.high %v190_v31, %v194_v8  ;;  %v8350_v12 = vcombine.low %v190_v31, %v194_v8  ;;  %v8380_v23 = vcombine.low %v221_v33, %v225_v34  ;;  %v8390_v8 = vcombine.low %v230_v46, %v234_v47 }
 0x24a   :  { %6987 = vmatpush1.bf16.msra.mxu0 %v8324_v41  ;;  %7315 = vmatpush1.bf16.msra.mxu1 %v8326_v42  ;;  %v8381_v41 = vcombine.high %v221_v33, %v225_v34  ;;  %v8383_v42 = vcombine.high %v222_v35, %v226_v36  ;;  %v270_v33 = vld [vmem:[%s13298_s1 + $0x798] sm:$0xff]  ;;  %v8422_v36 = vcombine.low %v262_v22, %v266_v24 }
 0x24b   :  { %6988 = vmatprep.subr.bf16.mxu0 %v8333_v43  ;;  %7316 = vmatprep.subr.bf16.mxu1 %v8335_v45  ;;  %v229_v43 = vld [vmem:[%s13298_s1 + $0x650] sm:$0xff]  ;;  %v274_v34 = vld [vmem:[%s13298_s1 + $0x7b8] sm:$0xff] }
 0x24c   :  { %v233_v45 = vld [vmem:[%s13298_s1 + $0x670] sm:$0xff] }
 0x24d   :  { %v8388_v31 = vcombine.low %v229_v43, %v233_v45 }
 0x24e   :  { %6989 = vmatpush1.bf16.msra.mxu0 %v8332_v52  ;;  %7317 = vmatpush1.bf16.msra.mxu1 %v8334_v54  ;;  %v8389_v52 = vcombine.high %v229_v43, %v233_v45  ;;  %v8391_v54 = vcombine.high %v230_v46, %v234_v47  ;;  %v278_v43 = vld [vmem:[%s13298_s1 + $0x7d8] sm:$0xff]  ;;  %v8430_v47 = vcombine.low %v270_v33, %v274_v34 }
 0x24f   :  { %6990 = vmatprep.subr.bf16.mxu0 %v8341_v55  ;;  %7318 = vmatprep.subr.bf16.mxu1 %v8343_v56  ;;  %v237_v55 = vld [vmem:[%s13298_s1 + $0x690] sm:$0xff]  ;;  %v282_v45 = vld [vmem:[%s13298_s1 + $0x7f8] sm:$0xff] }
 0x250   :  { %v241_v56 = vld [vmem:[%s13298_s1 + $0x6b0] sm:$0xff] }
 0x251   :  { %v8396_v6 = vcombine.low %v237_v55, %v241_v56 }
 0x252   :  { %6991 = vmatpush1.bf16.msra.mxu0 %v8340_v61  ;;  %7319 = vmatpush1.bf16.msra.mxu1 %v8342_v0  ;;  %v8397_v61 = vcombine.high %v237_v55, %v241_v56  ;;  %v8399_v0 = vcombine.high %v238_v57, %v242_v60  ;;  %v286_v55 = vld [vmem:[%s13298_s1 + $0x818] sm:$0xff]  ;;  %v8438_v60 = vcombine.low %v278_v43, %v282_v45 }
 0x253   :  { %6992 = vmatprep.subr.bf16.mxu0 %v8349_v2  ;;  %7320 = vmatprep.subr.bf16.mxu1 %v8351_v28  ;;  %v245_v2 = vld [vmem:[%s13298_s1 + $0x6d0] sm:$0xff]  ;;  %v290_v56 = vld [vmem:[%s13298_s1 + $0x838] sm:$0xff] }
 0x254   :  { %v249_v28 = vld [vmem:[%s13298_s1 + $0x6f0] sm:$0xff] }
 0x255   :  { %v8404_v15 = vcombine.low %v245_v2, %v249_v28 }
 0x256   :  { %6993 = vmatpush1.bf16.msra.mxu0 %v8348_v11  ;;  %7321 = vmatpush1.bf16.msra.mxu1 %v8350_v12  ;;  %v8405_v11 = vcombine.high %v245_v2, %v249_v28  ;;  %v8407_v12 = vcombine.high %v246_v3, %v250_v5  ;;  %v294_v2 = vld [vmem:[%s13298_s1 + $0x858] sm:$0xff]  ;;  %v8446_v5 = vcombine.low %v286_v55, %v290_v56 }
 0x257   :  { %6994 = vmatprep.subr.bf16.mxu0 %v8357_v13  ;;  %7322 = vmatprep.subr.bf16.mxu1 %v8359_v1  ;;  %v253_v13 = vld [vmem:[%s13298_s1 + $0x710] sm:$0xff]  ;;  %v298_v28 = vld [vmem:[%s13298_s1 + $0x878] sm:$0xff] }
 0x258   :  { %v257_v1 = vld [vmem:[%s13298_s1 + $0x730] sm:$0xff] }
 0x259   :  { %v8412_v25 = vcombine.low %v253_v13, %v257_v1 }
 0x25a   :  { %6995 = vmatpush1.bf16.msra.mxu0 %v8356_v9  ;;  %7323 = vmatpush1.bf16.msra.mxu1 %v8358_v18  ;;  %v8413_v9 = vcombine.high %v253_v13, %v257_v1  ;;  %v8415_v18 = vcombine.high %v254_v14, %v258_v53  ;;  %v302_v13 = vld [vmem:[%s13298_s1 + $0x898] sm:$0xff]  ;;  %v8454_v53 = vcombine.low %v294_v2, %v298_v28 }
 0x25b   :  { %6996 = vmatprep.subr.bf16.mxu0 %v8365_v20  ;;  %7324 = vmatprep.subr.bf16.mxu1 %v8367_v21  ;;  %v261_v20 = vld [vmem:[%s13298_s1 + $0x750] sm:$0xff]  ;;  %v306_v1 = vld [vmem:[%s13298_s1 + $0x8b8] sm:$0xff] }
 0x25c   :  { %v265_v21 = vld [vmem:[%s13298_s1 + $0x770] sm:$0xff] }
 0x25d   :  { %v8420_v35 = vcombine.low %v261_v20, %v265_v21 }
 0x25e   :  { %6997 = vmatpush1.bf16.msra.mxu0 %v8364_v27  ;;  %7325 = vmatpush1.bf16.msra.mxu1 %v8366_v63  ;;  %v8421_v27 = vcombine.high %v261_v20, %v265_v21  ;;  %v8423_v63 = vcombine.high %v262_v22, %v266_v24  ;;  %v314_v20 = vld [vmem:[%s13298_s1 + $0x8f8] sm:$0xff]  ;;  %v8462_v22 = vcombine.low %v302_v13, %v306_v1 }
 0x25f   :  { %6998 = vmatprep.subr.bf16.mxu0 %v8373_v30  ;;  %7326 = vmatprep.subr.bf16.mxu1 %v8375_v32  ;;  %v269_v30 = vld [vmem:[%s13298_s1 + $0x790] sm:$0xff] }
 0x260   :  { %v273_v32 = vld [vmem:[%s13298_s1 + $0x7b0] sm:$0xff] }
 0x261   :  { %v8428_v46 = vcombine.low %v269_v30, %v273_v32 }
 0x262   :  { %6999 = vmatpush1.bf16.msra.mxu0 %v8372_v39  ;;  %7327 = vmatpush1.bf16.msra.mxu1 %v8374_v40  ;;  %v8429_v39 = vcombine.high %v269_v30, %v273_v32  ;;  %v8431_v40 = vcombine.high %v270_v33, %v274_v34 }
 0x263   :  { %7000 = vmatprep.subr.bf16.mxu0 %v8381_v41  ;;  %7328 = vmatprep.subr.bf16.mxu1 %v8383_v42  ;;  %v277_v41 = vld [vmem:[%s13298_s1 + $0x7d0] sm:$0xff] }
 0x264   :  { %v281_v42 = vld [vmem:[%s13298_s1 + $0x7f0] sm:$0xff] }
 0x265   :  { %v8436_v57 = vcombine.low %v277_v41, %v281_v42 }
 0x266   :  { %7001 = vmatpush1.bf16.msra.mxu0 %v8380_v23  ;;  %7329 = vmatpush1.bf16.msra.mxu1 %v8382_v50  ;;  %v8437_v23 = vcombine.high %v277_v41, %v281_v42  ;;  %v8439_v50 = vcombine.high %v278_v43, %v282_v45 }
 0x267   :  { %7002 = vmatprep.subr.bf16.mxu0 %v8389_v52  ;;  %7330 = vmatprep.subr.bf16.mxu1 %v8391_v54  ;;  %v285_v52 = vld [vmem:[%s13298_s1 + $0x810] sm:$0xff] }
 0x268   :  { %v289_v54 = vld [vmem:[%s13298_s1 + $0x830] sm:$0xff] }
 0x269   :  { %v8444_v3 = vcombine.low %v285_v52, %v289_v54 }
 0x26a   :  { %7003 = vmatpush1.bf16.msra.mxu0 %v8388_v31  ;;  %7331 = vmatpush1.bf16.msra.mxu1 %v8390_v8  ;;  %v8445_v31 = vcombine.high %v285_v52, %v289_v54  ;;  %v8447_v8 = vcombine.high %v286_v55, %v290_v56 }
 0x26b   :  { %7004 = vmatprep.subr.bf16.mxu0 %v8397_v61  ;;  %7332 = vmatprep.subr.bf16.mxu1 %v8399_v0  ;;  %v293_v61 = vld [vmem:[%s13298_s1 + $0x850] sm:$0xff] }
 0x26c   :  { %v297_v0 = vld [vmem:[%s13298_s1 + $0x870] sm:$0xff] }
 0x26d   :  { %v8452_v14 = vcombine.low %v293_v61, %v297_v0 }
 0x26e   :  { %7005 = vmatpush1.bf16.msra.mxu0 %v8396_v6  ;;  %7333 = vmatpush1.bf16.msra.mxu1 %v8398_v10  ;;  %v8453_v6 = vcombine.high %v293_v61, %v297_v0  ;;  %v8455_v10 = vcombine.high %v294_v2, %v298_v28 }
 0x26f   :  { %7006 = vmatprep.subr.bf16.mxu0 %v8405_v11  ;;  %7334 = vmatprep.subr.bf16.mxu1 %v8407_v12  ;;  %v301_v11 = vld [vmem:[%s13298_s1 + $0x890] sm:$0xff] }
 0x270   :  { %v305_v12 = vld [vmem:[%s13298_s1 + $0x8b0] sm:$0xff] }
 0x271   :  { %v8460_v21 = vcombine.low %v301_v11, %v305_v12 }
 0x272   :  { %7007 = vmatpush1.bf16.msra.mxu0 %v8404_v15  ;;  %7335 = vmatpush1.bf16.msra.mxu1 %v8406_v17  ;;  %v8461_v15 = vcombine.high %v301_v11, %v305_v12  ;;  %v8463_v17 = vcombine.high %v302_v13, %v306_v1 }
 0x273   :  { %7008 = vmatprep.subr.bf16.mxu0 %v8413_v9  ;;  %7336 = vmatprep.subr.bf16.mxu1 %v8415_v18  ;;  %v309_v9 = vld [vmem:[%s13298_s1 + $0x8d0] sm:$0xff] }
 0x274   :  { %v313_v18 = vld [vmem:[%s13298_s1 + $0x8f0] sm:$0xff] }
 0x275   :  { %v8469_v24 = vcombine.high %v309_v9, %v313_v18  ;;  %v8468_v30 = vcombine.low %v309_v9, %v313_v18 }
 0x276   :  { %7009 = vmatpush1.bf16.msra.mxu0 %v8412_v25  ;;  %7337 = vmatpush1.bf16.msra.mxu1 %v8414_v26  ;;  %v317_v26 = vld [vmem:[%s13298_s1 + $0x910] sm:$0xff] }
 0x277   :  { %7010 = vmatprep.subr.bf16.mxu0 %v8421_v27  ;;  %7338 = vmatprep.subr.bf16.mxu1 %v8423_v63  ;;  %v321_v27 = vld [vmem:[%s13298_s1 + $0x930] sm:$0xff]  ;;  %v322_v63 = vld [vmem:[%s13298_s1 + $0x938] sm:$0xff] }
 0x278   :  { %v8477_v33 = vcombine.high %v317_v26, %v321_v27  ;;  %v8476_v41 = vcombine.low %v317_v26, %v321_v27 }
 0x27a   :  { %7011 = vmatpush1.bf16.msra.mxu0 %v8420_v35  ;;  %7339 = vmatpush1.bf16.msra.mxu1 %v8422_v36  ;;  %v325_v35 = vld [vmem:[%s13298_s1 + $0x950] sm:$0xff] }
 0x27b   :  { %7012 = vmatprep.subr.bf16.mxu0 %v8429_v39  ;;  %7340 = vmatprep.subr.bf16.mxu1 %v8431_v40  ;;  %v329_v36 = vld [vmem:[%s13298_s1 + $0x970] sm:$0xff]  ;;  %v326_v39 = vld [vmem:[%s13298_s1 + $0x958] sm:$0xff] }
 0x27c   :  { %v330_v40 = vld [vmem:[%s13298_s1 + $0x978] sm:$0xff]  ;;  %v8485_v43 = vcombine.high %v325_v35, %v329_v36  ;;  %v8484_v52 = vcombine.low %v325_v35, %v329_v36 }
 0x27d   :  { %v8487_v45 = vcombine.high %v326_v39, %v330_v40  ;;  %v8486_v54 = vcombine.low %v326_v39, %v330_v40 }
 0x27e   :  { %7013 = vmatpush1.bf16.msra.mxu0 %v8428_v46  ;;  %7341 = vmatpush1.bf16.msra.mxu1 %v8430_v47  ;;  %v333_v46 = vld [vmem:[%s13298_s1 + $0x990] sm:$0xff] }
 0x27f   :  { %7014 = vmatprep.subr.bf16.mxu0 %v8437_v23  ;;  %7342 = vmatprep.subr.bf16.mxu1 %v8439_v50  ;;  %v337_v47 = vld [vmem:[%s13298_s1 + $0x9b0] sm:$0xff]  ;;  %v334_v23 = vld [vmem:[%s13298_s1 + $0x998] sm:$0xff] }
 0x280   :  { %v338_v50 = vld [vmem:[%s13298_s1 + $0x9b8] sm:$0xff]  ;;  %v8493_v55 = vcombine.high %v333_v46, %v337_v47  ;;  %v8492_v61 = vcombine.low %v333_v46, %v337_v47 }
 0x281   :  { %v8495_v56 = vcombine.high %v334_v23, %v338_v50  ;;  %v8494_v0 = vcombine.low %v334_v23, %v338_v50 }
 0x282   :  { %7015 = vmatpush1.bf16.msra.mxu0 %v8436_v57  ;;  %7343 = vmatpush1.bf16.msra.mxu1 %v8438_v60  ;;  %v341_v57 = vld [vmem:[%s13298_s1 + $0x9d0] sm:$0xff] }
 0x283   :  { %7025 = vmatprep.subr.bf16.mxu0 %v8445_v31  ;;  %7353 = vmatprep.subr.bf16.mxu1 %v8447_v8  ;;  %v345_v60 = vld [vmem:[%s13298_s1 + $0x9f0] sm:$0xff]  ;;  %v342_v31 = vld [vmem:[%s13298_s1 + $0x9d8] sm:$0xff] }
 0x284   :  { %v346_v8 = vld [vmem:[%s13298_s1 + $0x9f8] sm:$0xff]  ;;  %v8501_v2 = vcombine.high %v341_v57, %v345_v60  ;;  %v8500_v11 = vcombine.low %v341_v57, %v345_v60 }
 0x285   :  { %7017 = vmatmul.mubr.bf16.vlgmr.msra.gmra.mrb[4].mxu0 %v10063_v38  ;;  %7345 = vmatmul.mubr.bf16.vlgmr.msra.gmra.mrb[4].mxu1 %v10063_v38  ;;  %v310_v38 = vld [vmem:[%s13298_s1 + $0x8d8] sm:$0xff]  ;;  %v8503_v28 = vcombine.high %v342_v31, %v346_v8  ;;  %v8502_v12 = vcombine.low %v342_v31, %v346_v8 }
 0x286   :  { %7026 = vmatpush1.bf16.msra.mxu0 %v8444_v3  ;;  %7354 = vmatpush1.bf16.msra.mxu1 %v8446_v5  ;;  %v8471_v25 = vcombine.high %v310_v38, %v314_v20  ;;  %v8470_v32 = vcombine.low %v310_v38, %v314_v20  ;;  %v349_v3 = vld [vmem:[%s13298_s1 + $0xa10] sm:$0xff] }
 0x287   :  { %7027 = vmatprep.subr.bf16.mxu0 %v8453_v6  ;;  %7355 = vmatprep.subr.bf16.mxu1 %v8455_v10  ;;  %v353_v5 = vld [vmem:[%s13298_s1 + $0xa30] sm:$0xff]  ;;  %v350_v6 = vld [vmem:[%s13298_s1 + $0xa18] sm:$0xff] }
 0x288   :  { %7057 = vmatprep.mubr.bf16.mxu0 %v10078_v48  ;;  %7385 = vmatprep.mubr.bf16.mxu1 %v10078_v48  ;;  %v318_v48 = vld [vmem:[%s13298_s1 + $0x918] sm:$0xff]  ;;  %v8509_v13 = vcombine.high %v349_v3, %v353_v5  ;;  %v8508_v9 = vcombine.low %v349_v3, %v353_v5 }
 0x289   :  { %v8479_v34 = vcombine.high %v318_v48, %v322_v63  ;;  %v8478_v42 = vcombine.low %v318_v48, %v322_v63  ;;  %v354_v10 = vld [vmem:[%s13298_s1 + $0xa38] sm:$0xff] }
 0x28a   :  { %7028 = vmatpush1.bf16.msra.mxu0 %v8452_v14  ;;  %7356 = vmatpush1.bf16.msra.mxu1 %v8454_v53  ;;  %v8511_v1 = vcombine.high %v350_v6, %v354_v10  ;;  %v357_v14 = vld [vmem:[%s13298_s1 + $0xa50] sm:$0xff]  ;;  %v8510_v18 = vcombine.low %v350_v6, %v354_v10 }
 0x28b   :  { %7029 = vmatprep.subr.bf16.mxu0 %v8461_v15  ;;  %7357 = vmatprep.subr.bf16.mxu1 %v8463_v17  ;;  %v361_v53 = vld [vmem:[%s13298_s1 + $0xa70] sm:$0xff]  ;;  %v358_v15 = vld [vmem:[%s13298_s1 + $0xa58] sm:$0xff] }
 0x28c   :  { %v362_v17 = vld [vmem:[%s13298_s1 + $0xa78] sm:$0xff]  ;;  %v8517_v38 = vcombine.high %v357_v14, %v361_v53  ;;  %v8516_v26 = vcombine.low %v357_v14, %v361_v53 }
 0x28d   :  { %v8519_v20 = vcombine.high %v358_v15, %v362_v17  ;;  %v8518_v27 = vcombine.low %v358_v15, %v362_v17 }
 0x28e   :  { %7030 = vmatpush1.bf16.msra.mxu0 %v8460_v21  ;;  %7358 = vmatpush1.bf16.msra.mxu1 %v8462_v22  ;;  %v365_v21 = vld [vmem:[%s13298_s1 + $0xa90] sm:$0xff] }
 0x28f   :  { %7031 = vmatprep.subr.bf16.mxu0 %v8469_v24  ;;  %7359 = vmatprep.subr.bf16.mxu1 %v8471_v25  ;;  %v369_v22 = vld [vmem:[%s13298_s1 + $0xab0] sm:$0xff]  ;;  %v366_v24 = vld [vmem:[%s13298_s1 + $0xa98] sm:$0xff] }
 0x290   :  { %v370_v25 = vld [vmem:[%s13298_s1 + $0xab8] sm:$0xff]  ;;  %v8525_v48 = vcombine.high %v365_v21, %v369_v22  ;;  %v8524_v35 = vcombine.low %v365_v21, %v369_v22 }
 0x291   :  { %v8527_v63 = vcombine.high %v366_v24, %v370_v25  ;;  %v8526_v36 = vcombine.low %v366_v24, %v370_v25 }
 0x292   :  { %7032 = vmatpush1.bf16.msra.mxu0 %v8468_v30  ;;  %7360 = vmatpush1.bf16.msra.mxu1 %v8470_v32  ;;  %v373_v30 = vld [vmem:[%s13298_s1 + $0xad0] sm:$0xff] }
 0x293   :  { %7033 = vmatprep.subr.bf16.mxu0 %v8477_v33  ;;  %7361 = vmatprep.subr.bf16.mxu1 %v8479_v34  ;;  %v377_v32 = vld [vmem:[%s13298_s1 + $0xaf0] sm:$0xff]  ;;  %v374_v33 = vld [vmem:[%s13298_s1 + $0xad8] sm:$0xff] }
 0x294   :  { %v378_v34 = vld [vmem:[%s13298_s1 + $0xaf8] sm:$0xff]  ;;  %v8533_v39 = vcombine.high %v373_v30, %v377_v32  ;;  %v8532_v46 = vcombine.low %v373_v30, %v377_v32 }
 0x295   :  { %v8535_v40 = vcombine.high %v374_v33, %v378_v34  ;;  %v8534_v47 = vcombine.low %v374_v33, %v378_v34 }
 0x296   :  { %7034 = vmatpush1.bf16.msra.mxu0 %v8476_v41  ;;  %7362 = vmatpush1.bf16.msra.mxu1 %v8478_v42  ;;  %v381_v41 = vld [vmem:[%s13298_s1 + $0xb10] sm:$0xff] }
 0x297   :  { %7035 = vmatprep.subr.bf16.mxu0 %v8485_v43  ;;  %7363 = vmatprep.subr.bf16.mxu1 %v8487_v45  ;;  %v385_v42 = vld [vmem:[%s13298_s1 + $0xb30] sm:$0xff]  ;;  %v382_v43 = vld [vmem:[%s13298_s1 + $0xb18] sm:$0xff] }
 0x298   :  { %v386_v45 = vld [vmem:[%s13298_s1 + $0xb38] sm:$0xff]  ;;  %v8541_v23 = vcombine.high %v381_v41, %v385_v42  ;;  %v8540_v57 = vcombine.low %v381_v41, %v385_v42 }
 0x299   :  { %v8543_v50 = vcombine.high %v382_v43, %v386_v45  ;;  %v8542_v60 = vcombine.low %v382_v43, %v386_v45 }
 0x29a   :  { %7036 = vmatpush1.bf16.msra.mxu0 %v8484_v52  ;;  %7364 = vmatpush1.bf16.msra.mxu1 %v8486_v54  ;;  %v389_v52 = vld [vmem:[%s13298_s1 + $0xb50] sm:$0xff] }
 0x29b   :  { %7037 = vmatprep.subr.bf16.mxu0 %v8493_v55  ;;  %7365 = vmatprep.subr.bf16.mxu1 %v8495_v56  ;;  %v393_v54 = vld [vmem:[%s13298_s1 + $0xb70] sm:$0xff]  ;;  %v390_v55 = vld [vmem:[%s13298_s1 + $0xb58] sm:$0xff] }
 0x29c   :  { %v394_v56 = vld [vmem:[%s13298_s1 + $0xb78] sm:$0xff]  ;;  %v8549_v31 = vcombine.high %v389_v52, %v393_v54  ;;  %v8548_v3 = vcombine.low %v389_v52, %v393_v54 }
 0x29d   :  { %v8551_v8 = vcombine.high %v390_v55, %v394_v56  ;;  %v8550_v5 = vcombine.low %v390_v55, %v394_v56  ;;  %v445_v56 = vld [vmem:[%s13298_s1 + $0xd10] sm:$0xff] }
 0x29e   :  { %7038 = vmatpush1.bf16.msra.mxu0 %v8492_v61  ;;  %7366 = vmatpush1.bf16.msra.mxu1 %v8494_v0  ;;  %v397_v61 = vld [vmem:[%s13298_s1 + $0xb90] sm:$0xff] }
 0x29f   :  { %7039 = vmatprep.subr.bf16.mxu0 %v8501_v2  ;;  %7367 = vmatprep.subr.bf16.mxu1 %v8503_v28  ;;  %v401_v0 = vld [vmem:[%s13298_s1 + $0xbb0] sm:$0xff]  ;;  %v398_v2 = vld [vmem:[%s13298_s1 + $0xb98] sm:$0xff] }
 0x2a0   :  { %v402_v28 = vld [vmem:[%s13298_s1 + $0xbb8] sm:$0xff]  ;;  %v8557_v6 = vcombine.high %v397_v61, %v401_v0  ;;  %v8556_v14 = vcombine.low %v397_v61, %v401_v0 }
 0x2a1   :  { %v8559_v10 = vcombine.high %v398_v2, %v402_v28  ;;  %v8558_v53 = vcombine.low %v398_v2, %v402_v28  ;;  %v9593_v2 = vmov 1983009808  }
 0x2a2   :  { %7040 = vmatpush1.bf16.msra.mxu0 %v8500_v11  ;;  %7368 = vmatpush1.bf16.msra.mxu1 %v8502_v12  ;;  %v405_v11 = vld [vmem:[%s13298_s1 + $0xbd0] sm:$0xff]  ;;  %v7610_v28 = vunpack.c.l.s4 %v9593_v2 }
 0x2a3   :  { %7041 = vmatprep.subr.bf16.mxu0 %v8509_v13  ;;  %7369 = vmatprep.subr.bf16.mxu1 %v8511_v1  ;;  %v409_v12 = vld [vmem:[%s13298_s1 + $0xbf0] sm:$0xff]  ;;  %v406_v13 = vld [vmem:[%s13298_s1 + $0xbd8] sm:$0xff] }
 0x2a4   :  { %v410_v1 = vld [vmem:[%s13298_s1 + $0xbf8] sm:$0xff]  ;;  %v8565_v15 = vcombine.high %v405_v11, %v409_v12  ;;  %v8564_v21 = vcombine.low %v405_v11, %v409_v12 }
 0x2a5   :  { %v8567_v17 = vcombine.high %v406_v13, %v410_v1  ;;  %v8566_v22 = vcombine.low %v406_v13, %v410_v1  ;;  %v7611_v1 = vunpack.c.0.s8 %v7610_v28 }
 0x2a6   :  { %7042 = vmatpush1.bf16.msra.mxu0 %v8508_v9  ;;  %7370 = vmatpush1.bf16.msra.mxu1 %v8510_v18  ;;  %v413_v9 = vld [vmem:[%s13298_s1 + $0xc10] sm:$0xff] }
 0x2a7   :  { %7043 = vmatprep.subr.bf16.mxu0 %v8517_v38  ;;  %7371 = vmatprep.subr.bf16.mxu1 %v8519_v20  ;;  %v417_v18 = vld [vmem:[%s13298_s1 + $0xc30] sm:$0xff]  ;;  %v414_v38 = vld [vmem:[%s13298_s1 + $0xc18] sm:$0xff] }
 0x2a8   :  { %v418_v20 = vld [vmem:[%s13298_s1 + $0xc38] sm:$0xff]  ;;  %v8573_v24 = vcombine.high %v413_v9, %v417_v18  ;;  %v8572_v30 = vcombine.low %v413_v9, %v417_v18 }
 0x2a9   :  { %v8575_v25 = vcombine.high %v414_v38, %v418_v20  ;;  %v8574_v32 = vcombine.low %v414_v38, %v418_v20  ;;  %v466_v9 = vld [vmem:[%s13298_s1 + $0xdb8] sm:$0xff] }
 0x2aa   :  { %7044 = vmatpush1.bf16.msra.mxu0 %v8516_v26  ;;  %7372 = vmatpush1.bf16.msra.mxu1 %v8518_v27  ;;  %v421_v26 = vld [vmem:[%s13298_s1 + $0xc50] sm:$0xff] }
 0x2ab   :  { %7045 = vmatprep.subr.bf16.mxu0 %v8525_v48  ;;  %7373 = vmatprep.subr.bf16.mxu1 %v8527_v63  ;;  %v425_v27 = vld [vmem:[%s13298_s1 + $0xc70] sm:$0xff]  ;;  %v422_v48 = vld [vmem:[%s13298_s1 + $0xc58] sm:$0xff] }
 0x2ac   :  { %v426_v63 = vld [vmem:[%s13298_s1 + $0xc78] sm:$0xff]  ;;  %v8581_v33 = vcombine.high %v421_v26, %v425_v27  ;;  %v8580_v41 = vcombine.low %v421_v26, %v425_v27  ;;  %v473_v26 = vld [vmem:[%s13298_s1 + $0xdf0] sm:$0xff] }
 0x2ad   :  { %v8583_v34 = vcombine.high %v422_v48, %v426_v63  ;;  %v8582_v42 = vcombine.low %v422_v48, %v426_v63  ;;  %v470_v63 = vld [vmem:[%s13298_s1 + $0xdd8] sm:$0xff] }
 0x2ae   :  { %7046 = vmatpush1.bf16.msra.mxu0 %v8524_v35  ;;  %7374 = vmatpush1.bf16.msra.mxu1 %v8526_v36  ;;  %v429_v35 = vld [vmem:[%s13298_s1 + $0xc90] sm:$0xff] }
 0x2af   :  { %7047 = vmatprep.subr.bf16.mxu0 %v8533_v39  ;;  %7375 = vmatprep.subr.bf16.mxu1 %v8535_v40  ;;  %v433_v36 = vld [vmem:[%s13298_s1 + $0xcb0] sm:$0xff]  ;;  %v430_v39 = vld [vmem:[%s13298_s1 + $0xc98] sm:$0xff] }
 0x2b0   :  { %v434_v40 = vld [vmem:[%s13298_s1 + $0xcb8] sm:$0xff]  ;;  %v8589_v43 = vcombine.high %v429_v35, %v433_v36 }
 0x2b1   :  { %v8591_v45 = vcombine.high %v430_v39, %v434_v40  ;;  %v8590_v52 = vcombine.low %v430_v39, %v434_v40 }
 0x2b2   :  { %7048 = vmatpush1.bf16.msra.mxu0 %v8532_v46  ;;  %7376 = vmatpush1.bf16.msra.mxu1 %v8534_v47  ;;  %v437_v46 = vld [vmem:[%s13298_s1 + $0xcd0] sm:$0xff] }
 0x2b3   :  { %7049 = vmatprep.subr.bf16.mxu0 %v8541_v23  ;;  %7377 = vmatprep.subr.bf16.mxu1 %v8543_v50  ;;  %v441_v47 = vld [vmem:[%s13298_s1 + $0xcf0] sm:$0xff]  ;;  %v442_v23 = vld [vmem:[%s13298_s1 + $0xcf8] sm:$0xff]  ;;  %v8588_v50 = vcombine.low %v429_v35, %v433_v36 }
 0x2b4   :  { %v8597_v54 = vcombine.high %v437_v46, %v441_v47 }
 0x2b6   :  { %7050 = vmatpush1.bf16.msra.mxu0 %v8540_v57  ;;  %7378 = vmatpush1.bf16.msra.mxu1 %v8542_v60  ;;  %v449_v57 = vld [vmem:[%s13298_s1 + $0xd30] sm:$0xff]  ;;  %v450_v60 = vld [vmem:[%s13298_s1 + $0xd38] sm:$0xff] }
 0x2b7   :  { %7051 = vmatprep.subr.bf16.mxu0 %v8549_v31  ;;  %7379 = vmatprep.subr.bf16.mxu1 %v8551_v8  ;;  %v8596_v31 = vcombine.low %v437_v46, %v441_v47  ;;  %v8605_v61 = vcombine.high %v445_v56, %v449_v57  ;;  %v8604_v11 = vcombine.low %v445_v56, %v449_v57  ;;  %v477_v47 = vld [vmem:[%s13298_s1 + $0xe10] sm:$0xff] }
 0x2ba   :  { %7052 = vmatpush1.bf16.msra.mxu0 %v8548_v3  ;;  %7380 = vmatpush1.bf16.msra.mxu1 %v8550_v5  ;;  %v453_v3 = vld [vmem:[%s13298_s1 + $0xd50] sm:$0xff] }
 0x2bb   :  { %7053 = vmatprep.subr.bf16.mxu0 %v8557_v6  ;;  %7381 = vmatprep.subr.bf16.mxu1 %v8559_v10  ;;  %v457_v5 = vld [vmem:[%s13298_s1 + $0xd70] sm:$0xff]  ;;  %v454_v6 = vld [vmem:[%s13298_s1 + $0xd58] sm:$0xff] }
 0x2bc   :  { %v458_v10 = vld [vmem:[%s13298_s1 + $0xd78] sm:$0xff]  ;;  %v8613_v13 = vcombine.high %v453_v3, %v457_v5  ;;  %v8612_v18 = vcombine.low %v453_v3, %v457_v5  ;;  %v493_v5 = vld [vmem:[%s13298_s1 + $0xe90] sm:$0xff] }
 0x2bd   :  { %v8614_v38 = vcombine.low %v454_v6, %v458_v10 }
 0x2be   :  { %7054 = vmatpush1.bf16.msra.mxu0 %v8556_v14  ;;  %7382 = vmatpush1.bf16.msra.mxu1 %v8558_v53  ;;  %v8615_v14 = vcombine.high %v454_v6, %v458_v10  ;;  %v461_v53 = vld [vmem:[%s13298_s1 + $0xd90] sm:$0xff]  ;;  %v494_v10 = vld [vmem:[%s13298_s1 + $0xe98] sm:$0xff] }
 0x2bf   :  { %7055 = vmatprep.subr.bf16.mxu0 %v8565_v15  ;;  %7383 = vmatprep.subr.bf16.mxu1 %v8567_v17  ;;  %v465_v15 = vld [vmem:[%s13298_s1 + $0xdb0] sm:$0xff]  ;;  %v462_v17 = vld [vmem:[%s13298_s1 + $0xd98] sm:$0xff] }
 0x2c0   :  { %v8621_v20 = vcombine.high %v461_v53, %v465_v15  ;;  %v8620_v35 = vcombine.low %v461_v53, %v465_v15  ;;  %v497_v6 = vld [vmem:[%s13298_s1 + $0xeb0] sm:$0xff] }
 0x2c1   :  { %v501_v53 = vld [vmem:[%s13298_s1 + $0xed0] sm:$0xff] }
 0x2c2   :  { %7056 = vmatpush1.bf16.msra.mxu0 %v8564_v21  ;;  %7384 = vmatpush1.bf16.msra.mxu1 %v8566_v22  ;;  %v11963_v22 = vsub.s32 %v7611_v1, %v9685_v44  ;;  %v8653_v1 = vcombine.high %v493_v5, %v497_v6  ;;  %v505_v15 = vld [vmem:[%s13298_s1 + $0xef0] sm:$0xff] }
 0x2c3   :  { %7066 = vmatprep.subr.bf16.mxu0 %v8573_v24  ;;  %7394 = vmatprep.subr.bf16.mxu1 %v8575_v25  ;;  %v8623_v24 = vcombine.high %v462_v17, %v466_v9  ;;  %v469_v25 = vld [vmem:[%s13298_s1 + $0xdd0] sm:$0xff] }
 0x2c5   :  { %7058 = vmatmul.mubr.bf16.vlgmr.msra.gmra.mrb[4].mxu0 %v10266_v58  ;;  %7386 = vmatmul.mubr.bf16.vlgmr.msra.gmra.mrb[4].mxu1 %v10266_v58  ;;  %v438_v58 = vld [vmem:[%s13298_s1 + $0xcd8] sm:$0xff] }
 0x2c6   :  { %7067 = vmatpush1.bf16.msra.mxu0 %v8572_v30  ;;  %7395 = vmatpush1.bf16.msra.mxu1 %v8574_v32  ;;  %v8599_v55 = vcombine.high %v438_v58, %v442_v23  ;;  %v8598_v8 = vcombine.low %v438_v58, %v442_v23  ;;  %v474_v30 = vld [vmem:[%s13298_s1 + $0xdf8] sm:$0xff]  ;;  %v481_v58 = vld [vmem:[%s13298_s1 + $0xe30] sm:$0xff] }
 0x2c7   :  { %7068 = vmatprep.subr.bf16.mxu0 %v8581_v33  ;;  %7396 = vmatprep.subr.bf16.mxu1 %v8583_v34  ;;  %v8631_v46 = vcombine.high %v470_v63, %v474_v30  ;;  %v8630_v56 = vcombine.low %v470_v63, %v474_v30  ;;  %v8637_v57 = vcombine.high %v477_v47, %v481_v58 }
 0x2c8   :  { %7098 = vmatprep.mubr.bf16.mxu0 %v10282_v4  ;;  %7426 = vmatprep.mubr.bf16.mxu1 %v10282_v4  ;;  %v446_v4 = vld [vmem:[%s13298_s1 + $0xd18] sm:$0xff] }
 0x2c9   :  { %v8607_v0 = vcombine.high %v446_v4, %v450_v60  ;;  %v8606_v12 = vcombine.low %v446_v4, %v450_v60  ;;  %v485_v60 = vld [vmem:[%s13298_s1 + $0xe50] sm:$0xff] }
 0x2ca   :  { %7069 = vmatpush1.bf16.msra.mxu0 %v8580_v41  ;;  %7397 = vmatpush1.bf16.msra.mxu1 %v8582_v42  ;;  %v8622_v41 = vcombine.low %v462_v17, %v466_v9  ;;  %v8629_v42 = vcombine.high %v469_v25, %v473_v26  ;;  %v502_v17 = vld [vmem:[%s13298_s1 + $0xed8] sm:$0xff] }
 0x2cb   :  { %7070 = vmatprep.subr.bf16.mxu0 %v8589_v43  ;;  %7398 = vmatprep.subr.bf16.mxu1 %v8591_v45  ;;  %v506_v9 = vld [vmem:[%s13298_s1 + $0xef8] sm:$0xff] }
 0x2cc   :  { %v8662_v63 = vcombine.low %v502_v17, %v506_v9 }
 0x2ce   :  { %7071 = vmatpush1.bf16.msra.mxu0 %v8588_v50  ;;  %7399 = vmatpush1.bf16.msra.mxu1 %v8590_v52  ;;  %v478_v50 = vld [vmem:[%s13298_s1 + $0xe18] sm:$0xff] }
 0x2cf   :  { %7072 = vmatprep.subr.bf16.mxu0 %v8597_v54  ;;  %7400 = vmatprep.subr.bf16.mxu1 %v8599_v55  ;;  %v482_v52 = vld [vmem:[%s13298_s1 + $0xe38] sm:$0xff]  ;;  %v8628_v54 = vcombine.low %v469_v25, %v473_v26  ;;  %v513_v25 = vld [vmem:[%s13298_s1 + $0xf30] sm:$0xff] }
 0x2d0   :  { %v8639_v4 = vcombine.high %v478_v50, %v482_v52  ;;  %v8638_v2 = vcombine.low %v478_v50, %v482_v52  ;;  %v510_v26 = vld [vmem:[%s13298_s1 + $0xf18] sm:$0xff] }
 0x2d2   :  { %7073 = vmatpush1.bf16.msra.mxu0 %v8596_v31  ;;  %7401 = vmatpush1.bf16.msra.mxu1 %v8598_v8  ;;  %v489_v31 = vld [vmem:[%s13298_s1 + $0xe70] sm:$0xff]  ;;  %v486_v8 = vld [vmem:[%s13298_s1 + $0xe58] sm:$0xff] }
 0x2d3   :  { %7074 = vmatprep.subr.bf16.mxu0 %v8605_v61  ;;  %7402 = vmatprep.subr.bf16.mxu1 %v8607_v0  ;;  %v490_v61 = vld [vmem:[%s13298_s1 + $0xe78] sm:$0xff]  ;;  %v8636_v0 = vcombine.low %v477_v47, %v481_v58  ;;  %v8645_v28 = vcombine.high %v485_v60, %v489_v31 }
 0x2d4   :  { %v8647_v3 = vcombine.high %v486_v8, %v490_v61  ;;  %v526_v47 = vld [vmem:[%s13298_s1 + $0xf98] sm:$0xff] }
 0x2d5   :  { %v530_v58 = vld [vmem:[%s13298_s1 + $0xfb8] sm:$0xff] }
 0x2d6   :  { %7075 = vmatpush1.bf16.msra.mxu0 %v8604_v11  ;;  %7403 = vmatpush1.bf16.msra.mxu1 %v8606_v12  ;;  %v498_v11 = vld [vmem:[%s13298_s1 + $0xeb8] sm:$0xff]  ;;  %v8644_v12 = vcombine.low %v485_v60, %v489_v31 }
 0x2d7   :  { %7076 = vmatprep.subr.bf16.mxu0 %v8613_v13  ;;  %7404 = vmatprep.subr.bf16.mxu1 %v8615_v14  ;;  %v8646_v13 = vcombine.low %v486_v8, %v490_v61  ;;  %v8655_v14 = vcombine.high %v494_v10, %v498_v11  ;;  %v534_v60 = vld [vmem:[%s13298_s1 + $0xfd8] sm:$0xff]  ;;  %v8686_v61 = vcombine.low %v526_v47, %v530_v58 }
 0x2d8   :  { %v6608_v21 = vpop.f32.mrb[0].mxu0  ;;  %v6936_v27 = vpop.f32.mrb[0].mxu1  ;;  %v538_v31 = vld [vmem:[%s13298_s1 + $0xff8] sm:$0xff] }
 0x2d9   :  { %v6610_v48 = vpop.f32.mrb[1].mxu0  ;;  %v6938_v33 = vpop.f32.mrb[1].mxu1 }
 0x2da   :  { %v7607_v32 = vcombine.low %v6608_v21, %v6610_v48  ;;  %v6612_v34 = vpop.f32.mrb[2].mxu0  ;;  %7077 = vmatpush1.bf16.msra.mxu0 %v8612_v18  ;;  %v7608_v36 = vcombine.low %v6936_v27, %v6938_v33  ;;  %v6940_v39 = vpop.f32.mrb[2].mxu1  ;;  %7405 = vmatpush1.bf16.msra.mxu1 %v8614_v38  ;;  %v8652_v18 = vcombine.low %v493_v5, %v497_v6  ;;  %v514_v27 = vld [vmem:[%s13298_s1 + $0xf38] sm:$0xff]  ;;  %v517_v33 = vld [vmem:[%s13298_s1 + $0xf50] sm:$0xff] }
 0x2db   :  { %v6613_v40 = vpop.f32.mrb[3].mxu0  ;;  %7078 = vmatprep.subr.bf16.mxu0 %v8621_v20  ;;  %v6941_v45 = vpop.f32.mrb[3].mxu1  ;;  %7406 = vmatprep.subr.bf16.mxu1 %v8623_v24  ;;  %v8654_v38 = vcombine.low %v494_v10, %v498_v11  ;;  %v8661_v20 = vcombine.high %v501_v53, %v505_v15  ;;  %v8663_v21 = vcombine.high %v502_v17, %v506_v9  ;;  %v509_v24 = vld [vmem:[%s13298_s1 + $0xf10] sm:$0xff]  ;;  %v542_v5 = vld [vmem:[%s13298_s1 + $0x1018] sm:$0xff] }
 0x2dc   :  { %v11978_v43 = vrot.slane %v7607_v32, %v11963_v22  ;;  %v11987_v23 = vrot.slane %v7608_v36, %v11963_v22  ;;  %v8660_v48 = vcombine.low %v501_v53, %v505_v15  ;;  %v8669_v30 = vcombine.high %v509_v24, %v513_v25  ;;  %v521_v34 = vld [vmem:[%s13298_s1 + $0xf70] sm:$0xff]  ;;  %v522_v36 = vld [vmem:[%s13298_s1 + $0xf78] sm:$0xff] }
 0x2dd   :  { %v8671_v32 = vcombine.high %v510_v26, %v514_v27  ;;  %v8668_v39 = vcombine.low %v509_v24, %v513_v25  ;;  %v8670_v40 = vcombine.low %v510_v26, %v514_v27  ;;  %v525_v45 = vld [vmem:[%s13298_s1 + $0xf90] sm:$0xff]  ;;  %v8676_v50 = vcombine.low %v517_v33, %v521_v34  ;;  %v546_v6 = vld [vmem:[%s13298_s1 + $0x1038] sm:$0xff] }
 0x2de   :  { %7079 = vmatpush1.bf16.msra.mxu0 %v8620_v35  ;;  %v7623_v55 = vcombine.low %v11978_v43, %v11987_v23  ;;  %7407 = vmatpush1.bf16.msra.mxu1 %v8622_v41  ;;  %v518_v35 = vld [vmem:[%s13298_s1 + $0xf58] sm:$0xff]  ;;  %v8677_v41 = vcombine.high %v517_v33, %v521_v34  ;;  %v8694_v11 = vcombine.low %v534_v60, %v538_v31 }
 0x2df   :  { %7080 = vmatprep.subr.bf16.mxu0 %v8629_v42  ;;  %7408 = vmatprep.subr.bf16.mxu1 %v8631_v46  ;;  %v8679_v42 = vcombine.high %v518_v35, %v522_v36  ;;  %v529_v46 = vld [vmem:[%s13298_s1 + $0xfb0] sm:$0xff]  ;;  %v8678_v52 = vcombine.low %v518_v35, %v522_v36  ;;  %v550_v53 = vld [vmem:[%s13298_s1 + $0x1058] sm:$0xff]  ;;  %v8702_v9 = vcombine.low %v542_v5, %v546_v6 }
 0x2e0   :  { %v8684_v8 = vcombine.low %v525_v45, %v529_v46  ;;  %v554_v15 = vld [vmem:[%s13298_s1 + $0x1078] sm:$0xff] }
 0x2e1   :  { %v558_v24 = vld [vmem:[%s13298_s1 + $0x1098] sm:$0xff]  ;;  %v8710_v27 = vcombine.low %v550_v53, %v554_v15 }
 0x2e2   :  { %7081 = vmatpush1.bf16.msra.mxu0 %v8628_v54  ;;  %7409 = vmatpush1.bf16.msra.mxu1 %v8630_v56  ;;  %v8685_v54 = vcombine.high %v525_v45, %v529_v46  ;;  %v8687_v56 = vcombine.high %v526_v47, %v530_v58  ;;  %v562_v25 = vld [vmem:[%s13298_s1 + $0x10b8] sm:$0xff] }
 0x2e3   :  { %7082 = vmatprep.subr.bf16.mxu0 %v8637_v57  ;;  %7410 = vmatprep.subr.bf16.mxu1 %v8639_v4  ;;  %v533_v57 = vld [vmem:[%s13298_s1 + $0xfd0] sm:$0xff]  ;;  %v570_v33 = vld [vmem:[%s13298_s1 + $0x10f8] sm:$0xff]  ;;  %v8718_v35 = vcombine.low %v558_v24, %v562_v25 }
 0x2e4   :  { %v537_v4 = vld [vmem:[%s13298_s1 + $0xff0] sm:$0xff]  ;;  %v1046_v43 = vld [vmem:[%s13298_s1 + $0x1fd8] sm:$0xff] }
 0x2e5   :  { %v8692_v10 = vcombine.low %v533_v57, %v537_v4  ;;  %v1050_v23 = vld [vmem:[%s13298_s1 + $0x1ff8] sm:$0xff] }
 0x2e6   :  { %7083 = vmatpush1.bf16.msra.mxu0 %v8636_v0  ;;  %7411 = vmatpush1.bf16.msra.mxu1 %v8638_v2  ;;  %v8693_v0 = vcombine.high %v533_v57, %v537_v4  ;;  %v8695_v2 = vcombine.high %v534_v60, %v538_v31 }
 0x2e7   :  { %7084 = vmatprep.subr.bf16.mxu0 %v8645_v28  ;;  %7412 = vmatprep.subr.bf16.mxu1 %v8647_v3  ;;  %v541_v28 = vld [vmem:[%s13298_s1 + $0x1010] sm:$0xff] }
 0x2e8   :  { %v545_v3 = vld [vmem:[%s13298_s1 + $0x1030] sm:$0xff] }
 0x2e9   :  { %v8700_v17 = vcombine.low %v541_v28, %v545_v3 }
 0x2ea   :  { %7085 = vmatpush1.bf16.msra.mxu0 %v8644_v12  ;;  %7413 = vmatpush1.bf16.msra.mxu1 %v8646_v13  ;;  %v8701_v12 = vcombine.high %v541_v28, %v545_v3  ;;  %v8703_v13 = vcombine.high %v542_v5, %v546_v6 }
 0x2eb   :  { %7086 = vmatprep.subr.bf16.mxu0 %v8653_v1  ;;  %7414 = vmatprep.subr.bf16.mxu1 %v8655_v14  ;;  %v549_v1 = vld [vmem:[%s13298_s1 + $0x1050] sm:$0xff] }
 0x2ec   :  { %v553_v14 = vld [vmem:[%s13298_s1 + $0x1070] sm:$0xff] }
 0x2ed   :  { %v8708_v26 = vcombine.low %v549_v1, %v553_v14 }
 0x2ee   :  { %7087 = vmatpush1.bf16.msra.mxu0 %v8652_v18  ;;  %7415 = vmatpush1.bf16.msra.mxu1 %v8654_v38  ;;  %v8709_v18 = vcombine.high %v549_v1, %v553_v14  ;;  %v8711_v38 = vcombine.high %v550_v53, %v554_v15 }
 0x2ef   :  { %7088 = vmatprep.subr.bf16.mxu0 %v8661_v20  ;;  %7416 = vmatprep.subr.bf16.mxu1 %v8663_v21  ;;  %v557_v20 = vld [vmem:[%s13298_s1 + $0x1090] sm:$0xff] }
 0x2f0   :  { %v561_v21 = vld [vmem:[%s13298_s1 + $0x10b0] sm:$0xff] }
 0x2f1   :  { %v8716_v34 = vcombine.low %v557_v20, %v561_v21 }
 0x2f2   :  { %7089 = vmatpush1.bf16.msra.mxu0 %v8660_v48  ;;  %7417 = vmatpush1.bf16.msra.mxu1 %v8662_v63  ;;  %v8717_v48 = vcombine.high %v557_v20, %v561_v21  ;;  %v8719_v63 = vcombine.high %v558_v24, %v562_v25 }
 0x2f3   :  { %7090 = vmatprep.subr.bf16.mxu0 %v8669_v30  ;;  %7418 = vmatprep.subr.bf16.mxu1 %v8671_v32  ;;  %v565_v30 = vld [vmem:[%s13298_s1 + $0x10d0] sm:$0xff] }
 0x2f4   :  { %v569_v32 = vld [vmem:[%s13298_s1 + $0x10f0] sm:$0xff] }
 0x2f5   :  { %v8725_v36 = vcombine.high %v565_v30, %v569_v32  ;;  %v8724_v45 = vcombine.low %v565_v30, %v569_v32 }
 0x2f6   :  { %7091 = vmatpush1.bf16.msra.mxu0 %v8668_v39  ;;  %7419 = vmatpush1.bf16.msra.mxu1 %v8670_v40  ;;  %v573_v40 = vld [vmem:[%s13298_s1 + $0x1110] sm:$0xff] }
 0x2f7   :  { %7092 = vmatprep.subr.bf16.mxu0 %v8677_v41  ;;  %7420 = vmatprep.subr.bf16.mxu1 %v8679_v42  ;;  %v577_v41 = vld [vmem:[%s13298_s1 + $0x1130] sm:$0xff]  ;;  %v578_v42 = vld [vmem:[%s13298_s1 + $0x1138] sm:$0xff] }
 0x2f8   :  { %v8733_v47 = vcombine.high %v573_v40, %v577_v41  ;;  %v8732_v57 = vcombine.low %v573_v40, %v577_v41 }
 0x2fa   :  { %7093 = vmatpush1.bf16.msra.mxu0 %v8676_v50  ;;  %7421 = vmatpush1.bf16.msra.mxu1 %v8678_v52  ;;  %v581_v50 = vld [vmem:[%s13298_s1 + $0x1150] sm:$0xff] }
 0x2fb   :  { %7094 = vmatprep.subr.bf16.mxu0 %v8685_v54  ;;  %7422 = vmatprep.subr.bf16.mxu1 %v8687_v56  ;;  %v585_v52 = vld [vmem:[%s13298_s1 + $0x1170] sm:$0xff]  ;;  %v582_v54 = vld [vmem:[%s13298_s1 + $0x1158] sm:$0xff] }
 0x2fc   :  { %v586_v56 = vld [vmem:[%s13298_s1 + $0x1178] sm:$0xff]  ;;  %v8741_v60 = vcombine.high %v581_v50, %v585_v52  ;;  %v8740_v28 = vcombine.low %v581_v50, %v585_v52 }
 0x2fd   :  { %v8743_v31 = vcombine.high %v582_v54, %v586_v56  ;;  %v8742_v3 = vcombine.low %v582_v54, %v586_v56 }
 0x2fe   :  { %7095 = vmatpush1.bf16.msra.mxu0 %v8684_v8  ;;  %7423 = vmatpush1.bf16.msra.mxu1 %v8686_v61  ;;  %v589_v8 = vld [vmem:[%s13298_s1 + $0x1190] sm:$0xff] }
 0x2ff   :  { %7096 = vmatprep.subr.bf16.mxu0 %v8693_v0  ;;  %7424 = vmatprep.subr.bf16.mxu1 %v8695_v2  ;;  %v593_v61 = vld [vmem:[%s13298_s1 + $0x11b0] sm:$0xff]  ;;  %v590_v0 = vld [vmem:[%s13298_s1 + $0x1198] sm:$0xff] }
 0x300   :  { %v594_v2 = vld [vmem:[%s13298_s1 + $0x11b8] sm:$0xff]  ;;  %v8749_v5 = vcombine.high %v589_v8, %v593_v61  ;;  %v8748_v1 = vcombine.low %v589_v8, %v593_v61 }
 0x301   :  { %v8751_v6 = vcombine.high %v590_v0, %v594_v2  ;;  %v8750_v14 = vcombine.low %v590_v0, %v594_v2 }
 0x302   :  { %7097 = vmatpush1.bf16.msra.mxu0 %v8692_v10  ;;  %7425 = vmatpush1.bf16.msra.mxu1 %v8694_v11  ;;  %v597_v10 = vld [vmem:[%s13298_s1 + $0x11d0] sm:$0xff] }
 0x303   :  { %7107 = vmatprep.subr.bf16.mxu0 %v8701_v12  ;;  %7435 = vmatprep.subr.bf16.mxu1 %v8703_v13  ;;  %v601_v11 = vld [vmem:[%s13298_s1 + $0x11f0] sm:$0xff]  ;;  %v598_v12 = vld [vmem:[%s13298_s1 + $0x11d8] sm:$0xff] }
 0x304   :  { %v602_v13 = vld [vmem:[%s13298_s1 + $0x11f8] sm:$0xff]  ;;  %v8757_v53 = vcombine.high %v597_v10, %v601_v11  ;;  %v8756_v20 = vcombine.low %v597_v10, %v601_v11 }
 0x305   :  { %7099 = vmatmul.mubr.bf16.vlgmr.msra.gmra.mrb[4].mxu0 %v10481_v19  ;;  %7427 = vmatmul.mubr.bf16.vlgmr.msra.gmra.mrb[4].mxu1 %v10481_v19  ;;  %v566_v19 = vld [vmem:[%s13298_s1 + $0x10d8] sm:$0xff]  ;;  %v8759_v15 = vcombine.high %v598_v12, %v602_v13  ;;  %v8758_v21 = vcombine.low %v598_v12, %v602_v13 }
 0x306   :  { %7108 = vmatpush1.bf16.msra.mxu0 %v8700_v17  ;;  %7436 = vmatpush1.bf16.msra.mxu1 %v8702_v9  ;;  %v8727_v39 = vcombine.high %v566_v19, %v570_v33  ;;  %v8726_v46 = vcombine.low %v566_v19, %v570_v33  ;;  %v605_v17 = vld [vmem:[%s13298_s1 + $0x1210] sm:$0xff] }
 0x307   :  { %7109 = vmatprep.subr.bf16.mxu0 %v8709_v18  ;;  %7437 = vmatprep.subr.bf16.mxu1 %v8711_v38  ;;  %v609_v9 = vld [vmem:[%s13298_s1 + $0x1230] sm:$0xff]  ;;  %v606_v18 = vld [vmem:[%s13298_s1 + $0x1218] sm:$0xff] }
 0x308   :  { %7139 = vmatprep.mubr.bf16.mxu0 %v10496_v29  ;;  %7467 = vmatprep.mubr.bf16.mxu1 %v10496_v29  ;;  %v574_v29 = vld [vmem:[%s13298_s1 + $0x1118] sm:$0xff]  ;;  %v8765_v24 = vcombine.high %v605_v17, %v609_v9  ;;  %v8764_v30 = vcombine.low %v605_v17, %v609_v9 }
 0x309   :  { %v8735_v58 = vcombine.high %v574_v29, %v578_v42  ;;  %v8734_v4 = vcombine.low %v574_v29, %v578_v42  ;;  %v610_v38 = vld [vmem:[%s13298_s1 + $0x1238] sm:$0xff] }
 0x30a   :  { %7110 = vmatpush1.bf16.msra.mxu0 %v8708_v26  ;;  %7438 = vmatpush1.bf16.msra.mxu1 %v8710_v27  ;;  %v8767_v25 = vcombine.high %v606_v18, %v610_v38  ;;  %v613_v26 = vld [vmem:[%s13298_s1 + $0x1250] sm:$0xff]  ;;  %v8766_v32 = vcombine.low %v606_v18, %v610_v38 }
 0x30b   :  { %7111 = vmatprep.subr.bf16.mxu0 %v8717_v48  ;;  %7439 = vmatprep.subr.bf16.mxu1 %v8719_v63  ;;  %v617_v27 = vld [vmem:[%s13298_s1 + $0x1270] sm:$0xff]  ;;  %v614_v48 = vld [vmem:[%s13298_s1 + $0x1258] sm:$0xff] }
 0x30c   :  { %v618_v63 = vld [vmem:[%s13298_s1 + $0x1278] sm:$0xff]  ;;  %v8773_v19 = vcombine.high %v613_v26, %v617_v27  ;;  %v8772_v40 = vcombine.low %v613_v26, %v617_v27 }
 0x30d   :  { %v8775_v33 = vcombine.high %v614_v48, %v618_v63  ;;  %v8774_v41 = vcombine.low %v614_v48, %v618_v63 }
 0x30e   :  { %7112 = vmatpush1.bf16.msra.mxu0 %v8716_v34  ;;  %7440 = vmatpush1.bf16.msra.mxu1 %v8718_v35  ;;  %v621_v34 = vld [vmem:[%s13298_s1 + $0x1290] sm:$0xff] }
 0x30f   :  { %7113 = vmatprep.subr.bf16.mxu0 %v8725_v36  ;;  %7441 = vmatprep.subr.bf16.mxu1 %v8727_v39  ;;  %v625_v35 = vld [vmem:[%s13298_s1 + $0x12b0] sm:$0xff]  ;;  %v622_v36 = vld [vmem:[%s13298_s1 + $0x1298] sm:$0xff] }
 0x310   :  { %v626_v39 = vld [vmem:[%s13298_s1 + $0x12b8] sm:$0xff]  ;;  %v8781_v29 = vcombine.high %v621_v34, %v625_v35  ;;  %v8780_v50 = vcombine.low %v621_v34, %v625_v35 }
 0x311   :  { %v8783_v42 = vcombine.high %v622_v36, %v626_v39  ;;  %v8782_v52 = vcombine.low %v622_v36, %v626_v39 }
 0x312   :  { %7114 = vmatpush1.bf16.msra.mxu0 %v8724_v45  ;;  %7442 = vmatpush1.bf16.msra.mxu1 %v8726_v46  ;;  %v629_v45 = vld [vmem:[%s13298_s1 + $0x12d0] sm:$0xff] }
 0x313   :  { %7115 = vmatprep.subr.bf16.mxu0 %v8733_v47  ;;  %7443 = vmatprep.subr.bf16.mxu1 %v8735_v58  ;;  %v633_v46 = vld [vmem:[%s13298_s1 + $0x12f0] sm:$0xff]  ;;  %v630_v47 = vld [vmem:[%s13298_s1 + $0x12d8] sm:$0xff] }
 0x314   :  { %v634_v58 = vld [vmem:[%s13298_s1 + $0x12f8] sm:$0xff]  ;;  %v8789_v54 = vcombine.high %v629_v45, %v633_v46  ;;  %v8788_v8 = vcombine.low %v629_v45, %v633_v46 }
 0x315   :  { %v8791_v56 = vcombine.high %v630_v47, %v634_v58  ;;  %v8790_v61 = vcombine.low %v630_v47, %v634_v58 }
 0x316   :  { %7116 = vmatpush1.bf16.msra.mxu0 %v8732_v57  ;;  %7444 = vmatpush1.bf16.msra.mxu1 %v8734_v4  ;;  %v637_v57 = vld [vmem:[%s13298_s1 + $0x1310] sm:$0xff] }
 0x317   :  { %7117 = vmatprep.subr.bf16.mxu0 %v8741_v60  ;;  %7445 = vmatprep.subr.bf16.mxu1 %v8743_v31  ;;  %v641_v4 = vld [vmem:[%s13298_s1 + $0x1330] sm:$0xff]  ;;  %v638_v60 = vld [vmem:[%s13298_s1 + $0x1318] sm:$0xff] }
 0x318   :  { %v642_v31 = vld [vmem:[%s13298_s1 + $0x1338] sm:$0xff]  ;;  %v8797_v0 = vcombine.high %v637_v57, %v641_v4  ;;  %v8796_v10 = vcombine.low %v637_v57, %v641_v4 }
 0x319   :  { %v8799_v2 = vcombine.high %v638_v60, %v642_v31  ;;  %v8798_v11 = vcombine.low %v638_v60, %v642_v31 }
 0x31a   :  { %7118 = vmatpush1.bf16.msra.mxu0 %v8740_v28  ;;  %7446 = vmatpush1.bf16.msra.mxu1 %v8742_v3  ;;  %v645_v28 = vld [vmem:[%s13298_s1 + $0x1350] sm:$0xff] }
 0x31b   :  { %7119 = vmatprep.subr.bf16.mxu0 %v8749_v5  ;;  %7447 = vmatprep.subr.bf16.mxu1 %v8751_v6  ;;  %v649_v3 = vld [vmem:[%s13298_s1 + $0x1370] sm:$0xff]  ;;  %v646_v5 = vld [vmem:[%s13298_s1 + $0x1358] sm:$0xff] }
 0x31c   :  { %v650_v6 = vld [vmem:[%s13298_s1 + $0x1378] sm:$0xff]  ;;  %v8805_v12 = vcombine.high %v645_v28, %v649_v3  ;;  %v8804_v17 = vcombine.low %v645_v28, %v649_v3 }
 0x31d   :  { %v8807_v13 = vcombine.high %v646_v5, %v650_v6  ;;  %v8806_v9 = vcombine.low %v646_v5, %v650_v6  ;;  %v701_v6 = vld [vmem:[%s13298_s1 + $0x1510] sm:$0xff] }
 0x31e   :  { %7120 = vmatpush1.bf16.msra.mxu0 %v8748_v1  ;;  %7448 = vmatpush1.bf16.msra.mxu1 %v8750_v14  ;;  %v653_v1 = vld [vmem:[%s13298_s1 + $0x1390] sm:$0xff] }
 0x31f   :  { %7121 = vmatprep.subr.bf16.mxu0 %v8757_v53  ;;  %7449 = vmatprep.subr.bf16.mxu1 %v8759_v15  ;;  %v657_v14 = vld [vmem:[%s13298_s1 + $0x13b0] sm:$0xff]  ;;  %v654_v53 = vld [vmem:[%s13298_s1 + $0x1398] sm:$0xff] }
 0x320   :  { %v658_v15 = vld [vmem:[%s13298_s1 + $0x13b8] sm:$0xff]  ;;  %v8813_v18 = vcombine.high %v653_v1, %v657_v14  ;;  %v8812_v26 = vcombine.low %v653_v1, %v657_v14 }
 0x321   :  { %v8815_v38 = vcombine.high %v654_v53, %v658_v15  ;;  %v8814_v27 = vcombine.low %v654_v53, %v658_v15  ;;  %v709_v53 = vld [vmem:[%s13298_s1 + $0x1550] sm:$0xff] }
 0x322   :  { %7122 = vmatpush1.bf16.msra.mxu0 %v8756_v20  ;;  %7450 = vmatpush1.bf16.msra.mxu1 %v8758_v21  ;;  %v661_v20 = vld [vmem:[%s13298_s1 + $0x13d0] sm:$0xff] }
 0x323   :  { %7123 = vmatprep.subr.bf16.mxu0 %v8765_v24  ;;  %7451 = vmatprep.subr.bf16.mxu1 %v8767_v25  ;;  %v665_v21 = vld [vmem:[%s13298_s1 + $0x13f0] sm:$0xff]  ;;  %v662_v24 = vld [vmem:[%s13298_s1 + $0x13d8] sm:$0xff] }
 0x324   :  { %v666_v25 = vld [vmem:[%s13298_s1 + $0x13f8] sm:$0xff]  ;;  %v8821_v48 = vcombine.high %v661_v20, %v665_v21  ;;  %v8820_v34 = vcombine.low %v661_v20, %v665_v21  ;;  %v713_v15 = vld [vmem:[%s13298_s1 + $0x1570] sm:$0xff] }
 0x325   :  { %v8823_v63 = vcombine.high %v662_v24, %v666_v25  ;;  %v8822_v35 = vcombine.low %v662_v24, %v666_v25  ;;  %v8869_v20 = vcombine.high %v709_v53, %v713_v15  ;;  %v717_v24 = vld [vmem:[%s13298_s1 + $0x1590] sm:$0xff] }
 0x326   :  { %7124 = vmatpush1.bf16.msra.mxu0 %v8764_v30  ;;  %7452 = vmatpush1.bf16.msra.mxu1 %v8766_v32  ;;  %v669_v30 = vld [vmem:[%s13298_s1 + $0x1410] sm:$0xff] }
 0x327   :  { %7125 = vmatprep.subr.bf16.mxu0 %v8773_v19  ;;  %7453 = vmatprep.subr.bf16.mxu1 %v8775_v33  ;;  %v673_v32 = vld [vmem:[%s13298_s1 + $0x1430] sm:$0xff]  ;;  %v670_v19 = vld [vmem:[%s13298_s1 + $0x1418] sm:$0xff] }
 0x328   :  { %v674_v33 = vld [vmem:[%s13298_s1 + $0x1438] sm:$0xff]  ;;  %v8829_v36 = vcombine.high %v669_v30, %v673_v32  ;;  %v8828_v45 = vcombine.low %v669_v30, %v673_v32  ;;  %v721_v25 = vld [vmem:[%s13298_s1 + $0x15b0] sm:$0xff] }
 0x329   :  { %v8831_v39 = vcombine.high %v670_v19, %v674_v33  ;;  %v8830_v46 = vcombine.low %v670_v19, %v674_v33  ;;  %v8877_v30 = vcombine.high %v717_v24, %v721_v25  ;;  %v725_v19 = vld [vmem:[%s13298_s1 + $0x15d0] sm:$0xff] }
 0x32a   :  { %7126 = vmatpush1.bf16.msra.mxu0 %v8772_v40  ;;  %7454 = vmatpush1.bf16.msra.mxu1 %v8774_v41  ;;  %v677_v40 = vld [vmem:[%s13298_s1 + $0x1450] sm:$0xff] }
 0x32b   :  { %7127 = vmatprep.subr.bf16.mxu0 %v8781_v29  ;;  %7455 = vmatprep.subr.bf16.mxu1 %v8783_v42  ;;  %v681_v41 = vld [vmem:[%s13298_s1 + $0x1470] sm:$0xff]  ;;  %v678_v29 = vld [vmem:[%s13298_s1 + $0x1458] sm:$0xff] }
 0x32c   :  { %v682_v42 = vld [vmem:[%s13298_s1 + $0x1478] sm:$0xff]  ;;  %v8837_v47 = vcombine.high %v677_v40, %v681_v41  ;;  %v8836_v57 = vcombine.low %v677_v40, %v681_v41  ;;  %v729_v33 = vld [vmem:[%s13298_s1 + $0x15f0] sm:$0xff] }
 0x32d   :  { %v8839_v58 = vcombine.high %v678_v29, %v682_v42  ;;  %v8838_v4 = vcombine.low %v678_v29, %v682_v42  ;;  %v8885_v40 = vcombine.high %v725_v19, %v729_v33  ;;  %v733_v29 = vld [vmem:[%s13298_s1 + $0x1610] sm:$0xff] }
 0x32e   :  { %7128 = vmatpush1.bf16.msra.mxu0 %v8780_v50  ;;  %7456 = vmatpush1.bf16.msra.mxu1 %v8782_v52  ;;  %v685_v50 = vld [vmem:[%s13298_s1 + $0x1490] sm:$0xff] }
 0x32f   :  { %7129 = vmatprep.subr.bf16.mxu0 %v8789_v54  ;;  %7457 = vmatprep.subr.bf16.mxu1 %v8791_v56  ;;  %v689_v52 = vld [vmem:[%s13298_s1 + $0x14b0] sm:$0xff]  ;;  %v686_v54 = vld [vmem:[%s13298_s1 + $0x1498] sm:$0xff] }
 0x330   :  { %v690_v56 = vld [vmem:[%s13298_s1 + $0x14b8] sm:$0xff]  ;;  %v8845_v60 = vcombine.high %v685_v50, %v689_v52  ;;  %v737_v42 = vld [vmem:[%s13298_s1 + $0x1630] sm:$0xff] }
 0x331   :  { %v8847_v31 = vcombine.high %v686_v54, %v690_v56  ;;  %v8846_v28 = vcombine.low %v686_v54, %v690_v56  ;;  %v741_v54 = vld [vmem:[%s13298_s1 + $0x1650] sm:$0xff] }
 0x332   :  { %7130 = vmatpush1.bf16.msra.mxu0 %v8788_v8  ;;  %7458 = vmatpush1.bf16.msra.mxu1 %v8790_v61  ;;  %v693_v8 = vld [vmem:[%s13298_s1 + $0x14d0] sm:$0xff] }
 0x333   :  { %7131 = vmatprep.subr.bf16.mxu0 %v8797_v0  ;;  %7459 = vmatprep.subr.bf16.mxu1 %v8799_v2  ;;  %v697_v61 = vld [vmem:[%s13298_s1 + $0x14f0] sm:$0xff]  ;;  %v698_v0 = vld [vmem:[%s13298_s1 + $0x14f8] sm:$0xff]  ;;  %v8844_v2 = vcombine.low %v685_v50, %v689_v52  ;;  %v8893_v50 = vcombine.high %v733_v29, %v737_v42 }
 0x334   :  { %v8853_v3 = vcombine.high %v693_v8, %v697_v61  ;;  %v745_v56 = vld [vmem:[%s13298_s1 + $0x1670] sm:$0xff] }
 0x336   :  { %7132 = vmatpush1.bf16.msra.mxu0 %v8796_v10  ;;  %7460 = vmatpush1.bf16.msra.mxu1 %v8798_v11  ;;  %v705_v10 = vld [vmem:[%s13298_s1 + $0x1530] sm:$0xff]  ;;  %v706_v11 = vld [vmem:[%s13298_s1 + $0x1538] sm:$0xff] }
 0x337   :  { %7133 = vmatprep.subr.bf16.mxu0 %v8805_v12  ;;  %7461 = vmatprep.subr.bf16.mxu1 %v8807_v13  ;;  %v8852_v12 = vcombine.low %v693_v8, %v697_v61  ;;  %v8861_v1 = vcombine.high %v701_v6, %v705_v10  ;;  %v8901_v8 = vcombine.high %v741_v54, %v745_v56 }
 0x33a   :  { %7134 = vmatpush1.bf16.msra.mxu0 %v8804_v17  ;;  %7462 = vmatpush1.bf16.msra.mxu1 %v8806_v9  ;;  %v710_v17 = vld [vmem:[%s13298_s1 + $0x1558] sm:$0xff] }
 0x33b   :  { %7135 = vmatprep.subr.bf16.mxu0 %v8813_v18  ;;  %7463 = vmatprep.subr.bf16.mxu1 %v8815_v38  ;;  %v714_v9 = vld [vmem:[%s13298_s1 + $0x1578] sm:$0xff]  ;;  %v8860_v18 = vcombine.low %v701_v6, %v705_v10 }
 0x33c   :  { %v8871_v21 = vcombine.high %v710_v17, %v714_v9 }
 0x33e   :  { %7136 = vmatpush1.bf16.msra.mxu0 %v8812_v26  ;;  %7464 = vmatpush1.bf16.msra.mxu1 %v8814_v27  ;;  %v718_v26 = vld [vmem:[%s13298_s1 + $0x1598] sm:$0xff] }
 0x33f   :  { %7137 = vmatprep.subr.bf16.mxu0 %v8821_v48  ;;  %7465 = vmatprep.subr.bf16.mxu1 %v8823_v63  ;;  %v722_v27 = vld [vmem:[%s13298_s1 + $0x15b8] sm:$0xff]  ;;  %v8868_v48 = vcombine.low %v709_v53, %v713_v15  ;;  %v8870_v63 = vcombine.low %v710_v17, %v714_v9  ;;  %v765_v17 = vld [vmem:[%s13298_s1 + $0x1710] sm:$0xff] }
 0x340   :  { %v8879_v32 = vcombine.high %v718_v26, %v722_v27  ;;  %v769_v9 = vld [vmem:[%s13298_s1 + $0x1730] sm:$0xff] }
 0x342   :  { %7138 = vmatpush1.bf16.msra.mxu0 %v8820_v34  ;;  %7466 = vmatpush1.bf16.msra.mxu1 %v8822_v35  ;;  %v726_v34 = vld [vmem:[%s13298_s1 + $0x15d8] sm:$0xff] }
 0x343   :  { %7148 = vmatprep.subr.bf16.mxu0 %v8829_v36  ;;  %7476 = vmatprep.subr.bf16.mxu1 %v8831_v39  ;;  %v730_v35 = vld [vmem:[%s13298_s1 + $0x15f8] sm:$0xff]  ;;  %v8876_v36 = vcombine.low %v717_v24, %v721_v25  ;;  %v8878_v39 = vcombine.low %v718_v26, %v722_v27  ;;  %v8925_v24 = vcombine.high %v765_v17, %v769_v9  ;;  %v773_v26 = vld [vmem:[%s13298_s1 + $0x1750] sm:$0xff] }
 0x344   :  { %v8887_v41 = vcombine.high %v726_v34, %v730_v35  ;;  %v777_v27 = vld [vmem:[%s13298_s1 + $0x1770] sm:$0xff] }
 0x345   :  { %7140 = vmatmul.mubr.bf16.vlgmr.msra.gmra.mrb[4].mxu0 %v10684_v51  ;;  %7468 = vmatmul.mubr.bf16.vlgmr.msra.gmra.mrb[4].mxu1 %v10684_v51  ;;  %v694_v51 = vld [vmem:[%s13298_s1 + $0x14d8] sm:$0xff] }
 0x346   :  { %7149 = vmatpush1.bf16.msra.mxu0 %v8828_v45  ;;  %7477 = vmatpush1.bf16.msra.mxu1 %v8830_v46  ;;  %v8855_v5 = vcombine.high %v694_v51, %v698_v0  ;;  %v8854_v13 = vcombine.low %v694_v51, %v698_v0  ;;  %v734_v45 = vld [vmem:[%s13298_s1 + $0x1618] sm:$0xff]  ;;  %v749_v51 = vld [vmem:[%s13298_s1 + $0x1690] sm:$0xff] }
 0x347   :  { %7150 = vmatprep.subr.bf16.mxu0 %v8837_v47  ;;  %7478 = vmatprep.subr.bf16.mxu1 %v8839_v58  ;;  %v738_v46 = vld [vmem:[%s13298_s1 + $0x1638] sm:$0xff]  ;;  %v8884_v47 = vcombine.low %v725_v19, %v729_v33  ;;  %v8886_v58 = vcombine.low %v726_v34, %v730_v35  ;;  %v753_v0 = vld [vmem:[%s13298_s1 + $0x16b0] sm:$0xff]  ;;  %v8933_v19 = vcombine.high %v773_v26, %v777_v27 }
 0x348   :  { %7180 = vmatprep.mubr.bf16.mxu0 %v10700_v62  ;;  %7508 = vmatprep.mubr.bf16.mxu1 %v10700_v62  ;;  %v702_v62 = vld [vmem:[%s13298_s1 + $0x1518] sm:$0xff]  ;;  %v8895_v52 = vcombine.high %v734_v45, %v738_v46  ;;  %v8909_v6 = vcombine.high %v749_v51, %v753_v0  ;;  %v781_v34 = vld [vmem:[%s13298_s1 + $0x1790] sm:$0xff] }
 0x349   :  { %v8863_v14 = vcombine.high %v702_v62, %v706_v11  ;;  %v8862_v38 = vcombine.low %v702_v62, %v706_v11  ;;  %v757_v62 = vld [vmem:[%s13298_s1 + $0x16d0] sm:$0xff] }
 0x34a   :  { %7151 = vmatpush1.bf16.msra.mxu0 %v8836_v57  ;;  %7479 = vmatpush1.bf16.msra.mxu1 %v8838_v4  ;;  %v742_v57 = vld [vmem:[%s13298_s1 + $0x1658] sm:$0xff]  ;;  %v761_v11 = vld [vmem:[%s13298_s1 + $0x16f0] sm:$0xff] }
 0x34b   :  { %7152 = vmatprep.subr.bf16.mxu0 %v8845_v60  ;;  %7480 = vmatprep.subr.bf16.mxu1 %v8847_v31  ;;  %v746_v4 = vld [vmem:[%s13298_s1 + $0x1678] sm:$0xff]  ;;  %v8892_v60 = vcombine.low %v733_v29, %v737_v42  ;;  %v8894_v31 = vcombine.low %v734_v45, %v738_v46  ;;  %v8917_v53 = vcombine.high %v757_v62, %v761_v11  ;;  %v785_v35 = vld [vmem:[%s13298_s1 + $0x17b0] sm:$0xff] }
 0x34c   :  { %v8903_v61 = vcombine.high %v742_v57, %v746_v4  ;;  %v8941_v29 = vcombine.high %v781_v34, %v785_v35  ;;  %v789_v45 = vld [vmem:[%s13298_s1 + $0x17d0] sm:$0xff] }
 0x34d   :  { %v793_v46 = vld [vmem:[%s13298_s1 + $0x17f0] sm:$0xff] }
 0x34e   :  { %7153 = vmatpush1.bf16.msra.mxu0 %v8844_v2  ;;  %7481 = vmatpush1.bf16.msra.mxu1 %v8846_v28  ;;  %v750_v2 = vld [vmem:[%s13298_s1 + $0x1698] sm:$0xff] }
 0x34f   :  { %7154 = vmatprep.subr.bf16.mxu0 %v8853_v3  ;;  %7482 = vmatprep.subr.bf16.mxu1 %v8855_v5  ;;  %v754_v28 = vld [vmem:[%s13298_s1 + $0x16b8] sm:$0xff]  ;;  %v8900_v3 = vcombine.low %v741_v54, %v745_v56  ;;  %v8902_v5 = vcombine.low %v742_v57, %v746_v4  ;;  %v8949_v54 = vcombine.high %v789_v45, %v793_v46  ;;  %v797_v57 = vld [vmem:[%s13298_s1 + $0x1810] sm:$0xff] }
 0x350   :  { %v8911_v10 = vcombine.high %v750_v2, %v754_v28  ;;  %v801_v4 = vld [vmem:[%s13298_s1 + $0x1830] sm:$0xff] }
 0x352   :  { %7155 = vmatpush1.bf16.msra.mxu0 %v8852_v12  ;;  %7483 = vmatpush1.bf16.msra.mxu1 %v8854_v13  ;;  %v758_v12 = vld [vmem:[%s13298_s1 + $0x16d8] sm:$0xff] }
 0x353   :  { %7156 = vmatprep.subr.bf16.mxu0 %v8861_v1  ;;  %7484 = vmatprep.subr.bf16.mxu1 %v8863_v14  ;;  %v762_v13 = vld [vmem:[%s13298_s1 + $0x16f8] sm:$0xff]  ;;  %v8908_v1 = vcombine.low %v749_v51, %v753_v0  ;;  %v8910_v14 = vcombine.low %v750_v2, %v754_v28  ;;  %v8957_v51 = vcombine.high %v797_v57, %v801_v4  ;;  %v805_v2 = vld [vmem:[%s13298_s1 + $0x1850] sm:$0xff] }
 0x354   :  { %v8919_v15 = vcombine.high %v758_v12, %v762_v13  ;;  %v809_v28 = vld [vmem:[%s13298_s1 + $0x1870] sm:$0xff] }
 0x356   :  { %7157 = vmatpush1.bf16.msra.mxu0 %v8860_v18  ;;  %7485 = vmatpush1.bf16.msra.mxu1 %v8862_v38  ;;  %v766_v18 = vld [vmem:[%s13298_s1 + $0x1718] sm:$0xff] }
 0x357   :  { %7158 = vmatprep.subr.bf16.mxu0 %v8869_v20  ;;  %7486 = vmatprep.subr.bf16.mxu1 %v8871_v21  ;;  %v770_v38 = vld [vmem:[%s13298_s1 + $0x1738] sm:$0xff]  ;;  %v8916_v20 = vcombine.low %v757_v62, %v761_v11  ;;  %v8918_v21 = vcombine.low %v758_v12, %v762_v13  ;;  %v8965_v62 = vcombine.high %v805_v2, %v809_v28  ;;  %v813_v12 = vld [vmem:[%s13298_s1 + $0x1890] sm:$0xff] }
 0x358   :  { %v8927_v25 = vcombine.high %v766_v18, %v770_v38  ;;  %v817_v13 = vld [vmem:[%s13298_s1 + $0x18b0] sm:$0xff] }
 0x35a   :  { %7159 = vmatpush1.bf16.msra.mxu0 %v8868_v48  ;;  %7487 = vmatpush1.bf16.msra.mxu1 %v8870_v63  ;;  %v774_v48 = vld [vmem:[%s13298_s1 + $0x1758] sm:$0xff] }
 0x35b   :  { %7160 = vmatprep.subr.bf16.mxu0 %v8877_v30  ;;  %7488 = vmatprep.subr.bf16.mxu1 %v8879_v32  ;;  %v778_v63 = vld [vmem:[%s13298_s1 + $0x1778] sm:$0xff]  ;;  %v8924_v30 = vcombine.low %v765_v17, %v769_v9  ;;  %v8926_v32 = vcombine.low %v766_v18, %v770_v38  ;;  %v8973_v17 = vcombine.high %v813_v12, %v817_v13  ;;  %v821_v18 = vld [vmem:[%s13298_s1 + $0x18d0] sm:$0xff] }
 0x35c   :  { %v8935_v33 = vcombine.high %v774_v48, %v778_v63  ;;  %v825_v38 = vld [vmem:[%s13298_s1 + $0x18f0] sm:$0xff] }
 0x35e   :  { %7161 = vmatpush1.bf16.msra.mxu0 %v8876_v36  ;;  %7489 = vmatpush1.bf16.msra.mxu1 %v8878_v39  ;;  %v782_v36 = vld [vmem:[%s13298_s1 + $0x1798] sm:$0xff] }
 0x35f   :  { %7162 = vmatprep.subr.bf16.mxu0 %v8885_v40  ;;  %7490 = vmatprep.subr.bf16.mxu1 %v8887_v41  ;;  %v786_v39 = vld [vmem:[%s13298_s1 + $0x17b8] sm:$0xff]  ;;  %v8932_v40 = vcombine.low %v773_v26, %v777_v27  ;;  %v8934_v41 = vcombine.low %v774_v48, %v778_v63  ;;  %v829_v27 = vld [vmem:[%s13298_s1 + $0x1910] sm:$0xff] }
 0x360   :  { %v8943_v42 = vcombine.high %v782_v36, %v786_v39  ;;  %v833_v48 = vld [vmem:[%s13298_s1 + $0x1930] sm:$0xff]  ;;  %v834_v63 = vld [vmem:[%s13298_s1 + $0x1938] sm:$0xff] }
 0x362   :  { %7163 = vmatpush1.bf16.msra.mxu0 %v8884_v47  ;;  %7491 = vmatpush1.bf16.msra.mxu1 %v8886_v58  ;;  %v790_v47 = vld [vmem:[%s13298_s1 + $0x17d8] sm:$0xff] }
 0x363   :  { %7164 = vmatprep.subr.bf16.mxu0 %v8893_v50  ;;  %7492 = vmatprep.subr.bf16.mxu1 %v8895_v52  ;;  %v794_v58 = vld [vmem:[%s13298_s1 + $0x17f8] sm:$0xff]  ;;  %v8940_v50 = vcombine.low %v781_v34, %v785_v35  ;;  %v8942_v52 = vcombine.low %v782_v36, %v786_v39  ;;  %v837_v34 = vld [vmem:[%s13298_s1 + $0x1950] sm:$0xff] }
 0x364   :  { %v8951_v56 = vcombine.high %v790_v47, %v794_v58  ;;  %v841_v35 = vld [vmem:[%s13298_s1 + $0x1970] sm:$0xff]  ;;  %v838_v36 = vld [vmem:[%s13298_s1 + $0x1958] sm:$0xff] }
 0x365   :  { %v842_v39 = vld [vmem:[%s13298_s1 + $0x1978] sm:$0xff] }
 0x366   :  { %7165 = vmatpush1.bf16.msra.mxu0 %v8892_v60  ;;  %7493 = vmatpush1.bf16.msra.mxu1 %v8894_v31  ;;  %v798_v60 = vld [vmem:[%s13298_s1 + $0x1818] sm:$0xff] }
 0x367   :  { %7166 = vmatprep.subr.bf16.mxu0 %v8901_v8  ;;  %7494 = vmatprep.subr.bf16.mxu1 %v8903_v61  ;;  %v802_v31 = vld [vmem:[%s13298_s1 + $0x1838] sm:$0xff]  ;;  %v8948_v8 = vcombine.low %v789_v45, %v793_v46  ;;  %v8950_v61 = vcombine.low %v790_v47, %v794_v58  ;;  %v845_v45 = vld [vmem:[%s13298_s1 + $0x1990] sm:$0xff] }
 0x368   :  { %v8959_v0 = vcombine.high %v798_v60, %v802_v31  ;;  %v849_v46 = vld [vmem:[%s13298_s1 + $0x19b0] sm:$0xff]  ;;  %v846_v47 = vld [vmem:[%s13298_s1 + $0x1998] sm:$0xff] }
 0x369   :  { %v850_v58 = vld [vmem:[%s13298_s1 + $0x19b8] sm:$0xff] }
 0x36a   :  { %7167 = vmatpush1.bf16.msra.mxu0 %v8900_v3  ;;  %7495 = vmatpush1.bf16.msra.mxu1 %v8902_v5  ;;  %v806_v3 = vld [vmem:[%s13298_s1 + $0x1858] sm:$0xff] }
 0x36b   :  { %7168 = vmatprep.subr.bf16.mxu0 %v8909_v6  ;;  %7496 = vmatprep.subr.bf16.mxu1 %v8911_v10  ;;  %v810_v5 = vld [vmem:[%s13298_s1 + $0x1878] sm:$0xff]  ;;  %v8956_v6 = vcombine.low %v797_v57, %v801_v4  ;;  %v8958_v10 = vcombine.low %v798_v60, %v802_v31  ;;  %v853_v57 = vld [vmem:[%s13298_s1 + $0x19d0] sm:$0xff] }
 0x36c   :  { %v8967_v11 = vcombine.high %v806_v3, %v810_v5  ;;  %v857_v4 = vld [vmem:[%s13298_s1 + $0x19f0] sm:$0xff]  ;;  %v854_v60 = vld [vmem:[%s13298_s1 + $0x19d8] sm:$0xff] }
 0x36d   :  { %v858_v31 = vld [vmem:[%s13298_s1 + $0x19f8] sm:$0xff] }
 0x36e   :  { %7169 = vmatpush1.bf16.msra.mxu0 %v8908_v1  ;;  %7497 = vmatpush1.bf16.msra.mxu1 %v8910_v14  ;;  %v814_v1 = vld [vmem:[%s13298_s1 + $0x1898] sm:$0xff] }
 0x36f   :  { %7170 = vmatprep.subr.bf16.mxu0 %v8917_v53  ;;  %7498 = vmatprep.subr.bf16.mxu1 %v8919_v15  ;;  %v818_v14 = vld [vmem:[%s13298_s1 + $0x18b8] sm:$0xff]  ;;  %v8964_v53 = vcombine.low %v805_v2, %v809_v28  ;;  %v8966_v15 = vcombine.low %v806_v3, %v810_v5  ;;  %v861_v2 = vld [vmem:[%s13298_s1 + $0x1a10] sm:$0xff] }
 0x370   :  { %v8975_v9 = vcombine.high %v814_v1, %v818_v14  ;;  %v865_v28 = vld [vmem:[%s13298_s1 + $0x1a30] sm:$0xff]  ;;  %v862_v3 = vld [vmem:[%s13298_s1 + $0x1a18] sm:$0xff] }
 0x371   :  { %v866_v5 = vld [vmem:[%s13298_s1 + $0x1a38] sm:$0xff] }
 0x372   :  { %7171 = vmatpush1.bf16.msra.mxu0 %v8916_v20  ;;  %7499 = vmatpush1.bf16.msra.mxu1 %v8918_v21  ;;  %v826_v20 = vld [vmem:[%s13298_s1 + $0x18f8] sm:$0xff]  ;;  %v8972_v21 = vcombine.low %v813_v12, %v817_v13  ;;  %v869_v12 = vld [vmem:[%s13298_s1 + $0x1a50] sm:$0xff] }
 0x373   :  { %7172 = vmatprep.subr.bf16.mxu0 %v8925_v24  ;;  %7500 = vmatprep.subr.bf16.mxu1 %v8927_v25  ;;  %v8974_v24 = vcombine.low %v814_v1, %v818_v14  ;;  %v8981_v25 = vcombine.high %v821_v18, %v825_v38  ;;  %v873_v13 = vld [vmem:[%s13298_s1 + $0x1a70] sm:$0xff]  ;;  %v870_v1 = vld [vmem:[%s13298_s1 + $0x1a58] sm:$0xff] }
 0x374   :  { %v874_v14 = vld [vmem:[%s13298_s1 + $0x1a78] sm:$0xff] }
 0x376   :  { %7173 = vmatpush1.bf16.msra.mxu0 %v8924_v30  ;;  %7501 = vmatpush1.bf16.msra.mxu1 %v8926_v32  ;;  %v8980_v30 = vcombine.low %v821_v18, %v825_v38  ;;  %v877_v18 = vld [vmem:[%s13298_s1 + $0x1a90] sm:$0xff] }
 0x377   :  { %7174 = vmatprep.subr.bf16.mxu0 %v8933_v19  ;;  %7502 = vmatprep.subr.bf16.mxu1 %v8935_v33  ;;  %v8989_v19 = vcombine.high %v829_v27, %v833_v48  ;;  %v881_v38 = vld [vmem:[%s13298_s1 + $0x1ab0] sm:$0xff] }
 0x37a   :  { %7175 = vmatpush1.bf16.msra.mxu0 %v8932_v40  ;;  %7503 = vmatpush1.bf16.msra.mxu1 %v8934_v41  ;;  %v8988_v40 = vcombine.low %v829_v27, %v833_v48  ;;  %v885_v27 = vld [vmem:[%s13298_s1 + $0x1ad0] sm:$0xff] }
 0x37b   :  { %7176 = vmatprep.subr.bf16.mxu0 %v8941_v29  ;;  %7504 = vmatprep.subr.bf16.mxu1 %v8943_v42  ;;  %v8997_v29 = vcombine.high %v837_v34, %v841_v35  ;;  %v8999_v42 = vcombine.high %v838_v36, %v842_v39  ;;  %v889_v48 = vld [vmem:[%s13298_s1 + $0x1af0] sm:$0xff] }
 0x37e   :  { %7177 = vmatpush1.bf16.msra.mxu0 %v8940_v50  ;;  %7505 = vmatpush1.bf16.msra.mxu1 %v8942_v52  ;;  %v8996_v50 = vcombine.low %v837_v34, %v841_v35  ;;  %v8998_v52 = vcombine.low %v838_v36, %v842_v39  ;;  %v893_v34 = vld [vmem:[%s13298_s1 + $0x1b10] sm:$0xff]  ;;  %v894_v36 = vld [vmem:[%s13298_s1 + $0x1b18] sm:$0xff] }
 0x37f   :  { %7178 = vmatprep.subr.bf16.mxu0 %v8949_v54  ;;  %7506 = vmatprep.subr.bf16.mxu1 %v8951_v56  ;;  %v9005_v54 = vcombine.high %v845_v45, %v849_v46  ;;  %v9007_v56 = vcombine.high %v846_v47, %v850_v58  ;;  %v897_v35 = vld [vmem:[%s13298_s1 + $0x1b30] sm:$0xff]  ;;  %v898_v39 = vld [vmem:[%s13298_s1 + $0x1b38] sm:$0xff] }
 0x382   :  { %7179 = vmatpush1.bf16.msra.mxu0 %v8948_v8  ;;  %7507 = vmatpush1.bf16.msra.mxu1 %v8950_v61  ;;  %v9004_v8 = vcombine.low %v845_v45, %v849_v46  ;;  %v9006_v61 = vcombine.low %v846_v47, %v850_v58  ;;  %v901_v45 = vld [vmem:[%s13298_s1 + $0x1b50] sm:$0xff]  ;;  %v902_v47 = vld [vmem:[%s13298_s1 + $0x1b58] sm:$0xff] }
 0x383   :  { %7189 = vmatprep.subr.bf16.mxu0 %v8957_v51  ;;  %7517 = vmatprep.subr.bf16.mxu1 %v8959_v0  ;;  %v9013_v51 = vcombine.high %v853_v57, %v857_v4  ;;  %v9015_v0 = vcombine.high %v854_v60, %v858_v31  ;;  %v905_v46 = vld [vmem:[%s13298_s1 + $0x1b70] sm:$0xff]  ;;  %v906_v58 = vld [vmem:[%s13298_s1 + $0x1b78] sm:$0xff] }
 0x385   :  { %7181 = vmatmul.mubr.bf16.vlgmr.msra.gmra.mrb[4].mxu0 %v10895_v59  ;;  %7509 = vmatmul.mubr.bf16.vlgmr.msra.gmra.mrb[4].mxu1 %v10895_v59  ;;  %v822_v59 = vld [vmem:[%s13298_s1 + $0x18d8] sm:$0xff] }
 0x386   :  { %7190 = vmatpush1.bf16.msra.mxu0 %v8956_v6  ;;  %7518 = vmatpush1.bf16.msra.mxu1 %v8958_v10  ;;  %v8983_v26 = vcombine.high %v822_v59, %v826_v20  ;;  %v8982_v32 = vcombine.low %v822_v59, %v826_v20  ;;  %v9012_v6 = vcombine.low %v853_v57, %v857_v4  ;;  %v878_v59 = vld [vmem:[%s13298_s1 + $0x1a98] sm:$0xff]  ;;  %v909_v57 = vld [vmem:[%s13298_s1 + $0x1b90] sm:$0xff] }
 0x387   :  { %7191 = vmatprep.subr.bf16.mxu0 %v8965_v62  ;;  %7519 = vmatprep.subr.bf16.mxu1 %v8967_v11  ;;  %v9014_v10 = vcombine.low %v854_v60, %v858_v31  ;;  %v9021_v62 = vcombine.high %v861_v2, %v865_v28  ;;  %v9023_v11 = vcombine.high %v862_v3, %v866_v5  ;;  %v882_v20 = vld [vmem:[%s13298_s1 + $0x1ab8] sm:$0xff]  ;;  %v913_v4 = vld [vmem:[%s13298_s1 + $0x1bb0] sm:$0xff] }
 0x388   :  { %7221 = vmatprep.mubr.bf16.mxu0 %v10910_v37  ;;  %7549 = vmatprep.mubr.bf16.mxu1 %v10910_v37  ;;  %v830_v37 = vld [vmem:[%s13298_s1 + $0x1918] sm:$0xff] }
 0x389   :  { %v8991_v33 = vcombine.high %v830_v37, %v834_v63  ;;  %v8990_v41 = vcombine.low %v830_v37, %v834_v63  ;;  %v886_v37 = vld [vmem:[%s13298_s1 + $0x1ad8] sm:$0xff] }
 0x38a   :  { %7192 = vmatpush1.bf16.msra.mxu0 %v8964_v53  ;;  %7520 = vmatpush1.bf16.msra.mxu1 %v8966_v15  ;;  %v9020_v53 = vcombine.low %v861_v2, %v865_v28  ;;  %v9022_v15 = vcombine.low %v862_v3, %v866_v5  ;;  %v890_v63 = vld [vmem:[%s13298_s1 + $0x1af8] sm:$0xff]  ;;  %v917_v2 = vld [vmem:[%s13298_s1 + $0x1bd0] sm:$0xff] }
 0x38b   :  { %7193 = vmatprep.subr.bf16.mxu0 %v8973_v17  ;;  %7521 = vmatprep.subr.bf16.mxu1 %v8975_v9  ;;  %v9029_v17 = vcombine.high %v869_v12, %v873_v13  ;;  %v9031_v9 = vcombine.high %v870_v1, %v874_v14  ;;  %v910_v60 = vld [vmem:[%s13298_s1 + $0x1b98] sm:$0xff]  ;;  %v921_v28 = vld [vmem:[%s13298_s1 + $0x1bf0] sm:$0xff] }
 0x38c   :  { %v914_v31 = vld [vmem:[%s13298_s1 + $0x1bb8] sm:$0xff] }
 0x38d   :  { %v918_v3 = vld [vmem:[%s13298_s1 + $0x1bd8] sm:$0xff] }
 0x38e   :  { %7194 = vmatpush1.bf16.msra.mxu0 %v8972_v21  ;;  %7522 = vmatpush1.bf16.msra.mxu1 %v8974_v24  ;;  %v9028_v21 = vcombine.low %v869_v12, %v873_v13  ;;  %v9030_v24 = vcombine.low %v870_v1, %v874_v14  ;;  %v922_v5 = vld [vmem:[%s13298_s1 + $0x1bf8] sm:$0xff]  ;;  %v925_v12 = vld [vmem:[%s13298_s1 + $0x1c10] sm:$0xff] }
 0x38f   :  { %7195 = vmatprep.subr.bf16.mxu0 %v8981_v25  ;;  %7523 = vmatprep.subr.bf16.mxu1 %v8983_v26  ;;  %v9037_v25 = vcombine.high %v877_v18, %v881_v38  ;;  %v9039_v26 = vcombine.high %v878_v59, %v882_v20  ;;  %v929_v13 = vld [vmem:[%s13298_s1 + $0x1c30] sm:$0xff]  ;;  %v926_v1 = vld [vmem:[%s13298_s1 + $0x1c18] sm:$0xff] }
 0x390   :  { %v930_v14 = vld [vmem:[%s13298_s1 + $0x1c38] sm:$0xff] }
 0x392   :  { %7196 = vmatpush1.bf16.msra.mxu0 %v8980_v30  ;;  %7524 = vmatpush1.bf16.msra.mxu1 %v8982_v32  ;;  %v9036_v30 = vcombine.low %v877_v18, %v881_v38  ;;  %v9038_v32 = vcombine.low %v878_v59, %v882_v20  ;;  %v933_v18 = vld [vmem:[%s13298_s1 + $0x1c50] sm:$0xff]  ;;  %v934_v59 = vld [vmem:[%s13298_s1 + $0x1c58] sm:$0xff] }
 0x393   :  { %7197 = vmatprep.subr.bf16.mxu0 %v8989_v19  ;;  %7525 = vmatprep.subr.bf16.mxu1 %v8991_v33  ;;  %v9045_v19 = vcombine.high %v885_v27, %v889_v48  ;;  %v9047_v33 = vcombine.high %v886_v37, %v890_v63  ;;  %v937_v38 = vld [vmem:[%s13298_s1 + $0x1c70] sm:$0xff]  ;;  %v938_v20 = vld [vmem:[%s13298_s1 + $0x1c78] sm:$0xff] }
 0x396   :  { %7198 = vmatpush1.bf16.msra.mxu0 %v8988_v40  ;;  %7526 = vmatpush1.bf16.msra.mxu1 %v8990_v41  ;;  %v9044_v40 = vcombine.low %v885_v27, %v889_v48  ;;  %v9046_v41 = vcombine.low %v886_v37, %v890_v63  ;;  %v941_v27 = vld [vmem:[%s13298_s1 + $0x1c90] sm:$0xff]  ;;  %v942_v37 = vld [vmem:[%s13298_s1 + $0x1c98] sm:$0xff] }
 0x397   :  { %7199 = vmatprep.subr.bf16.mxu0 %v8997_v29  ;;  %7527 = vmatprep.subr.bf16.mxu1 %v8999_v42  ;;  %v9053_v29 = vcombine.high %v893_v34, %v897_v35  ;;  %v9055_v42 = vcombine.high %v894_v36, %v898_v39  ;;  %v945_v48 = vld [vmem:[%s13298_s1 + $0x1cb0] sm:$0xff]  ;;  %v946_v63 = vld [vmem:[%s13298_s1 + $0x1cb8] sm:$0xff] }
 0x39a   :  { %7200 = vmatpush1.bf16.msra.mxu0 %v8996_v50  ;;  %7528 = vmatpush1.bf16.msra.mxu1 %v8998_v52  ;;  %v9052_v50 = vcombine.low %v893_v34, %v897_v35  ;;  %v9054_v52 = vcombine.low %v894_v36, %v898_v39  ;;  %v949_v34 = vld [vmem:[%s13298_s1 + $0x1cd0] sm:$0xff]  ;;  %v954_v36 = vld [vmem:[%s13298_s1 + $0x1cf8] sm:$0xff]  ;;  %v9100_v39 = vcombine.low %v941_v27, %v945_v48 }
 0x39b   :  { %7201 = vmatprep.subr.bf16.mxu0 %v9005_v54  ;;  %7529 = vmatprep.subr.bf16.mxu1 %v9007_v56  ;;  %v9061_v54 = vcombine.high %v901_v45, %v905_v46  ;;  %v9063_v56 = vcombine.high %v902_v47, %v906_v58  ;;  %v953_v35 = vld [vmem:[%s13298_s1 + $0x1cf0] sm:$0xff] }
 0x39e   :  { %7202 = vmatpush1.bf16.msra.mxu0 %v9004_v8  ;;  %7530 = vmatpush1.bf16.msra.mxu1 %v9006_v61  ;;  %v9060_v8 = vcombine.low %v901_v45, %v905_v46  ;;  %v9062_v61 = vcombine.low %v902_v47, %v906_v58  ;;  %v961_v45 = vld [vmem:[%s13298_s1 + $0x1d30] sm:$0xff]  ;;  %v962_v46 = vld [vmem:[%s13298_s1 + $0x1d38] sm:$0xff]  ;;  %v9108_v47 = vcombine.low %v949_v34, %v953_v35 }
 0x39f   :  { %7203 = vmatprep.subr.bf16.mxu0 %v9013_v51  ;;  %7531 = vmatprep.subr.bf16.mxu1 %v9015_v0  ;;  %v9069_v51 = vcombine.high %v909_v57, %v913_v4  ;;  %v9071_v0 = vcombine.high %v910_v60, %v914_v31 }
 0x3a2   :  { %7204 = vmatpush1.bf16.msra.mxu0 %v9012_v6  ;;  %7532 = vmatpush1.bf16.msra.mxu1 %v9014_v10  ;;  %v9068_v6 = vcombine.low %v909_v57, %v913_v4  ;;  %v9070_v10 = vcombine.low %v910_v60, %v914_v31  ;;  %v966_v57 = vld [vmem:[%s13298_s1 + $0x1d58] sm:$0xff] }
 0x3a3   :  { %7205 = vmatprep.subr.bf16.mxu0 %v9021_v62  ;;  %7533 = vmatprep.subr.bf16.mxu1 %v9023_v11  ;;  %v9077_v62 = vcombine.high %v917_v2, %v921_v28  ;;  %v9079_v11 = vcombine.high %v918_v3, %v922_v5  ;;  %v970_v4 = vld [vmem:[%s13298_s1 + $0x1d78] sm:$0xff] }
 0x3a6   :  { %7206 = vmatpush1.bf16.msra.mxu0 %v9020_v53  ;;  %7534 = vmatpush1.bf16.msra.mxu1 %v9022_v15  ;;  %v9076_v53 = vcombine.low %v917_v2, %v921_v28  ;;  %v9078_v15 = vcombine.low %v918_v3, %v922_v5  ;;  %v974_v2 = vld [vmem:[%s13298_s1 + $0x1d98] sm:$0xff]  ;;  %v9126_v5 = vcombine.low %v966_v57, %v970_v4 }
 0x3a7   :  { %7207 = vmatprep.subr.bf16.mxu0 %v9029_v17  ;;  %7535 = vmatprep.subr.bf16.mxu1 %v9031_v9  ;;  %v9085_v17 = vcombine.high %v925_v12, %v929_v13  ;;  %v9087_v9 = vcombine.high %v926_v1, %v930_v14  ;;  %v978_v28 = vld [vmem:[%s13298_s1 + $0x1db8] sm:$0xff] }
 0x3aa   :  { %7208 = vmatpush1.bf16.msra.mxu0 %v9028_v21  ;;  %7536 = vmatpush1.bf16.msra.mxu1 %v9030_v24  ;;  %v9084_v21 = vcombine.low %v925_v12, %v929_v13  ;;  %v9086_v24 = vcombine.low %v926_v1, %v930_v14  ;;  %v982_v12 = vld [vmem:[%s13298_s1 + $0x1dd8] sm:$0xff]  ;;  %v9134_v14 = vcombine.low %v974_v2, %v978_v28 }
 0x3ab   :  { %7209 = vmatprep.subr.bf16.mxu0 %v9037_v25  ;;  %7537 = vmatprep.subr.bf16.mxu1 %v9039_v26  ;;  %v9093_v25 = vcombine.high %v933_v18, %v937_v38  ;;  %v9095_v26 = vcombine.high %v934_v59, %v938_v20  ;;  %v986_v13 = vld [vmem:[%s13298_s1 + $0x1df8] sm:$0xff] }
 0x3ae   :  { %7210 = vmatpush1.bf16.msra.mxu0 %v9036_v30  ;;  %7538 = vmatpush1.bf16.msra.mxu1 %v9038_v32  ;;  %v9092_v30 = vcombine.low %v933_v18, %v937_v38  ;;  %v9094_v32 = vcombine.low %v934_v59, %v938_v20  ;;  %v990_v18 = vld [vmem:[%s13298_s1 + $0x1e18] sm:$0xff]  ;;  %v9142_v20 = vcombine.low %v982_v12, %v986_v13 }
 0x3af   :  { %7211 = vmatprep.subr.bf16.mxu0 %v9045_v19  ;;  %7539 = vmatprep.subr.bf16.mxu1 %v9047_v33  ;;  %v9101_v19 = vcombine.high %v941_v27, %v945_v48  ;;  %v9103_v33 = vcombine.high %v942_v37, %v946_v63  ;;  %v994_v38 = vld [vmem:[%s13298_s1 + $0x1e38] sm:$0xff]  ;;  %v7656_v27 = vsub.s32 0, %v9685_v44 }
 0x3b0   :  { %v998_v48 = vld [vmem:[%s13298_s1 + $0x1e58] sm:$0xff] }
 0x3b2   :  { %7212 = vmatpush1.bf16.msra.mxu0 %v9044_v40  ;;  %7540 = vmatpush1.bf16.msra.mxu1 %v9046_v41  ;;  %v9102_v40 = vcombine.low %v942_v37, %v946_v63  ;;  %v9109_v41 = vcombine.high %v949_v34, %v953_v35  ;;  %v1002_v37 = vld [vmem:[%s13298_s1 + $0x1e78] sm:$0xff]  ;;  %v12797_v63 = vld [vmem:[%s13300_s2] sm:$0xff]  ;;  %v9150_v34 = vcombine.low %v990_v18, %v994_v38 }
 0x3b3   :  { %7213 = vmatprep.subr.bf16.mxu0 %v9053_v29  ;;  %7541 = vmatprep.subr.bf16.mxu1 %v9055_v42  ;;  %v957_v42 = vld [vmem:[%s13298_s1 + $0x1d10] sm:$0xff] }
 0x3b4   :  { %v9116_v60 = vcombine.low %v957_v42, %v961_v45 }
 0x3b6   :  { %7214 = vmatpush1.bf16.msra.mxu0 %v9052_v50  ;;  %7542 = vmatpush1.bf16.msra.mxu1 %v9054_v52  ;;  %v9117_v50 = vcombine.high %v957_v42, %v961_v45 }
 0x3b7   :  { %7215 = vmatprep.subr.bf16.mxu0 %v9061_v54  ;;  %7543 = vmatprep.subr.bf16.mxu1 %v9063_v56  ;;  %v965_v54 = vld [vmem:[%s13298_s1 + $0x1d50] sm:$0xff] }
 0x3b8   :  { %v969_v56 = vld [vmem:[%s13298_s1 + $0x1d70] sm:$0xff] }
 0x3b9   :  { %v9124_v3 = vcombine.low %v965_v54, %v969_v56 }
 0x3ba   :  { %7216 = vmatpush1.bf16.msra.mxu0 %v9060_v8  ;;  %7544 = vmatpush1.bf16.msra.mxu1 %v9062_v61  ;;  %v9125_v8 = vcombine.high %v965_v54, %v969_v56  ;;  %v9127_v61 = vcombine.high %v966_v57, %v970_v4  ;;  %v1017_v54 = vld [vmem:[%s13298_s1 + $0x1ef0] sm:$0xff]  ;;  %v1014_v56 = vld [vmem:[%s13298_s1 + $0x1ed8] sm:$0xff] }
 0x3bb   :  { %7217 = vmatprep.subr.bf16.mxu0 %v9069_v51  ;;  %7545 = vmatprep.subr.bf16.mxu1 %v9071_v0  ;;  %v973_v51 = vld [vmem:[%s13298_s1 + $0x1d90] sm:$0xff]  ;;  %v1018_v57 = vld [vmem:[%s13298_s1 + $0x1ef8] sm:$0xff] }
 0x3bc   :  { %v977_v0 = vld [vmem:[%s13298_s1 + $0x1db0] sm:$0xff] }
 0x3bd   :  { %v9132_v1 = vcombine.low %v973_v51, %v977_v0 }
 0x3be   :  { %7218 = vmatpush1.bf16.msra.mxu0 %v9068_v6  ;;  %7546 = vmatpush1.bf16.msra.mxu1 %v9070_v10  ;;  %v9133_v6 = vcombine.high %v973_v51, %v977_v0  ;;  %v9135_v10 = vcombine.high %v974_v2, %v978_v28  ;;  %v9175_v51 = vcombine.high %v1014_v56, %v1018_v57  ;;  %v1021_v0 = vld [vmem:[%s13298_s1 + $0x1f10] sm:$0xff]  ;;  %v1022_v28 = vld [vmem:[%s13298_s1 + $0x1f18] sm:$0xff] }
 0x3bf   :  { %7219 = vmatprep.subr.bf16.mxu0 %v9077_v62  ;;  %7547 = vmatprep.subr.bf16.mxu1 %v9079_v11  ;;  %v981_v62 = vld [vmem:[%s13298_s1 + $0x1dd0] sm:$0xff] }
 0x3c0   :  { %v985_v11 = vld [vmem:[%s13298_s1 + $0x1df0] sm:$0xff] }
 0x3c1   :  { %v9140_v59 = vcombine.low %v981_v62, %v985_v11  ;;  %v1025_v2 = vld [vmem:[%s13298_s1 + $0x1f30] sm:$0xff] }
 0x3c2   :  { %7220 = vmatpush1.bf16.msra.mxu0 %v9076_v53  ;;  %7548 = vmatpush1.bf16.msra.mxu1 %v9078_v15  ;;  %v9141_v53 = vcombine.high %v981_v62, %v985_v11  ;;  %v9143_v15 = vcombine.high %v982_v12, %v986_v13  ;;  %v9174_v62 = vcombine.low %v1014_v56, %v1018_v57  ;;  %v1029_v13 = vld [vmem:[%s13298_s1 + $0x1f50] sm:$0xff]  ;;  %v7745_v56 = vld [vmem:[%s13301_s3 + $0x98] sm:$0xff] }
 0x3c3   :  { %7230 = vmatprep.subr.bf16.mxu0 %v9085_v17  ;;  %7558 = vmatprep.subr.bf16.mxu1 %v9087_v9  ;;  %v989_v17 = vld [vmem:[%s13298_s1 + $0x1e10] sm:$0xff]  ;;  %v9181_v11 = vcombine.high %v1021_v0, %v1025_v2 }
 0x3c4   :  { %v993_v9 = vld [vmem:[%s13298_s1 + $0x1e30] sm:$0xff] }
 0x3c5   :  { %7222 = vmatmul.mubr.bf16.vlgmr.msra.gmra.mrb[4].mxu0 %v11098_v7  ;;  %7550 = vmatmul.mubr.bf16.vlgmr.msra.gmra.mrb[4].mxu1 %v11098_v7  ;;  %v950_v7 = vld [vmem:[%s13298_s1 + $0x1cd8] sm:$0xff] }
 0x3c6   :  { %7231 = vmatpush1.bf16.msra.mxu0 %v9084_v21  ;;  %7559 = vmatpush1.bf16.msra.mxu1 %v9086_v24  ;;  %v9111_v29 = vcombine.high %v950_v7, %v954_v36  ;;  %v9110_v58 = vcombine.low %v950_v7, %v954_v36  ;;  %v9149_v21 = vcombine.high %v989_v17, %v993_v9  ;;  %v1005_v36 = vld [vmem:[%s13298_s1 + $0x1e90] sm:$0xff] }
 0x3c7   :  { %7232 = vmatprep.subr.bf16.mxu0 %v9093_v25  ;;  %7560 = vmatprep.subr.bf16.mxu1 %v9095_v26  ;;  %v9151_v24 = vcombine.high %v990_v18, %v994_v38  ;;  %v997_v25 = vld [vmem:[%s13298_s1 + $0x1e50] sm:$0xff]  ;;  %v9159_v7 = vcombine.high %v998_v48, %v1002_v37 }
 0x3c8   :  { %7262 = vmatprep.mubr.bf16.mxu0 %v11114_v16  ;;  %7590 = vmatprep.mubr.bf16.mxu1 %v11114_v16  ;;  %v958_v16 = vld [vmem:[%s13298_s1 + $0x1d18] sm:$0xff]  ;;  %v1001_v26 = vld [vmem:[%s13298_s1 + $0x1e70] sm:$0xff] }
 0x3c9   :  { %v9119_v52 = vcombine.high %v958_v16, %v962_v46  ;;  %v9118_v31 = vcombine.low %v958_v16, %v962_v46  ;;  %v9157_v35 = vcombine.high %v997_v25, %v1001_v26  ;;  %v9156_v46 = vcombine.low %v997_v25, %v1001_v26 }
 0x3ca   :  { %7233 = vmatpush1.bf16.msra.mxu0 %v9092_v30  ;;  %7561 = vmatpush1.bf16.msra.mxu1 %v9094_v32  ;;  %v7660_v30 = vsub.s32 1, %v9685_v44  ;;  %v7664_v32 = vsub.s32 2, %v9685_v44 }
 0x3cb   :  { %7234 = vmatprep.subr.bf16.mxu0 %v9101_v19  ;;  %7562 = vmatprep.subr.bf16.mxu1 %v9103_v33  ;;  %v7668_v19 = vsub.s32 3, %v9685_v44  ;;  %v9148_v33 = vcombine.low %v989_v17, %v993_v9  ;;  %v9180_v17 = vcombine.low %v1021_v0, %v1025_v2  ;;  %v7760_v0 = vld [vmem:[%s13301_s3 + $0x110] sm:$0xff] }
 0x3cc   :  { %v7661_v42 = vrot.slane %v12797_v63, %v7660_v30  ;;  %v7665_v45 = vrot.slane %v12797_v63, %v7664_v32  ;;  %v1045_v30 = vld [vmem:[%s13298_s1 + $0x1fd0] sm:$0xff] }
 0x3cd   :  { %v7669_v16 = vrot.slane %v12797_v63, %v7668_v19  ;;  %v1049_v32 = vld [vmem:[%s13298_s1 + $0x1ff0] sm:$0xff] }
 0x3ce   :  { %7235 = vmatpush1.bf16.msra.mxu0 %v9100_v39  ;;  %7563 = vmatpush1.bf16.msra.mxu1 %v9102_v40  ;;  %v1009_v39 = vld [vmem:[%s13298_s1 + $0x1eb0] sm:$0xff]  ;;  %v7657_v40 = vrot.slane %v12797_v63, %v7656_v27 }
 0x3cf   :  { %7236 = vmatprep.subr.bf16.mxu0 %v9109_v41  ;;  %7564 = vmatprep.subr.bf16.mxu1 %v9111_v29  ;;  %v1006_v41 = vld [vmem:[%s13298_s1 + $0x1e98] sm:$0xff] }
 0x3d0   :  { %v1010_v29 = vld [vmem:[%s13298_s1 + $0x1eb8] sm:$0xff]  ;;  %v7686_v4 = vcombine.low %v7657_v40, %v7661_v42  ;;  %v7775_v40 = vld [vmem:[%s13301_s3 + $0x188] sm:$0xff]  ;;  %v9206_v42 = vcombine.low %v1046_v43, %v1050_v23 }
 0x3d2   :  { %7237 = vmatpush1.bf16.msra.mxu0 %v9108_v47  ;;  %7565 = vmatpush1.bf16.msra.mxu1 %v9110_v58  ;;  %v9158_v47 = vcombine.low %v998_v48, %v1002_v37  ;;  %v9165_v58 = vcombine.high %v1005_v36, %v1009_v39 }
 0x3d3   :  { %7238 = vmatprep.subr.bf16.mxu0 %v9117_v50  ;;  %7566 = vmatprep.subr.bf16.mxu1 %v9119_v52  ;;  %v9167_v50 = vcombine.high %v1006_v41, %v1010_v29  ;;  %v1013_v52 = vld [vmem:[%s13298_s1 + $0x1ed0] sm:$0xff] }
 0x3d6   :  { %7239 = vmatpush1.bf16.msra.mxu0 %v9116_v60  ;;  %7567 = vmatpush1.bf16.msra.mxu1 %v9118_v31  ;;  %v7687_v60 = vcombine.low %v7665_v45, %v7669_v16  ;;  %v9164_v31 = vcombine.low %v1005_v36, %v1009_v39  ;;  %v7743_v36 = vld [vmem:[%s13301_s3 + $0x88] sm:$0xff]  ;;  %v7774_v39 = vld [vmem:[%s13301_s3 + $0x180] sm:$0xff] }
 0x3d7   :  { %7240 = vmatprep.subr.bf16.mxu0 %v9125_v8  ;;  %7568 = vmatprep.subr.bf16.mxu1 %v9127_v61  ;;  %v9166_v8 = vcombine.low %v1006_v41, %v1010_v29  ;;  %v9173_v61 = vcombine.high %v1013_v52, %v1017_v54  ;;  %v9204_v41 = vcombine.low %v1045_v30, %v1049_v32  ;;  %v7726_v16 = vld [vmem:[%s13301_s3] sm:$0xff] }
 0x3da   :  { %7241 = vmatpush1.bf16.msra.mxu0 %v9124_v3  ;;  %7569 = vmatpush1.bf16.msra.mxu1 %v9126_v5  ;;  %v1026_v3 = vld [vmem:[%s13298_s1 + $0x1f38] sm:$0xff]  ;;  %v7694_v5 = vrot.slane %v7686_v4, %v11963_v22 }
 0x3db   :  { %7242 = vmatprep.subr.bf16.mxu0 %v9133_v6  ;;  %7570 = vmatprep.subr.bf16.mxu1 %v9135_v10  ;;  %v7701_v6 = vrot.slane %v7687_v60, %v11963_v22  ;;  %v9172_v10 = vcombine.low %v1013_v52, %v1017_v54  ;;  %v9183_v12 = vcombine.high %v1022_v28, %v1026_v3  ;;  %v7744_v54 = vld [vmem:[%s13301_s3 + $0x90] sm:$0xff] }
 0x3dc   :  { %v9182_v9 = vcombine.low %v1022_v28, %v1026_v3  ;;  %v7776_v60 = vld [vmem:[%s13301_s3 + $0x190] sm:$0xff]  ;;  %v9352_v2 = vpack.c.bf16 %v7745_v56, %v7744_v54  ;;  %v7761_v28 = vld [vmem:[%s13301_s3 + $0x118] sm:$0xff]  ;;  %v7746_v3 = vld [vmem:[%s13301_s3 + $0xa0] sm:$0xff] }
 0x3dd   :  { %v7768_v54 = vld [vmem:[%s13301_s3 + $0x150] sm:$0xff] }
 0x3de   :  { %7243 = vmatpush1.bf16.msra.mxu0 %v9132_v1  ;;  %7571 = vmatpush1.bf16.msra.mxu1 %v9134_v14  ;;  %v1033_v1 = vld [vmem:[%s13298_s1 + $0x1f70] sm:$0xff]  ;;  %v1030_v14 = vld [vmem:[%s13298_s1 + $0x1f58] sm:$0xff] }
 0x3df   :  { %7244 = vmatprep.subr.bf16.mxu0 %v9141_v53  ;;  %7572 = vmatprep.subr.bf16.mxu1 %v9143_v15  ;;  %v1034_v53 = vld [vmem:[%s13298_s1 + $0x1f78] sm:$0xff]  ;;  %v7702_v15 = vcombine.low %v7694_v5, %v7701_v6  ;;  %v9189_v18 = vcombine.high %v1029_v13, %v1033_v1  ;;  %v9188_v26 = vcombine.low %v1029_v13, %v1033_v1  ;;  %v7747_v5 = vld [vmem:[%s13301_s3 + $0xa8] sm:$0xff] }
 0x3e0   :  { %v9191_v38 = vcombine.high %v1030_v14, %v1034_v53  ;;  %v9190_v27 = vcombine.low %v1030_v14, %v1034_v53  ;;  %v9386_v1 = vpack.c.bf16 %v7761_v28, %v7760_v0  ;;  %v9356_v14 = vpack.c.bf16 %v7747_v5, %v7746_v3  ;;  %v7730_v53 = vld [vmem:[%s13301_s3 + $0x20] sm:$0xff]  ;;  %v7739_v3 = vld [vmem:[%s13301_s3 + $0x68] sm:$0xff] }
 0x3e1   :  { %v7722_v25 = vadd.f32 %v7702_v15, %v7623_v55  ;;  %v7731_v15 = vld [vmem:[%s13301_s3 + $0x28] sm:$0xff]  ;;  %v7738_v28 = vld [vmem:[%s13301_s3 + $0x60] sm:$0xff] }
 0x3e2   :  { %7245 = vmatpush1.bf16.msra.mxu0 %v9140_v59  ;;  %7573 = vmatpush1.bf16.msra.mxu1 %v9142_v20  ;;  %v1037_v59 = vld [vmem:[%s13298_s1 + $0x1f90] sm:$0xff]  ;;  %v7770_v5 = vld [vmem:[%s13301_s3 + $0x160] sm:$0xff] }
 0x3e3   :  { %7246 = vmatprep.subr.bf16.mxu0 %v9149_v21  ;;  %7574 = vmatprep.subr.bf16.mxu1 %v9151_v24  ;;  %v1041_v20 = vld [vmem:[%s13298_s1 + $0x1fb0] sm:$0xff]  ;;  %v1038_v21 = vld [vmem:[%s13298_s1 + $0x1f98] sm:$0xff]  ;;  %v7724_v55 = vmax.f32 %v7722_v25, 0.0 }
 0x3e4   :  { %v1042_v24 = vld [vmem:[%s13298_s1 + $0x1fb8] sm:$0xff]  ;;  %v9197_v48 = vcombine.high %v1037_v59, %v1041_v20  ;;  %v9196_v19 = vcombine.low %v1037_v59, %v1041_v20  ;;  %v7780_v59 = vld [vmem:[%s13301_s3 + $0x1b0] sm:$0xff] }
 0x3e5   :  { %v9199_v37 = vcombine.high %v1038_v21, %v1042_v24  ;;  %v7856_v29 = vcombine.high %v7724_v55, %v7724_v55  ;;  %v12908_v52 = vrot.slane %v7724_v55, %v11963_v22  ;;  %v7781_v20 = vld [vmem:[%s13301_s3 + $0x1b8] sm:$0xff]  ;;  %v7783_v55 = vld [vmem:[%s13301_s3 + $0x1c8] sm:$0xff] }
 0x3e6   :  { %7247 = vmatpush1.bf16.msra.mxu0 %v9148_v33  ;;  %7575 = vmatpush1.bf16.msra.mxu1 %v9150_v34  ;;  %v9198_v33 = vcombine.low %v1038_v21, %v1042_v24  ;;  %v9205_v34 = vcombine.high %v1045_v30, %v1049_v32  ;;  %v9358_v21 = vpack.c.bf16 %v7731_v15, %v7730_v53  ;;  %v7765_v30 = vld [vmem:[%s13301_s3 + $0x138] sm:$0xff]  ;;  %v7750_v32 = vld [vmem:[%s13301_s3 + $0xc0] sm:$0xff]  ;;  %v7740_v15 = vld [vmem:[%s13301_s3 + $0x70] sm:$0xff] }
 0x3e7   :  { %7248 = vmatprep.subr.bf16.mxu0 %v9157_v35  ;;  %7576 = vmatprep.subr.bf16.mxu1 %v9159_v7  ;;  %v9207_v35 = vcombine.high %v1046_v43, %v1050_v23  ;;  %v7742_v7 = vld [vmem:[%s13301_s3 + $0x80] sm:$0xff]  ;;  %v12917_v4 = vrot.slane %v7856_v29, %v11963_v22  ;;  %v7871_v6 = vcombine.high %v12908_v52, %v12908_v52  ;;  %v7751_v43 = vld [vmem:[%s13301_s3 + $0xc8] sm:$0xff]  ;;  %v7753_v29 = vld [vmem:[%s13301_s3 + $0xd8] sm:$0xff] }
 0x3e8   :  { %v9348_v45 = vpack.c.bf16 %v7743_v36, %v7742_v7  ;;  %v7782_v23 = vld [vmem:[%s13301_s3 + $0x1c0] sm:$0xff]  ;;  %v7735_v7 = vld [vmem:[%s13301_s3 + $0x48] sm:$0xff] }
 0x3e9   :  { %v7766_v36 = vld [vmem:[%s13301_s3 + $0x140] sm:$0xff] }
 0x3ea   :  { %7249 = vmatpush1.bf16.msra.mxu0 %v9156_v46  ;;  %7577 = vmatpush1.bf16.msra.mxu1 %v9158_v47  ;;  %v7727_v46 = vld [vmem:[%s13301_s3 + $0x8] sm:$0xff]  ;;  %v9380_v47 = vpack.c.bf16 %v7775_v40, %v7774_v39  ;;  %v9396_v39 = vpack.c.bf16 %v7783_v55, %v7782_v23  ;;  %v7809_v23 = vld [vmem:[%s13301_s3 + $0x298] sm:$0xff]  ;;  %v7840_v55 = vld [vmem:[%s13301_s3 + $0x390] sm:$0xff] }
 0x3eb   :  { %7250 = vmatprep.subr.bf16.mxu0 %v9165_v58  ;;  %7578 = vmatprep.subr.bf16.mxu1 %v9167_v50  ;;  %v7758_v58 = vld [vmem:[%s13301_s3 + $0x100] sm:$0xff]  ;;  %v7759_v50 = vld [vmem:[%s13301_s3 + $0x108] sm:$0xff]  ;;  %v9350_v57 = vpack.c.bf16 %v7727_v46, %v7726_v16 }
 0x3ec   :  { %v7767_v40 = vld [vmem:[%s13301_s3 + $0x148] sm:$0xff] }
 0x3ed   :  { %v9398_v46 = vpack.c.bf16 %v7767_v40, %v7766_v36  ;;  %v7793_v36 = vld [vmem:[%s13301_s3 + $0x218] sm:$0xff] }
 0x3ee   :  { %7251 = vmatpush1.bf16.msra.mxu0 %v9164_v31  ;;  %7579 = vmatpush1.bf16.msra.mxu1 %v9166_v8  ;;  %v7777_v31 = vld [vmem:[%s13301_s3 + $0x198] sm:$0xff]  ;;  %v9382_v8 = vpack.c.bf16 %v7759_v50, %v7758_v58  ;;  %v7736_v58 = vld [vmem:[%s13301_s3 + $0x50] sm:$0xff] }
 0x3ef   :  { %7252 = vmatprep.subr.bf16.mxu0 %v9173_v61  ;;  %7580 = vmatprep.subr.bf16.mxu1 %v9175_v51  ;;  %v7728_v61 = vld [vmem:[%s13301_s3 + $0x10] sm:$0xff]  ;;  %v7729_v51 = vld [vmem:[%s13301_s3 + $0x18] sm:$0xff] }
 0x3f0   :  { %v9354_v13 = vpack.c.bf16 %v7729_v51, %v7728_v61  ;;  %v7737_v50 = vld [vmem:[%s13301_s3 + $0x58] sm:$0xff]  ;;  %v7787_v61 = vld [vmem:[%s13301_s3 + $0x1e8] sm:$0xff] }
 0x3f1   :  { %v9370_v51 = vpack.c.bf16 %v7737_v50, %v7736_v58  ;;  %v7795_v50 = vld [vmem:[%s13301_s3 + $0x228] sm:$0xff] }
 0x3f2   :  { %7253 = vmatpush1.bf16.msra.mxu0 %v9172_v10  ;;  %7581 = vmatpush1.bf16.msra.mxu1 %v9174_v62  ;;  %v9384_v10 = vpack.c.bf16 %v7777_v31, %v7776_v60  ;;  %v7778_v62 = vld [vmem:[%s13301_s3 + $0x1a0] sm:$0xff]  ;;  %v7755_v31 = vld [vmem:[%s13301_s3 + $0xe8] sm:$0xff] }
 0x3f3   :  { %7254 = vmatprep.subr.bf16.mxu0 %v9181_v11  ;;  %7582 = vmatprep.subr.bf16.mxu1 %v9183_v12  ;;  %v7779_v11 = vld [vmem:[%s13301_s3 + $0x1a8] sm:$0xff]  ;;  %v7872_v12 = vcombine.high %v12917_v4, %v12917_v4  ;;  %v7754_v60 = vld [vmem:[%s13301_s3 + $0xe0] sm:$0xff] }
 0x3f6   :  { %7255 = vmatpush1.bf16.msra.mxu0 %v9180_v17  ;;  %7583 = vmatpush1.bf16.msra.mxu1 %v9182_v9  ;;  %v9388_v17 = vpack.c.bf16 %v7779_v11, %v7778_v62  ;;  %v7763_v9 = vld [vmem:[%s13301_s3 + $0x128] sm:$0xff]  ;;  %v7756_v62 = vld [vmem:[%s13301_s3 + $0xf0] sm:$0xff]  ;;  %v7757_v11 = vld [vmem:[%s13301_s3 + $0xf8] sm:$0xff] }
 0x3f7   :  { %7256 = vmatprep.subr.bf16.mxu0 %v9189_v18  ;;  %7584 = vmatprep.subr.bf16.mxu1 %v9191_v38  ;;  %v7748_v18 = vld [vmem:[%s13301_s3 + $0xb0] sm:$0xff]  ;;  %v7749_v38 = vld [vmem:[%s13301_s3 + $0xb8] sm:$0xff]  ;;  %v9376_v53 = vpack.c.bf16 %v7757_v11, %v7756_v62  ;;  %v7814_v11 = vld [vmem:[%s13301_s3 + $0x2c0] sm:$0xff] }
 0x3f8   :  { %v9360_v25 = vpack.c.bf16 %v7749_v38, %v7748_v18  ;;  %v7773_v18 = vld [vmem:[%s13301_s3 + $0x178] sm:$0xff]  ;;  %v7806_v38 = vld [vmem:[%s13301_s3 + $0x280] sm:$0xff] }
 0x3fa   :  { %7257 = vmatpush1.bf16.msra.mxu0 %v9188_v26  ;;  %7585 = vmatpush1.bf16.msra.mxu1 %v9190_v27  ;;  %v7732_v26 = vld [vmem:[%s13301_s3 + $0x30] sm:$0xff]  ;;  %v7733_v27 = vld [vmem:[%s13301_s3 + $0x38] sm:$0xff] }
 0x3fb   :  { %7258 = vmatprep.subr.bf16.mxu0 %v9197_v48  ;;  %7586 = vmatprep.subr.bf16.mxu1 %v9199_v37  ;;  %v7764_v48 = vld [vmem:[%s13301_s3 + $0x130] sm:$0xff]  ;;  %v9392_v37 = vpack.c.bf16 %v7781_v20, %v7780_v59  ;;  %v7807_v59 = vld [vmem:[%s13301_s3 + $0x288] sm:$0xff]  ;;  %v7838_v20 = vld [vmem:[%s13301_s3 + $0x380] sm:$0xff] }
 0x3fe   :  { %7259 = vmatpush1.bf16.msra.mxu0 %v9196_v19  ;;  %7587 = vmatpush1.bf16.msra.mxu1 %v9198_v33  ;;  %v9362_v19 = vpack.c.bf16 %v7733_v27, %v7732_v26  ;;  %v9394_v33 = vpack.c.bf16 %v7765_v30, %v7764_v48  ;;  %v9412_v26 = vpack.c.bf16 %v7807_v59, %v7806_v38  ;;  %v7790_v27 = vld [vmem:[%s13301_s3 + $0x200] sm:$0xff]  ;;  %v7791_v48 = vld [vmem:[%s13301_s3 + $0x208] sm:$0xff]  ;;  %v7816_v59 = vld [vmem:[%s13301_s3 + $0x2d0] sm:$0xff] }
 0x3ff   :  { %7260 = vmatprep.subr.bf16.mxu0 %v9205_v34  ;;  %7588 = vmatprep.subr.bf16.mxu1 %v9207_v35  ;;  %v9364_v34 = vpack.c.bf16 %v7751_v43, %v7750_v32  ;;  %v7734_v35 = vld [vmem:[%s13301_s3 + $0x40] sm:$0xff]  ;;  %v7823_v32 = vld [vmem:[%s13301_s3 + $0x308] sm:$0xff]  ;;  %v7808_v43 = vld [vmem:[%s13301_s3 + $0x290] sm:$0xff] }
 0x400   :  { %v9366_v16 = vpack.c.bf16 %v7735_v7, %v7734_v35  ;;  %v9416_v35 = vpack.c.bf16 %v7809_v23, %v7808_v43  ;;  %v7792_v7 = vld [vmem:[%s13301_s3 + $0x210] sm:$0xff]  ;;  %v7818_v23 = vld [vmem:[%s13301_s3 + $0x2e0] sm:$0xff] }
 0x402   :  { %7261 = vmatpush1.bf16.msra.mxu0 %v9204_v41  ;;  %7589 = vmatpush1.bf16.msra.mxu1 %v9206_v42  ;;  %v7752_v41 = vld [vmem:[%s13301_s3 + $0xd0] sm:$0xff] }
 0x403   :  { %9349 = vmatprep.subr.bf16.mxu0 %v9348_v45  ;;  %9381 = vmatprep.subr.bf16.mxu1 %v9380_v47  ;;  %v7784_v42 = vld [vmem:[%s13301_s3 + $0x1d0] sm:$0xff]  ;;  %v7785_v45 = vld [vmem:[%s13301_s3 + $0x1d8] sm:$0xff]  ;;  %v9368_v47 = vpack.c.bf16 %v7753_v29, %v7752_v41  ;;  %v7810_v29 = vld [vmem:[%s13301_s3 + $0x2a0] sm:$0xff] }
 0x404   :  { %v9400_v56 = vpack.c.bf16 %v7785_v45, %v7784_v42  ;;  %v7825_v41 = vld [vmem:[%s13301_s3 + $0x318] sm:$0xff]  ;;  %v7811_v42 = vld [vmem:[%s13301_s3 + $0x2a8] sm:$0xff]  ;;  %v7842_v45 = vld [vmem:[%s13301_s3 + $0x3a0] sm:$0xff] }
 0x405   :  { %7263 = vmatmul.mubr.bf16.vlgmr.msra.gmra.mrb[4].mxu0 %v11302_v49  ;;  %7591 = vmatmul.mubr.bf16.vlgmr.msra.gmra.mrb[4].mxu1 %v11302_v49  ;;  %v7762_v49 = vld [vmem:[%s13301_s3 + $0x120] sm:$0xff]  ;;  %v9420_v58 = vpack.c.bf16 %v7811_v42, %v7810_v29  ;;  %v7820_v29 = vld [vmem:[%s13301_s3 + $0x2f0] sm:$0xff] }
 0x406   :  { %9351 = vmatpush3.bf16.msra.mxu0 %v9350_v57  ;;  %7962 = vmatprep.mubr.f32.mxu0 %v7871_v6  ;;  %v9390_v24 = vpack.c.bf16 %v7763_v9, %v7762_v49  ;;  %v7769_v57 = vld [vmem:[%s13301_s3 + $0x158] sm:$0xff] }
 0x407   :  { %9383 = vmatpush3.bf16.msra.mxu1 %v9382_v8  ;;  %8032 = vmatprep.mubr.f32.mxu1 %v7872_v12  ;;  %v7786_v8 = vld [vmem:[%s13301_s3 + $0x1e0] sm:$0xff]  ;;  %v9402_v0 = vpack.c.bf16 %v7769_v57, %v7768_v54  ;;  %v7788_v12 = vld [vmem:[%s13301_s3 + $0x1f0] sm:$0xff]  ;;  %v7741_v49 = vld [vmem:[%s13301_s3 + $0x78] sm:$0xff] }
 0x408   :  { %9353 = vmatprep.subr.bf16.mxu0 %v9352_v2  ;;  %9385 = vmatprep.subr.bf16.mxu1 %v9384_v10  ;;  %v9372_v2 = vpack.c.bf16 %v7755_v31, %v7754_v60  ;;  %v9404_v6 = vpack.c.bf16 %v7787_v61, %v7786_v8  ;;  %v7771_v10 = vld [vmem:[%s13301_s3 + $0x168] sm:$0xff]  ;;  %v7826_v54 = vld [vmem:[%s13301_s3 + $0x320] sm:$0xff]  ;;  %v7812_v57 = vld [vmem:[%s13301_s3 + $0x2b0] sm:$0xff] }
 0x409   :  { %v7813_v60 = vld [vmem:[%s13301_s3 + $0x2b8] sm:$0xff]  ;;  %v7844_v31 = vld [vmem:[%s13301_s3 + $0x3b0] sm:$0xff] }
 0x40a   :  { %9355 = vmatpush3.bf16.msra.mxu0 %v9354_v13  ;;  %v7789_v13 = vld [vmem:[%s13301_s3 + $0x1f8] sm:$0xff] }
 0x40b   :  { %9387 = vmatpush3.bf16.msra.mxu1 %v9386_v1  ;;  %9357 = vmatprep.subr.bf16.mxu0 %v9356_v14  ;;  %v9374_v1 = vpack.c.bf16 %v7739_v3, %v7738_v28  ;;  %v9406_v14 = vpack.c.bf16 %v7771_v10, %v7770_v5  ;;  %v9408_v9 = vpack.c.bf16 %v7789_v13, %v7788_v12  ;;  %v7845_v8 = vld [vmem:[%s13301_s3 + $0x3b8] sm:$0xff]  ;;  %v7815_v12 = vld [vmem:[%s13301_s3 + $0x2c8] sm:$0xff] }
 0x40c   :  { %9389 = vmatprep.subr.bf16.mxu1 %v9388_v17  ;;  %v7772_v17 = vld [vmem:[%s13301_s3 + $0x170] sm:$0xff]  ;;  %v7797_v28 = vld [vmem:[%s13301_s3 + $0x238] sm:$0xff]  ;;  %v9456_v3 = vpack.c.bf16 %v7845_v8, %v7844_v31  ;;  %v9428_v13 = vpack.c.bf16 %v7815_v12, %v7814_v11  ;;  %v7676_v31 = vsub.s32 5, %v9685_v44  ;;  %v7680_v8 = vsub.s32 6, %v9685_v44 }
 0x40d   :  { %v7829_v10 = vld [vmem:[%s13301_s3 + $0x338] sm:$0xff] }
 0x40e   :  { %9359 = vmatpush3.bf16.msra.mxu0 %v9358_v21  ;;  %v7839_v21 = vld [vmem:[%s13301_s3 + $0x388] sm:$0xff] }
 0x40f   :  { %9391 = vmatpush3.bf16.msra.mxu1 %v9390_v24  ;;  %9361 = vmatprep.subr.bf16.mxu0 %v9360_v25  ;;  %v9378_v24 = vpack.c.bf16 %v7741_v49, %v7740_v15  ;;  %v9410_v25 = vpack.c.bf16 %v7773_v18, %v7772_v17  ;;  %v9444_v30 = vpack.c.bf16 %v7839_v21, %v7838_v20  ;;  %v7846_v15 = vld [vmem:[%s13301_s3 + $0x3c0] sm:$0xff]  ;;  %v7847_v49 = vld [vmem:[%s13301_s3 + $0x3c8] sm:$0xff]  ;;  %v7817_v20 = vld [vmem:[%s13301_s3 + $0x2d8] sm:$0xff] }
 0x410   :  { %9393 = vmatprep.subr.bf16.mxu1 %v9392_v37  ;;  %v7822_v37 = vld [vmem:[%s13301_s3 + $0x300] sm:$0xff]  ;;  %v9460_v17 = vpack.c.bf16 %v7847_v49, %v7846_v15  ;;  %v7831_v18 = vld [vmem:[%s13301_s3 + $0x348] sm:$0xff]  ;;  %v9432_v21 = vpack.c.bf16 %v7817_v20, %v7816_v59 }
 0x412   :  { %9363 = vmatpush3.bf16.msra.mxu0 %v9362_v19  ;;  %v7841_v19 = vld [vmem:[%s13301_s3 + $0x398] sm:$0xff] }
 0x413   :  { %9395 = vmatpush3.bf16.msra.mxu1 %v9394_v33  ;;  %9365 = vmatprep.subr.bf16.mxu0 %v9364_v34  ;;  %v9414_v33 = vpack.c.bf16 %v7791_v48, %v7790_v27  ;;  %v9446_v34 = vpack.c.bf16 %v7823_v32, %v7822_v37  ;;  %v9448_v40 = vpack.c.bf16 %v7841_v19, %v7840_v55  ;;  %v7848_v27 = vld [vmem:[%s13301_s3 + $0x3d0] sm:$0xff]  ;;  %v7849_v48 = vld [vmem:[%s13301_s3 + $0x3d8] sm:$0xff]  ;;  %v7819_v55 = vld [vmem:[%s13301_s3 + $0x2e8] sm:$0xff] }
 0x414   :  { %9397 = vmatprep.subr.bf16.mxu1 %v9396_v39  ;;  %v7824_v39 = vld [vmem:[%s13301_s3 + $0x310] sm:$0xff]  ;;  %v9464_v37 = vpack.c.bf16 %v7849_v48, %v7848_v27  ;;  %v7833_v32 = vld [vmem:[%s13301_s3 + $0x358] sm:$0xff]  ;;  %v9436_v19 = vpack.c.bf16 %v7819_v55, %v7818_v23 }
 0x416   :  { %9367 = vmatpush3.bf16.msra.mxu0 %v9366_v16  ;;  %v7843_v16 = vld [vmem:[%s13301_s3 + $0x3a8] sm:$0xff] }
 0x417   :  { %9399 = vmatpush3.bf16.msra.mxu1 %v9398_v46  ;;  %9369 = vmatprep.subr.bf16.mxu0 %v9368_v47  ;;  %v9418_v46 = vpack.c.bf16 %v7793_v36, %v7792_v7  ;;  %v9450_v47 = vpack.c.bf16 %v7825_v41, %v7824_v39  ;;  %v7850_v7 = vld [vmem:[%s13301_s3 + $0x3e0] sm:$0xff]  ;;  %v7851_v36 = vld [vmem:[%s13301_s3 + $0x3e8] sm:$0xff] }
 0x418   :  { %9401 = vmatprep.subr.bf16.mxu1 %v9400_v56  ;;  %v7827_v56 = vld [vmem:[%s13301_s3 + $0x328] sm:$0xff]  ;;  %v9468_v39 = vpack.c.bf16 %v7851_v36, %v7850_v7 }
 0x419   :  { %v7835_v41 = vld [vmem:[%s13301_s3 + $0x368] sm:$0xff] }
 0x41a   :  { %9371 = vmatpush3.bf16.msra.mxu0 %v9370_v51  ;;  %v9454_v51 = vpack.c.bf16 %v7827_v56, %v7826_v54  ;;  %v7837_v56 = vld [vmem:[%s13301_s3 + $0x378] sm:$0xff] }
 0x41b   :  { %9403 = vmatpush3.bf16.msra.mxu1 %v9402_v0  ;;  %9373 = vmatprep.subr.bf16.mxu0 %v9372_v2  ;;  %v9424_v0 = vpack.c.bf16 %v7813_v60, %v7812_v57  ;;  %v7796_v2 = vld [vmem:[%s13301_s3 + $0x230] sm:$0xff]  ;;  %v7672_v60 = vsub.s32 4, %v9685_v44 }
 0x41c   :  { %9405 = vmatprep.subr.bf16.mxu1 %v9404_v6  ;;  %v9426_v5 = vpack.c.bf16 %v7797_v28, %v7796_v2  ;;  %v7828_v6 = vld [vmem:[%s13301_s3 + $0x330] sm:$0xff]  ;;  %v7681_v2 = vrot.slane %v12797_v63, %v7680_v8 }
 0x41d   :  { %v9458_v62 = vpack.c.bf16 %v7829_v10, %v7828_v6 }
 0x41e   :  { %9375 = vmatpush3.bf16.msra.mxu0 %v9374_v1  ;;  %v7798_v1 = vld [vmem:[%s13301_s3 + $0x240] sm:$0xff] }
 0x41f   :  { %9407 = vmatpush3.bf16.msra.mxu1 %v9406_v14  ;;  %9377 = vmatprep.subr.bf16.mxu0 %v9376_v53  ;;  %v7799_v14 = vld [vmem:[%s13301_s3 + $0x248] sm:$0xff] }
 0x420   :  { %9409 = vmatprep.subr.bf16.mxu1 %v9408_v9  ;;  %v9430_v53 = vpack.c.bf16 %v7799_v14, %v7798_v1  ;;  %v7830_v9 = vld [vmem:[%s13301_s3 + $0x340] sm:$0xff] }
 0x421   :  { %v9462_v38 = vpack.c.bf16 %v7831_v18, %v7830_v9 }
 0x422   :  { %9379 = vmatpush3.bf16.msra.mxu0 %v9378_v24  ;;  %v7800_v24 = vld [vmem:[%s13301_s3 + $0x250] sm:$0xff] }
 0x423   :  { %9411 = vmatpush3.bf16.msra.mxu1 %v9410_v25  ;;  %9413 = vmatprep.subr.bf16.mxu0 %v9412_v26  ;;  %v7801_v25 = vld [vmem:[%s13301_s3 + $0x258] sm:$0xff] }
 0x424   :  { %9445 = vmatprep.subr.bf16.mxu1 %v9444_v30  ;;  %v9434_v26 = vpack.c.bf16 %v7801_v25, %v7800_v24  ;;  %v7832_v30 = vld [vmem:[%s13301_s3 + $0x350] sm:$0xff] }
 0x425   :  { %7963 = vmatmul.mubr.f32.vlgmr.msra.gmra.mrb[8].mxu0 %v12908_v52  ;;  %v7794_v52 = vld [vmem:[%s13301_s3 + $0x220] sm:$0xff]  ;;  %v9466_v43 = vpack.c.bf16 %v7833_v32, %v7832_v30 }
 0x426   :  { %8033 = vmatmul.mubr.f32.vlgmr.msra.gmra.mrb[8].mxu1 %v12917_v4  ;;  %9415 = vmatpush3.bf16.msra.mxu0 %v9414_v33  ;;  %v9452_v4 = vpack.c.bf16 %v7843_v16, %v7842_v45  ;;  %v9422_v61 = vpack.c.bf16 %v7795_v50, %v7794_v52  ;;  %v7802_v33 = vld [vmem:[%s13301_s3 + $0x260] sm:$0xff]  ;;  %v7821_v45 = vld [vmem:[%s13301_s3 + $0x2f8] sm:$0xff]  ;;  %v7804_v16 = vld [vmem:[%s13301_s3 + $0x270] sm:$0xff] }
 0x427   :  { %9447 = vmatpush3.bf16.msra.mxu1 %v9446_v34  ;;  %9417 = vmatprep.subr.bf16.mxu0 %v9416_v35  ;;  %v7803_v34 = vld [vmem:[%s13301_s3 + $0x268] sm:$0xff]  ;;  %v7852_v52 = vld [vmem:[%s13301_s3 + $0x3f0] sm:$0xff]  ;;  %v7853_v50 = vld [vmem:[%s13301_s3 + $0x3f8] sm:$0xff] }
 0x428   :  { %9449 = vmatprep.subr.bf16.mxu1 %v9448_v40  ;;  %v9438_v35 = vpack.c.bf16 %v7803_v34, %v7802_v33  ;;  %v7834_v40 = vld [vmem:[%s13301_s3 + $0x360] sm:$0xff]  ;;  %v9472_v54 = vpack.c.bf16 %v7853_v50, %v7852_v52 }
 0x429   :  { %v9470_v42 = vpack.c.bf16 %v7835_v41, %v7834_v40 }
 0x42a   :  { %9419 = vmatpush3.bf16.msra.mxu0 %v9418_v46  ;;  %v7805_v46 = vld [vmem:[%s13301_s3 + $0x278] sm:$0xff] }
 0x42b   :  { %9451 = vmatpush3.bf16.msra.mxu1 %v9450_v47  ;;  %9421 = vmatprep.subr.bf16.mxu0 %v9420_v58  ;;  %v9440_v47 = vpack.c.bf16 %v7821_v45, %v7820_v29  ;;  %v9442_v58 = vpack.c.bf16 %v7805_v46, %v7804_v16 }
 0x42c   :  { %9453 = vmatprep.subr.bf16.mxu1 %v9452_v4  ;;  %v7836_v4 = vld [vmem:[%s13301_s3 + $0x370] sm:$0xff] }
 0x42d   :  { %v9474_v57 = vpack.c.bf16 %v7837_v56, %v7836_v4 }
 0x42e   :  { %9423 = vmatpush3.bf16.msra.mxu0 %v9422_v61  ;;  %v7684_v61 = vsub.s32 7, %v9685_v44 }
 0x42f   :  { %9455 = vmatpush3.bf16.msra.mxu1 %v9454_v51  ;;  %9425 = vmatprep.subr.bf16.mxu0 %v9424_v0  ;;  %v7673_v51 = vrot.slane %v12797_v63, %v7672_v60  ;;  %v7677_v0 = vrot.slane %v12797_v63, %v7676_v31 }
 0x430   :  { %9457 = vmatprep.subr.bf16.mxu1 %v9456_v3  ;;  %v7685_v28 = vrot.slane %v12797_v63, %v7684_v61 }
 0x431   :  { %v7703_v3 = vcombine.low %v7673_v51, %v7677_v0 }
 0x432   :  { %9427 = vmatpush3.bf16.msra.mxu0 %v9426_v5  ;;  %v7704_v5 = vcombine.low %v7681_v2, %v7685_v28 }
 0x433   :  { %9459 = vmatpush3.bf16.msra.mxu1 %v9458_v62  ;;  %9429 = vmatprep.subr.bf16.mxu0 %v9428_v13  ;;  %v7711_v11 = vrot.slane %v7703_v3, %v11963_v22 }
 0x434   :  { %9461 = vmatprep.subr.bf16.mxu1 %v9460_v17  ;;  %v7718_v12 = vrot.slane %v7704_v5, %v11963_v22 }
 0x436   :  { %9431 = vmatpush3.bf16.msra.mxu0 %v9430_v53  ;;  %v7719_v9 = vcombine.low %v7711_v11, %v7718_v12 }
 0x437   :  { %9463 = vmatpush3.bf16.msra.mxu1 %v9462_v38  ;;  %9433 = vmatprep.subr.bf16.mxu0 %v9432_v21 }
 0x438   :  { %9465 = vmatprep.subr.bf16.mxu1 %v9464_v37 }
 0x43a   :  { %9435 = vmatpush3.bf16.msra.mxu0 %v9434_v26 }
 0x43b   :  { %9467 = vmatpush3.bf16.msra.mxu1 %v9466_v43  ;;  %9437 = vmatprep.subr.bf16.mxu0 %v9436_v19 }
 0x43c   :  { %9469 = vmatprep.subr.bf16.mxu1 %v9468_v39 }
 0x43e   :  { %9439 = vmatpush3.bf16.msra.mxu0 %v9438_v35 }
 0x43f   :  { %9471 = vmatpush3.bf16.msra.mxu1 %v9470_v42  ;;  %9441 = vmatprep.subr.bf16.mxu0 %v9440_v47 }
 0x440   :  { %9473 = vmatprep.subr.bf16.mxu1 %v9472_v54 }
 0x442   :  { %9443 = vmatpush3.bf16.msra.mxu0 %v9442_v58 }
 0x443   :  { %9475 = vmatpush3.bf16.msra.mxu1 %v9474_v57 }
 0x4d8   :  { %v7264_v6 = vpop.f32.mrb[4].mxu0  ;;  %v7592_v10 = vpop.f32.mrb[4].mxu1 }
 0x4d9   :  { %v7266_v62 = vpop.f32.mrb[5].mxu0  ;;  %v7594_v1 = vpop.f32.mrb[5].mxu1 }
 0x4da   :  { %v7624_v13 = vcombine.low %v7264_v6, %v7266_v62  ;;  %v7268_v44 = vpop.f32.mrb[6].mxu0  ;;  %v7625_v14 = vcombine.low %v7592_v10, %v7594_v1  ;;  %v7596_v53 = vpop.f32.mrb[6].mxu1 }
 0x4db   :  { %v7269_v15 = vpop.f32.mrb[7].mxu0  ;;  %v7597_v17 = vpop.f32.mrb[7].mxu1 }
 0x4dc   :  { %v7632_v49 = vrot.slane %v7624_v13, %v11963_v22  ;;  %v7639_v63 = vrot.slane %v7625_v14, %v11963_v22 }
 0x4de   :  { %v7640_v18 = vcombine.low %v7632_v49, %v7639_v63 }
 0x4e0   :  { %v7723_v38 = vadd.f32 %v7719_v9, %v7640_v18 }
 0x4e2   :  { %v7725_v59 = vmax.f32 %v7723_v38, 0.0 }
 0x4e4   :  { %v7880_v20 = vrot.slane %v7725_v59, %v11963_v22  ;;  %v7873_v21 = vcombine.high %v7725_v59, %v7725_v59 }
 0x4e6   :  { %v7888_v24 = vcombine.high %v7880_v20, %v7880_v20  ;;  %v7887_v25 = vrot.slane %v7873_v21, %v11963_v22 }
 0x4e8   :  { %8102 = vmatprep.mubr.f32.mxu0 %v7888_v24  ;;  %v7889_v26 = vcombine.high %v7887_v25, %v7887_v25 }
 0x4e9   :  { %8103 = vmatmul.mubr.f32.vlgmr.msra.gmra.mrb[10].mxu0 %v7880_v20 }
 0x4ea   :  { %8172 = vmatprep.mubr.f32.mxu1 %v7889_v26 }
 0x4eb   :  { %8173 = vmatmul.mubr.f32.vlgmr.msra.gmra.mrb[10].mxu1 %v7887_v25 }
 0x4f8   :  { %v9240_v27 = vpop.f32.mrb[8].mxu0 }
 0x4f9   :  { %v9275_v48 = vpop.f32.mrb[8].mxu1  ;;  %v9241_v37 = vpop.f32.mrb[9].mxu0 }
 0x4fa   :  { %v9242_v30 = vadd.f32 %v9241_v37, %v9240_v27  ;;  %v9276_v32 = vpop.f32.mrb[9].mxu1 }
 0x4fb   :  { %v9277_v43 = vadd.f32 %v9276_v32, %v9275_v48 }
 0x4fd   :  { %v8035_v23 = vadd.f32 %v9277_v43, %v9242_v30 }
 0x5bc   :  { %v9310_v55 = vpop.f32.mrb[10].mxu0 }
 0x5bd   :  { %v9311_v19 = vpop.f32.mrb[11].mxu0 }
 0x5be   :  { %v9312_v33 = vadd.f32 %v9311_v19, %v9310_v55  ;;  %v9345_v34 = vpop.f32.mrb[10].mxu1 }
 0x5bf   :  { %v9346_v35 = vpop.f32.mrb[11].mxu1 }
 0x5c0   :  { %v8105_v7 = vadd.f32 %v9312_v33, %v8035_v23  ;;  %v9347_v36 = vadd.f32 %v9346_v35, %v9345_v34 }
 0x5c2   :  { %v8175_v22 = vadd.f32 %v9347_v36, %v8105_v7 }
 0x5c4   :  { %8179 = vst.msk [vmem:[%s13302_s4] sm:$0x3] %vm8178_vm0, %v8175_v22 }

</bundles_post_ra>
